<compile_context>
chip_gen: v7x
topology: tpu7x:2x2x1
jax: 0.10.0
libtpu: 0.0.40
codegen_flags: <defaults>
</compile_context>

<pallas_src>
import functools
import math

import jax
import jax.numpy as jnp
import numpy as np
from jax import lax
from jax.experimental import pallas as pl
from jax.experimental.pallas import tpu as pltpu


def _mhsa_kernel(mask_ref, x_ref, wq_ref, bq_ref, wkv_ref, bkv_ref,
                 wo_ref, bo_ref, out_ref, kv_scr, ctx_scr,
                 *, n_heads, compute_dtype, use_bf16_exp):
    """One grid step == (batch b, query tile qi).

    kv_scr  : VMEM (S, 2*D) compute_dtype -- fused K|V projection of the whole
              sequence, computed once per batch at qi == 0 and reused by every
              query tile (the q-tile grid axis is sequential / "arbitrary").
    ctx_scr : VMEM (TQ, D) compute_dtype -- per-head contexts assembled at
              static lane offsets; consumed by ONE output-projection matmul.
    """
    qi = pl.program_id(1)
    seq = kv_scr.shape[0]
    d_model = wq_ref.shape[0]
    dph = d_model // n_heads
    tq = ctx_scr.shape[0]

    # ---- fused K|V projection (one wide MXU matmul), cached once per batch ----
    @pl.when(qi == 0)
    def _():
        kv = jnp.dot(x_ref[...], wkv_ref[...],
                     preferred_element_type=jnp.float32)                    # (S, 2D)
        kv_scr[...] = (kv + bkv_ref[...]).astype(compute_dtype)

    # ---- per-tile Q projection (Wq / bq pre-scaled by 1/sqrt(dph) in wrapper) --
    # Same total FLOPs as projecting Q once per batch, but saves S*D of VMEM.
    q_start = pl.multiple_of(qi * tq, tq)
    x_tile = x_ref[pl.ds(q_start, tq), :]                                   # (TQ, D)
    q_all = (jnp.dot(x_tile, wq_ref[...], preferred_element_type=jnp.float32)
             + bq_ref[...]).astype(compute_dtype)                           # (TQ, D)

    # ---- additive key mask, broadcast ONCE per tile (hoisted out of head loop) -
    # scores + finfo(f32).min is equivalent to masked_fill(mask==0, min).
    mask_tile = jnp.broadcast_to(mask_ref[...], (tq, seq))                  # f32 (TQ, S)

    approx_recip = np.dtype(compute_dtype) != np.dtype(jnp.float32)

    # Static Python loop over heads: head slices are static lane offsets; each
    # head's softmax/context temporaries are consumed immediately (write into
    # ctx_scr), so live ranges stay bounded.
    for h in range(n_heads):
        lo = h * dph
        qh = q_all[:, lo:lo + dph]                                          # (TQ, dph)
        kh = kv_scr[:, lo:lo + dph]                                         # (S,  dph)
        vh = kv_scr[:, d_model + lo:d_model + lo + dph]                     # (S,  dph)

        # q already carries the 1/sqrt(dph) scaling (folded into Wq/bq).
        scores = lax.dot_general(qh, kh, (((1,), (1,)), ((), ())),
                                 preferred_element_type=jnp.float32)        # (TQ, S)
        scores = scores + mask_tile

        m = jnp.max(scores, axis=-1, keepdims=True)
        s = scores - m
        if use_bf16_exp:
            # bf16 EUP path (v6e/v7x): ~2x exp throughput, half the vreg footprint
            # of e/p; the row-sum / reciprocal stay in f32.
            e = jnp.exp(s.astype(jnp.bfloat16))
            denom = jnp.sum(e.astype(jnp.float32), axis=-1, keepdims=True)
            p = e * pl.reciprocal(denom, approx=True).astype(jnp.bfloat16)  # bf16
        else:
            e = jnp.exp(s)                                                  # f32 exp
            denom = jnp.sum(e, axis=-1, keepdims=True)
            p = (e * pl.reciprocal(denom, approx=approx_recip)).astype(compute_dtype)
        # TODO(synk): attention dropout (p=0.1) is identity in eval mode; not applied.

        ctx = jnp.dot(p, vh, preferred_element_type=jnp.float32)            # (TQ, dph)
        ctx_scr[:, lo:lo + dph] = ctx.astype(compute_dtype)

    # ---- single full-depth output projection (K = d_model) ---------------------
    out = jnp.dot(ctx_scr[...], wo_ref[...],
                  preferred_element_type=jnp.float32) + bo_ref[...]          # (TQ, D)
    out_ref[...] = out.astype(out_ref.dtype)


def _device_kind():
    try:
        return jax.devices()[0].device_kind.lower()
    except Exception:
        return ""


def _pick_q_tile(seq_len, is_v5):
    # v5e: TQ=128 (128x128 MXU; smaller live softmax state / spill traffic).
    # v6e/v7x: TQ=256 when it divides the sequence.
    cands = (128,) if is_v5 else (256, 128)
    for cand in cands:
        if seq_len >= cand and seq_len % cand == 0:
            return cand
    return seq_len


def mhsa_forward(query, key, value, mask, params, n_heads,
                 compute_dtype=jnp.bfloat16, q_tile=None):
    """Forward pass of MultiHeadSelfAttention. Returns `context` (bs, seq, d_model).

    params: dict with nn.Linear weights/biases "wq","bq","wk","bk","wv","bv","wo","bo"
            (weights in PyTorch (out_features, in_features) layout).
    """
    if not (query is key and key is value):
        # TODO(synk): distinct query/key/value tensors (cross-attention) are not
        # fused into the Pallas self-attention kernel; use the pure-JAX path.
        return mhsa_reference(query, key, value, mask, params, n_heads)

    x = query
    bs, seq, d_model = x.shape
    assert d_model % n_heads == 0
    dph = d_model // n_heads
    scale = 1.0 / math.sqrt(dph)

    kind = _device_kind()
    is_v5 = "v5" in kind
    # 128-MiB-VMEM parts (v5e/v6e) get a generous scoped limit; 64-MiB parts
    # (v7x) and unknown generations stay at 56 MiB.
    vmem_limit = (100 if ("v5" in kind or "v6" in kind) else 56) * 1024 * 1024
    use_bf16_exp = (np.dtype(compute_dtype) == np.dtype(jnp.bfloat16)
                    and ("v6" in kind or "v7" in kind))

    # nn.Linear weight is (out, in); pass (in, out) so the kernel does x @ W^T + b.
    # Fold the 1/sqrt(dph) query scaling into Wq / bq (one-time weight transform).
    wq = (params["wq"] * scale).T.astype(compute_dtype)                     # (D, D)
    bq = (params["bq"] * scale).reshape(1, d_model).astype(jnp.float32)     # (1, D)
    wkv = jnp.concatenate([params["wk"].T, params["wv"].T],
                          axis=1).astype(compute_dtype)                     # (D, 2D)
    bkv = jnp.concatenate([params["bk"], params["bv"]]
                          ).reshape(1, 2 * d_model).astype(jnp.float32)     # (1, 2D)
    wo_t = params["wo"].T.astype(compute_dtype)                             # (D, D)
    bo = params["bo"].reshape(1, d_model).astype(jnp.float32)               # (1, D)

    # Additive key mask precomputed once in the wrapper (0 or finfo(f32).min).
    mask_bias = jnp.where(mask.reshape(bs, 1, seq) == 0,
                          jnp.finfo(jnp.float32).min, 0.0).astype(jnp.float32)

    # Activations DMA'd / held in compute dtype; output keeps the caller's dtype.
    x_in = x.astype(compute_dtype)
    out_dtype = x.dtype

    tq = q_tile if q_tile is not None else _pick_q_tile(seq, is_v5)
    assert seq % tq == 0
    n_qt = seq // tq
    # Output lane dim = d_model; multiples of 128 (256/384/768/...) give unmasked
    # vector stores -- true for all shapes exercised here.

    kernel = functools.partial(_mhsa_kernel, n_heads=n_heads,
                               compute_dtype=compute_dtype,
                               use_bf16_exp=use_bf16_exp)

    grid_spec = pltpu.PrefetchScalarGridSpec(
        num_scalar_prefetch=0,
        grid=(bs, n_qt),
        in_specs=[
            pl.BlockSpec((None, 1, seq), lambda b, qi: (b, 0, 0)),           # mask bias
            pl.BlockSpec((None, seq, d_model), lambda b, qi: (b, 0, 0)),     # x (full seq)
            pl.BlockSpec((d_model, d_model), lambda b, qi: (0, 0)),          # Wq (scaled)
            pl.BlockSpec((1, d_model), lambda b, qi: (0, 0)),                # bq (scaled)
            pl.BlockSpec((d_model, 2 * d_model), lambda b, qi: (0, 0)),      # Wk|Wv
            pl.BlockSpec((1, 2 * d_model), lambda b, qi: (0, 0)),            # bk|bv
            pl.BlockSpec((d_model, d_model), lambda b, qi: (0, 0)),          # Wo
            pl.BlockSpec((1, d_model), lambda b, qi: (0, 0)),                # bo
        ],
        out_specs=pl.BlockSpec((None, tq, d_model), lambda b, qi: (b, qi, 0)),
        scratch_shapes=[
            pltpu.VMEM((seq, 2 * d_model), compute_dtype),   # cached K|V projection
            pltpu.VMEM((tq, d_model), compute_dtype),        # per-head context slab
        ],
    )

    return pl.pallas_call(
        kernel,
        out_shape=jax.ShapeDtypeStruct((bs, seq, d_model), out_dtype),
        grid_spec=grid_spec,
        compiler_params=pltpu.CompilerParams(
            # Batch axis is megacore-parallel; the q-tile axis must stay
            # sequential ("arbitrary") because the cached K|V projection in
            # scratch is reused across the q-tiles of one batch element.
            dimension_semantics=("parallel", "arbitrary"),
            vmem_limit_bytes=vmem_limit,
        ),
    )(mask_bias, x_in, wq, bq, wkv, bkv, wo_t, bo)


def mhsa_reference(query, key, value, mask, params, n_heads):
    """Pure-JAX reference mirroring the PyTorch forward exactly."""
    bs, S, D = query.shape
    dph = D // n_heads

    def lin(xx, w, b):  # nn.Linear: y = x @ W^T + b, W is (out, in)
        return xx @ w.T + b

    def shape(xx):
        return xx.reshape(bs, S, n_heads, dph).transpose(0, 2, 1, 3)  # (bs, H, S, dph)

    q = shape(lin(query, params["wq"], params["bq"])) / math.sqrt(dph)
    k = shape(lin(key, params["wk"], params["bk"]))
    v = shape(lin(value, params["wv"], params["bv"]))

    scores = jnp.einsum("bhqd,bhkd->bhqk", q, k)
    mbool = (mask == 0).reshape(bs, 1, 1, S)
    scores = jnp.where(mbool, jnp.finfo(scores.dtype).min, scores)
    weights = jax.nn.softmax(scores, axis=-1)
    ctx = jnp.einsum("bhqk,bhkd->bhqd", weights, v)
    ctx = ctx.transpose(0, 2, 1, 3).reshape(bs, S, D)
    return lin(ctx, params["wo"], params["bo"])


def _make_inputs(key0, bs, seq, d_model):
    keys = jax.random.split(key0, 9)
    bound = 1.0 / math.sqrt(d_model)  # nn.Linear default init range

    def init_w(k):
        return jax.random.uniform(k, (d_model, d_model), jnp.float32, -bound, bound)

    def init_b(k):
        return jax.random.uniform(k, (d_model,), jnp.float32, -bound, bound)

    params = {
        "wq": init_w(keys[0]), "bq": init_b(keys[1]),
        "wk": init_w(keys[2]), "bk": init_b(keys[3]),
        "wv": init_w(keys[4]), "bv": init_b(keys[5]),
        "wo": init_w(keys[6]), "bo": init_b(keys[7]),
    }
    x = jax.random.normal(keys[8], (bs, seq, d_model), jnp.float32)
    # attention mask: 1 = attend, 0 = masked (mask out the last 3 keys of the last batch row)
    mask = jnp.ones((bs, seq), jnp.float32).at[bs - 1, -3:].set(0.0)
    return x, mask, params


if __name__ == "__main__":
    configs = [
        # (bs, seq, d_model, n_heads) -- small, TPU-layout-friendly shapes
        (2, 512, 256, 2),   # multiple query tiles -> exercises the cached-K|V path
        (1, 128, 384, 6),   # dph = 64 (DistilBERT-style head size)
    ]
    key0 = jax.random.PRNGKey(0)
    for bs, seq, d_model, n_heads in configs:
        key0, sub = jax.random.split(key0)
        x, mask, params = _make_inputs(sub, bs, seq, d_model)
        ref = mhsa_reference(x, x, x, mask, params, n_heads)

        # f32 compute path: tight numerical check against the pure-JAX reference.
        out_f32 = jax.block_until_ready(
            mhsa_forward(x, x, x, mask, params, n_heads, compute_dtype=jnp.float32))
        np.testing.assert_allclose(np.asarray(out_f32), np.asarray(ref),
                                   rtol=1e-5, atol=1e-5)

        # bf16 MXU-operand path (default): loose check (bf16 rounding of operands).
        out_bf16 = jax.block_until_ready(
            mhsa_forward(x, x, x, mask, params, n_heads))
        np.testing.assert_allclose(np.asarray(out_bf16), np.asarray(ref),
                                   rtol=5e-2, atol=5e-2)

    print("KERNEL_OK")
</pallas_src>

<mosaic_0001>
module attributes {stable_mosaic.version = 11 : i64} {
  func.func @_mhsa_kernel(%arg0: i32, %arg1: i32, %arg2: memref<1x1x512xf32, #tpu.memory_space<vmem>>, %arg3: memref<1x512x256xf32, #tpu.memory_space<vmem>>, %arg4: memref<256x256xf32, #tpu.memory_space<vmem>>, %arg5: memref<1x256xf32, #tpu.memory_space<vmem>>, %arg6: memref<256x512xf32, #tpu.memory_space<vmem>>, %arg7: memref<1x512xf32, #tpu.memory_space<vmem>>, %arg8: memref<256x256xf32, #tpu.memory_space<vmem>>, %arg9: memref<1x256xf32, #tpu.memory_space<vmem>>, %arg10: memref<1x256x256xf32, #tpu.memory_space<vmem>>, %arg11: memref<512x512xf32, #tpu.memory_space<vmem>>, %arg12: memref<256x256xf32, #tpu.memory_space<vmem>>) attributes {dimension_semantics = [#tpu.dimension_semantics<parallel>, #tpu.dimension_semantics<arbitrary>], iteration_bounds = array<i64: 2, 2>, scalar_prefetch = 0 : i64, scratch_operands = 2 : i64, tpu.core_type = #tpu.core_type<tc>, window_params = [{transform_indices = @transform_0, window_bounds = array<i64: 1, 1, 512>}, {transform_indices = @transform_1, window_bounds = array<i64: 1, 512, 256>}, {pipeline_mode = #tpu.pipeline_mode<synchronous>, transform_indices = @transform_2, window_bounds = array<i64: 256, 256>}, {pipeline_mode = #tpu.pipeline_mode<synchronous>, transform_indices = @transform_3, window_bounds = array<i64: 1, 256>}, {pipeline_mode = #tpu.pipeline_mode<synchronous>, transform_indices = @transform_4, window_bounds = array<i64: 256, 512>}, {pipeline_mode = #tpu.pipeline_mode<synchronous>, transform_indices = @transform_5, window_bounds = array<i64: 1, 512>}, {pipeline_mode = #tpu.pipeline_mode<synchronous>, transform_indices = @transform_6, window_bounds = array<i64: 256, 256>}, {pipeline_mode = #tpu.pipeline_mode<synchronous>, transform_indices = @transform_7, window_bounds = array<i64: 1, 256>}, {transform_indices = @transform_8, window_bounds = array<i64: 1, 256, 256>}]} {
    %c0_i32 = arith.constant 0 : i32
    %0 = arith.cmpi eq, %arg1, %c0_i32 : i32
    %1 = arith.extui %0 : i1 to i32
    %c0_i32_0 = arith.constant 0 : i32
    %2 = arith.cmpi ne, %1, %c0_i32_0 : i32
    scf.if %2 {
      %c0_36 = arith.constant 0 : index
      %c0_37 = arith.constant 0 : index
      %c0_38 = arith.constant 0 : index
      %60 = vector.load %arg3[%c0_36, %c0_37, %c0_38] : memref<1x512x256xf32, #tpu.memory_space<vmem>>, vector<1x512x256xf32>
      %61 = vector.shape_cast %60 : vector<1x512x256xf32> to vector<512x256xf32>
      %c0_39 = arith.constant 0 : index
      %c0_40 = arith.constant 0 : index
      %62 = vector.load %arg6[%c0_39, %c0_40] : memref<256x512xf32, #tpu.memory_space<vmem>>, vector<256x512xf32>
      %cst_41 = arith.constant dense<0.000000e+00> : vector<512x512xf32>
      %63 = tpu.matmul %61, %62, %cst_41 {dimension_numbers = #tpu.dot_dimension_numbers<[1], [0], [0], [1], [0, 0, 1, 1], [], []>} : vector<512x256xf32>, vector<256x512xf32>, vector<512x512xf32> -> vector<512x512xf32>
      %c0_42 = arith.constant 0 : index
      %c0_43 = arith.constant 0 : index
      %64 = vector.load %arg7[%c0_42, %c0_43] : memref<1x512xf32, #tpu.memory_space<vmem>>, vector<1x512xf32>
      %65 = vector.broadcast %64 : vector<1x512xf32> to vector<512x512xf32>
      %66 = arith.addf %63, %65 : vector<512x512xf32>
      %c0_44 = arith.constant 0 : index
      %c0_45 = arith.constant 0 : index
      %67 = vector.load %arg11[%c0_44, %c0_45] : memref<512x512xf32, #tpu.memory_space<vmem>>, vector<512x512xf32>
      tpu.vector_store %arg11[%c0_44, %c0_45], %66 {strides = array<i32>} : memref<512x512xf32, #tpu.memory_space<vmem>>, vector<512x512xf32>,
    } else {
    }
    %c256_i32 = arith.constant 256 : i32
    %3 = arith.muli %arg1, %c256_i32 : i32
    %4 = tpu.assume_multiple %3, 256 : i32
    %c0 = arith.constant 0 : index
    %5 = arith.index_cast %4 : i32 to index
    %c0_1 = arith.constant 0 : index
    %6 = vector.load %arg3[%c0, %5, %c0_1] : memref<1x512x256xf32, #tpu.memory_space<vmem>>, vector<1x256x256xf32>
    %7 = vector.shape_cast %6 : vector<1x256x256xf32> to vector<256x256xf32>
    %c0_2 = arith.constant 0 : index
    %c0_3 = arith.constant 0 : index
    %8 = vector.load %arg4[%c0_2, %c0_3] : memref<256x256xf32, #tpu.memory_space<vmem>>, vector<256x256xf32>
    %cst = arith.constant dense<0.000000e+00> : vector<256x256xf32>
    %9 = tpu.matmul %7, %8, %cst {dimension_numbers = #tpu.dot_dimension_numbers<[1], [0], [0], [1], [0, 0, 1, 1], [], []>} : vector<256x256xf32>, vector<256x256xf32>, vector<256x256xf32> -> vector<256x256xf32>
    %c0_4 = arith.constant 0 : index
    %c0_5 = arith.constant 0 : index
    %10 = vector.load %arg5[%c0_4, %c0_5] : memref<1x256xf32, #tpu.memory_space<vmem>>, vector<1x256xf32>
    %11 = vector.broadcast %10 : vector<1x256xf32> to vector<256x256xf32>
    %12 = arith.addf %9, %11 : vector<256x256xf32>
    %c0_6 = arith.constant 0 : index
    %c0_7 = arith.constant 0 : index
    %c0_8 = arith.constant 0 : index
    %13 = vector.load %arg2[%c0_6, %c0_7, %c0_8] : memref<1x1x512xf32, #tpu.memory_space<vmem>>, vector<1x1x512xf32>
    %14 = vector.shape_cast %13 : vector<1x1x512xf32> to vector<1x512xf32>
    %15 = vector.shape_cast %14 : vector<1x512xf32> to vector<1x512xf32>
    %16 = vector.broadcast %15 : vector<1x512xf32> to vector<256x512xf32>
    %17 = vector.extract_strided_slice %12 {offsets = [0, 0], sizes = [256, 128], strides = [1, 1]} : vector<256x256xf32> to vector<256x128xf32>
    %c0_9 = arith.constant 0 : index
    %c0_10 = arith.constant 0 : index
    %18 = vector.load %arg11[%c0_9, %c0_10] : memref<512x512xf32, #tpu.memory_space<vmem>>, vector<512x128xf32>
    %c0_11 = arith.constant 0 : index
    %c256 = arith.constant 256 : index
    %19 = vector.load %arg11[%c0_11, %c256] : memref<512x512xf32, #tpu.memory_space<vmem>>, vector<512x128xf32>
    %cst_12 = arith.constant dense<0.000000e+00> : vector<256x512xf32>
    %20 = tpu.matmul %17, %18, %cst_12 {dimension_numbers = #tpu.dot_dimension_numbers<[1], [1], [0], [0], [0, 0, 1, 0], [], []>} : vector<256x128xf32>, vector<512x128xf32>, vector<256x512xf32> -> vector<256x512xf32>
    %21 = arith.addf %20, %16 : vector<256x512xf32>
    %cst_13 = arith.constant dense<0xFF800000> : vector<256xf32>
    %22 = vector.multi_reduction <maximumf>, %21, %cst_13 [1] : vector<256x512xf32> to vector<256xf32>
    %23 = vector.shape_cast %22 : vector<256xf32> to vector<256x1xf32>
    %24 = vector.broadcast %23 : vector<256x1xf32> to vector<256x512xf32>
    %25 = arith.subf %21, %24 : vector<256x512xf32>
    %26 = math.exp %25 : vector<256x512xf32>
    %cst_14 = arith.constant dense<0.000000e+00> : vector<256xf32>
    %27 = vector.multi_reduction <add>, %26, %cst_14 [1] : vector<256x512xf32> to vector<256xf32>
    %28 = vector.shape_cast %27 : vector<256xf32> to vector<256x1xf32>
    %29 = tpu.reciprocal %28 : vector<256x1xf32> -> vector<256x1xf32>
    %30 = vector.broadcast %29 : vector<256x1xf32> to vector<256x512xf32>
    %31 = arith.mulf %26, %30 : vector<256x512xf32>
    %cst_15 = arith.constant dense<0.000000e+00> : vector<256x128xf32>
    %32 = tpu.matmul %31, %19, %cst_15 {dimension_numbers = #tpu.dot_dimension_numbers<[1], [0], [0], [1], [0, 0, 1, 1], [], []>} : vector<256x512xf32>, vector<512x128xf32>, vector<256x128xf32> -> vector<256x128xf32>
    %c0_16 = arith.constant 0 : index
    %c0_17 = arith.constant 0 : index
    %33 = vector.load %arg12[%c0_16, %c0_17] : memref<256x256xf32, #tpu.memory_space<vmem>>, vector<256x128xf32>
    tpu.vector_store %arg12[%c0_16, %c0_17], %32 {strides = array<i32>} : memref<256x256xf32, #tpu.memory_space<vmem>>, vector<256x128xf32>,
    %34 = vector.extract_strided_slice %12 {offsets = [0, 128], sizes = [256, 128], strides = [1, 1]} : vector<256x256xf32> to vector<256x128xf32>
    %c0_18 = arith.constant 0 : index
    %c128 = arith.constant 128 : index
    %35 = vector.load %arg11[%c0_18, %c128] : memref<512x512xf32, #tpu.memory_space<vmem>>, vector<512x128xf32>
    %c0_19 = arith.constant 0 : index
    %c384 = arith.constant 384 : index
    %36 = vector.load %arg11[%c0_19, %c384] : memref<512x512xf32, #tpu.memory_space<vmem>>, vector<512x128xf32>
    %cst_20 = arith.constant dense<0.000000e+00> : vector<256x512xf32>
    %37 = tpu.matmul %34, %35, %cst_20 {dimension_numbers = #tpu.dot_dimension_numbers<[1], [1], [0], [0], [0, 0, 1, 0], [], []>} : vector<256x128xf32>, vector<512x128xf32>, vector<256x512xf32> -> vector<256x512xf32>
    %38 = arith.addf %37, %16 : vector<256x512xf32>
    %cst_21 = arith.constant dense<0xFF800000> : vector<256xf32>
    %39 = vector.multi_reduction <maximumf>, %38, %cst_21 [1] : vector<256x512xf32> to vector<256xf32>
    %40 = vector.shape_cast %39 : vector<256xf32> to vector<256x1xf32>
    %41 = vector.broadcast %40 : vector<256x1xf32> to vector<256x512xf32>
    %42 = arith.subf %38, %41 : vector<256x512xf32>
    %43 = math.exp %42 : vector<256x512xf32>
    %cst_22 = arith.constant dense<0.000000e+00> : vector<256xf32>
    %44 = vector.multi_reduction <add>, %43, %cst_22 [1] : vector<256x512xf32> to vector<256xf32>
    %45 = vector.shape_cast %44 : vector<256xf32> to vector<256x1xf32>
    %46 = tpu.reciprocal %45 : vector<256x1xf32> -> vector<256x1xf32>
    %47 = vector.broadcast %46 : vector<256x1xf32> to vector<256x512xf32>
    %48 = arith.mulf %43, %47 : vector<256x512xf32>
    %cst_23 = arith.constant dense<0.000000e+00> : vector<256x128xf32>
    %49 = tpu.matmul %48, %36, %cst_23 {dimension_numbers = #tpu.dot_dimension_numbers<[1], [0], [0], [1], [0, 0, 1, 1], [], []>} : vector<256x512xf32>, vector<512x128xf32>, vector<256x128xf32> -> vector<256x128xf32>
    %c0_24 = arith.constant 0 : index
    %c128_25 = arith.constant 128 : index
    %50 = vector.load %arg12[%c0_24, %c128_25] : memref<256x256xf32, #tpu.memory_space<vmem>>, vector<256x128xf32>
    tpu.vector_store %arg12[%c0_24, %c128_25], %49 {strides = array<i32>} : memref<256x256xf32, #tpu.memory_space<vmem>>, vector<256x128xf32>,
    %c0_26 = arith.constant 0 : index
    %c0_27 = arith.constant 0 : index
    %51 = vector.load %arg12[%c0_26, %c0_27] : memref<256x256xf32, #tpu.memory_space<vmem>>, vector<256x256xf32>
    %c0_28 = arith.constant 0 : index
    %c0_29 = arith.constant 0 : index
    %52 = vector.load %arg8[%c0_28, %c0_29] : memref<256x256xf32, #tpu.memory_space<vmem>>, vector<256x256xf32>
    %cst_30 = arith.constant dense<0.000000e+00> : vector<256x256xf32>
    %53 = tpu.matmul %51, %52, %cst_30 {dimension_numbers = #tpu.dot_dimension_numbers<[1], [0], [0], [1], [0, 0, 1, 1], [], []>} : vector<256x256xf32>, vector<256x256xf32>, vector<256x256xf32> -> vector<256x256xf32>
    %c0_31 = arith.constant 0 : index
    %c0_32 = arith.constant 0 : index
    %54 = vector.load %arg9[%c0_31, %c0_32] : memref<1x256xf32, #tpu.memory_space<vmem>>, vector<1x256xf32>
    %55 = vector.broadcast %54 : vector<1x256xf32> to vector<256x256xf32>
    %56 = arith.addf %53, %55 : vector<256x256xf32>
    %c0_33 = arith.constant 0 : index
    %c0_34 = arith.constant 0 : index
    %c0_35 = arith.constant 0 : index
    %57 = vector.load %arg10[%c0_33, %c0_34, %c0_35] : memref<1x256x256xf32, #tpu.memory_space<vmem>>, vector<1x256x256xf32>
    %58 = vector.shape_cast %57 : vector<1x256x256xf32> to vector<256x256xf32>
    %59 = vector.shape_cast %56 : vector<256x256xf32> to vector<1x256x256xf32>
    tpu.vector_store %arg10[%c0_33, %c0_34, %c0_35], %59 {strides = array<i32>} : memref<1x256x256xf32, #tpu.memory_space<vmem>>, vector<1x256x256xf32>,
    return
  }
  func.func @transform_0(%arg0: i32, %arg1: i32) -> (i32, i32, i32) {
    %c0_i32 = arith.constant 0 : i32
    %c0_i32_0 = arith.constant 0 : i32
    %c0_i32_1 = arith.constant 0 : i32
    return %arg0, %c0_i32, %c0_i32_0 : i32, i32, i32
  }
  func.func @transform_1(%arg0: i32, %arg1: i32) -> (i32, i32, i32) {
    %c0_i32 = arith.constant 0 : i32
    %c0_i32_0 = arith.constant 0 : i32
    %c0_i32_1 = arith.constant 0 : i32
    return %arg0, %c0_i32, %c0_i32_0 : i32, i32, i32
  }
  func.func @transform_2(%arg0: i32, %arg1: i32) -> (i32, i32) {
    %c0_i32 = arith.constant 0 : i32
    %c0_i32_0 = arith.constant 0 : i32
    %c0_i32_1 = arith.constant 0 : i32
    return %c0_i32, %c0_i32_0 : i32, i32
  }
  func.func @transform_3(%arg0: i32, %arg1: i32) -> (i32, i32) {
    %c0_i32 = arith.constant 0 : i32
    %c0_i32_0 = arith.constant 0 : i32
    %c0_i32_1 = arith.constant 0 : i32
    return %c0_i32, %c0_i32_0 : i32, i32
  }
  func.func @transform_4(%arg0: i32, %arg1: i32) -> (i32, i32) {
    %c0_i32 = arith.constant 0 : i32
    %c0_i32_0 = arith.constant 0 : i32
    %c0_i32_1 = arith.constant 0 : i32
    return %c0_i32, %c0_i32_0 : i32, i32
  }
  func.func @transform_5(%arg0: i32, %arg1: i32) -> (i32, i32) {
    %c0_i32 = arith.constant 0 : i32
    %c0_i32_0 = arith.constant 0 : i32
    %c0_i32_1 = arith.constant 0 : i32
    return %c0_i32, %c0_i32_0 : i32, i32
  }
  func.func @transform_6(%arg0: i32, %arg1: i32) -> (i32, i32) {
    %c0_i32 = arith.constant 0 : i32
    %c0_i32_0 = arith.constant 0 : i32
    %c0_i32_1 = arith.constant 0 : i32
    return %c0_i32, %c0_i32_0 : i32, i32
  }
  func.func @transform_7(%arg0: i32, %arg1: i32) -> (i32, i32) {
    %c0_i32 = arith.constant 0 : i32
    %c0_i32_0 = arith.constant 0 : i32
    %c0_i32_1 = arith.constant 0 : i32
    return %c0_i32, %c0_i32_0 : i32, i32
  }
  func.func @transform_8(%arg0: i32, %arg1: i32) -> (i32, i32, i32) {
    %c0_i32 = arith.constant 0 : i32
    %c0_i32_0 = arith.constant 0 : i32
    return %arg0, %arg1, %c0_i32 : i32, i32, i32
  }
}

</mosaic_0001>

<bundles_post_ra>
// kernel: tpu_custom_call.1
= control target key start
LH: loop header
LB: loop body
LE: loop exit
PB: predicated region body
PF: predicated region fallthrough
CT: control target
= control target key end

     0   :  { %s13977_s0 = inlined_call_operand.hbm [shape: f32[2,1,512], index: 0, kind: input, shape index: {}]   ;;  %s13978_s1 = inlined_call_operand.hbm [shape: f32[2,512,256], index: 1, kind: input, shape index: {}]   ;;  %s13979_s2 = inlined_call_operand.hbm [shape: f32[256,256], index: 2, kind: input, shape index: {}]   ;;  %s13980_s3 = inlined_call_operand.vmem [shape: f32[1,256], index: 3, kind: input, shape index: {}]   ;;  %s13981_s4 = inlined_call_operand.hbm [shape: f32[256,512], index: 4, kind: input, shape index: {}]   ;;  %s13982_s5 = inlined_call_operand.vmem [shape: f32[1,512], index: 5, kind: input, shape index: {}]   ;;  %s13983_s6 = inlined_call_operand.hbm [shape: f32[256,256], index: 6, kind: input, shape index: {}]   ;;  %s13984_s7 = inlined_call_operand.vmem [shape: f32[1,256], index: 7, kind: input, shape index: {}]   ;;  %s13985_s8 = inlined_call_operand.hbm [shape: f32[2,512,256], index: 8, kind: output, shape index: {}]  }
   0x1   :  { %14437 = sst [smem:[#allocation242_spill]] %s13977_s0 }
   0x2   :  { %14438 = sst [smem:[#allocation243_spill]] %s13979_s2 }
   0x3   :  { %14439 = sst [smem:[#allocation244_spill]] %s13980_s3 }
   0x4   :  { %14440 = sst [smem:[#allocation245_spill]] %s13981_s4 }
   0x5   :  { %14441 = sst [smem:[#allocation246_spill]] %s13982_s5 }
   0x6   :  { %14442 = sst [smem:[#allocation247_spill]] %s13983_s6 }
   0x7   :  { %14443 = sst [smem:[#allocation248_spill]] %s13984_s7 }
   0x8   :  { %14444 = sst [smem:[#allocation249_spill]] %s13985_s8 }
   0x9   :  { %13 = vsyncpa [#allocation5], 0 }
   0xa   :  { %15 = vsyncpa [#allocation5 + $0x1], 0 }
   0xb   :  { %16 = vsyncpa [#allocation8], 0 }
   0xc   :  { %18 = vsyncpa [#allocation8 + $0x1], 0 }
   0xd   :  { %19 = vsyncpa [#allocation11], 0 }
   0xe   :  { %20 = vsyncpa [#allocation6], 0 }
   0xf   :  { %22 = vsyncpa [#allocation6 + $0x1], 0  ;;  %s9121_s27 = smov 0   ;;  %s9123_s28 = smov 0  }
  0x10   :  { %s9125_s29 = smov 0   ;;  %s9127_s30 = smov 0  }
  0x11   :  { %s9129_s9 = smov 0   ;;  %s9131_s10 = smov 0  }
  0x12   :  { %s9133_s11 = smov 0   ;;  %s9135_s12 = smov 0  }
  0x13   :  { %s9137_s13 = smov 0   ;;  %s9139_s14 = smov 0  }
  0x14   :  { %s9141_s15 = smov 0  }
  0x15 LB: > { %14445 = sst [smem:[#allocation19_spill]] %s9021_s27  ;;  %s9175_s16 = sadd.s32 4294967295, %s9061_s15   ;;  %s9061_s15 = sphi %s9141_s15, %s28_s15   ;;  %s9057_s14 = sphi %s9139_s14, %s15552_s14   ;;  %s9053_s13 = sphi %s9137_s13, %s15551_s13   ;;  %s9049_s12 = sphi %s9135_s12, %s15550_s12   ;;  %s9045_s11 = sphi %s9133_s11, %s15549_s11   ;;  %s9041_s10 = sphi %s9131_s10, %s15548_s10   ;;  %s9037_s9 = sphi %s9129_s9, %s15547_s9   ;;  %s9033_s30 = sphi %s9127_s30, %s15546_s30   ;;  %s9029_s29 = sphi %s9125_s29, %s15545_s29   ;;  %s9025_s28 = sphi %s9123_s28, %s15544_s28   ;;  %s9021_s27 = sphi %s9121_s27, %s15543_s27  }
  0x16   : > { %14446 = sst [smem:[#allocation20_spill]] %s9049_s12  ;;  %s6876_s17 = sadd.s32 4294967294, %s9061_s15  }
  0x17   : > { %p60_p0 = scmp.ne.s32.totalorder %s9037_s9, %s9033_s30  ;;  %p13991_p1 = scmp.eq.s32.totalorder %s9175_s16, 0 }
  0x18   : > { %p237_p2 = scmp.ne.s32.totalorder %s9029_s29, %s9025_s28  ;;  %p238_p4 = scmp.eq.s32.totalorder %s9175_s16, 3 }
  0x19   : > { %p9185_p3 = por %p13991_p1, %p60_p0  ;;  %p243_p5 = scmp.ne.s32.totalorder %s9025_s28, %s9021_s27 }
  0x1a   : > { %p244_p6 = scmp.eq.s32.totalorder %s6876_s17, 3  ;;  %p9192_p7 = por %p238_p4, %p237_p2 }
  0x1b   : > { %s14447_s19 = scalar_select %p9185_p3, 1, 0 }
  0x1c   : > { %s14448_s20 = scalar_select %p9192_p7, 1, 0 }
  0x1d   : > { %p6877_p8 = scmp.ge.s32.totalorder %s9061_s15, 1  ;;  %p9197_p9 = por %p244_p6, %p243_p5 }
  0x1e   : > { %14449 = sst [smem:[#allocation21_spill]] %s14448_s20  ;;  %p251_p10 = scmp.lt.s32.totalorder %s9061_s15, 5 }
  0x1f   : > { %s14450_s21 = scalar_select %p9197_p9, 1, 0 }
  0x20   : > { %p9202_p11 = pnand %p6877_p8, %p251_p10  ;;  %s9063_s23 = smov [#allocation9]  }
  0x21   : > { %14451 = sst [smem:[#allocation22_spill]] %s14450_s21  ;;  %s263_s24 = sshll.u32 %s9063_s23, 4  ;;  %s264_s24 = int_to_ptr.vmem [resolvable:$true] %s263_s24 }
  0x22   : > { %s14452_s22 = scalar_select %p9202_p11, 1, 0 }
  0x23   : > { %p8016_p12 = pneg %p9202_p11  ;;  %s9064_s26 = smov [#allocation10]  }
  0x24   : > { %s279_s30 = sshll.u32 %s9064_s26, 4  ;;  %s14454_s2 = sld [smem:[#allocation243_spill]]  ;;  %s9214_s30 = int_to_ptr.vmem [resolvable:$true] %s279_s30 }
  0x25   : > { %p9210_p13 = pnand %p8016_p12, %p13991_p1 }
  0x27   : > { %p9224_p2 = pneg %p9210_p13 }
  0x2a   : > { %s8783_s21 = scalar_lea.hbm %s14454_s2, 8192 }
  0x2b   : > { %p8784_p0 = scmp.ne.s32.totalorder %s14454_s2, %s8783_s21  ;;  %p8790_p6 = scmp.lt.u32.totalorder %s8783_s21, %s14454_s2 }
  0x2d   : > { %p8786_p4 = pnand %p9224_p2, %p8784_p0 }
  0x2f   : > { %p8787_p5 = pneg %p8786_p4 }
  0x31   : > { %p8792_p8 = pnand %p8790_p6, %p8787_p5 }
  0x33   : > { %8795 = shalt.err (!%p8792_p8)
}
  0x34   : > { %s8796_s18 = scalar_lea.vmem %s264_s24, 8192  ;;  %p8804_p9 = scmp.lt.s32.totalorder %s264_s24, %s264_s24 }
  0x35   : > { %p8797_p10 = scmp.ne.s32.totalorder %s264_s24, %s8796_s18  ;;  %p8805_p7 = scmp.lt.s32.totalorder %s8796_s18, %s8796_s18 }
  0x37   : > { %p8799_p12 = pnand %p8797_p10, %p9224_p2  ;;  %p8806_p3 = por %p8805_p7, %p8804_p9 }
  0x39   : > { %p8800_p1 = pneg %p8799_p12 }
  0x3b   : > { %p8807_p11 = pnand %p8806_p3, %p8800_p1 }
  0x3d   : > { %8810 = shalt.err (!%p8807_p11)
}
  0x3e   : > { %s13995_s8 = smov 256   ;;  %s13997_s27 = smov 16  }
  0x3f   : > { %8019 = dma.hbm_to_vmem [thread:$0]  (!%p9210_p13), %s14454_s2, 8192, %s264_s24, [#allocation8], %s13995_s8, %s13995_s8, %s13997_s27  }
  0x40   : > { %s14456_s4 = sld [smem:[#allocation245_spill]] }
  0x46   : > { %s8811_s12 = scalar_lea.hbm %s14456_s4, 16384 }
  0x47   : > { %p8812_p1 = scmp.ne.s32.totalorder %s14456_s4, %s8811_s12  ;;  %p8818_p9 = scmp.lt.u32.totalorder %s8811_s12, %s14456_s4 }
  0x49   : > { %p8814_p3 = pnand %p8812_p1, %p9224_p2 }
  0x4b   : > { %p8815_p7 = pneg %p8814_p3 }
  0x4d   : > { %p8820_p11 = pnand %p8818_p9, %p8815_p7 }
  0x4f   : > { %8823 = shalt.err (!%p8820_p11)
}
  0x50   : > { %s8824_s24 = scalar_lea.vmem %s9214_s30, 16384  ;;  %p8832_p6 = scmp.lt.s32.totalorder %s9214_s30, %s9214_s30 }
  0x51   : > { %p8825_p0 = scmp.ne.s32.totalorder %s9214_s30, %s8824_s24  ;;  %p8833_p8 = scmp.lt.s32.totalorder %s8824_s24, %s8824_s24 }
  0x53   : > { %p8827_p4 = pnand %p8825_p0, %p9224_p2  ;;  %p8834_p10 = por %p8833_p8, %p8832_p6 }
  0x55   : > { %p8828_p5 = pneg %p8827_p4 }
  0x57   : > { %p8835_p12 = pnand %p8834_p10, %p8828_p5 }
  0x59   : > { %8838 = shalt.err (!%p8835_p12)
}
  0x5a   : > { %s9067_s7 = smov 512   ;;  %s9068_s3 = smov 32  }
  0x5b   : > { %8022 = dma.hbm_to_vmem [thread:$0]  (!%p9210_p13), %s14456_s4, 16384, %s9214_s30, [#allocation11], %s9067_s7, %s9067_s7, %s9068_s3  }
  0x5c   : > { %s9069_s20 = smov [#allocation12]   ;;  %s14457_s6 = sld [smem:[#allocation247_spill]] }
  0x5d   : > { %s295_s21 = sshll.u32 %s9069_s20, 4  ;;  %s296_s21 = int_to_ptr.vmem [resolvable:$true] %s295_s21 }
  0x62   : > { %s8839_s18 = scalar_lea.hbm %s14457_s6, 8192 }
  0x63   : > { %p8840_p1 = scmp.ne.s32.totalorder %s14457_s6, %s8839_s18  ;;  %p8846_p9 = scmp.lt.u32.totalorder %s8839_s18, %s14457_s6 }
  0x65   : > { %p8842_p3 = pnand %p8840_p1, %p9224_p2 }
  0x67   : > { %p8843_p7 = pneg %p8842_p3 }
  0x69   : > { %p8848_p11 = pnand %p8846_p9, %p8843_p7 }
  0x6b   : > { %8851 = shalt.err (!%p8848_p11)
}
  0x6c   : > { %s8852_s30 = scalar_lea.vmem %s296_s21, 8192  ;;  %p8860_p6 = scmp.lt.s32.totalorder %s296_s21, %s296_s21 }
  0x6d   : > { %p8853_p0 = scmp.ne.s32.totalorder %s296_s21, %s8852_s30  ;;  %p8861_p8 = scmp.lt.s32.totalorder %s8852_s30, %s8852_s30 }
  0x6f   : > { %p8855_p4 = pnand %p8853_p0, %p9224_p2  ;;  %p8862_p10 = por %p8861_p8, %p8860_p6 }
  0x71   : > { %p8856_p5 = pneg %p8855_p4 }
  0x73   : > { %p8863_p12 = pnand %p8862_p10, %p8856_p5 }
  0x75   : > { %8866 = shalt.err (!%p8863_p12)
}
  0x76   : > { %s14458_s8 = smov 16   ;;  %s14459_s7 = smov 256  }
  0x77   : > { %8025 = dma.hbm_to_vmem [thread:$0]  (!%p9210_p13), %s14457_s6, 8192, %s296_s21, [#allocation11], %s14459_s7, %s14459_s7, %s14458_s8  }
  0x78   : > { %s37_s23 = sadd.s32 1, %s9053_s13  ;;  %s40_s25 = sadd.s32 1, %s9057_s14 }
  0x79   : > { %p38_p2 = scmp.ge.s32.totalorder %s37_s23, 2  ;;  %s47_s3 = sadd.s32 1, %s9041_s10 }
  0x7a   : > { %p54_p1 = scmp.ne.s32.totalorder %s9041_s10, %s9037_s9  ;;  %p55_p3 = scmp.eq.s32.totalorder %s9061_s15, 0 }
  0x7b   : > { %s15554_s23 = smov (%p38_p2, %s37_s23), 0  ;;  %s15556_s25 = smov (!%p38_p2, %s40_s25), %s9057_s14 }
  0x7c   : > { %14460 = sst [smem:[#allocation23_spill]] %s15554_s23  ;;  %s223_s5 = ssub.s32 %s9053_s13, %s15554_s23 }
  0x7d   : > { %p42_p7 = scmp.ge.s32.totalorder %s15556_s25, 2  ;;  %p8040_p9 = scmp.lt.s32.totalorder %s9061_s15, 4 }
  0x7e   : > { %p9299_p13 = por %p55_p3, %p54_p1  ;;  %s9304_s20 = sand.u32 1, %s9041_s10  }
  0x7f   : > { %s15558_s25 = smov (%p42_p7, %s15556_s25), 0  ;;  %s6882_s21 = sshll.u32 %s9304_s20, 2 }
  0x80   : > { %14462 = sst [smem:[#allocation24_spill]] %s15558_s25  ;;  %s44_s17 = ssub.s32 %s9057_s14, %s15558_s25 }
  0x81   : > { %p45_p11 = scmp.eq.s32.totalorder %s44_s17, 0  ;;  %s224_s26 = sor.u32 %s223_s5, %s44_s17 }
  0x82   : > { %p225_p0 = scmp.eq.s32.totalorder %s224_s26, 0  ;;  %s6906_s18 = sshll.u32 %s9057_s14, 6 }
  0x83   : > { %s9313_s24 = scalar_select %p45_p11, %s9041_s10, %s47_s3  }
  0x84   : > { %s14463_s30 = sadd.s32 1, %s9029_s29  ;;  %s14464_s0 = sld [smem:[#allocation242_spill]] }
  0x85   : > { %s9318_s2 = scalar_select %p225_p0, %s9029_s29, %s14463_s30  }
  0x86   : > { %s316_s23 = scalar_lea.vmem [#allocation4], %s6882_s21  ;;  %p9331_p4 = pnand %p8040_p9, %p9299_p13 }
  0x87   : > { %s324_s25 = sshll.u32 %s316_s23, 4  ;;  %s6885_s5 = sshll.u32 %s9304_s20, 10  ;;  %s9325_s25 = int_to_ptr.vmem [resolvable:$true] %s324_s25 }
  0x88   : > { %s331_s4 = sand.u32 1, %s9061_s15   ;;  %s313_s17 = scalar_lea.sflag [#allocation5], %s9304_s20 }
  0x89   : > { %p8869_p6 = pneg %p9331_p4 }
  0x8a   : > { %s9323_s6 = scalar_lea.hbm %s14464_s0, %s6906_s18  ;;  %s8872_s21 = scalar_lea.hbm %s14464_s0, 128 }
  0x8b   : > { %s8867_s26 = scalar_lea.hbm %s9323_s6, 64  ;;  %p8873_p12 = scmp.lt.u32.totalorder %s9323_s6, %s14464_s0 }
  0x8c   : > { %p8868_p5 = scmp.ne.s32.totalorder %s9323_s6, %s8867_s26  ;;  %p8874_p2 = scmp.lt.u32.totalorder %s8872_s21, %s8867_s26 }
  0x8d   : > { %p8876_p3 = scmp.lt.u32.totalorder %s8867_s26, %s9323_s6 }
  0x8e   : > { %p8870_p8 = pnand %p8869_p6, %p8868_p5  ;;  %p8875_p1 = por %p8874_p2, %p8873_p12 }
  0x90   : > { %p8871_p10 = pneg %p8870_p8  ;;  %p8877_p7 = por %p8876_p3, %p8875_p1 }
  0x92   : > { %p8878_p9 = pnand %p8877_p7, %p8871_p10 }
  0x94   : > { %8881 = shalt.err (!%p8878_p9)
}
  0x95   : > { %s8882_s27 = scalar_lea.vmem %s9325_s25, 64  ;;  %s9070_s23 = smov [#allocation4]  }
  0x96   : > { %p8883_p13 = scmp.ne.s32.totalorder %s9325_s25, %s8882_s27  ;;  %s8887_s12 = sshll.u32 %s9070_s23, 4  ;;  %s8888_s12 = int_to_ptr.vmem [resolvable:$false] %s8887_s12 }
  0x97   : > { %s8889_s18 = scalar_lea.vmem %s8888_s12, 128  ;;  %p8890_p5 = scmp.lt.s32.totalorder %s9325_s25, %s8888_s12 }
  0x98   : > { %p8885_p11 = pnand %p8883_p13, %p8869_p6  ;;  %p8891_p8 = scmp.lt.s32.totalorder %s8889_s18, %s8882_s27 }
  0x9a   : > { %p8886_p0 = pneg %p8885_p11  ;;  %p8892_p12 = por %p8891_p8, %p8890_p5 }
  0x9c   : > { %p8893_p2 = pnand %p8892_p12, %p8886_p0 }
  0x9e   : > { %8896 = shalt.err (!%p8893_p2)
}
  0x9f   : > { %8029 = dma.hbm_to_vmem [thread:$0]  (!%p9331_p4), %s9323_s6, 64, %s9325_s25, %s313_s17  }
  0xa0   : > { %s335_s26 = scalar_lea.vmem [#allocation7], %s6885_s5  ;;  %s6907_s30 = sshll.u32 %s9057_s14, 14 }
  0xa1   : > { %s342_s21 = sshll.u32 %s335_s26, 4  ;;  %s9371_s12 = scalar_lea.hbm %s13978_s1, %s6907_s30  ;;  %s9365_s21 = int_to_ptr.vmem [resolvable:$true] %s342_s21 }
  0xa2   : > { %s9375_s18 = scalar_lea.sflag [#allocation8], %s331_s4  ;;  %s8897_s0 = scalar_lea.hbm %s9371_s12, 16384 }
  0xa3   : > { %p8898_p10 = scmp.ne.s32.totalorder %s9371_s12, %s8897_s0  ;;  %s8902_s20 = scalar_lea.hbm %s13978_s1, 32768 }
  0xa4   : > { %p8903_p7 = scmp.lt.u32.totalorder %s9371_s12, %s13978_s1  ;;  %p8904_p9 = scmp.lt.u32.totalorder %s8902_s20, %s8897_s0 }
  0xa5   : > { %p8900_p1 = pnand %p8898_p10, %p8869_p6  ;;  %p8906_p11 = scmp.lt.u32.totalorder %s8897_s0, %s9371_s12 }
  0xa6   : > { %p8905_p13 = por %p8904_p9, %p8903_p7 }
  0xa7   : > { %p8901_p3 = pneg %p8900_p1 }
  0xa8   : > { %p8907_p0 = por %p8906_p11, %p8905_p13 }
  0xaa   : > { %p8908_p5 = pnand %p8907_p0, %p8901_p3 }
  0xac   : > { %8911 = shalt.err (!%p8908_p5)
}
  0xad   : > { %s8912_s4 = scalar_lea.vmem %s9365_s21, 16384  ;;  %s9071_s26 = smov [#allocation7]  }
  0xae   : > { %p8913_p8 = scmp.ne.s32.totalorder %s9365_s21, %s8912_s4  ;;  %s8917_s30 = sshll.u32 %s9071_s26, 4  ;;  %s8918_s30 = int_to_ptr.vmem [resolvable:$false] %s8917_s30 }
  0xaf   : > { %s8919_s23 = scalar_lea.vmem %s8918_s30, 32768  ;;  %p8920_p10 = scmp.lt.s32.totalorder %s9365_s21, %s8918_s30 }
  0xb0   : > { %p8915_p12 = pnand %p8913_p8, %p8869_p6  ;;  %p8921_p1 = scmp.lt.s32.totalorder %s8919_s23, %s8912_s4 }
  0xb2   : > { %p8916_p2 = pneg %p8915_p12  ;;  %p8922_p7 = por %p8921_p1, %p8920_p10 }
  0xb4   : > { %p8923_p9 = pnand %p8922_p7, %p8916_p2 }
  0xb6   : > { %8926 = shalt.err (!%p8923_p9)
}
  0xb7   : > { %8032 = dma.hbm_to_vmem [thread:$0]  (!%p9331_p4), %s9371_s12, 16384, %s9365_s21, %s9375_s18, %s14459_s7, %s14459_s7, %s14458_s8  }
  0xb8   : > { %p14466_p6 = scmp.ne.s32.totalorder %s14452_s22, 0 }
  0xba   : > { %354 = sbr.rel (%p14466_p6) target bundleno = 2584 (0xa18), region = 52 }
  0xc1   : > { %s356_s0 = sand.u32 1, %s9037_s9   ;;  %p14467_p3 = scmp.ne.s32.totalorder %s14447_s19, 0 }
  0xc2   : > { %s6889_s27 = sshll.u32 %s356_s0, 2  ;;  %s357_s6 = scalar_lea.sflag [#allocation5], %s356_s0 }
  0xc3   : > { %s9407_s25 = scalar_lea.vmem [#allocation4], %s6889_s27 }
  0xc4   : > { %9000 = dma.done.wait (%p14467_p3), %s357_s6, 64  }
  0xc5   : > { %9002 = vsyncadd (%p14467_p3), %s357_s6, 4294967232  ;;  %s365_s3 = sand.u32 1, %s9175_s16   ;;  %s6890_s20 = sshll.u32 %s356_s0, 10 }
  0xc6   : > { %s366_s8 = scalar_lea.sflag [#allocation8], %s365_s3  ;;  %s9414_s7 = scalar_lea.vmem [#allocation7], %s6890_s20 }
  0xc7   : > { %9004 = dma.done.wait (%p14467_p3), %s366_s8, 16384  }
  0xc8   : > { %9006 = vsyncadd (%p14467_p3), %s366_s8, 4294950912  ;;  %p14468_p4 = scmp.eq.s32.totalorder %s9175_s16, 0 }
  0xca   : > { %9008 = dma.done.wait (%p14468_p4), [#allocation8], 8192   ;;  %p14469_p13 = pmov %p14468_p4 }
  0xcb   : > { %p14470_p11 = pmov %p14468_p4 }
  0xcc   : > { %9010 = vsyncadd (%p14469_p13), [#allocation8], 4294959104 }
  0xcd   : > { %9012 = dma.done.wait (%p14470_p11), [#allocation11], 24576   ;;  %p14471_p0 = pmov %p14468_p4 }
  0xce   : > { %s416_s22 = sand.u32 1, %s9025_s28   ;;  %p6895_p5 = scmp.ne.s32.totalorder %s9045_s11, 0 }
  0xcf   : > { %9014 = vsyncadd (%p14471_p0), [#allocation11], 4294942720  ;;  %s6894_s21 = sshll.u32 %s416_s22, 9  ;;  %v553_v0 = vld [vmem:[#allocation10 + $0x8] sm:$0xff] (!%p6895_p5)  ;;  %v555_v2 = vld [vmem:[#allocation10 + $0x18] sm:$0xff] (!%p6895_p5)  ;;  %s14472_s18 = sld [smem:[#allocation246_spill]] (!%p6895_p5) }
  0xd0   : > { %s9431_s12 = scalar_lea.vmem [#allocation13], %s6894_s21  ;;  %423 = sbr.rel (%p6895_p5) target bundleno = 744 (0x2e8), region = 76  ;;  %v557_v1 = vld [vmem:[#allocation10 + $0x28] sm:$0xff] (!%p6895_p5)  ;;  %v559_v4 = vld [vmem:[#allocation10 + $0x38] sm:$0xff] (!%p6895_p5)  ;;  %v552_v5 = vld [vmem:[#allocation10] sm:$0xff] (!%p6895_p5) }
  0xd1   : > { %v7294_v3 = vpack.c.bf16 (!%p6895_p5), %v557_v1, %v553_v0  ;;  %v556_v6 = vld [vmem:[#allocation10 + $0x20] sm:$0xff] (!%p6895_p5)  ;;  %v7358_v7 = vpack.c.bf16 (!%p6895_p5), %v559_v4, %v555_v2  ;;  %v554_v9 = vld [vmem:[#allocation10 + $0x10] sm:$0xff] (!%p6895_p5)  ;;  %v561_v11 = vld [vmem:[#allocation10 + $0x48] sm:$0xff] (!%p6895_p5) }
  0xd2   : > { %v7296_v8 = vpack.c.bf16 (!%p6895_p5), %v556_v6, %v552_v5  ;;  %v558_v10 = vld [vmem:[#allocation10 + $0x30] sm:$0xff] (!%p6895_p5)  ;;  %v565_v13 = vld [vmem:[#allocation10 + $0x68] sm:$0xff] (!%p6895_p5)  ;;  %v563_v14 = vld [vmem:[#allocation10 + $0x58] sm:$0xff] (!%p6895_p5) }
  0xd3   : > { %7295 = vmatprep.subr.bf16.mxu0 (!%p6895_p5), %v7294_v3  ;;  %v7360_v12 = vpack.c.bf16 (!%p6895_p5), %v558_v10, %v554_v9  ;;  %v567_v15 = vld [vmem:[#allocation10 + $0x78] sm:$0xff] (!%p6895_p5)  ;;  %7359 = vmatprep.subr.bf16.mxu1 (!%p6895_p5), %v7358_v7  ;;  %v7298_v16 = vpack.c.bf16 (!%p6895_p5), %v565_v13, %v561_v11  ;;  %v560_v18 = vld [vmem:[#allocation10 + $0x40] sm:$0xff] (!%p6895_p5)  ;;  %v562_v20 = vld [vmem:[#allocation10 + $0x50] sm:$0xff] (!%p6895_p5) }
  0xd4   : > { %7297 = vmatpush1.bf16.msra.mxu0 (!%p6895_p5), %v7296_v8  ;;  %v7362_v17 = vpack.c.bf16 (!%p6895_p5), %v567_v15, %v563_v14  ;;  %v564_v19 = vld [vmem:[#allocation10 + $0x60] sm:$0xff] (!%p6895_p5)  ;;  %v566_v22 = vld [vmem:[#allocation10 + $0x70] sm:$0xff] (!%p6895_p5)  ;;  %v569_v23 = vld [vmem:[#allocation10 + $0x88] sm:$0xff] (!%p6895_p5) }
  0xd5   : > { %7361 = vmatpush1.bf16.msra.mxu1 (!%p6895_p5), %v7360_v12  ;;  %v7300_v21 = vpack.c.bf16 (!%p6895_p5), %v564_v19, %v560_v18  ;;  %v573_v24 = vld [vmem:[#allocation10 + $0xa8] sm:$0xff] (!%p6895_p5)  ;;  %7299 = vmatprep.subr.bf16.mxu0 (!%p6895_p5), %v7298_v16  ;;  %v7364_v25 = vpack.c.bf16 (!%p6895_p5), %v566_v22, %v562_v20  ;;  %v571_v27 = vld [vmem:[#allocation10 + $0x98] sm:$0xff] (!%p6895_p5)  ;;  %v568_v29 = vld [vmem:[#allocation10 + $0x80] sm:$0xff] (!%p6895_p5) }
  0xd6   : > { %7363 = vmatprep.subr.bf16.mxu1 (!%p6895_p5), %v7362_v17  ;;  %v7302_v26 = vpack.c.bf16 (!%p6895_p5), %v573_v24, %v569_v23  ;;  %v575_v28 = vld [vmem:[#allocation10 + $0xb8] sm:$0xff] (!%p6895_p5)  ;;  %v572_v31 = vld [vmem:[#allocation10 + $0xa0] sm:$0xff] (!%p6895_p5)  ;;  %v570_v32 = vld [vmem:[#allocation10 + $0x90] sm:$0xff] (!%p6895_p5) }
  0xd7   : > { %v7366_v30 = vpack.c.bf16 %v575_v28, %v571_v27  ;;  %v574_v33 = vld [vmem:[#allocation10 + $0xb0] sm:$0xff]  ;;  %v7304_v34 = vpack.c.bf16 %v572_v31, %v568_v29  ;;  %v577_v35 = vld [vmem:[#allocation10 + $0xc8] sm:$0xff]  ;;  %v579_v37 = vld [vmem:[#allocation10 + $0xd8] sm:$0xff] }
  0xd8   : > { %7301 = vmatpush1.bf16.msra.mxu0 %v7300_v21  ;;  %v581_v36 = vld [vmem:[#allocation10 + $0xe8] sm:$0xff]  ;;  %v7368_v38 = vpack.c.bf16 %v574_v33, %v570_v32  ;;  %v583_v40 = vld [vmem:[#allocation10 + $0xf8] sm:$0xff]  ;;  %v576_v41 = vld [vmem:[#allocation10 + $0xc0] sm:$0xff] }
  0xd9   : > { %7365 = vmatpush1.bf16.msra.mxu1 %v7364_v25  ;;  %7303 = vmatprep.subr.bf16.mxu0 %v7302_v26  ;;  %v7306_v39 = vpack.c.bf16 %v581_v36, %v577_v35  ;;  %v580_v42 = vld [vmem:[#allocation10 + $0xe0] sm:$0xff]  ;;  %v7370_v43 = vpack.c.bf16 %v583_v40, %v579_v37  ;;  %v578_v44 = vld [vmem:[#allocation10 + $0xd0] sm:$0xff]  ;;  %v585_v46 = vld [vmem:[#allocation10 + $0x108] sm:$0xff] }
  0xda   : > { %7367 = vmatprep.subr.bf16.mxu1 %v7366_v30  ;;  %v582_v45 = vld [vmem:[#allocation10 + $0xf0] sm:$0xff]  ;;  %v589_v47 = vld [vmem:[#allocation10 + $0x128] sm:$0xff]  ;;  %v587_v48 = vld [vmem:[#allocation10 + $0x118] sm:$0xff]  ;;  %v7308_v50 = vpack.c.bf16 %v580_v42, %v576_v41 }
  0xdb   : > { %v591_v49 = vld [vmem:[#allocation10 + $0x138] sm:$0xff]  ;;  %v7372_v51 = vpack.c.bf16 %v582_v45, %v578_v44  ;;  %v7310_v52 = vpack.c.bf16 %v589_v47, %v585_v46  ;;  %v584_v53 = vld [vmem:[#allocation10 + $0x100] sm:$0xff]  ;;  %v586_v55 = vld [vmem:[#allocation10 + $0x110] sm:$0xff] }
  0xdc   : > { %7305 = vmatpush1.bf16.msra.mxu0 %v7304_v34  ;;  %v588_v54 = vld [vmem:[#allocation10 + $0x120] sm:$0xff]  ;;  %v7374_v56 = vpack.c.bf16 %v591_v49, %v587_v48  ;;  %v590_v57 = vld [vmem:[#allocation10 + $0x130] sm:$0xff]  ;;  %v593_v58 = vld [vmem:[#allocation10 + $0x148] sm:$0xff] }
  0xdd   : > { %7369 = vmatpush1.bf16.msra.mxu1 %v7368_v38  ;;  %7307 = vmatprep.subr.bf16.mxu0 %v7306_v39  ;;  %v597_v59 = vld [vmem:[#allocation10 + $0x168] sm:$0xff]  ;;  %v595_v60 = vld [vmem:[#allocation10 + $0x158] sm:$0xff]  ;;  %v7312_v62 = vpack.c.bf16 %v588_v54, %v584_v53  ;;  %v7376_v63 = vpack.c.bf16 %v590_v57, %v586_v55  ;;  %v592_v1 = vld [vmem:[#allocation10 + $0x140] sm:$0xff] }
  0xde   : > { %7371 = vmatprep.subr.bf16.mxu1 %v7370_v43  ;;  %v599_v61 = vld [vmem:[#allocation10 + $0x178] sm:$0xff]  ;;  %v7314_v0 = vpack.c.bf16 %v597_v59, %v593_v58  ;;  %v596_v2 = vld [vmem:[#allocation10 + $0x160] sm:$0xff]  ;;  %v594_v3 = vld [vmem:[#allocation10 + $0x150] sm:$0xff] }
  0xdf   : > { %v7378_v4 = vpack.c.bf16 %v599_v61, %v595_v60  ;;  %v598_v5 = vld [vmem:[#allocation10 + $0x170] sm:$0xff]  ;;  %v601_v6 = vld [vmem:[#allocation10 + $0x188] sm:$0xff]  ;;  %v603_v8 = vld [vmem:[#allocation10 + $0x198] sm:$0xff]  ;;  %v7316_v10 = vpack.c.bf16 %v596_v2, %v592_v1 }
  0xe0   : > { %7309 = vmatpush1.bf16.msra.mxu0 %v7308_v50  ;;  %v605_v7 = vld [vmem:[#allocation10 + $0x1a8] sm:$0xff]  ;;  %v607_v9 = vld [vmem:[#allocation10 + $0x1b8] sm:$0xff]  ;;  %v7380_v11 = vpack.c.bf16 %v598_v5, %v594_v3  ;;  %v600_v13 = vld [vmem:[#allocation10 + $0x180] sm:$0xff] }
  0xe1   : > { %7373 = vmatpush1.bf16.msra.mxu1 %v7372_v51  ;;  %7311 = vmatprep.subr.bf16.mxu0 %v7310_v52  ;;  %v7318_v12 = vpack.c.bf16 %v605_v7, %v601_v6  ;;  %v604_v14 = vld [vmem:[#allocation10 + $0x1a0] sm:$0xff]  ;;  %v602_v15 = vld [vmem:[#allocation10 + $0x190] sm:$0xff]  ;;  %v7382_v16 = vpack.c.bf16 %v607_v9, %v603_v8  ;;  %v609_v18 = vld [vmem:[#allocation10 + $0x1c8] sm:$0xff] }
  0xe2   : > { %7375 = vmatprep.subr.bf16.mxu1 %v7374_v56  ;;  %v606_v17 = vld [vmem:[#allocation10 + $0x1b0] sm:$0xff]  ;;  %v613_v19 = vld [vmem:[#allocation10 + $0x1e8] sm:$0xff]  ;;  %v611_v20 = vld [vmem:[#allocation10 + $0x1d8] sm:$0xff]  ;;  %v7320_v22 = vpack.c.bf16 %v604_v14, %v600_v13 }
  0xe3   : > { %v615_v21 = vld [vmem:[#allocation10 + $0x1f8] sm:$0xff]  ;;  %v7384_v23 = vpack.c.bf16 %v606_v17, %v602_v15  ;;  %v7322_v24 = vpack.c.bf16 %v613_v19, %v609_v18  ;;  %v608_v25 = vld [vmem:[#allocation10 + $0x1c0] sm:$0xff]  ;;  %v610_v27 = vld [vmem:[#allocation10 + $0x1d0] sm:$0xff] }
  0xe4   : > { %7313 = vmatpush1.bf16.msra.mxu0 %v7312_v62  ;;  %v612_v26 = vld [vmem:[#allocation10 + $0x1e0] sm:$0xff]  ;;  %v7386_v28 = vpack.c.bf16 %v615_v21, %v611_v20  ;;  %v614_v29 = vld [vmem:[#allocation10 + $0x1f0] sm:$0xff]  ;;  %v617_v30 = vld [vmem:[#allocation10 + $0x208] sm:$0xff] }
  0xe5   : > { %7377 = vmatpush1.bf16.msra.mxu1 %v7376_v63  ;;  %7315 = vmatprep.subr.bf16.mxu0 %v7314_v0  ;;  %v621_v31 = vld [vmem:[#allocation10 + $0x228] sm:$0xff]  ;;  %v619_v32 = vld [vmem:[#allocation10 + $0x218] sm:$0xff]  ;;  %v7324_v34 = vpack.c.bf16 %v612_v26, %v608_v25  ;;  %v7388_v35 = vpack.c.bf16 %v614_v29, %v610_v27  ;;  %v616_v37 = vld [vmem:[#allocation10 + $0x200] sm:$0xff] }
  0xe6   : > { %7379 = vmatprep.subr.bf16.mxu1 %v7378_v4  ;;  %v623_v33 = vld [vmem:[#allocation10 + $0x238] sm:$0xff]  ;;  %v7326_v36 = vpack.c.bf16 %v621_v31, %v617_v30  ;;  %v620_v38 = vld [vmem:[#allocation10 + $0x220] sm:$0xff]  ;;  %v618_v39 = vld [vmem:[#allocation10 + $0x210] sm:$0xff] }
  0xe7   : > { %v7390_v40 = vpack.c.bf16 %v623_v33, %v619_v32  ;;  %v622_v41 = vld [vmem:[#allocation10 + $0x230] sm:$0xff]  ;;  %v625_v42 = vld [vmem:[#allocation10 + $0x248] sm:$0xff]  ;;  %v627_v44 = vld [vmem:[#allocation10 + $0x258] sm:$0xff]  ;;  %v7328_v46 = vpack.c.bf16 %v620_v38, %v616_v37 }
  0xe8   : > { %7317 = vmatpush1.bf16.msra.mxu0 %v7316_v10  ;;  %v629_v43 = vld [vmem:[#allocation10 + $0x268] sm:$0xff]  ;;  %v631_v45 = vld [vmem:[#allocation10 + $0x278] sm:$0xff]  ;;  %v7392_v47 = vpack.c.bf16 %v622_v41, %v618_v39  ;;  %v624_v49 = vld [vmem:[#allocation10 + $0x240] sm:$0xff] }
  0xe9   : > { %7381 = vmatpush1.bf16.msra.mxu1 %v7380_v11  ;;  %7319 = vmatprep.subr.bf16.mxu0 %v7318_v12  ;;  %v7330_v48 = vpack.c.bf16 %v629_v43, %v625_v42  ;;  %v628_v50 = vld [vmem:[#allocation10 + $0x260] sm:$0xff]  ;;  %v626_v51 = vld [vmem:[#allocation10 + $0x250] sm:$0xff]  ;;  %v7394_v52 = vpack.c.bf16 %v631_v45, %v627_v44  ;;  %v633_v54 = vld [vmem:[#allocation10 + $0x288] sm:$0xff] }
  0xea   : > { %7383 = vmatprep.subr.bf16.mxu1 %v7382_v16  ;;  %v630_v53 = vld [vmem:[#allocation10 + $0x270] sm:$0xff]  ;;  %v637_v55 = vld [vmem:[#allocation10 + $0x2a8] sm:$0xff]  ;;  %v635_v56 = vld [vmem:[#allocation10 + $0x298] sm:$0xff]  ;;  %v7332_v58 = vpack.c.bf16 %v628_v50, %v624_v49 }
  0xeb   : > { %v639_v57 = vld [vmem:[#allocation10 + $0x2b8] sm:$0xff]  ;;  %v7396_v59 = vpack.c.bf16 %v630_v53, %v626_v51  ;;  %v7334_v60 = vpack.c.bf16 %v637_v55, %v633_v54  ;;  %v632_v61 = vld [vmem:[#allocation10 + $0x280] sm:$0xff]  ;;  %v634_v63 = vld [vmem:[#allocation10 + $0x290] sm:$0xff] }
  0xec   : > { %7321 = vmatpush1.bf16.msra.mxu0 %v7320_v22  ;;  %v636_v62 = vld [vmem:[#allocation10 + $0x2a0] sm:$0xff]  ;;  %v7398_v0 = vpack.c.bf16 %v639_v57, %v635_v56  ;;  %v638_v1 = vld [vmem:[#allocation10 + $0x2b0] sm:$0xff]  ;;  %v641_v2 = vld [vmem:[#allocation10 + $0x2c8] sm:$0xff] }
  0xed   : > { %7385 = vmatpush1.bf16.msra.mxu1 %v7384_v23  ;;  %7323 = vmatprep.subr.bf16.mxu0 %v7322_v24  ;;  %v645_v3 = vld [vmem:[#allocation10 + $0x2e8] sm:$0xff]  ;;  %v643_v4 = vld [vmem:[#allocation10 + $0x2d8] sm:$0xff]  ;;  %v7336_v6 = vpack.c.bf16 %v636_v62, %v632_v61  ;;  %v640_v7 = vld [vmem:[#allocation10 + $0x2c0] sm:$0xff]  ;;  %v7400_v8 = vpack.c.bf16 %v638_v1, %v634_v63 }
  0xee   : > { %7387 = vmatprep.subr.bf16.mxu1 %v7386_v28  ;;  %v647_v5 = vld [vmem:[#allocation10 + $0x2f8] sm:$0xff]  ;;  %v7338_v9 = vpack.c.bf16 %v645_v3, %v641_v2  ;;  %v644_v10 = vld [vmem:[#allocation10 + $0x2e0] sm:$0xff]  ;;  %v642_v11 = vld [vmem:[#allocation10 + $0x2d0] sm:$0xff] }
  0xef   : > { %v646_v12 = vld [vmem:[#allocation10 + $0x2f0] sm:$0xff]  ;;  %v7402_v13 = vpack.c.bf16 %v647_v5, %v643_v4  ;;  %v649_v14 = vld [vmem:[#allocation10 + $0x308] sm:$0xff]  ;;  %v651_v17 = vld [vmem:[#allocation10 + $0x318] sm:$0xff]  ;;  %v7340_v19 = vpack.c.bf16 %v644_v10, %v640_v7 }
  0xf0   : > { %7325 = vmatpush1.bf16.msra.mxu0 %v7324_v34  ;;  %v653_v15 = vld [vmem:[#allocation10 + $0x328] sm:$0xff]  ;;  %v655_v18 = vld [vmem:[#allocation10 + $0x338] sm:$0xff]  ;;  %v7404_v20 = vpack.c.bf16 %v646_v12, %v642_v11  ;;  %v648_v22 = vld [vmem:[#allocation10 + $0x300] sm:$0xff] }
  0xf1   : > { %7389 = vmatpush1.bf16.msra.mxu1 %v7388_v35  ;;  %7327 = vmatprep.subr.bf16.mxu0 %v7326_v36  ;;  %v425_v16 = vld [vmem:[%s9414_s7 + $0x8] sm:$0xff]  ;;  %v7342_v21 = vpack.c.bf16 %v653_v15, %v649_v14  ;;  %v652_v23 = vld [vmem:[#allocation10 + $0x320] sm:$0xff]  ;;  %v650_v24 = vld [vmem:[#allocation10 + $0x310] sm:$0xff]  ;;  %v7406_v25 = vpack.c.bf16 %v655_v18, %v651_v17 }
  0xf2   : > { %7391 = vmatprep.subr.bf16.mxu1 %v7390_v40  ;;  %766 = vmatprep.mubr.f32.mxu0 %v425_v16  ;;  %v654_v26 = vld [vmem:[#allocation10 + $0x330] sm:$0xff]  ;;  %v657_v27 = vld [vmem:[#allocation10 + $0x348] sm:$0xff]  ;;  %v659_v29 = vld [vmem:[#allocation10 + $0x358] sm:$0xff]  ;;  %v7344_v31 = vpack.c.bf16 %v652_v23, %v648_v22 }
  0xf3   : > { %1215 = vmatprep.mubr.f32.mxu1 %v425_v16  ;;  %v661_v28 = vld [vmem:[#allocation10 + $0x368] sm:$0xff]  ;;  %v663_v30 = vld [vmem:[#allocation10 + $0x378] sm:$0xff]  ;;  %v7408_v32 = vpack.c.bf16 %v654_v26, %v650_v24  ;;  %v656_v34 = vld [vmem:[#allocation10 + $0x340] sm:$0xff] }
  0xf4   : > { %7329 = vmatpush1.bf16.msra.mxu0 %v7328_v46  ;;  %v7346_v33 = vpack.c.bf16 %v661_v28, %v657_v27  ;;  %v660_v35 = vld [vmem:[#allocation10 + $0x360] sm:$0xff]  ;;  %v658_v36 = vld [vmem:[#allocation10 + $0x350] sm:$0xff]  ;;  %v7410_v37 = vpack.c.bf16 %v663_v30, %v659_v29  ;;  %v665_v39 = vld [vmem:[#allocation10 + $0x388] sm:$0xff] }
  0xf5   : > { %7393 = vmatpush1.bf16.msra.mxu1 %v7392_v47  ;;  %7331 = vmatprep.subr.bf16.mxu0 %v7330_v48  ;;  %v662_v38 = vld [vmem:[#allocation10 + $0x370] sm:$0xff]  ;;  %v669_v40 = vld [vmem:[#allocation10 + $0x3a8] sm:$0xff]  ;;  %v667_v41 = vld [vmem:[#allocation10 + $0x398] sm:$0xff]  ;;  %v7348_v43 = vpack.c.bf16 %v660_v35, %v656_v34 }
  0xf6   : > { %7395 = vmatprep.subr.bf16.mxu1 %v7394_v52  ;;  %v671_v42 = vld [vmem:[#allocation10 + $0x3b8] sm:$0xff]  ;;  %v7412_v44 = vpack.c.bf16 %v662_v38, %v658_v36  ;;  %v7350_v45 = vpack.c.bf16 %v669_v40, %v665_v39  ;;  %v664_v46 = vld [vmem:[#allocation10 + $0x380] sm:$0xff]  ;;  %v666_v48 = vld [vmem:[#allocation10 + $0x390] sm:$0xff] }
  0xf7   : > { %v668_v47 = vld [vmem:[#allocation10 + $0x3a0] sm:$0xff]  ;;  %v7414_v49 = vpack.c.bf16 %v671_v42, %v667_v41  ;;  %v670_v50 = vld [vmem:[#allocation10 + $0x3b0] sm:$0xff]  ;;  %v673_v51 = vld [vmem:[#allocation10 + $0x3c8] sm:$0xff] }
  0xf8   : > { %7333 = vmatpush1.bf16.msra.mxu0 %v7332_v58  ;;  %v677_v52 = vld [vmem:[#allocation10 + $0x3e8] sm:$0xff]  ;;  %v675_v53 = vld [vmem:[#allocation10 + $0x3d8] sm:$0xff]  ;;  %v7352_v55 = vpack.c.bf16 %v668_v47, %v664_v46  ;;  %v7416_v56 = vpack.c.bf16 %v670_v50, %v666_v48  ;;  %v672_v58 = vld [vmem:[#allocation10 + $0x3c0] sm:$0xff] }
  0xf9   : > { %7397 = vmatpush1.bf16.msra.mxu1 %v7396_v59  ;;  %7335 = vmatprep.subr.bf16.mxu0 %v7334_v60  ;;  %v679_v54 = vld [vmem:[#allocation10 + $0x3f8] sm:$0xff]  ;;  %v7354_v57 = vpack.c.bf16 %v677_v52, %v673_v51  ;;  %v676_v59 = vld [vmem:[#allocation10 + $0x3e0] sm:$0xff]  ;;  %v674_v61 = vld [vmem:[#allocation10 + $0x3d0] sm:$0xff] }
  0xfa   : > { %7399 = vmatprep.subr.bf16.mxu1 %v7398_v0  ;;  %v7418_v60 = vpack.c.bf16 %v679_v54, %v675_v53  ;;  %v678_v62 = vld [vmem:[#allocation10 + $0x3f0] sm:$0xff]  ;;  %v7356_v63 = vpack.c.bf16 %v676_v59, %v672_v58  ;;  %v424_v1 = vld [vmem:[%s9414_s7] sm:$0xff]  ;;  %v427_v2 = vld [vmem:[%s9414_s7 + $0x18] sm:$0xff] }
  0xfb   : > { %v7420_v0 = vpack.c.bf16 %v678_v62, %v674_v61  ;;  %v426_v3 = vld [vmem:[%s9414_s7 + $0x10] sm:$0xff]  ;;  %v429_v4 = vld [vmem:[%s9414_s7 + $0x28] sm:$0xff]  ;;  %v428_v5 = vld [vmem:[%s9414_s7 + $0x20] sm:$0xff] }
  0xfc   : > { %7337 = vmatpush1.bf16.msra.mxu0 %v7336_v6  ;;  %v431_v6 = vld [vmem:[%s9414_s7 + $0x38] sm:$0xff]  ;;  %v430_v7 = vld [vmem:[%s9414_s7 + $0x30] sm:$0xff]  ;;  %v437_v12 = vld [vmem:[%s9414_s7 + $0x68] sm:$0xff] }
  0xfd   : > { %7401 = vmatpush1.bf16.msra.mxu1 %v7400_v8  ;;  %7339 = vmatprep.subr.bf16.mxu0 %v7338_v9  ;;  %v433_v8 = vld [vmem:[%s9414_s7 + $0x48] sm:$0xff]  ;;  %v432_v9 = vld [vmem:[%s9414_s7 + $0x40] sm:$0xff]  ;;  %v435_v10 = vld [vmem:[%s9414_s7 + $0x58] sm:$0xff] }
  0xfe   : > { %7403 = vmatprep.subr.bf16.mxu1 %v7402_v13  ;;  %v434_v11 = vld [vmem:[%s9414_s7 + $0x50] sm:$0xff]  ;;  %v436_v13 = vld [vmem:[%s9414_s7 + $0x60] sm:$0xff]  ;;  %v439_v14 = vld [vmem:[%s9414_s7 + $0x78] sm:$0xff] }
  0xff   : > { %v438_v15 = vld [vmem:[%s9414_s7 + $0x70] sm:$0xff]  ;;  %v441_v16 = vld [vmem:[%s9414_s7 + $0x88] sm:$0xff]  ;;  %v440_v17 = vld [vmem:[%s9414_s7 + $0x80] sm:$0xff] }
 0x100   : > { %7341 = vmatpush1.bf16.msra.mxu0 %v7340_v19  ;;  %v443_v18 = vld [vmem:[%s9414_s7 + $0x98] sm:$0xff]  ;;  %v442_v19 = vld [vmem:[%s9414_s7 + $0x90] sm:$0xff]  ;;  %v449_v24 = vld [vmem:[%s9414_s7 + $0xc8] sm:$0xff] }
 0x101   : > { %7405 = vmatpush1.bf16.msra.mxu1 %v7404_v20  ;;  %7343 = vmatprep.subr.bf16.mxu0 %v7342_v21  ;;  %v445_v20 = vld [vmem:[%s9414_s7 + $0xa8] sm:$0xff]  ;;  %v444_v21 = vld [vmem:[%s9414_s7 + $0xa0] sm:$0xff]  ;;  %v447_v22 = vld [vmem:[%s9414_s7 + $0xb8] sm:$0xff] }
 0x102   : > { %7407 = vmatprep.subr.bf16.mxu1 %v7406_v25  ;;  %v446_v23 = vld [vmem:[%s9414_s7 + $0xb0] sm:$0xff]  ;;  %v448_v25 = vld [vmem:[%s9414_s7 + $0xc0] sm:$0xff]  ;;  %v451_v26 = vld [vmem:[%s9414_s7 + $0xd8] sm:$0xff] }
 0x103   : > { %v450_v27 = vld [vmem:[%s9414_s7 + $0xd0] sm:$0xff]  ;;  %v453_v28 = vld [vmem:[%s9414_s7 + $0xe8] sm:$0xff]  ;;  %v452_v29 = vld [vmem:[%s9414_s7 + $0xe0] sm:$0xff] }
 0x104   : > { %7345 = vmatpush1.bf16.msra.mxu0 %v7344_v31  ;;  %v455_v30 = vld [vmem:[%s9414_s7 + $0xf8] sm:$0xff]  ;;  %v454_v31 = vld [vmem:[%s9414_s7 + $0xf0] sm:$0xff]  ;;  %v461_v36 = vld [vmem:[%s9414_s7 + $0x128] sm:$0xff] }
 0x105   : > { %7409 = vmatpush1.bf16.msra.mxu1 %v7408_v32  ;;  %7347 = vmatprep.subr.bf16.mxu0 %v7346_v33  ;;  %v457_v32 = vld [vmem:[%s9414_s7 + $0x108] sm:$0xff]  ;;  %v456_v33 = vld [vmem:[%s9414_s7 + $0x100] sm:$0xff]  ;;  %v459_v34 = vld [vmem:[%s9414_s7 + $0x118] sm:$0xff] }
 0x106   : > { %7411 = vmatprep.subr.bf16.mxu1 %v7410_v37  ;;  %v458_v35 = vld [vmem:[%s9414_s7 + $0x110] sm:$0xff]  ;;  %v460_v37 = vld [vmem:[%s9414_s7 + $0x120] sm:$0xff]  ;;  %v463_v38 = vld [vmem:[%s9414_s7 + $0x138] sm:$0xff] }
 0x107   : > { %v462_v39 = vld [vmem:[%s9414_s7 + $0x130] sm:$0xff]  ;;  %v465_v40 = vld [vmem:[%s9414_s7 + $0x148] sm:$0xff]  ;;  %v464_v41 = vld [vmem:[%s9414_s7 + $0x140] sm:$0xff] }
 0x108   : > { %7349 = vmatpush1.bf16.msra.mxu0 %v7348_v43  ;;  %v467_v42 = vld [vmem:[%s9414_s7 + $0x158] sm:$0xff]  ;;  %v466_v43 = vld [vmem:[%s9414_s7 + $0x150] sm:$0xff]  ;;  %v473_v48 = vld [vmem:[%s9414_s7 + $0x188] sm:$0xff] }
 0x109   : > { %7413 = vmatpush1.bf16.msra.mxu1 %v7412_v44  ;;  %7351 = vmatprep.subr.bf16.mxu0 %v7350_v45  ;;  %v469_v44 = vld [vmem:[%s9414_s7 + $0x168] sm:$0xff]  ;;  %v468_v45 = vld [vmem:[%s9414_s7 + $0x160] sm:$0xff]  ;;  %v471_v46 = vld [vmem:[%s9414_s7 + $0x178] sm:$0xff] }
 0x10a   : > { %7415 = vmatprep.subr.bf16.mxu1 %v7414_v49  ;;  %v470_v47 = vld [vmem:[%s9414_s7 + $0x170] sm:$0xff]  ;;  %v472_v49 = vld [vmem:[%s9414_s7 + $0x180] sm:$0xff]  ;;  %v475_v50 = vld [vmem:[%s9414_s7 + $0x198] sm:$0xff] }
 0x10b   : > { %v474_v51 = vld [vmem:[%s9414_s7 + $0x190] sm:$0xff]  ;;  %v477_v52 = vld [vmem:[%s9414_s7 + $0x1a8] sm:$0xff]  ;;  %v476_v53 = vld [vmem:[%s9414_s7 + $0x1a0] sm:$0xff] }
 0x10c   : > { %7353 = vmatpush1.bf16.msra.mxu0 %v7352_v55  ;;  %v479_v54 = vld [vmem:[%s9414_s7 + $0x1b8] sm:$0xff]  ;;  %v478_v55 = vld [vmem:[%s9414_s7 + $0x1b0] sm:$0xff]  ;;  %v484_v61 = vld [vmem:[%s9414_s7 + $0x1e0] sm:$0xff] }
 0x10d   : > { %7417 = vmatpush1.bf16.msra.mxu1 %v7416_v56  ;;  %7355 = vmatprep.subr.bf16.mxu0 %v7354_v57  ;;  %v481_v56 = vld [vmem:[%s9414_s7 + $0x1c8] sm:$0xff]  ;;  %v480_v57 = vld [vmem:[%s9414_s7 + $0x1c0] sm:$0xff]  ;;  %v483_v58 = vld [vmem:[%s9414_s7 + $0x1d8] sm:$0xff] }
 0x10e   : > { %7419 = vmatprep.subr.bf16.mxu1 %v7418_v60  ;;  %v482_v59 = vld [vmem:[%s9414_s7 + $0x1d0] sm:$0xff]  ;;  %v485_v60 = vld [vmem:[%s9414_s7 + $0x1e8] sm:$0xff]  ;;  %v487_v62 = vld [vmem:[%s9414_s7 + $0x1f8] sm:$0xff] }
 0x110   : > { %7357 = vmatpush1.bf16.msra.mxu0 %v7356_v63  ;;  %v486_v63 = vld [vmem:[%s9414_s7 + $0x1f0] sm:$0xff] }
 0x111   : > { %7421 = vmatpush1.bf16.msra.mxu1 %v7420_v0  ;;  %v489_v0 = vld [vmem:[%s9414_s7 + $0x208] sm:$0xff] }
 0x113   : > { %767 = vmatmul.mubr.f32.vlgmr.msra.gmra.mrb[0].mxu0 %v424_v1 }
 0x114   : > { %1216 = vmatmul.mubr.f32.vlgmr.msra.gmra.mrb[0].mxu1 %v424_v1  ;;  %772 = vmatprep.mubr.f32.mxu0 %v427_v2  ;;  %v488_v1 = vld [vmem:[%s9414_s7 + $0x200] sm:$0xff] }
 0x115   : > { %1221 = vmatprep.mubr.f32.mxu1 %v427_v2  ;;  %v491_v2 = vld [vmem:[%s9414_s7 + $0x218] sm:$0xff] }
 0x117   : > { %773 = vmatmul.mubr.f32.gmra.mrb[2].mxu0 %v426_v3 }
 0x118   : > { %1222 = vmatmul.mubr.f32.gmra.mrb[2].mxu1 %v426_v3  ;;  %778 = vmatprep.mubr.f32.mxu0 %v429_v4  ;;  %v490_v3 = vld [vmem:[%s9414_s7 + $0x210] sm:$0xff] }
 0x119   : > { %1227 = vmatprep.mubr.f32.mxu1 %v429_v4  ;;  %v493_v4 = vld [vmem:[%s9414_s7 + $0x228] sm:$0xff] }
 0x11b   : > { %779 = vmatmul.mubr.f32.gmra.mrb[4].mxu0 %v428_v5 }
 0x11c   : > { %1228 = vmatmul.mubr.f32.gmra.mrb[4].mxu1 %v428_v5  ;;  %784 = vmatprep.mubr.f32.mxu0 %v431_v6  ;;  %v492_v5 = vld [vmem:[%s9414_s7 + $0x220] sm:$0xff] }
 0x11d   : > { %1233 = vmatprep.mubr.f32.mxu1 %v431_v6  ;;  %v495_v6 = vld [vmem:[%s9414_s7 + $0x238] sm:$0xff] }
 0x11f   : > { %785 = vmatmul.mubr.f32.gmra.mrb[6].mxu0 %v430_v7 }
 0x120   : > { %1234 = vmatmul.mubr.f32.gmra.mrb[6].mxu1 %v430_v7  ;;  %790 = vmatprep.mubr.f32.mxu0 %v433_v8  ;;  %v494_v7 = vld [vmem:[%s9414_s7 + $0x230] sm:$0xff] }
 0x121   : > { %1239 = vmatprep.mubr.f32.mxu1 %v433_v8  ;;  %v497_v8 = vld [vmem:[%s9414_s7 + $0x248] sm:$0xff] }
 0x123   : > { %791 = vmatmul.mubr.f32.gmra.mrb[8].mxu0 %v432_v9 }
 0x124   : > { %1240 = vmatmul.mubr.f32.gmra.mrb[8].mxu1 %v432_v9  ;;  %796 = vmatprep.mubr.f32.mxu0 %v435_v10  ;;  %v496_v9 = vld [vmem:[%s9414_s7 + $0x240] sm:$0xff] }
 0x125   : > { %1245 = vmatprep.mubr.f32.mxu1 %v435_v10  ;;  %v499_v10 = vld [vmem:[%s9414_s7 + $0x258] sm:$0xff] }
 0x127   : > { %797 = vmatmul.mubr.f32.gmra.mrb[10].mxu0 %v434_v11 }
 0x128   : > { %1246 = vmatmul.mubr.f32.gmra.mrb[10].mxu1 %v434_v11  ;;  %802 = vmatprep.mubr.f32.mxu0 %v437_v12  ;;  %v498_v11 = vld [vmem:[%s9414_s7 + $0x250] sm:$0xff] }
 0x129   : > { %1251 = vmatprep.mubr.f32.mxu1 %v437_v12  ;;  %v501_v12 = vld [vmem:[%s9414_s7 + $0x268] sm:$0xff] }
 0x12b   : > { %803 = vmatmul.mubr.f32.gmra.mrb[12].mxu0 %v436_v13 }
 0x12c   : > { %1252 = vmatmul.mubr.f32.gmra.mrb[12].mxu1 %v436_v13  ;;  %808 = vmatprep.mubr.f32.mxu0 %v439_v14  ;;  %v500_v13 = vld [vmem:[%s9414_s7 + $0x260] sm:$0xff] }
 0x12d   : > { %1257 = vmatprep.mubr.f32.mxu1 %v439_v14  ;;  %v503_v14 = vld [vmem:[%s9414_s7 + $0x278] sm:$0xff] }
 0x12f   : > { %809 = vmatmul.mubr.f32.gmra.mrb[14].mxu0 %v438_v15 }
 0x130   : > { %1258 = vmatmul.mubr.f32.gmra.mrb[14].mxu1 %v438_v15  ;;  %814 = vmatprep.mubr.f32.mxu0 %v441_v16  ;;  %v502_v15 = vld [vmem:[%s9414_s7 + $0x270] sm:$0xff] }
 0x131   : > { %1263 = vmatprep.mubr.f32.mxu1 %v441_v16  ;;  %v505_v16 = vld [vmem:[%s9414_s7 + $0x288] sm:$0xff] }
 0x133   : > { %815 = vmatmul.mubr.f32.gmra.mrb[16].mxu0 %v440_v17 }
 0x134   : > { %1264 = vmatmul.mubr.f32.gmra.mrb[16].mxu1 %v440_v17  ;;  %820 = vmatprep.mubr.f32.mxu0 %v443_v18  ;;  %v504_v17 = vld [vmem:[%s9414_s7 + $0x280] sm:$0xff] }
 0x135   : > { %1269 = vmatprep.mubr.f32.mxu1 %v443_v18  ;;  %v507_v18 = vld [vmem:[%s9414_s7 + $0x298] sm:$0xff] }
 0x137   : > { %821 = vmatmul.mubr.f32.gmra.mrb[18].mxu0 %v442_v19 }
 0x138   : > { %1270 = vmatmul.mubr.f32.gmra.mrb[18].mxu1 %v442_v19  ;;  %826 = vmatprep.mubr.f32.mxu0 %v445_v20  ;;  %v506_v19 = vld [vmem:[%s9414_s7 + $0x290] sm:$0xff] }
 0x139   : > { %1275 = vmatprep.mubr.f32.mxu1 %v445_v20  ;;  %v509_v20 = vld [vmem:[%s9414_s7 + $0x2a8] sm:$0xff] }
 0x13b   : > { %827 = vmatmul.mubr.f32.gmra.mrb[20].mxu0 %v444_v21 }
 0x13c   : > { %1276 = vmatmul.mubr.f32.gmra.mrb[20].mxu1 %v444_v21  ;;  %832 = vmatprep.mubr.f32.mxu0 %v447_v22  ;;  %v508_v21 = vld [vmem:[%s9414_s7 + $0x2a0] sm:$0xff] }
 0x13d   : > { %1281 = vmatprep.mubr.f32.mxu1 %v447_v22  ;;  %v511_v22 = vld [vmem:[%s9414_s7 + $0x2b8] sm:$0xff] }
 0x13f   : > { %833 = vmatmul.mubr.f32.gmra.mrb[22].mxu0 %v446_v23 }
 0x140   : > { %1282 = vmatmul.mubr.f32.gmra.mrb[22].mxu1 %v446_v23  ;;  %838 = vmatprep.mubr.f32.mxu0 %v449_v24  ;;  %v510_v23 = vld [vmem:[%s9414_s7 + $0x2b0] sm:$0xff] }
 0x141   : > { %1287 = vmatprep.mubr.f32.mxu1 %v449_v24  ;;  %v513_v24 = vld [vmem:[%s9414_s7 + $0x2c8] sm:$0xff] }
 0x143   : > { %839 = vmatmul.mubr.f32.gmra.mrb[24].mxu0 %v448_v25 }
 0x144   : > { %1288 = vmatmul.mubr.f32.gmra.mrb[24].mxu1 %v448_v25  ;;  %844 = vmatprep.mubr.f32.mxu0 %v451_v26  ;;  %v512_v25 = vld [vmem:[%s9414_s7 + $0x2c0] sm:$0xff] }
 0x145   : > { %1293 = vmatprep.mubr.f32.mxu1 %v451_v26  ;;  %v515_v26 = vld [vmem:[%s9414_s7 + $0x2d8] sm:$0xff] }
 0x147   : > { %845 = vmatmul.mubr.f32.gmra.mrb[26].mxu0 %v450_v27 }
 0x148   : > { %1294 = vmatmul.mubr.f32.gmra.mrb[26].mxu1 %v450_v27  ;;  %850 = vmatprep.mubr.f32.mxu0 %v453_v28  ;;  %v514_v27 = vld [vmem:[%s9414_s7 + $0x2d0] sm:$0xff] }
 0x149   : > { %1299 = vmatprep.mubr.f32.mxu1 %v453_v28  ;;  %v517_v28 = vld [vmem:[%s9414_s7 + $0x2e8] sm:$0xff] }
 0x14b   : > { %851 = vmatmul.mubr.f32.gmra.mrb[28].mxu0 %v452_v29 }
 0x14c   : > { %1300 = vmatmul.mubr.f32.gmra.mrb[28].mxu1 %v452_v29  ;;  %856 = vmatprep.mubr.f32.mxu0 %v455_v30  ;;  %v516_v29 = vld [vmem:[%s9414_s7 + $0x2e0] sm:$0xff] }
 0x14d   : > { %1305 = vmatprep.mubr.f32.mxu1 %v455_v30  ;;  %v519_v30 = vld [vmem:[%s9414_s7 + $0x2f8] sm:$0xff] }
 0x14f   : > { %857 = vmatmul.mubr.f32.gmra.mrb[30].mxu0 %v454_v31 }
 0x150   : > { %1306 = vmatmul.mubr.f32.gmra.mrb[30].mxu1 %v454_v31  ;;  %862 = vmatprep.mubr.f32.mxu0 %v457_v32  ;;  %v518_v31 = vld [vmem:[%s9414_s7 + $0x2f0] sm:$0xff] }
 0x151   : > { %1311 = vmatprep.mubr.f32.mxu1 %v457_v32  ;;  %v521_v32 = vld [vmem:[%s9414_s7 + $0x308] sm:$0xff] }
 0x153   : > { %863 = vmatmul.mubr.f32.gmra.mrb[32].mxu0 %v456_v33 }
 0x154   : > { %1312 = vmatmul.mubr.f32.gmra.mrb[32].mxu1 %v456_v33  ;;  %868 = vmatprep.mubr.f32.mxu0 %v459_v34  ;;  %v520_v33 = vld [vmem:[%s9414_s7 + $0x300] sm:$0xff] }
 0x155   : > { %1317 = vmatprep.mubr.f32.mxu1 %v459_v34  ;;  %v523_v34 = vld [vmem:[%s9414_s7 + $0x318] sm:$0xff] }
 0x157   : > { %869 = vmatmul.mubr.f32.gmra.mrb[34].mxu0 %v458_v35 }
 0x158   : > { %1318 = vmatmul.mubr.f32.gmra.mrb[34].mxu1 %v458_v35  ;;  %874 = vmatprep.mubr.f32.mxu0 %v461_v36  ;;  %v522_v35 = vld [vmem:[%s9414_s7 + $0x310] sm:$0xff] }
 0x159   : > { %1323 = vmatprep.mubr.f32.mxu1 %v461_v36  ;;  %v525_v36 = vld [vmem:[%s9414_s7 + $0x328] sm:$0xff] }
 0x15b   : > { %875 = vmatmul.mubr.f32.gmra.mrb[36].mxu0 %v460_v37 }
 0x15c   : > { %1324 = vmatmul.mubr.f32.gmra.mrb[36].mxu1 %v460_v37  ;;  %880 = vmatprep.mubr.f32.mxu0 %v463_v38  ;;  %v682_v37 = vlaneseq }
 0x15d   : > { %1329 = vmatprep.mubr.f32.mxu1 %v463_v38  ;;  %v524_v38 = vld [vmem:[%s9414_s7 + $0x320] sm:$0xff] }
 0x15f   : > { %881 = vmatmul.mubr.f32.gmra.mrb[38].mxu0 %v462_v39 }
 0x160   : > { %1330 = vmatmul.mubr.f32.gmra.mrb[38].mxu1 %v462_v39  ;;  %886 = vmatprep.mubr.f32.mxu0 %v465_v40  ;;  %v527_v39 = vld [vmem:[%s9414_s7 + $0x338] sm:$0xff] }
 0x161   : > { %1335 = vmatprep.mubr.f32.mxu1 %v465_v40  ;;  %v683_v40 = vshrl.u32 %v682_v37, 7 }
 0x163   : > { %887 = vmatmul.mubr.f32.gmra.mrb[40].mxu0 %v464_v41 }
 0x164   : > { %1336 = vmatmul.mubr.f32.gmra.mrb[40].mxu1 %v464_v41  ;;  %892 = vmatprep.mubr.f32.mxu0 %v467_v42  ;;  %v526_v41 = vld [vmem:[%s9414_s7 + $0x330] sm:$0xff] }
 0x165   : > { %1341 = vmatprep.mubr.f32.mxu1 %v467_v42  ;;  %v529_v42 = vld [vmem:[%s9414_s7 + $0x348] sm:$0xff] }
 0x167   : > { %893 = vmatmul.mubr.f32.gmra.mrb[42].mxu0 %v466_v43 }
 0x168   : > { %1342 = vmatmul.mubr.f32.gmra.mrb[42].mxu1 %v466_v43  ;;  %898 = vmatprep.mubr.f32.mxu0 %v469_v44  ;;  %v684_v43 = vsub.s32 0, %v683_v40 }
 0x169   : > { %1347 = vmatprep.mubr.f32.mxu1 %v469_v44  ;;  %v528_v44 = vld [vmem:[%s9414_s7 + $0x340] sm:$0xff] }
 0x16b   : > { %899 = vmatmul.mubr.f32.gmra.mrb[44].mxu0 %v468_v45 }
 0x16c   : > { %1348 = vmatmul.mubr.f32.gmra.mrb[44].mxu1 %v468_v45  ;;  %904 = vmatprep.mubr.f32.mxu0 %v471_v46  ;;  %v680_v45 = vld [vmem:[%s14472_s18] sm:$0xf] }
 0x16d   : > { %1353 = vmatprep.mubr.f32.mxu1 %v471_v46  ;;  %v692_v46 = vsub.s32 2, %v683_v40 }
 0x16f   : > { %905 = vmatmul.mubr.f32.gmra.mrb[46].mxu0 %v470_v47 }
 0x170   : > { %1354 = vmatmul.mubr.f32.gmra.mrb[46].mxu1 %v470_v47  ;;  %910 = vmatprep.mubr.f32.mxu0 %v473_v48  ;;  %v688_v47 = vsub.s32 1, %v683_v40 }
 0x171   : > { %1359 = vmatprep.mubr.f32.mxu1 %v473_v48  ;;  %v531_v48 = vld [vmem:[%s9414_s7 + $0x358] sm:$0xff] }
 0x173   : > { %911 = vmatmul.mubr.f32.gmra.mrb[48].mxu0 %v472_v49 }
 0x174   : > { %1360 = vmatmul.mubr.f32.gmra.mrb[48].mxu1 %v472_v49  ;;  %916 = vmatprep.mubr.f32.mxu0 %v475_v50  ;;  %v696_v49 = vsub.s32 3, %v683_v40 }
 0x175   : > { %1365 = vmatprep.mubr.f32.mxu1 %v475_v50  ;;  %v9544_v50 = vrot.slane %v680_v45, %v684_v43 }
 0x177   : > { %917 = vmatmul.mubr.f32.gmra.mrb[50].mxu0 %v474_v51 }
 0x178   : > { %1366 = vmatmul.mubr.f32.gmra.mrb[50].mxu1 %v474_v51  ;;  %922 = vmatprep.mubr.f32.mxu0 %v477_v52  ;;  %v9546_v51 = vrot.slane %v680_v45, %v692_v46 }
 0x179   : > { %1371 = vmatprep.mubr.f32.mxu1 %v477_v52  ;;  %v9548_v52 = vrot.slane %v680_v45, %v688_v47 }
 0x17b   : > { %923 = vmatmul.mubr.f32.gmra.mrb[52].mxu0 %v476_v53 }
 0x17c   : > { %1372 = vmatmul.mubr.f32.gmra.mrb[52].mxu1 %v476_v53  ;;  %928 = vmatprep.mubr.f32.mxu0 %v479_v54  ;;  %v530_v53 = vld [vmem:[%s9414_s7 + $0x350] sm:$0xff] }
 0x17d   : > { %1377 = vmatprep.mubr.f32.mxu1 %v479_v54  ;;  %v9551_v54 = vrot.slane %v680_v45, %v696_v49  ;;  %v542_v49 = vld [vmem:[%s9414_s7 + $0x3b0] sm:$0xff] }
 0x17f   : > { %929 = vmatmul.mubr.f32.gmra.mrb[54].mxu0 %v478_v55 }
 0x180   : > { %1378 = vmatmul.mubr.f32.gmra.mrb[54].mxu1 %v478_v55  ;;  %934 = vmatprep.mubr.f32.mxu0 %v481_v56  ;;  %v533_v55 = vld [vmem:[%s9414_s7 + $0x368] sm:$0xff] }
 0x181   : > { %1383 = vmatprep.mubr.f32.mxu1 %v481_v56 }
 0x183   : > { %935 = vmatmul.mubr.f32.gmra.mrb[56].mxu0 %v480_v57 }
 0x184   : > { %1384 = vmatmul.mubr.f32.gmra.mrb[56].mxu1 %v480_v57  ;;  %940 = vmatprep.mubr.f32.mxu0 %v483_v58 }
 0x185   : > { %1389 = vmatprep.mubr.f32.mxu1 %v483_v58 }
 0x187   : > { %941 = vmatmul.mubr.f32.gmra.mrb[58].mxu0 %v482_v59 }
 0x188   : > { %1390 = vmatmul.mubr.f32.gmra.mrb[58].mxu1 %v482_v59  ;;  %946 = vmatprep.mubr.f32.mxu0 %v485_v60 }
 0x189   : > { %1395 = vmatprep.mubr.f32.mxu1 %v485_v60 }
 0x18b   : > { %947 = vmatmul.mubr.f32.gmra.mrb[60].mxu0 %v484_v61 }
 0x18c   : > { %1396 = vmatmul.mubr.f32.gmra.mrb[60].mxu1 %v484_v61  ;;  %952 = vmatprep.mubr.f32.mxu0 %v487_v62 }
 0x18d   : > { %1401 = vmatprep.mubr.f32.mxu1 %v487_v62 }
 0x18f   : > { %953 = vmatmul.mubr.f32.gmra.mrb[62].mxu0 %v486_v63 }
 0x190   : > { %1402 = vmatmul.mubr.f32.gmra.mrb[62].mxu1 %v486_v63  ;;  %958 = vmatprep.mubr.f32.mxu0 %v489_v0  ;;  %v532_v63 = vld [vmem:[%s9414_s7 + $0x360] sm:$0xff] }
 0x191   : > { %1407 = vmatprep.mubr.f32.mxu1 %v489_v0 }
 0x193   : > { %959 = vmatmul.mubr.f32.gmra.mrb[64].mxu0 %v488_v1 }
 0x194   : > { %1408 = vmatmul.mubr.f32.gmra.mrb[64].mxu1 %v488_v1  ;;  %964 = vmatprep.mubr.f32.mxu0 %v491_v2  ;;  %v535_v1 = vld [vmem:[%s9414_s7 + $0x378] sm:$0xff] }
 0x195   : > { %1413 = vmatprep.mubr.f32.mxu1 %v491_v2 }
 0x197   : > { %965 = vmatmul.mubr.f32.gmra.mrb[66].mxu0 %v490_v3 }
 0x198   : > { %1414 = vmatmul.mubr.f32.gmra.mrb[66].mxu1 %v490_v3  ;;  %970 = vmatprep.mubr.f32.mxu0 %v493_v4 }
 0x199   : > { %1419 = vmatprep.mubr.f32.mxu1 %v493_v4 }
 0x19b   : > { %971 = vmatmul.mubr.f32.gmra.mrb[68].mxu0 %v492_v5 }
 0x19c   : > { %1420 = vmatmul.mubr.f32.gmra.mrb[68].mxu1 %v492_v5  ;;  %976 = vmatprep.mubr.f32.mxu0 %v495_v6 }
 0x19d   : > { %1425 = vmatprep.mubr.f32.mxu1 %v495_v6 }
 0x19f   : > { %977 = vmatmul.mubr.f32.gmra.mrb[70].mxu0 %v494_v7 }
 0x1a0   : > { %1426 = vmatmul.mubr.f32.gmra.mrb[70].mxu1 %v494_v7  ;;  %982 = vmatprep.mubr.f32.mxu0 %v497_v8 }
 0x1a1   : > { %1431 = vmatprep.mubr.f32.mxu1 %v497_v8 }
 0x1a3   : > { %983 = vmatmul.mubr.f32.gmra.mrb[72].mxu0 %v496_v9 }
 0x1a4   : > { %1432 = vmatmul.mubr.f32.gmra.mrb[72].mxu1 %v496_v9  ;;  %988 = vmatprep.mubr.f32.mxu0 %v499_v10  ;;  %v534_v9 = vld [vmem:[%s9414_s7 + $0x370] sm:$0xff] }
 0x1a5   : > { %1437 = vmatprep.mubr.f32.mxu1 %v499_v10 }
 0x1a7   : > { %989 = vmatmul.mubr.f32.gmra.mrb[74].mxu0 %v498_v11 }
 0x1a8   : > { %1438 = vmatmul.mubr.f32.gmra.mrb[74].mxu1 %v498_v11  ;;  %994 = vmatprep.mubr.f32.mxu0 %v501_v12  ;;  %v537_v11 = vld [vmem:[%s9414_s7 + $0x388] sm:$0xff] }
 0x1a9   : > { %1443 = vmatprep.mubr.f32.mxu1 %v501_v12 }
 0x1ab   : > { %995 = vmatmul.mubr.f32.gmra.mrb[76].mxu0 %v500_v13 }
 0x1ac   : > { %1444 = vmatmul.mubr.f32.gmra.mrb[76].mxu1 %v500_v13  ;;  %1000 = vmatprep.mubr.f32.mxu0 %v503_v14 }
 0x1ad   : > { %1449 = vmatprep.mubr.f32.mxu1 %v503_v14 }
 0x1af   : > { %1001 = vmatmul.mubr.f32.gmra.mrb[78].mxu0 %v502_v15 }
 0x1b0   : > { %1450 = vmatmul.mubr.f32.gmra.mrb[78].mxu1 %v502_v15  ;;  %1006 = vmatprep.mubr.f32.mxu0 %v505_v16 }
 0x1b1   : > { %1455 = vmatprep.mubr.f32.mxu1 %v505_v16 }
 0x1b3   : > { %1007 = vmatmul.mubr.f32.gmra.mrb[80].mxu0 %v504_v17 }
 0x1b4   : > { %1456 = vmatmul.mubr.f32.gmra.mrb[80].mxu1 %v504_v17  ;;  %1012 = vmatprep.mubr.f32.mxu0 %v507_v18 }
 0x1b5   : > { %1461 = vmatprep.mubr.f32.mxu1 %v507_v18 }
 0x1b7   : > { %1013 = vmatmul.mubr.f32.gmra.mrb[82].mxu0 %v506_v19 }
 0x1b8   : > { %1462 = vmatmul.mubr.f32.gmra.mrb[82].mxu1 %v506_v19  ;;  %1018 = vmatprep.mubr.f32.mxu0 %v509_v20  ;;  %v536_v19 = vld [vmem:[%s9414_s7 + $0x380] sm:$0xff] }
 0x1b9   : > { %1467 = vmatprep.mubr.f32.mxu1 %v509_v20 }
 0x1bb   : > { %1019 = vmatmul.mubr.f32.gmra.mrb[84].mxu0 %v508_v21 }
 0x1bc   : > { %1468 = vmatmul.mubr.f32.gmra.mrb[84].mxu1 %v508_v21  ;;  %1024 = vmatprep.mubr.f32.mxu0 %v511_v22  ;;  %v539_v21 = vld [vmem:[%s9414_s7 + $0x398] sm:$0xff] }
 0x1bd   : > { %1473 = vmatprep.mubr.f32.mxu1 %v511_v22 }
 0x1bf   : > { %1025 = vmatmul.mubr.f32.gmra.mrb[86].mxu0 %v510_v23 }
 0x1c0   : > { %1474 = vmatmul.mubr.f32.gmra.mrb[86].mxu1 %v510_v23  ;;  %1030 = vmatprep.mubr.f32.mxu0 %v513_v24 }
 0x1c1   : > { %1479 = vmatprep.mubr.f32.mxu1 %v513_v24 }
 0x1c3   : > { %1031 = vmatmul.mubr.f32.gmra.mrb[88].mxu0 %v512_v25 }
 0x1c4   : > { %1480 = vmatmul.mubr.f32.gmra.mrb[88].mxu1 %v512_v25  ;;  %1036 = vmatprep.mubr.f32.mxu0 %v515_v26 }
 0x1c5   : > { %1485 = vmatprep.mubr.f32.mxu1 %v515_v26 }
 0x1c7   : > { %1037 = vmatmul.mubr.f32.gmra.mrb[90].mxu0 %v514_v27 }
 0x1c8   : > { %1486 = vmatmul.mubr.f32.gmra.mrb[90].mxu1 %v514_v27  ;;  %1042 = vmatprep.mubr.f32.mxu0 %v517_v28 }
 0x1c9   : > { %1491 = vmatprep.mubr.f32.mxu1 %v517_v28 }
 0x1cb   : > { %1043 = vmatmul.mubr.f32.gmra.mrb[92].mxu0 %v516_v29 }
 0x1cc   : > { %1492 = vmatmul.mubr.f32.gmra.mrb[92].mxu1 %v516_v29  ;;  %1048 = vmatprep.mubr.f32.mxu0 %v519_v30  ;;  %v538_v29 = vld [vmem:[%s9414_s7 + $0x390] sm:$0xff] }
 0x1cd   : > { %1497 = vmatprep.mubr.f32.mxu1 %v519_v30 }
 0x1cf   : > { %1049 = vmatmul.mubr.f32.gmra.mrb[94].mxu0 %v518_v31 }
 0x1d0   : > { %1498 = vmatmul.mubr.f32.gmra.mrb[94].mxu1 %v518_v31  ;;  %1054 = vmatprep.mubr.f32.mxu0 %v521_v32  ;;  %v541_v31 = vld [vmem:[%s9414_s7 + $0x3a8] sm:$0xff] }
 0x1d1   : > { %1503 = vmatprep.mubr.f32.mxu1 %v521_v32 }
 0x1d3   : > { %1055 = vmatmul.mubr.f32.gmra.mrb[96].mxu0 %v520_v33 }
 0x1d4   : > { %1504 = vmatmul.mubr.f32.gmra.mrb[96].mxu1 %v520_v33  ;;  %1060 = vmatprep.mubr.f32.mxu0 %v523_v34 }
 0x1d5   : > { %1509 = vmatprep.mubr.f32.mxu1 %v523_v34 }
 0x1d7   : > { %1061 = vmatmul.mubr.f32.gmra.mrb[98].mxu0 %v522_v35 }
 0x1d8   : > { %1510 = vmatmul.mubr.f32.gmra.mrb[98].mxu1 %v522_v35  ;;  %1066 = vmatprep.mubr.f32.mxu0 %v525_v36 }
 0x1d9   : > { %1515 = vmatprep.mubr.f32.mxu1 %v525_v36 }
 0x1db   : > { %1067 = vmatmul.mubr.f32.gmra.mrb[100].mxu0 %v524_v38 }
 0x1dc   : > { %1516 = vmatmul.mubr.f32.gmra.mrb[100].mxu1 %v524_v38  ;;  %1072 = vmatprep.mubr.f32.mxu0 %v527_v39 }
 0x1dd   : > { %1521 = vmatprep.mubr.f32.mxu1 %v527_v39  ;;  %v540_v39 = vld [vmem:[%s9414_s7 + $0x3a0] sm:$0xff] }
 0x1df   : > { %1073 = vmatmul.mubr.f32.gmra.mrb[102].mxu0 %v526_v41 }
 0x1e0   : > { %1522 = vmatmul.mubr.f32.gmra.mrb[102].mxu1 %v526_v41  ;;  %1078 = vmatprep.mubr.f32.mxu0 %v529_v42  ;;  %v543_v41 = vld [vmem:[%s9414_s7 + $0x3b8] sm:$0xff] }
 0x1e1   : > { %1527 = vmatprep.mubr.f32.mxu1 %v529_v42 }
 0x1e3   : > { %1079 = vmatmul.mubr.f32.gmra.mrb[104].mxu0 %v528_v44 }
 0x1e4   : > { %1528 = vmatmul.mubr.f32.gmra.mrb[104].mxu1 %v528_v44  ;;  %1084 = vmatprep.mubr.f32.mxu0 %v531_v48 }
 0x1e5   : > { %1533 = vmatprep.mubr.f32.mxu1 %v531_v48 }
 0x1e6   : > { %v768_v56 = vpop.f32.mrb[0].mxu0 }
 0x1e7   : > { %v769_v57 = vadd.f32 %v768_v56, %v9544_v50  ;;  %v1217_v58 = vpop.f32.mrb[0].mxu1  ;;  %v770_v59 = vpop.f32.mrb[1].mxu0  ;;  %1085 = vmatmul.mubr.f32.gmra.mrb[106].mxu0 %v530_v53 }
 0x1e8   : > { %v1218_v60 = vadd.f32 %v1217_v58, %v9546_v51  ;;  %v771_v61 = vadd.f32 %v770_v59, %v9548_v52  ;;  %v1219_v62 = vpop.f32.mrb[1].mxu1  ;;  %1534 = vmatmul.mubr.f32.gmra.mrb[106].mxu1 %v530_v53  ;;  %1090 = vmatprep.mubr.f32.mxu0 %v533_v55 }
 0x1e9   : > { %1600 = vst [vmem:[#allocation2] sm:$0xff] %v769_v57  ;;  %v1220_v0 = vadd.f32 %v1219_v62, %v9551_v54  ;;  %1539 = vmatprep.mubr.f32.mxu1 %v533_v55  ;;  %v545_v55 = vld [vmem:[%s9414_s7 + $0x3c8] sm:$0xff] }
 0x1ea   : > { %1602 = vst [vmem:[#allocation2 + $0x10] sm:$0xff] %v1218_v60  ;;  %1601 = vst [vmem:[#allocation2 + $0x8] sm:$0xff] %v771_v61  ;;  %v774_v2 = vpop.f32.mrb[2].mxu0 }
 0x1eb   : > { %1603 = vst [vmem:[#allocation2 + $0x18] sm:$0xff] %v1220_v0  ;;  %v775_v3 = vadd.f32 %v774_v2, %v9544_v50  ;;  %v1223_v4 = vpop.f32.mrb[2].mxu1  ;;  %v776_v5 = vpop.f32.mrb[3].mxu0  ;;  %1091 = vmatmul.mubr.f32.gmra.mrb[108].mxu0 %v532_v63 }
 0x1ec   : > { %v1224_v6 = vadd.f32 %v1223_v4, %v9546_v51  ;;  %v777_v7 = vadd.f32 %v776_v5, %v9548_v52  ;;  %v1225_v8 = vpop.f32.mrb[3].mxu1  ;;  %1540 = vmatmul.mubr.f32.gmra.mrb[108].mxu1 %v532_v63  ;;  %1096 = vmatprep.mubr.f32.mxu0 %v535_v1  ;;  %v544_v63 = vld [vmem:[%s9414_s7 + $0x3c0] sm:$0xff] }
 0x1ed   : > { %1604 = vst [vmem:[#allocation2 + $0x20] sm:$0xff] %v775_v3  ;;  %v1226_v10 = vadd.f32 %v1225_v8, %v9551_v54  ;;  %1545 = vmatprep.mubr.f32.mxu1 %v535_v1  ;;  %v547_v1 = vld [vmem:[%s9414_s7 + $0x3d8] sm:$0xff] }
 0x1ee   : > { %1606 = vst [vmem:[#allocation2 + $0x30] sm:$0xff] %v1224_v6  ;;  %1605 = vst [vmem:[#allocation2 + $0x28] sm:$0xff] %v777_v7  ;;  %v780_v12 = vpop.f32.mrb[4].mxu0 }
 0x1ef   : > { %1607 = vst [vmem:[#allocation2 + $0x38] sm:$0xff] %v1226_v10  ;;  %v781_v13 = vadd.f32 %v780_v12, %v9544_v50  ;;  %v1229_v14 = vpop.f32.mrb[4].mxu1  ;;  %v782_v15 = vpop.f32.mrb[5].mxu0  ;;  %1097 = vmatmul.mubr.f32.gmra.mrb[110].mxu0 %v534_v9 }
 0x1f0   : > { %v1230_v16 = vadd.f32 %v1229_v14, %v9546_v51  ;;  %v783_v17 = vadd.f32 %v782_v15, %v9548_v52  ;;  %v1231_v18 = vpop.f32.mrb[5].mxu1  ;;  %1546 = vmatmul.mubr.f32.gmra.mrb[110].mxu1 %v534_v9  ;;  %1102 = vmatprep.mubr.f32.mxu0 %v537_v11  ;;  %v546_v9 = vld [vmem:[%s9414_s7 + $0x3d0] sm:$0xff] }
 0x1f1   : > { %1608 = vst [vmem:[#allocation2 + $0x40] sm:$0xff] %v781_v13  ;;  %v1232_v20 = vadd.f32 %v1231_v18, %v9551_v54  ;;  %1551 = vmatprep.mubr.f32.mxu1 %v537_v11  ;;  %v549_v11 = vld [vmem:[%s9414_s7 + $0x3e8] sm:$0xff] }
 0x1f2   : > { %1610 = vst [vmem:[#allocation2 + $0x50] sm:$0xff] %v1230_v16  ;;  %1609 = vst [vmem:[#allocation2 + $0x48] sm:$0xff] %v783_v17  ;;  %v786_v22 = vpop.f32.mrb[6].mxu0 }
 0x1f3   : > { %1611 = vst [vmem:[#allocation2 + $0x58] sm:$0xff] %v1232_v20  ;;  %v787_v23 = vadd.f32 %v786_v22, %v9544_v50  ;;  %v1235_v24 = vpop.f32.mrb[6].mxu1  ;;  %v788_v25 = vpop.f32.mrb[7].mxu0  ;;  %1103 = vmatmul.mubr.f32.gmra.mrb[112].mxu0 %v536_v19 }
 0x1f4   : > { %v1236_v26 = vadd.f32 %v1235_v24, %v9546_v51  ;;  %v789_v27 = vadd.f32 %v788_v25, %v9548_v52  ;;  %v1237_v28 = vpop.f32.mrb[7].mxu1  ;;  %1552 = vmatmul.mubr.f32.gmra.mrb[112].mxu1 %v536_v19  ;;  %1108 = vmatprep.mubr.f32.mxu0 %v539_v21  ;;  %v548_v19 = vld [vmem:[%s9414_s7 + $0x3e0] sm:$0xff] }
 0x1f5   : > { %1612 = vst [vmem:[#allocation2 + $0x60] sm:$0xff] %v787_v23  ;;  %v1238_v30 = vadd.f32 %v1237_v28, %v9551_v54  ;;  %1557 = vmatprep.mubr.f32.mxu1 %v539_v21  ;;  %v551_v21 = vld [vmem:[%s9414_s7 + $0x3f8] sm:$0xff] }
 0x1f6   : > { %1614 = vst [vmem:[#allocation2 + $0x70] sm:$0xff] %v1236_v26  ;;  %1613 = vst [vmem:[#allocation2 + $0x68] sm:$0xff] %v789_v27  ;;  %v792_v32 = vpop.f32.mrb[8].mxu0 }
 0x1f7   : > { %1615 = vst [vmem:[#allocation2 + $0x78] sm:$0xff] %v1238_v30  ;;  %v793_v33 = vadd.f32 %v792_v32, %v9544_v50  ;;  %v1241_v34 = vpop.f32.mrb[8].mxu1  ;;  %v794_v35 = vpop.f32.mrb[9].mxu0  ;;  %1109 = vmatmul.mubr.f32.gmra.mrb[114].mxu0 %v538_v29 }
 0x1f8   : > { %v1242_v36 = vadd.f32 %v1241_v34, %v9546_v51  ;;  %v795_v37 = vadd.f32 %v794_v35, %v9548_v52  ;;  %v1243_v38 = vpop.f32.mrb[9].mxu1  ;;  %1558 = vmatmul.mubr.f32.gmra.mrb[114].mxu1 %v538_v29  ;;  %1114 = vmatprep.mubr.f32.mxu0 %v541_v31  ;;  %v550_v29 = vld [vmem:[%s9414_s7 + $0x3f0] sm:$0xff] }
 0x1f9   : > { %1616 = vst [vmem:[#allocation2 + $0x80] sm:$0xff] %v793_v33  ;;  %v1244_v40 = vadd.f32 %v1243_v38, %v9551_v54  ;;  %1563 = vmatprep.mubr.f32.mxu1 %v541_v31 }
 0x1fa   : > { %1618 = vst [vmem:[#allocation2 + $0x90] sm:$0xff] %v1242_v36  ;;  %1617 = vst [vmem:[#allocation2 + $0x88] sm:$0xff] %v795_v37  ;;  %v798_v42 = vpop.f32.mrb[10].mxu0 }
 0x1fb   : > { %1619 = vst [vmem:[#allocation2 + $0x98] sm:$0xff] %v1244_v40  ;;  %v799_v43 = vadd.f32 %v798_v42, %v9544_v50  ;;  %v1247_v44 = vpop.f32.mrb[10].mxu1  ;;  %v800_v45 = vpop.f32.mrb[11].mxu0  ;;  %1115 = vmatmul.mubr.f32.gmra.mrb[116].mxu0 %v540_v39 }
 0x1fc   : > { %v1248_v46 = vadd.f32 %v1247_v44, %v9546_v51  ;;  %v801_v47 = vadd.f32 %v800_v45, %v9548_v52  ;;  %v1249_v48 = vpop.f32.mrb[11].mxu1  ;;  %1564 = vmatmul.mubr.f32.gmra.mrb[116].mxu1 %v540_v39  ;;  %1120 = vmatprep.mubr.f32.mxu0 %v543_v41 }
 0x1fd   : > { %1620 = vst [vmem:[#allocation2 + $0xa0] sm:$0xff] %v799_v43  ;;  %v1250_v53 = vadd.f32 %v1249_v48, %v9551_v54  ;;  %1569 = vmatprep.mubr.f32.mxu1 %v543_v41 }
 0x1fe   : > { %1622 = vst [vmem:[#allocation2 + $0xb0] sm:$0xff] %v1248_v46  ;;  %1621 = vst [vmem:[#allocation2 + $0xa8] sm:$0xff] %v801_v47  ;;  %v804_v56 = vpop.f32.mrb[12].mxu0 }
 0x1ff   : > { %1623 = vst [vmem:[#allocation2 + $0xb8] sm:$0xff] %v1250_v53  ;;  %v805_v57 = vadd.f32 %v804_v56, %v9544_v50  ;;  %v1253_v58 = vpop.f32.mrb[12].mxu1  ;;  %v806_v59 = vpop.f32.mrb[13].mxu0  ;;  %1121 = vmatmul.mubr.f32.gmra.mrb[118].mxu0 %v542_v49 }
 0x200   : > { %v1254_v60 = vadd.f32 %v1253_v58, %v9546_v51  ;;  %v807_v61 = vadd.f32 %v806_v59, %v9548_v52  ;;  %v1255_v62 = vpop.f32.mrb[13].mxu1  ;;  %1570 = vmatmul.mubr.f32.gmra.mrb[118].mxu1 %v542_v49  ;;  %1126 = vmatprep.mubr.f32.mxu0 %v545_v55 }
 0x201   : > { %1624 = vst [vmem:[#allocation2 + $0xc0] sm:$0xff] %v805_v57  ;;  %v1256_v0 = vadd.f32 %v1255_v62, %v9551_v54  ;;  %1575 = vmatprep.mubr.f32.mxu1 %v545_v55 }
 0x202   : > { %1626 = vst [vmem:[#allocation2 + $0xd0] sm:$0xff] %v1254_v60  ;;  %1625 = vst [vmem:[#allocation2 + $0xc8] sm:$0xff] %v807_v61  ;;  %v810_v2 = vpop.f32.mrb[14].mxu0 }
 0x203   : > { %1627 = vst [vmem:[#allocation2 + $0xd8] sm:$0xff] %v1256_v0  ;;  %v811_v3 = vadd.f32 %v810_v2, %v9544_v50  ;;  %v1259_v4 = vpop.f32.mrb[14].mxu1  ;;  %v812_v5 = vpop.f32.mrb[15].mxu0  ;;  %1127 = vmatmul.mubr.f32.gmra.mrb[120].mxu0 %v544_v63 }
 0x204   : > { %v1260_v6 = vadd.f32 %v1259_v4, %v9546_v51  ;;  %v813_v7 = vadd.f32 %v812_v5, %v9548_v52  ;;  %v1261_v8 = vpop.f32.mrb[15].mxu1  ;;  %1576 = vmatmul.mubr.f32.gmra.mrb[120].mxu1 %v544_v63  ;;  %1132 = vmatprep.mubr.f32.mxu0 %v547_v1 }
 0x205   : > { %1628 = vst [vmem:[#allocation2 + $0xe0] sm:$0xff] %v811_v3  ;;  %v1262_v10 = vadd.f32 %v1261_v8, %v9551_v54  ;;  %1581 = vmatprep.mubr.f32.mxu1 %v547_v1 }
 0x206   : > { %1630 = vst [vmem:[#allocation2 + $0xf0] sm:$0xff] %v1260_v6  ;;  %1629 = vst [vmem:[#allocation2 + $0xe8] sm:$0xff] %v813_v7  ;;  %v816_v12 = vpop.f32.mrb[16].mxu0 }
 0x207   : > { %1631 = vst [vmem:[#allocation2 + $0xf8] sm:$0xff] %v1262_v10  ;;  %v817_v13 = vadd.f32 %v816_v12, %v9544_v50  ;;  %v1265_v14 = vpop.f32.mrb[16].mxu1  ;;  %v818_v15 = vpop.f32.mrb[17].mxu0  ;;  %1133 = vmatmul.mubr.f32.gmra.mrb[122].mxu0 %v546_v9 }
 0x208   : > { %v1266_v16 = vadd.f32 %v1265_v14, %v9546_v51  ;;  %v819_v17 = vadd.f32 %v818_v15, %v9548_v52  ;;  %v1267_v18 = vpop.f32.mrb[17].mxu1  ;;  %1582 = vmatmul.mubr.f32.gmra.mrb[122].mxu1 %v546_v9  ;;  %1138 = vmatprep.mubr.f32.mxu0 %v549_v11 }
 0x209   : > { %1632 = vst [vmem:[#allocation2 + $0x100] sm:$0xff] %v817_v13  ;;  %v1268_v20 = vadd.f32 %v1267_v18, %v9551_v54  ;;  %1587 = vmatprep.mubr.f32.mxu1 %v549_v11 }
 0x20a   : > { %1634 = vst [vmem:[#allocation2 + $0x110] sm:$0xff] %v1266_v16  ;;  %1633 = vst [vmem:[#allocation2 + $0x108] sm:$0xff] %v819_v17  ;;  %v822_v22 = vpop.f32.mrb[18].mxu0 }
 0x20b   : > { %1635 = vst [vmem:[#allocation2 + $0x118] sm:$0xff] %v1268_v20  ;;  %v823_v23 = vadd.f32 %v822_v22, %v9544_v50  ;;  %v1271_v24 = vpop.f32.mrb[18].mxu1  ;;  %v824_v25 = vpop.f32.mrb[19].mxu0  ;;  %1139 = vmatmul.mubr.f32.gmra.mrb[124].mxu0 %v548_v19 }
 0x20c   : > { %v1272_v26 = vadd.f32 %v1271_v24, %v9546_v51  ;;  %v825_v27 = vadd.f32 %v824_v25, %v9548_v52  ;;  %v1273_v28 = vpop.f32.mrb[19].mxu1  ;;  %1588 = vmatmul.mubr.f32.gmra.mrb[124].mxu1 %v548_v19  ;;  %1144 = vmatprep.mubr.f32.mxu0 %v551_v21 }
 0x20d   : > { %1636 = vst [vmem:[#allocation2 + $0x120] sm:$0xff] %v823_v23  ;;  %v1274_v30 = vadd.f32 %v1273_v28, %v9551_v54  ;;  %1593 = vmatprep.mubr.f32.mxu1 %v551_v21 }
 0x20e   : > { %1638 = vst [vmem:[#allocation2 + $0x130] sm:$0xff] %v1272_v26  ;;  %1637 = vst [vmem:[#allocation2 + $0x128] sm:$0xff] %v825_v27  ;;  %v828_v31 = vpop.f32.mrb[20].mxu0 }
 0x20f   : > { %1639 = vst [vmem:[#allocation2 + $0x138] sm:$0xff] %v1274_v30  ;;  %v829_v32 = vadd.f32 %v828_v31, %v9544_v50  ;;  %v1277_v33 = vpop.f32.mrb[20].mxu1  ;;  %v830_v34 = vpop.f32.mrb[21].mxu0  ;;  %1145 = vmatmul.mubr.f32.gmra.mrb[126].mxu0 %v550_v29 }
 0x210   : > { %v1278_v35 = vadd.f32 %v1277_v33, %v9546_v51  ;;  %v831_v36 = vadd.f32 %v830_v34, %v9548_v52  ;;  %v1279_v37 = vpop.f32.mrb[21].mxu1  ;;  %1594 = vmatmul.mubr.f32.gmra.mrb[126].mxu1 %v550_v29 }
 0x211   : > { %1640 = vst [vmem:[#allocation2 + $0x140] sm:$0xff] %v829_v32  ;;  %v1280_v38 = vadd.f32 %v1279_v37, %v9551_v54 }
 0x212   : > { %1642 = vst [vmem:[#allocation2 + $0x150] sm:$0xff] %v1278_v35  ;;  %1641 = vst [vmem:[#allocation2 + $0x148] sm:$0xff] %v831_v36  ;;  %v834_v39 = vpop.f32.mrb[22].mxu0 }
 0x213   : > { %1643 = vst [vmem:[#allocation2 + $0x158] sm:$0xff] %v1280_v38  ;;  %v835_v40 = vadd.f32 %v834_v39, %v9544_v50  ;;  %v1283_v41 = vpop.f32.mrb[22].mxu1  ;;  %v836_v42 = vpop.f32.mrb[23].mxu0 }
 0x214   : > { %v1284_v43 = vadd.f32 %v1283_v41, %v9546_v51  ;;  %v837_v44 = vadd.f32 %v836_v42, %v9548_v52  ;;  %v1285_v45 = vpop.f32.mrb[23].mxu1 }
 0x215   : > { %1644 = vst [vmem:[#allocation2 + $0x160] sm:$0xff] %v835_v40  ;;  %v1286_v46 = vadd.f32 %v1285_v45, %v9551_v54 }
 0x216   : > { %1646 = vst [vmem:[#allocation2 + $0x170] sm:$0xff] %v1284_v43  ;;  %1645 = vst [vmem:[#allocation2 + $0x168] sm:$0xff] %v837_v44  ;;  %v840_v47 = vpop.f32.mrb[24].mxu0 }
 0x217   : > { %1647 = vst [vmem:[#allocation2 + $0x178] sm:$0xff] %v1286_v46  ;;  %v841_v48 = vadd.f32 %v840_v47, %v9544_v50  ;;  %v1289_v49 = vpop.f32.mrb[24].mxu1  ;;  %v842_v53 = vpop.f32.mrb[25].mxu0 }
 0x218   : > { %v1290_v55 = vadd.f32 %v1289_v49, %v9546_v51  ;;  %v843_v56 = vadd.f32 %v842_v53, %v9548_v52  ;;  %v1291_v57 = vpop.f32.mrb[25].mxu1 }
 0x219   : > { %1648 = vst [vmem:[#allocation2 + $0x180] sm:$0xff] %v841_v48  ;;  %v1292_v58 = vadd.f32 %v1291_v57, %v9551_v54 }
 0x21a   : > { %1650 = vst [vmem:[#allocation2 + $0x190] sm:$0xff] %v1290_v55  ;;  %1649 = vst [vmem:[#allocation2 + $0x188] sm:$0xff] %v843_v56  ;;  %v846_v59 = vpop.f32.mrb[26].mxu0 }
 0x21b   : > { %1651 = vst [vmem:[#allocation2 + $0x198] sm:$0xff] %v1292_v58  ;;  %v847_v60 = vadd.f32 %v846_v59, %v9544_v50  ;;  %v1295_v61 = vpop.f32.mrb[26].mxu1  ;;  %v848_v62 = vpop.f32.mrb[27].mxu0 }
 0x21c   : > { %v1296_v63 = vadd.f32 %v1295_v61, %v9546_v51  ;;  %v849_v0 = vadd.f32 %v848_v62, %v9548_v52  ;;  %v1297_v1 = vpop.f32.mrb[27].mxu1 }
 0x21d   : > { %1652 = vst [vmem:[#allocation2 + $0x1a0] sm:$0xff] %v847_v60  ;;  %v1298_v2 = vadd.f32 %v1297_v1, %v9551_v54 }
 0x21e   : > { %1654 = vst [vmem:[#allocation2 + $0x1b0] sm:$0xff] %v1296_v63  ;;  %1653 = vst [vmem:[#allocation2 + $0x1a8] sm:$0xff] %v849_v0  ;;  %v852_v3 = vpop.f32.mrb[28].mxu0 }
 0x21f   : > { %1655 = vst [vmem:[#allocation2 + $0x1b8] sm:$0xff] %v1298_v2  ;;  %v853_v4 = vadd.f32 %v852_v3, %v9544_v50  ;;  %v1301_v5 = vpop.f32.mrb[28].mxu1  ;;  %v854_v6 = vpop.f32.mrb[29].mxu0 }
 0x220   : > { %v1302_v7 = vadd.f32 %v1301_v5, %v9546_v51  ;;  %v855_v8 = vadd.f32 %v854_v6, %v9548_v52  ;;  %v1303_v9 = vpop.f32.mrb[29].mxu1 }
 0x221   : > { %1656 = vst [vmem:[#allocation2 + $0x1c0] sm:$0xff] %v853_v4  ;;  %v1304_v10 = vadd.f32 %v1303_v9, %v9551_v54 }
 0x222   : > { %1658 = vst [vmem:[#allocation2 + $0x1d0] sm:$0xff] %v1302_v7  ;;  %1657 = vst [vmem:[#allocation2 + $0x1c8] sm:$0xff] %v855_v8  ;;  %v858_v11 = vpop.f32.mrb[30].mxu0 }
 0x223   : > { %1659 = vst [vmem:[#allocation2 + $0x1d8] sm:$0xff] %v1304_v10  ;;  %v859_v12 = vadd.f32 %v858_v11, %v9544_v50  ;;  %v1307_v13 = vpop.f32.mrb[30].mxu1  ;;  %v860_v14 = vpop.f32.mrb[31].mxu0 }
 0x224   : > { %v1308_v15 = vadd.f32 %v1307_v13, %v9546_v51  ;;  %v861_v16 = vadd.f32 %v860_v14, %v9548_v52  ;;  %v1309_v17 = vpop.f32.mrb[31].mxu1 }
 0x225   : > { %1660 = vst [vmem:[#allocation2 + $0x1e0] sm:$0xff] %v859_v12  ;;  %v1310_v18 = vadd.f32 %v1309_v17, %v9551_v54 }
 0x226   : > { %1662 = vst [vmem:[#allocation2 + $0x1f0] sm:$0xff] %v1308_v15  ;;  %1661 = vst [vmem:[#allocation2 + $0x1e8] sm:$0xff] %v861_v16  ;;  %v864_v19 = vpop.f32.mrb[32].mxu0 }
 0x227   : > { %1663 = vst [vmem:[#allocation2 + $0x1f8] sm:$0xff] %v1310_v18  ;;  %v865_v20 = vadd.f32 %v864_v19, %v9544_v50  ;;  %v1313_v21 = vpop.f32.mrb[32].mxu1  ;;  %v866_v22 = vpop.f32.mrb[33].mxu0 }
 0x228   : > { %v1314_v23 = vadd.f32 %v1313_v21, %v9546_v51  ;;  %v867_v24 = vadd.f32 %v866_v22, %v9548_v52  ;;  %v1315_v25 = vpop.f32.mrb[33].mxu1 }
 0x229   : > { %1664 = vst [vmem:[#allocation2 + $0x200] sm:$0xff] %v865_v20  ;;  %v1316_v26 = vadd.f32 %v1315_v25, %v9551_v54 }
 0x22a   : > { %1666 = vst [vmem:[#allocation2 + $0x210] sm:$0xff] %v1314_v23  ;;  %1665 = vst [vmem:[#allocation2 + $0x208] sm:$0xff] %v867_v24  ;;  %v870_v27 = vpop.f32.mrb[34].mxu0 }
 0x22b   : > { %1667 = vst [vmem:[#allocation2 + $0x218] sm:$0xff] %v1316_v26  ;;  %v871_v28 = vadd.f32 %v870_v27, %v9544_v50  ;;  %v1319_v29 = vpop.f32.mrb[34].mxu1  ;;  %v872_v30 = vpop.f32.mrb[35].mxu0 }
 0x22c   : > { %v1320_v31 = vadd.f32 %v1319_v29, %v9546_v51  ;;  %v873_v32 = vadd.f32 %v872_v30, %v9548_v52  ;;  %v1321_v33 = vpop.f32.mrb[35].mxu1 }
 0x22d   : > { %1668 = vst [vmem:[#allocation2 + $0x220] sm:$0xff] %v871_v28  ;;  %v1322_v34 = vadd.f32 %v1321_v33, %v9551_v54 }
 0x22e   : > { %1670 = vst [vmem:[#allocation2 + $0x230] sm:$0xff] %v1320_v31  ;;  %1669 = vst [vmem:[#allocation2 + $0x228] sm:$0xff] %v873_v32  ;;  %v876_v35 = vpop.f32.mrb[36].mxu0 }
 0x22f   : > { %1671 = vst [vmem:[#allocation2 + $0x238] sm:$0xff] %v1322_v34  ;;  %v877_v36 = vadd.f32 %v876_v35, %v9544_v50  ;;  %v1325_v37 = vpop.f32.mrb[36].mxu1  ;;  %v878_v38 = vpop.f32.mrb[37].mxu0 }
 0x230   : > { %v1326_v39 = vadd.f32 %v1325_v37, %v9546_v51  ;;  %v879_v40 = vadd.f32 %v878_v38, %v9548_v52  ;;  %v1327_v41 = vpop.f32.mrb[37].mxu1 }
 0x231   : > { %1672 = vst [vmem:[#allocation2 + $0x240] sm:$0xff] %v877_v36  ;;  %v1328_v42 = vadd.f32 %v1327_v41, %v9551_v54 }
 0x232   : > { %1674 = vst [vmem:[#allocation2 + $0x250] sm:$0xff] %v1326_v39  ;;  %1673 = vst [vmem:[#allocation2 + $0x248] sm:$0xff] %v879_v40  ;;  %v882_v43 = vpop.f32.mrb[38].mxu0 }
 0x233   : > { %1675 = vst [vmem:[#allocation2 + $0x258] sm:$0xff] %v1328_v42  ;;  %v883_v44 = vadd.f32 %v882_v43, %v9544_v50  ;;  %v1331_v45 = vpop.f32.mrb[38].mxu1  ;;  %v884_v46 = vpop.f32.mrb[39].mxu0 }
 0x234   : > { %v1332_v47 = vadd.f32 %v1331_v45, %v9546_v51  ;;  %v885_v48 = vadd.f32 %v884_v46, %v9548_v52  ;;  %v1333_v49 = vpop.f32.mrb[39].mxu1 }
 0x235   : > { %1676 = vst [vmem:[#allocation2 + $0x260] sm:$0xff] %v883_v44  ;;  %v1334_v53 = vadd.f32 %v1333_v49, %v9551_v54 }
 0x236   : > { %1678 = vst [vmem:[#allocation2 + $0x270] sm:$0xff] %v1332_v47  ;;  %1677 = vst [vmem:[#allocation2 + $0x268] sm:$0xff] %v885_v48  ;;  %v888_v55 = vpop.f32.mrb[40].mxu0 }
 0x237   : > { %1679 = vst [vmem:[#allocation2 + $0x278] sm:$0xff] %v1334_v53  ;;  %v889_v56 = vadd.f32 %v888_v55, %v9544_v50  ;;  %v1337_v57 = vpop.f32.mrb[40].mxu1  ;;  %v890_v58 = vpop.f32.mrb[41].mxu0 }
 0x238   : > { %v1338_v59 = vadd.f32 %v1337_v57, %v9546_v51  ;;  %v891_v60 = vadd.f32 %v890_v58, %v9548_v52  ;;  %v1339_v61 = vpop.f32.mrb[41].mxu1 }
 0x239   : > { %1680 = vst [vmem:[#allocation2 + $0x280] sm:$0xff] %v889_v56  ;;  %v1340_v62 = vadd.f32 %v1339_v61, %v9551_v54 }
 0x23a   : > { %1682 = vst [vmem:[#allocation2 + $0x290] sm:$0xff] %v1338_v59  ;;  %1681 = vst [vmem:[#allocation2 + $0x288] sm:$0xff] %v891_v60  ;;  %v894_v63 = vpop.f32.mrb[42].mxu0 }
 0x23b   : > { %1683 = vst [vmem:[#allocation2 + $0x298] sm:$0xff] %v1340_v62  ;;  %v895_v0 = vadd.f32 %v894_v63, %v9544_v50  ;;  %v1343_v1 = vpop.f32.mrb[42].mxu1  ;;  %v896_v2 = vpop.f32.mrb[43].mxu0 }
 0x23c   : > { %v1344_v3 = vadd.f32 %v1343_v1, %v9546_v51  ;;  %v897_v4 = vadd.f32 %v896_v2, %v9548_v52  ;;  %v1345_v5 = vpop.f32.mrb[43].mxu1 }
 0x23d   : > { %1684 = vst [vmem:[#allocation2 + $0x2a0] sm:$0xff] %v895_v0  ;;  %v1346_v6 = vadd.f32 %v1345_v5, %v9551_v54 }
 0x23e   : > { %1686 = vst [vmem:[#allocation2 + $0x2b0] sm:$0xff] %v1344_v3  ;;  %1685 = vst [vmem:[#allocation2 + $0x2a8] sm:$0xff] %v897_v4  ;;  %v900_v7 = vpop.f32.mrb[44].mxu0 }
 0x23f   : > { %1687 = vst [vmem:[#allocation2 + $0x2b8] sm:$0xff] %v1346_v6  ;;  %v901_v8 = vadd.f32 %v900_v7, %v9544_v50  ;;  %v1349_v9 = vpop.f32.mrb[44].mxu1  ;;  %v902_v10 = vpop.f32.mrb[45].mxu0 }
 0x240   : > { %v1350_v11 = vadd.f32 %v1349_v9, %v9546_v51  ;;  %v903_v12 = vadd.f32 %v902_v10, %v9548_v52  ;;  %v1351_v13 = vpop.f32.mrb[45].mxu1 }
 0x241   : > { %1688 = vst [vmem:[#allocation2 + $0x2c0] sm:$0xff] %v901_v8  ;;  %v1352_v14 = vadd.f32 %v1351_v13, %v9551_v54 }
 0x242   : > { %1690 = vst [vmem:[#allocation2 + $0x2d0] sm:$0xff] %v1350_v11  ;;  %1689 = vst [vmem:[#allocation2 + $0x2c8] sm:$0xff] %v903_v12  ;;  %v906_v15 = vpop.f32.mrb[46].mxu0 }
 0x243   : > { %1691 = vst [vmem:[#allocation2 + $0x2d8] sm:$0xff] %v1352_v14  ;;  %v907_v16 = vadd.f32 %v906_v15, %v9544_v50  ;;  %v1355_v17 = vpop.f32.mrb[46].mxu1  ;;  %v908_v18 = vpop.f32.mrb[47].mxu0 }
 0x244   : > { %v1356_v19 = vadd.f32 %v1355_v17, %v9546_v51  ;;  %v909_v20 = vadd.f32 %v908_v18, %v9548_v52  ;;  %v1357_v21 = vpop.f32.mrb[47].mxu1 }
 0x245   : > { %1692 = vst [vmem:[#allocation2 + $0x2e0] sm:$0xff] %v907_v16  ;;  %v1358_v22 = vadd.f32 %v1357_v21, %v9551_v54 }
 0x246   : > { %1694 = vst [vmem:[#allocation2 + $0x2f0] sm:$0xff] %v1356_v19  ;;  %1693 = vst [vmem:[#allocation2 + $0x2e8] sm:$0xff] %v909_v20  ;;  %v912_v23 = vpop.f32.mrb[48].mxu0 }
 0x247   : > { %1695 = vst [vmem:[#allocation2 + $0x2f8] sm:$0xff] %v1358_v22  ;;  %v913_v24 = vadd.f32 %v912_v23, %v9544_v50  ;;  %v1361_v25 = vpop.f32.mrb[48].mxu1  ;;  %v914_v26 = vpop.f32.mrb[49].mxu0 }
 0x248   : > { %v1362_v27 = vadd.f32 %v1361_v25, %v9546_v51  ;;  %v915_v28 = vadd.f32 %v914_v26, %v9548_v52  ;;  %v1363_v29 = vpop.f32.mrb[49].mxu1 }
 0x249   : > { %1696 = vst [vmem:[#allocation2 + $0x300] sm:$0xff] %v913_v24  ;;  %v1364_v30 = vadd.f32 %v1363_v29, %v9551_v54 }
 0x24a   : > { %1698 = vst [vmem:[#allocation2 + $0x310] sm:$0xff] %v1362_v27  ;;  %1697 = vst [vmem:[#allocation2 + $0x308] sm:$0xff] %v915_v28  ;;  %v918_v31 = vpop.f32.mrb[50].mxu0 }
 0x24b   : > { %1699 = vst [vmem:[#allocation2 + $0x318] sm:$0xff] %v1364_v30  ;;  %v919_v32 = vadd.f32 %v918_v31, %v9544_v50  ;;  %v1367_v33 = vpop.f32.mrb[50].mxu1  ;;  %v920_v34 = vpop.f32.mrb[51].mxu0 }
 0x24c   : > { %v1368_v35 = vadd.f32 %v1367_v33, %v9546_v51  ;;  %v921_v36 = vadd.f32 %v920_v34, %v9548_v52  ;;  %v1369_v37 = vpop.f32.mrb[51].mxu1 }
 0x24d   : > { %1700 = vst [vmem:[#allocation2 + $0x320] sm:$0xff] %v919_v32  ;;  %v1370_v38 = vadd.f32 %v1369_v37, %v9551_v54 }
 0x24e   : > { %1702 = vst [vmem:[#allocation2 + $0x330] sm:$0xff] %v1368_v35  ;;  %1701 = vst [vmem:[#allocation2 + $0x328] sm:$0xff] %v921_v36  ;;  %v924_v39 = vpop.f32.mrb[52].mxu0 }
 0x24f   : > { %1703 = vst [vmem:[#allocation2 + $0x338] sm:$0xff] %v1370_v38  ;;  %v925_v40 = vadd.f32 %v924_v39, %v9544_v50  ;;  %v1373_v41 = vpop.f32.mrb[52].mxu1  ;;  %v926_v42 = vpop.f32.mrb[53].mxu0 }
 0x250   : > { %v1374_v43 = vadd.f32 %v1373_v41, %v9546_v51  ;;  %v927_v44 = vadd.f32 %v926_v42, %v9548_v52  ;;  %v1375_v45 = vpop.f32.mrb[53].mxu1 }
 0x251   : > { %1704 = vst [vmem:[#allocation2 + $0x340] sm:$0xff] %v925_v40  ;;  %v1376_v46 = vadd.f32 %v1375_v45, %v9551_v54 }
 0x252   : > { %1706 = vst [vmem:[#allocation2 + $0x350] sm:$0xff] %v1374_v43  ;;  %1705 = vst [vmem:[#allocation2 + $0x348] sm:$0xff] %v927_v44  ;;  %v930_v47 = vpop.f32.mrb[54].mxu0 }
 0x253   : > { %1707 = vst [vmem:[#allocation2 + $0x358] sm:$0xff] %v1376_v46  ;;  %v931_v48 = vadd.f32 %v930_v47, %v9544_v50  ;;  %v1379_v49 = vpop.f32.mrb[54].mxu1  ;;  %v932_v53 = vpop.f32.mrb[55].mxu0 }
 0x254   : > { %v1380_v55 = vadd.f32 %v1379_v49, %v9546_v51  ;;  %v933_v56 = vadd.f32 %v932_v53, %v9548_v52  ;;  %v1381_v57 = vpop.f32.mrb[55].mxu1 }
 0x255   : > { %1708 = vst [vmem:[#allocation2 + $0x360] sm:$0xff] %v931_v48  ;;  %v1382_v58 = vadd.f32 %v1381_v57, %v9551_v54 }
 0x256   : > { %1710 = vst [vmem:[#allocation2 + $0x370] sm:$0xff] %v1380_v55  ;;  %1709 = vst [vmem:[#allocation2 + $0x368] sm:$0xff] %v933_v56  ;;  %v936_v59 = vpop.f32.mrb[56].mxu0 }
 0x257   : > { %1711 = vst [vmem:[#allocation2 + $0x378] sm:$0xff] %v1382_v58  ;;  %v937_v60 = vadd.f32 %v936_v59, %v9544_v50  ;;  %v1385_v61 = vpop.f32.mrb[56].mxu1  ;;  %v938_v62 = vpop.f32.mrb[57].mxu0 }
 0x258   : > { %v1386_v63 = vadd.f32 %v1385_v61, %v9546_v51  ;;  %v939_v0 = vadd.f32 %v938_v62, %v9548_v52  ;;  %v1387_v1 = vpop.f32.mrb[57].mxu1 }
 0x259   : > { %1712 = vst [vmem:[#allocation2 + $0x380] sm:$0xff] %v937_v60  ;;  %v1388_v2 = vadd.f32 %v1387_v1, %v9551_v54 }
 0x25a   : > { %1714 = vst [vmem:[#allocation2 + $0x390] sm:$0xff] %v1386_v63  ;;  %1713 = vst [vmem:[#allocation2 + $0x388] sm:$0xff] %v939_v0  ;;  %v942_v3 = vpop.f32.mrb[58].mxu0 }
 0x25b   : > { %1715 = vst [vmem:[#allocation2 + $0x398] sm:$0xff] %v1388_v2  ;;  %v943_v4 = vadd.f32 %v942_v3, %v9544_v50  ;;  %v1391_v5 = vpop.f32.mrb[58].mxu1  ;;  %v944_v6 = vpop.f32.mrb[59].mxu0 }
 0x25c   : > { %v1392_v7 = vadd.f32 %v1391_v5, %v9546_v51  ;;  %v945_v8 = vadd.f32 %v944_v6, %v9548_v52  ;;  %v1393_v9 = vpop.f32.mrb[59].mxu1 }
 0x25d   : > { %1716 = vst [vmem:[#allocation2 + $0x3a0] sm:$0xff] %v943_v4  ;;  %v1394_v10 = vadd.f32 %v1393_v9, %v9551_v54 }
 0x25e   : > { %1718 = vst [vmem:[#allocation2 + $0x3b0] sm:$0xff] %v1392_v7  ;;  %1717 = vst [vmem:[#allocation2 + $0x3a8] sm:$0xff] %v945_v8  ;;  %v948_v11 = vpop.f32.mrb[60].mxu0 }
 0x25f   : > { %1719 = vst [vmem:[#allocation2 + $0x3b8] sm:$0xff] %v1394_v10  ;;  %v949_v12 = vadd.f32 %v948_v11, %v9544_v50  ;;  %v1397_v13 = vpop.f32.mrb[60].mxu1  ;;  %v950_v14 = vpop.f32.mrb[61].mxu0 }
 0x260   : > { %v1398_v15 = vadd.f32 %v1397_v13, %v9546_v51  ;;  %v951_v16 = vadd.f32 %v950_v14, %v9548_v52  ;;  %v1399_v17 = vpop.f32.mrb[61].mxu1 }
 0x261   : > { %1720 = vst [vmem:[#allocation2 + $0x3c0] sm:$0xff] %v949_v12  ;;  %v1400_v18 = vadd.f32 %v1399_v17, %v9551_v54 }
 0x262   : > { %1722 = vst [vmem:[#allocation2 + $0x3d0] sm:$0xff] %v1398_v15  ;;  %1721 = vst [vmem:[#allocation2 + $0x3c8] sm:$0xff] %v951_v16  ;;  %v954_v19 = vpop.f32.mrb[62].mxu0 }
 0x263   : > { %1723 = vst [vmem:[#allocation2 + $0x3d8] sm:$0xff] %v1400_v18  ;;  %v955_v20 = vadd.f32 %v954_v19, %v9544_v50  ;;  %v1403_v21 = vpop.f32.mrb[62].mxu1  ;;  %v956_v22 = vpop.f32.mrb[63].mxu0 }
 0x264   : > { %v1404_v23 = vadd.f32 %v1403_v21, %v9546_v51  ;;  %v957_v24 = vadd.f32 %v956_v22, %v9548_v52  ;;  %v1405_v25 = vpop.f32.mrb[63].mxu1 }
 0x265   : > { %1724 = vst [vmem:[#allocation2 + $0x3e0] sm:$0xff] %v955_v20  ;;  %v1406_v26 = vadd.f32 %v1405_v25, %v9551_v54 }
 0x266   : > { %1726 = vst [vmem:[#allocation2 + $0x3f0] sm:$0xff] %v1404_v23  ;;  %1725 = vst [vmem:[#allocation2 + $0x3e8] sm:$0xff] %v957_v24  ;;  %v960_v27 = vpop.f32.mrb[64].mxu0 }
 0x267   : > { %1727 = vst [vmem:[#allocation2 + $0x3f8] sm:$0xff] %v1406_v26  ;;  %v961_v28 = vadd.f32 %v960_v27, %v9544_v50  ;;  %v1409_v29 = vpop.f32.mrb[64].mxu1  ;;  %v962_v30 = vpop.f32.mrb[65].mxu0 }
 0x268   : > { %v1410_v31 = vadd.f32 %v1409_v29, %v9546_v51  ;;  %v963_v32 = vadd.f32 %v962_v30, %v9548_v52  ;;  %v1411_v33 = vpop.f32.mrb[65].mxu1 }
 0x269   : > { %1728 = vst [vmem:[#allocation2 + $0x400] sm:$0xff] %v961_v28  ;;  %v1412_v34 = vadd.f32 %v1411_v33, %v9551_v54 }
 0x26a   : > { %1730 = vst [vmem:[#allocation2 + $0x410] sm:$0xff] %v1410_v31  ;;  %1729 = vst [vmem:[#allocation2 + $0x408] sm:$0xff] %v963_v32  ;;  %v966_v35 = vpop.f32.mrb[66].mxu0 }
 0x26b   : > { %1731 = vst [vmem:[#allocation2 + $0x418] sm:$0xff] %v1412_v34  ;;  %v967_v36 = vadd.f32 %v966_v35, %v9544_v50  ;;  %v1415_v37 = vpop.f32.mrb[66].mxu1  ;;  %v968_v38 = vpop.f32.mrb[67].mxu0 }
 0x26c   : > { %v1416_v39 = vadd.f32 %v1415_v37, %v9546_v51  ;;  %v969_v40 = vadd.f32 %v968_v38, %v9548_v52  ;;  %v1417_v41 = vpop.f32.mrb[67].mxu1 }
 0x26d   : > { %1732 = vst [vmem:[#allocation2 + $0x420] sm:$0xff] %v967_v36  ;;  %v1418_v42 = vadd.f32 %v1417_v41, %v9551_v54 }
 0x26e   : > { %1734 = vst [vmem:[#allocation2 + $0x430] sm:$0xff] %v1416_v39  ;;  %1733 = vst [vmem:[#allocation2 + $0x428] sm:$0xff] %v969_v40  ;;  %v972_v43 = vpop.f32.mrb[68].mxu0 }
 0x26f   : > { %1735 = vst [vmem:[#allocation2 + $0x438] sm:$0xff] %v1418_v42  ;;  %v973_v44 = vadd.f32 %v972_v43, %v9544_v50  ;;  %v1421_v45 = vpop.f32.mrb[68].mxu1  ;;  %v974_v46 = vpop.f32.mrb[69].mxu0 }
 0x270   : > { %v1422_v47 = vadd.f32 %v1421_v45, %v9546_v51  ;;  %v975_v48 = vadd.f32 %v974_v46, %v9548_v52  ;;  %v1423_v49 = vpop.f32.mrb[69].mxu1 }
 0x271   : > { %1736 = vst [vmem:[#allocation2 + $0x440] sm:$0xff] %v973_v44  ;;  %v1424_v53 = vadd.f32 %v1423_v49, %v9551_v54 }
 0x272   : > { %1738 = vst [vmem:[#allocation2 + $0x450] sm:$0xff] %v1422_v47  ;;  %1737 = vst [vmem:[#allocation2 + $0x448] sm:$0xff] %v975_v48  ;;  %v978_v55 = vpop.f32.mrb[70].mxu0 }
 0x273   : > { %1739 = vst [vmem:[#allocation2 + $0x458] sm:$0xff] %v1424_v53  ;;  %v979_v56 = vadd.f32 %v978_v55, %v9544_v50  ;;  %v1427_v57 = vpop.f32.mrb[70].mxu1  ;;  %v980_v58 = vpop.f32.mrb[71].mxu0 }
 0x274   : > { %v1428_v59 = vadd.f32 %v1427_v57, %v9546_v51  ;;  %v981_v60 = vadd.f32 %v980_v58, %v9548_v52  ;;  %v1429_v61 = vpop.f32.mrb[71].mxu1 }
 0x275   : > { %1740 = vst [vmem:[#allocation2 + $0x460] sm:$0xff] %v979_v56  ;;  %v1430_v62 = vadd.f32 %v1429_v61, %v9551_v54 }
 0x276   : > { %1742 = vst [vmem:[#allocation2 + $0x470] sm:$0xff] %v1428_v59  ;;  %1741 = vst [vmem:[#allocation2 + $0x468] sm:$0xff] %v981_v60  ;;  %v984_v63 = vpop.f32.mrb[72].mxu0 }
 0x277   : > { %1743 = vst [vmem:[#allocation2 + $0x478] sm:$0xff] %v1430_v62  ;;  %v985_v0 = vadd.f32 %v984_v63, %v9544_v50  ;;  %v1433_v1 = vpop.f32.mrb[72].mxu1  ;;  %v986_v2 = vpop.f32.mrb[73].mxu0 }
 0x278   : > { %v1434_v3 = vadd.f32 %v1433_v1, %v9546_v51  ;;  %v987_v4 = vadd.f32 %v986_v2, %v9548_v52  ;;  %v1435_v5 = vpop.f32.mrb[73].mxu1 }
 0x279   : > { %1744 = vst [vmem:[#allocation2 + $0x480] sm:$0xff] %v985_v0  ;;  %v1436_v6 = vadd.f32 %v1435_v5, %v9551_v54 }
 0x27a   : > { %1746 = vst [vmem:[#allocation2 + $0x490] sm:$0xff] %v1434_v3  ;;  %1745 = vst [vmem:[#allocation2 + $0x488] sm:$0xff] %v987_v4  ;;  %v990_v7 = vpop.f32.mrb[74].mxu0 }
 0x27b   : > { %1747 = vst [vmem:[#allocation2 + $0x498] sm:$0xff] %v1436_v6  ;;  %v991_v8 = vadd.f32 %v990_v7, %v9544_v50  ;;  %v1439_v9 = vpop.f32.mrb[74].mxu1  ;;  %v992_v10 = vpop.f32.mrb[75].mxu0 }
 0x27c   : > { %v1440_v11 = vadd.f32 %v1439_v9, %v9546_v51  ;;  %v993_v12 = vadd.f32 %v992_v10, %v9548_v52  ;;  %v1441_v13 = vpop.f32.mrb[75].mxu1 }
 0x27d   : > { %1748 = vst [vmem:[#allocation2 + $0x4a0] sm:$0xff] %v991_v8  ;;  %v1442_v14 = vadd.f32 %v1441_v13, %v9551_v54 }
 0x27e   : > { %1750 = vst [vmem:[#allocation2 + $0x4b0] sm:$0xff] %v1440_v11  ;;  %1749 = vst [vmem:[#allocation2 + $0x4a8] sm:$0xff] %v993_v12  ;;  %v996_v15 = vpop.f32.mrb[76].mxu0 }
 0x27f   : > { %1751 = vst [vmem:[#allocation2 + $0x4b8] sm:$0xff] %v1442_v14  ;;  %v997_v16 = vadd.f32 %v996_v15, %v9544_v50  ;;  %v1445_v17 = vpop.f32.mrb[76].mxu1  ;;  %v998_v18 = vpop.f32.mrb[77].mxu0 }
 0x280   : > { %v1446_v19 = vadd.f32 %v1445_v17, %v9546_v51  ;;  %v999_v20 = vadd.f32 %v998_v18, %v9548_v52  ;;  %v1447_v21 = vpop.f32.mrb[77].mxu1 }
 0x281   : > { %1752 = vst [vmem:[#allocation2 + $0x4c0] sm:$0xff] %v997_v16  ;;  %v1448_v22 = vadd.f32 %v1447_v21, %v9551_v54 }
 0x282   : > { %1754 = vst [vmem:[#allocation2 + $0x4d0] sm:$0xff] %v1446_v19  ;;  %1753 = vst [vmem:[#allocation2 + $0x4c8] sm:$0xff] %v999_v20  ;;  %v1002_v23 = vpop.f32.mrb[78].mxu0 }
 0x283   : > { %1755 = vst [vmem:[#allocation2 + $0x4d8] sm:$0xff] %v1448_v22  ;;  %v1003_v24 = vadd.f32 %v1002_v23, %v9544_v50  ;;  %v1451_v25 = vpop.f32.mrb[78].mxu1  ;;  %v1004_v26 = vpop.f32.mrb[79].mxu0 }
 0x284   : > { %v1452_v27 = vadd.f32 %v1451_v25, %v9546_v51  ;;  %v1005_v28 = vadd.f32 %v1004_v26, %v9548_v52  ;;  %v1453_v29 = vpop.f32.mrb[79].mxu1 }
 0x285   : > { %1756 = vst [vmem:[#allocation2 + $0x4e0] sm:$0xff] %v1003_v24  ;;  %v1454_v30 = vadd.f32 %v1453_v29, %v9551_v54 }
 0x286   : > { %1758 = vst [vmem:[#allocation2 + $0x4f0] sm:$0xff] %v1452_v27  ;;  %1757 = vst [vmem:[#allocation2 + $0x4e8] sm:$0xff] %v1005_v28  ;;  %v1008_v31 = vpop.f32.mrb[80].mxu0 }
 0x287   : > { %1759 = vst [vmem:[#allocation2 + $0x4f8] sm:$0xff] %v1454_v30  ;;  %v1009_v32 = vadd.f32 %v1008_v31, %v9544_v50  ;;  %v1457_v33 = vpop.f32.mrb[80].mxu1  ;;  %v1010_v34 = vpop.f32.mrb[81].mxu0 }
 0x288   : > { %v1458_v35 = vadd.f32 %v1457_v33, %v9546_v51  ;;  %v1011_v36 = vadd.f32 %v1010_v34, %v9548_v52  ;;  %v1459_v37 = vpop.f32.mrb[81].mxu1 }
 0x289   : > { %1760 = vst [vmem:[#allocation2 + $0x500] sm:$0xff] %v1009_v32  ;;  %v1460_v38 = vadd.f32 %v1459_v37, %v9551_v54 }
 0x28a   : > { %1762 = vst [vmem:[#allocation2 + $0x510] sm:$0xff] %v1458_v35  ;;  %1761 = vst [vmem:[#allocation2 + $0x508] sm:$0xff] %v1011_v36  ;;  %v1014_v39 = vpop.f32.mrb[82].mxu0 }
 0x28b   : > { %1763 = vst [vmem:[#allocation2 + $0x518] sm:$0xff] %v1460_v38  ;;  %v1015_v40 = vadd.f32 %v1014_v39, %v9544_v50  ;;  %v1463_v41 = vpop.f32.mrb[82].mxu1  ;;  %v1016_v42 = vpop.f32.mrb[83].mxu0 }
 0x28c   : > { %v1464_v43 = vadd.f32 %v1463_v41, %v9546_v51  ;;  %v1017_v44 = vadd.f32 %v1016_v42, %v9548_v52  ;;  %v1465_v45 = vpop.f32.mrb[83].mxu1 }
 0x28d   : > { %1764 = vst [vmem:[#allocation2 + $0x520] sm:$0xff] %v1015_v40  ;;  %v1466_v46 = vadd.f32 %v1465_v45, %v9551_v54 }
 0x28e   : > { %1766 = vst [vmem:[#allocation2 + $0x530] sm:$0xff] %v1464_v43  ;;  %1765 = vst [vmem:[#allocation2 + $0x528] sm:$0xff] %v1017_v44  ;;  %v1020_v47 = vpop.f32.mrb[84].mxu0 }
 0x28f   : > { %1767 = vst [vmem:[#allocation2 + $0x538] sm:$0xff] %v1466_v46  ;;  %v1021_v48 = vadd.f32 %v1020_v47, %v9544_v50  ;;  %v1469_v49 = vpop.f32.mrb[84].mxu1  ;;  %v1022_v53 = vpop.f32.mrb[85].mxu0 }
 0x290   : > { %v1470_v55 = vadd.f32 %v1469_v49, %v9546_v51  ;;  %v1023_v56 = vadd.f32 %v1022_v53, %v9548_v52  ;;  %v1471_v57 = vpop.f32.mrb[85].mxu1 }
 0x291   : > { %1768 = vst [vmem:[#allocation2 + $0x540] sm:$0xff] %v1021_v48  ;;  %v1472_v58 = vadd.f32 %v1471_v57, %v9551_v54 }
 0x292   : > { %1770 = vst [vmem:[#allocation2 + $0x550] sm:$0xff] %v1470_v55  ;;  %1769 = vst [vmem:[#allocation2 + $0x548] sm:$0xff] %v1023_v56  ;;  %v1026_v59 = vpop.f32.mrb[86].mxu0 }
 0x293   : > { %1771 = vst [vmem:[#allocation2 + $0x558] sm:$0xff] %v1472_v58  ;;  %v1027_v60 = vadd.f32 %v1026_v59, %v9544_v50  ;;  %v1475_v61 = vpop.f32.mrb[86].mxu1  ;;  %v1028_v62 = vpop.f32.mrb[87].mxu0 }
 0x294   : > { %v1476_v63 = vadd.f32 %v1475_v61, %v9546_v51  ;;  %v1029_v0 = vadd.f32 %v1028_v62, %v9548_v52  ;;  %v1477_v1 = vpop.f32.mrb[87].mxu1 }
 0x295   : > { %1772 = vst [vmem:[#allocation2 + $0x560] sm:$0xff] %v1027_v60  ;;  %v1478_v2 = vadd.f32 %v1477_v1, %v9551_v54 }
 0x296   : > { %1774 = vst [vmem:[#allocation2 + $0x570] sm:$0xff] %v1476_v63  ;;  %1773 = vst [vmem:[#allocation2 + $0x568] sm:$0xff] %v1029_v0  ;;  %v1032_v3 = vpop.f32.mrb[88].mxu0 }
 0x297   : > { %1775 = vst [vmem:[#allocation2 + $0x578] sm:$0xff] %v1478_v2  ;;  %v1033_v4 = vadd.f32 %v1032_v3, %v9544_v50  ;;  %v1481_v5 = vpop.f32.mrb[88].mxu1  ;;  %v1034_v6 = vpop.f32.mrb[89].mxu0 }
 0x298   : > { %v1482_v7 = vadd.f32 %v1481_v5, %v9546_v51  ;;  %v1035_v8 = vadd.f32 %v1034_v6, %v9548_v52  ;;  %v1483_v9 = vpop.f32.mrb[89].mxu1 }
 0x299   : > { %1776 = vst [vmem:[#allocation2 + $0x580] sm:$0xff] %v1033_v4  ;;  %v1484_v10 = vadd.f32 %v1483_v9, %v9551_v54 }
 0x29a   : > { %1778 = vst [vmem:[#allocation2 + $0x590] sm:$0xff] %v1482_v7  ;;  %1777 = vst [vmem:[#allocation2 + $0x588] sm:$0xff] %v1035_v8  ;;  %v1038_v11 = vpop.f32.mrb[90].mxu0 }
 0x29b   : > { %1779 = vst [vmem:[#allocation2 + $0x598] sm:$0xff] %v1484_v10  ;;  %v1039_v12 = vadd.f32 %v1038_v11, %v9544_v50  ;;  %v1487_v13 = vpop.f32.mrb[90].mxu1  ;;  %v1040_v14 = vpop.f32.mrb[91].mxu0 }
 0x29c   : > { %v1488_v15 = vadd.f32 %v1487_v13, %v9546_v51  ;;  %v1041_v16 = vadd.f32 %v1040_v14, %v9548_v52  ;;  %v1489_v17 = vpop.f32.mrb[91].mxu1 }
 0x29d   : > { %1780 = vst [vmem:[#allocation2 + $0x5a0] sm:$0xff] %v1039_v12  ;;  %v1490_v18 = vadd.f32 %v1489_v17, %v9551_v54 }
 0x29e   : > { %1782 = vst [vmem:[#allocation2 + $0x5b0] sm:$0xff] %v1488_v15  ;;  %1781 = vst [vmem:[#allocation2 + $0x5a8] sm:$0xff] %v1041_v16  ;;  %v1044_v19 = vpop.f32.mrb[92].mxu0 }
 0x29f   : > { %1783 = vst [vmem:[#allocation2 + $0x5b8] sm:$0xff] %v1490_v18  ;;  %v1045_v20 = vadd.f32 %v1044_v19, %v9544_v50  ;;  %v1493_v21 = vpop.f32.mrb[92].mxu1  ;;  %v1046_v22 = vpop.f32.mrb[93].mxu0 }
 0x2a0   : > { %v1494_v23 = vadd.f32 %v1493_v21, %v9546_v51  ;;  %v1047_v24 = vadd.f32 %v1046_v22, %v9548_v52  ;;  %v1495_v25 = vpop.f32.mrb[93].mxu1 }
 0x2a1   : > { %1784 = vst [vmem:[#allocation2 + $0x5c0] sm:$0xff] %v1045_v20  ;;  %v1496_v26 = vadd.f32 %v1495_v25, %v9551_v54 }
 0x2a2   : > { %1786 = vst [vmem:[#allocation2 + $0x5d0] sm:$0xff] %v1494_v23  ;;  %1785 = vst [vmem:[#allocation2 + $0x5c8] sm:$0xff] %v1047_v24  ;;  %v1050_v27 = vpop.f32.mrb[94].mxu0 }
 0x2a3   : > { %1787 = vst [vmem:[#allocation2 + $0x5d8] sm:$0xff] %v1496_v26  ;;  %v1051_v28 = vadd.f32 %v1050_v27, %v9544_v50  ;;  %v1499_v29 = vpop.f32.mrb[94].mxu1  ;;  %v1052_v30 = vpop.f32.mrb[95].mxu0 }
 0x2a4   : > { %v1500_v31 = vadd.f32 %v1499_v29, %v9546_v51  ;;  %v1053_v32 = vadd.f32 %v1052_v30, %v9548_v52  ;;  %v1501_v33 = vpop.f32.mrb[95].mxu1 }
 0x2a5   : > { %1788 = vst [vmem:[#allocation2 + $0x5e0] sm:$0xff] %v1051_v28  ;;  %v1502_v34 = vadd.f32 %v1501_v33, %v9551_v54 }
 0x2a6   : > { %1790 = vst [vmem:[#allocation2 + $0x5f0] sm:$0xff] %v1500_v31  ;;  %1789 = vst [vmem:[#allocation2 + $0x5e8] sm:$0xff] %v1053_v32  ;;  %v1056_v35 = vpop.f32.mrb[96].mxu0 }
 0x2a7   : > { %1791 = vst [vmem:[#allocation2 + $0x5f8] sm:$0xff] %v1502_v34  ;;  %v1057_v36 = vadd.f32 %v1056_v35, %v9544_v50  ;;  %v1505_v37 = vpop.f32.mrb[96].mxu1  ;;  %v1058_v38 = vpop.f32.mrb[97].mxu0 }
 0x2a8   : > { %v1506_v39 = vadd.f32 %v1505_v37, %v9546_v51  ;;  %v1059_v40 = vadd.f32 %v1058_v38, %v9548_v52  ;;  %v1507_v41 = vpop.f32.mrb[97].mxu1 }
 0x2a9   : > { %1792 = vst [vmem:[#allocation2 + $0x600] sm:$0xff] %v1057_v36  ;;  %v1508_v42 = vadd.f32 %v1507_v41, %v9551_v54 }
 0x2aa   : > { %1794 = vst [vmem:[#allocation2 + $0x610] sm:$0xff] %v1506_v39  ;;  %1793 = vst [vmem:[#allocation2 + $0x608] sm:$0xff] %v1059_v40  ;;  %v1062_v43 = vpop.f32.mrb[98].mxu0 }
 0x2ab   : > { %1795 = vst [vmem:[#allocation2 + $0x618] sm:$0xff] %v1508_v42  ;;  %v1063_v44 = vadd.f32 %v1062_v43, %v9544_v50  ;;  %v1511_v45 = vpop.f32.mrb[98].mxu1  ;;  %v1064_v46 = vpop.f32.mrb[99].mxu0 }
 0x2ac   : > { %v1512_v47 = vadd.f32 %v1511_v45, %v9546_v51  ;;  %v1065_v48 = vadd.f32 %v1064_v46, %v9548_v52  ;;  %v1513_v49 = vpop.f32.mrb[99].mxu1 }
 0x2ad   : > { %1796 = vst [vmem:[#allocation2 + $0x620] sm:$0xff] %v1063_v44  ;;  %v1514_v53 = vadd.f32 %v1513_v49, %v9551_v54 }
 0x2ae   : > { %1798 = vst [vmem:[#allocation2 + $0x630] sm:$0xff] %v1512_v47  ;;  %1797 = vst [vmem:[#allocation2 + $0x628] sm:$0xff] %v1065_v48  ;;  %v1068_v55 = vpop.f32.mrb[100].mxu0 }
 0x2af   : > { %1799 = vst [vmem:[#allocation2 + $0x638] sm:$0xff] %v1514_v53  ;;  %v1069_v56 = vadd.f32 %v1068_v55, %v9544_v50  ;;  %v1517_v57 = vpop.f32.mrb[100].mxu1  ;;  %v1070_v58 = vpop.f32.mrb[101].mxu0 }
 0x2b0   : > { %v1518_v59 = vadd.f32 %v1517_v57, %v9546_v51  ;;  %v1071_v60 = vadd.f32 %v1070_v58, %v9548_v52  ;;  %v1519_v61 = vpop.f32.mrb[101].mxu1 }
 0x2b1   : > { %1800 = vst [vmem:[#allocation2 + $0x640] sm:$0xff] %v1069_v56  ;;  %v1520_v62 = vadd.f32 %v1519_v61, %v9551_v54 }
 0x2b2   : > { %1802 = vst [vmem:[#allocation2 + $0x650] sm:$0xff] %v1518_v59  ;;  %1801 = vst [vmem:[#allocation2 + $0x648] sm:$0xff] %v1071_v60  ;;  %v1074_v63 = vpop.f32.mrb[102].mxu0 }
 0x2b3   : > { %1803 = vst [vmem:[#allocation2 + $0x658] sm:$0xff] %v1520_v62  ;;  %v1075_v0 = vadd.f32 %v1074_v63, %v9544_v50  ;;  %v1523_v1 = vpop.f32.mrb[102].mxu1  ;;  %v1076_v2 = vpop.f32.mrb[103].mxu0 }
 0x2b4   : > { %v1524_v3 = vadd.f32 %v1523_v1, %v9546_v51  ;;  %v1077_v4 = vadd.f32 %v1076_v2, %v9548_v52  ;;  %v1525_v5 = vpop.f32.mrb[103].mxu1 }
 0x2b5   : > { %1804 = vst [vmem:[#allocation2 + $0x660] sm:$0xff] %v1075_v0  ;;  %v1526_v6 = vadd.f32 %v1525_v5, %v9551_v54 }
 0x2b6   : > { %1806 = vst [vmem:[#allocation2 + $0x670] sm:$0xff] %v1524_v3  ;;  %1805 = vst [vmem:[#allocation2 + $0x668] sm:$0xff] %v1077_v4  ;;  %v1080_v7 = vpop.f32.mrb[104].mxu0 }
 0x2b7   : > { %1807 = vst [vmem:[#allocation2 + $0x678] sm:$0xff] %v1526_v6  ;;  %v1081_v8 = vadd.f32 %v1080_v7, %v9544_v50  ;;  %v1529_v9 = vpop.f32.mrb[104].mxu1  ;;  %v1082_v10 = vpop.f32.mrb[105].mxu0 }
 0x2b8   : > { %v1530_v11 = vadd.f32 %v1529_v9, %v9546_v51  ;;  %v1083_v12 = vadd.f32 %v1082_v10, %v9548_v52  ;;  %v1531_v13 = vpop.f32.mrb[105].mxu1 }
 0x2b9   : > { %1808 = vst [vmem:[#allocation2 + $0x680] sm:$0xff] %v1081_v8  ;;  %v1532_v14 = vadd.f32 %v1531_v13, %v9551_v54 }
 0x2ba   : > { %1810 = vst [vmem:[#allocation2 + $0x690] sm:$0xff] %v1530_v11  ;;  %1809 = vst [vmem:[#allocation2 + $0x688] sm:$0xff] %v1083_v12  ;;  %v1086_v15 = vpop.f32.mrb[106].mxu0 }
 0x2bb   : > { %1811 = vst [vmem:[#allocation2 + $0x698] sm:$0xff] %v1532_v14  ;;  %v1087_v16 = vadd.f32 %v1086_v15, %v9544_v50  ;;  %v1535_v17 = vpop.f32.mrb[106].mxu1  ;;  %v1088_v18 = vpop.f32.mrb[107].mxu0 }
 0x2bc   : > { %v1536_v19 = vadd.f32 %v1535_v17, %v9546_v51  ;;  %v1089_v20 = vadd.f32 %v1088_v18, %v9548_v52  ;;  %v1537_v21 = vpop.f32.mrb[107].mxu1 }
 0x2bd   : > { %1812 = vst [vmem:[#allocation2 + $0x6a0] sm:$0xff] %v1087_v16  ;;  %v1538_v22 = vadd.f32 %v1537_v21, %v9551_v54 }
 0x2be   : > { %1814 = vst [vmem:[#allocation2 + $0x6b0] sm:$0xff] %v1536_v19  ;;  %1813 = vst [vmem:[#allocation2 + $0x6a8] sm:$0xff] %v1089_v20  ;;  %v1092_v23 = vpop.f32.mrb[108].mxu0 }
 0x2bf   : > { %1815 = vst [vmem:[#allocation2 + $0x6b8] sm:$0xff] %v1538_v22  ;;  %v1093_v24 = vadd.f32 %v1092_v23, %v9544_v50  ;;  %v1541_v25 = vpop.f32.mrb[108].mxu1  ;;  %v1094_v26 = vpop.f32.mrb[109].mxu0 }
 0x2c0   : > { %v1542_v27 = vadd.f32 %v1541_v25, %v9546_v51  ;;  %v1095_v28 = vadd.f32 %v1094_v26, %v9548_v52  ;;  %v1543_v29 = vpop.f32.mrb[109].mxu1 }
 0x2c1   : > { %1816 = vst [vmem:[#allocation2 + $0x6c0] sm:$0xff] %v1093_v24  ;;  %v1544_v30 = vadd.f32 %v1543_v29, %v9551_v54 }
 0x2c2   : > { %1818 = vst [vmem:[#allocation2 + $0x6d0] sm:$0xff] %v1542_v27  ;;  %1817 = vst [vmem:[#allocation2 + $0x6c8] sm:$0xff] %v1095_v28  ;;  %v1098_v31 = vpop.f32.mrb[110].mxu0 }
 0x2c3   : > { %1819 = vst [vmem:[#allocation2 + $0x6d8] sm:$0xff] %v1544_v30  ;;  %v1099_v32 = vadd.f32 %v1098_v31, %v9544_v50  ;;  %v1547_v33 = vpop.f32.mrb[110].mxu1  ;;  %v1100_v34 = vpop.f32.mrb[111].mxu0 }
 0x2c4   : > { %v1548_v35 = vadd.f32 %v1547_v33, %v9546_v51  ;;  %v1101_v36 = vadd.f32 %v1100_v34, %v9548_v52  ;;  %v1549_v37 = vpop.f32.mrb[111].mxu1 }
 0x2c5   : > { %1820 = vst [vmem:[#allocation2 + $0x6e0] sm:$0xff] %v1099_v32  ;;  %v1550_v38 = vadd.f32 %v1549_v37, %v9551_v54 }
 0x2c6   : > { %1822 = vst [vmem:[#allocation2 + $0x6f0] sm:$0xff] %v1548_v35  ;;  %1821 = vst [vmem:[#allocation2 + $0x6e8] sm:$0xff] %v1101_v36  ;;  %v1104_v39 = vpop.f32.mrb[112].mxu0 }
 0x2c7   : > { %1823 = vst [vmem:[#allocation2 + $0x6f8] sm:$0xff] %v1550_v38  ;;  %v1105_v40 = vadd.f32 %v1104_v39, %v9544_v50  ;;  %v1553_v41 = vpop.f32.mrb[112].mxu1  ;;  %v1106_v42 = vpop.f32.mrb[113].mxu0 }
 0x2c8   : > { %v1554_v43 = vadd.f32 %v1553_v41, %v9546_v51  ;;  %v1107_v44 = vadd.f32 %v1106_v42, %v9548_v52  ;;  %v1555_v45 = vpop.f32.mrb[113].mxu1 }
 0x2c9   : > { %1824 = vst [vmem:[#allocation2 + $0x700] sm:$0xff] %v1105_v40  ;;  %v1556_v46 = vadd.f32 %v1555_v45, %v9551_v54 }
 0x2ca   : > { %1826 = vst [vmem:[#allocation2 + $0x710] sm:$0xff] %v1554_v43  ;;  %1825 = vst [vmem:[#allocation2 + $0x708] sm:$0xff] %v1107_v44  ;;  %v1110_v47 = vpop.f32.mrb[114].mxu0 }
 0x2cb   : > { %1827 = vst [vmem:[#allocation2 + $0x718] sm:$0xff] %v1556_v46  ;;  %v1111_v48 = vadd.f32 %v1110_v47, %v9544_v50  ;;  %v1559_v49 = vpop.f32.mrb[114].mxu1  ;;  %v1112_v53 = vpop.f32.mrb[115].mxu0 }
 0x2cc   : > { %v1560_v55 = vadd.f32 %v1559_v49, %v9546_v51  ;;  %v1113_v56 = vadd.f32 %v1112_v53, %v9548_v52  ;;  %v1561_v57 = vpop.f32.mrb[115].mxu1 }
 0x2cd   : > { %1828 = vst [vmem:[#allocation2 + $0x720] sm:$0xff] %v1111_v48  ;;  %v1562_v58 = vadd.f32 %v1561_v57, %v9551_v54 }
 0x2ce   : > { %1830 = vst [vmem:[#allocation2 + $0x730] sm:$0xff] %v1560_v55  ;;  %1829 = vst [vmem:[#allocation2 + $0x728] sm:$0xff] %v1113_v56  ;;  %v1116_v59 = vpop.f32.mrb[116].mxu0 }
 0x2cf   : > { %1831 = vst [vmem:[#allocation2 + $0x738] sm:$0xff] %v1562_v58  ;;  %v1117_v60 = vadd.f32 %v1116_v59, %v9544_v50  ;;  %v1565_v61 = vpop.f32.mrb[116].mxu1  ;;  %v1118_v62 = vpop.f32.mrb[117].mxu0 }
 0x2d0   : > { %v1566_v63 = vadd.f32 %v1565_v61, %v9546_v51  ;;  %v1119_v0 = vadd.f32 %v1118_v62, %v9548_v52  ;;  %v1567_v1 = vpop.f32.mrb[117].mxu1 }
 0x2d1   : > { %1832 = vst [vmem:[#allocation2 + $0x740] sm:$0xff] %v1117_v60  ;;  %v1568_v2 = vadd.f32 %v1567_v1, %v9551_v54 }
 0x2d2   : > { %1834 = vst [vmem:[#allocation2 + $0x750] sm:$0xff] %v1566_v63  ;;  %1833 = vst [vmem:[#allocation2 + $0x748] sm:$0xff] %v1119_v0  ;;  %v1122_v3 = vpop.f32.mrb[118].mxu0 }
 0x2d3   : > { %1835 = vst [vmem:[#allocation2 + $0x758] sm:$0xff] %v1568_v2  ;;  %v1123_v4 = vadd.f32 %v1122_v3, %v9544_v50  ;;  %v1571_v5 = vpop.f32.mrb[118].mxu1  ;;  %v1124_v6 = vpop.f32.mrb[119].mxu0 }
 0x2d4   : > { %v1572_v7 = vadd.f32 %v1571_v5, %v9546_v51  ;;  %v1125_v8 = vadd.f32 %v1124_v6, %v9548_v52  ;;  %v1573_v9 = vpop.f32.mrb[119].mxu1 }
 0x2d5   : > { %1836 = vst [vmem:[#allocation2 + $0x760] sm:$0xff] %v1123_v4  ;;  %v1574_v10 = vadd.f32 %v1573_v9, %v9551_v54 }
 0x2d6   : > { %1838 = vst [vmem:[#allocation2 + $0x770] sm:$0xff] %v1572_v7  ;;  %1837 = vst [vmem:[#allocation2 + $0x768] sm:$0xff] %v1125_v8  ;;  %v1128_v11 = vpop.f32.mrb[120].mxu0 }
 0x2d7   : > { %1839 = vst [vmem:[#allocation2 + $0x778] sm:$0xff] %v1574_v10  ;;  %v1129_v12 = vadd.f32 %v1128_v11, %v9544_v50  ;;  %v1577_v13 = vpop.f32.mrb[120].mxu1  ;;  %v1130_v14 = vpop.f32.mrb[121].mxu0 }
 0x2d8   : > { %v1578_v15 = vadd.f32 %v1577_v13, %v9546_v51  ;;  %v1131_v16 = vadd.f32 %v1130_v14, %v9548_v52  ;;  %v1579_v17 = vpop.f32.mrb[121].mxu1 }
 0x2d9   : > { %1840 = vst [vmem:[#allocation2 + $0x780] sm:$0xff] %v1129_v12  ;;  %v1580_v18 = vadd.f32 %v1579_v17, %v9551_v54 }
 0x2da   : > { %1842 = vst [vmem:[#allocation2 + $0x790] sm:$0xff] %v1578_v15  ;;  %1841 = vst [vmem:[#allocation2 + $0x788] sm:$0xff] %v1131_v16  ;;  %v1134_v19 = vpop.f32.mrb[122].mxu0 }
 0x2db   : > { %1843 = vst [vmem:[#allocation2 + $0x798] sm:$0xff] %v1580_v18  ;;  %v1135_v20 = vadd.f32 %v1134_v19, %v9544_v50  ;;  %v1583_v21 = vpop.f32.mrb[122].mxu1  ;;  %v1136_v22 = vpop.f32.mrb[123].mxu0 }
 0x2dc   : > { %v1584_v23 = vadd.f32 %v1583_v21, %v9546_v51  ;;  %v1137_v24 = vadd.f32 %v1136_v22, %v9548_v52  ;;  %v1585_v25 = vpop.f32.mrb[123].mxu1 }
 0x2dd   : > { %1844 = vst [vmem:[#allocation2 + $0x7a0] sm:$0xff] %v1135_v20  ;;  %v1586_v26 = vadd.f32 %v1585_v25, %v9551_v54 }
 0x2de   : > { %1846 = vst [vmem:[#allocation2 + $0x7b0] sm:$0xff] %v1584_v23  ;;  %1845 = vst [vmem:[#allocation2 + $0x7a8] sm:$0xff] %v1137_v24  ;;  %v1140_v27 = vpop.f32.mrb[124].mxu0 }
 0x2df   : > { %1847 = vst [vmem:[#allocation2 + $0x7b8] sm:$0xff] %v1586_v26  ;;  %v1141_v28 = vadd.f32 %v1140_v27, %v9544_v50  ;;  %v1589_v29 = vpop.f32.mrb[124].mxu1  ;;  %v1142_v30 = vpop.f32.mrb[125].mxu0 }
 0x2e0   : > { %v1590_v31 = vadd.f32 %v1589_v29, %v9546_v51  ;;  %v1143_v32 = vadd.f32 %v1142_v30, %v9548_v52  ;;  %v1591_v33 = vpop.f32.mrb[125].mxu1 }
 0x2e1   : > { %1848 = vst [vmem:[#allocation2 + $0x7c0] sm:$0xff] %v1141_v28  ;;  %v1592_v34 = vadd.f32 %v1591_v33, %v9551_v54 }
 0x2e2   : > { %1850 = vst [vmem:[#allocation2 + $0x7d0] sm:$0xff] %v1590_v31  ;;  %1849 = vst [vmem:[#allocation2 + $0x7c8] sm:$0xff] %v1143_v32  ;;  %v1146_v35 = vpop.f32.mrb[126].mxu0 }
 0x2e3   : > { %1851 = vst [vmem:[#allocation2 + $0x7d8] sm:$0xff] %v1592_v34  ;;  %v1147_v36 = vadd.f32 %v1146_v35, %v9544_v50  ;;  %v1595_v37 = vpop.f32.mrb[126].mxu1  ;;  %v1148_v38 = vpop.f32.mrb[127].mxu0 }
 0x2e4   : > { %v1596_v39 = vadd.f32 %v1595_v37, %v9546_v51  ;;  %v1149_v40 = vadd.f32 %v1148_v38, %v9548_v52  ;;  %v1597_v41 = vpop.f32.mrb[127].mxu1 }
 0x2e5   : > { %1852 = vst [vmem:[#allocation2 + $0x7e0] sm:$0xff] %v1147_v36  ;;  %v1598_v42 = vadd.f32 %v1597_v41, %v9551_v54 }
 0x2e6   : > { %1854 = vst [vmem:[#allocation2 + $0x7f0] sm:$0xff] %v1596_v39  ;;  %1853 = vst [vmem:[#allocation2 + $0x7e8] sm:$0xff] %v1149_v40 }
 0x2e7   : > { %1855 = vst [vmem:[#allocation2 + $0x7f8] sm:$0xff] %v1598_v42 }
 0x2e8 PF: > { %v1927_v43 = vld [vmem:[#allocation9 + $0x8] sm:$0xff]  ;;  %v1929_v44 = vld [vmem:[#allocation9 + $0x18] sm:$0xff]  ;;  %v1926_v45 = vld [vmem:[#allocation9] sm:$0xff]  ;;  %s6896_s5 = sshll.u32 %s9045_s11, 8  ;;  %s14474_s0 = sld [smem:[#allocation244_spill]] }
 0x2e9   : > { %v7422_v46 = vpack.c.bf16 %v1929_v44, %v1927_v43  ;;  %v1928_v47 = vld [vmem:[#allocation9 + $0x10] sm:$0xff]  ;;  %v1931_v50 = vld [vmem:[#allocation9 + $0x28] sm:$0xff]  ;;  %v1933_v48 = vld [vmem:[#allocation9 + $0x38] sm:$0xff]  ;;  %s1857_s17 = sshra.s32 %s6896_s5, 3  ;;  %s15534_s3 = sld [smem:[#allocation20_spill]] }
 0x2ea   : > { %v7424_v49 = vpack.c.bf16 %v1928_v47, %v1926_v45  ;;  %v7426_v53 = vpack.c.bf16 %v1933_v48, %v1931_v50  ;;  %v1930_v51 = vld [vmem:[#allocation9 + $0x20] sm:$0xff]  ;;  %v1932_v55 = vld [vmem:[#allocation9 + $0x30] sm:$0xff]  ;;  %v1935_v52 = vld [vmem:[#allocation9 + $0x48] sm:$0xff]  ;;  %s6908_s4 = sshll.u32 %s1857_s17, 4  ;;  %s6909_s20 = sshll.u32 %s9045_s11, 6 }
 0x2eb   : > { %7423 = vmatprep.subr.bf16.mxu0 %v7422_v46  ;;  %v1937_v56 = vld [vmem:[#allocation9 + $0x58] sm:$0xff]  ;;  %v7428_v54 = vpack.c.bf16 %v1932_v55, %v1930_v51  ;;  %v1934_v58 = vld [vmem:[#allocation9 + $0x40] sm:$0xff]  ;;  %v1936_v59 = vld [vmem:[#allocation9 + $0x50] sm:$0xff]  ;;  %s9831_s26 = scalar_lea.vmem %s9414_s7, %s6908_s4 [#allocation7]  ;;  %s15535_s21 = sld [smem:[#allocation21_spill]] }
 0x2ec   : > { %7425 = vmatpush1.bf16.msra.mxu0 %v7424_v49  ;;  %v7430_v57 = vpack.c.bf16 %v1937_v56, %v1935_v52  ;;  %v1939_v60 = vld [vmem:[#allocation9 + $0x68] sm:$0xff]  ;;  %v1941_v61 = vld [vmem:[#allocation9 + $0x78] sm:$0xff]  ;;  %v7432_v62 = vpack.c.bf16 %v1936_v59, %v1934_v58  ;;  %v1938_v0 = vld [vmem:[#allocation9 + $0x60] sm:$0xff]  ;;  %s6735_s16 = sshll.u32 %s9431_s12, 4  ;;  %s15536_s5 = sld [smem:[#allocation249_spill]]  ;;  %s13904_s16 = int_to_ptr.vmem [resolvable:$true] %s6735_s16 }
 0x2ed   : > { %7427 = vmatprep.subr.bf16.mxu0 %v7426_v53  ;;  %v7434_v63 = vpack.c.bf16 %v1941_v61, %v1939_v60  ;;  %v1940_v1 = vld [vmem:[#allocation9 + $0x70] sm:$0xff]  ;;  %v1943_v2 = vld [vmem:[#allocation9 + $0x88] sm:$0xff]  ;;  %v1945_v3 = vld [vmem:[#allocation9 + $0x98] sm:$0xff]  ;;  %s13916_s4 = scalar_lea.sflag [#allocation6], %s416_s22  ;;  %s9073_s30 = smov [#allocation13]  }
 0x2ee   : > { %v7436_v4 = vpack.c.bf16 %v1940_v1, %v1938_v0  ;;  %v7438_v5 = vpack.c.bf16 %v1945_v3, %v1943_v2  ;;  %v1942_v6 = vld [vmem:[#allocation9 + $0x80] sm:$0xff]  ;;  %v1944_v7 = vld [vmem:[#allocation9 + $0x90] sm:$0xff]  ;;  %v1947_v8 = vld [vmem:[#allocation9 + $0xa8] sm:$0xff]  ;;  %s8931_s23 = sshll.u32 %s9073_s30, 4  ;;  %s8932_s23 = int_to_ptr.vmem [resolvable:$false] %s8931_s23 }
 0x2ef   : > { %v1949_v9 = vld [vmem:[#allocation9 + $0xb8] sm:$0xff]  ;;  %v7440_v10 = vpack.c.bf16 %v1944_v7, %v1942_v6  ;;  %v1946_v12 = vld [vmem:[#allocation9 + $0xa0] sm:$0xff]  ;;  %v1948_v13 = vld [vmem:[#allocation9 + $0xb0] sm:$0xff]  ;;  %s6902_s8 = sshll.u32 %s15534_s3, 7  ;;  %p8934_p1 = scmp.lt.s32.totalorder %s13904_s16, %s8932_s23 }
 0x2f0   : > { %7429 = vmatpush1.bf16.msra.mxu0 %v7428_v54  ;;  %v7442_v11 = vpack.c.bf16 %v1949_v9, %v1947_v8  ;;  %v1951_v14 = vld [vmem:[#allocation9 + $0xc8] sm:$0xff]  ;;  %v1953_v15 = vld [vmem:[#allocation9 + $0xd8] sm:$0xff]  ;;  %v7444_v16 = vpack.c.bf16 %v1948_v13, %v1946_v12  ;;  %v1950_v18 = vld [vmem:[#allocation9 + $0xc0] sm:$0xff]  ;;  %s6732_s7 = sadd.s32 %s6909_s20, %s6902_s8 }
 0x2f1   : > { %7431 = vmatprep.subr.bf16.mxu0 %v7430_v57  ;;  %v7446_v17 = vpack.c.bf16 %v1953_v15, %v1951_v14  ;;  %v1952_v19 = vld [vmem:[#allocation9 + $0xd0] sm:$0xff]  ;;  %v1863_v20 = vld [vmem:[%s9831_s26 + $0x8] sm:$0xff]  ;;  %v1955_v21 = vld [vmem:[#allocation9 + $0xe8] sm:$0xff]  ;;  %s6903_s19 = sshll.u32 %s6732_s7, 7  ;;  %p15537_p12 = scmp.ne.s32.totalorder %s15535_s21, 0 }
 0x2f2   : > { %v1957_v22 = vld [vmem:[#allocation9 + $0xf8] sm:$0xff]  ;;  %2066 = vmatprep.mubr.f32.mxu0 %v1863_v20  ;;  %v7448_v23 = vpack.c.bf16 %v1952_v19, %v1950_v18  ;;  %v1954_v25 = vld [vmem:[#allocation9 + $0xe0] sm:$0xff]  ;;  %v1956_v26 = vld [vmem:[#allocation9 + $0xf0] sm:$0xff]  ;;  %s13910_s17 = scalar_lea.hbm %s15536_s5, %s6903_s19 }
 0x2f3   : > { %v7450_v24 = vpack.c.bf16 %v1957_v22, %v1955_v21  ;;  %v1959_v27 = vld [vmem:[#allocation9 + $0x108] sm:$0xff]  ;;  %v1961_v28 = vld [vmem:[#allocation9 + $0x118] sm:$0xff]  ;;  %v7452_v29 = vpack.c.bf16 %v1956_v26, %v1954_v25  ;;  %v1958_v31 = vld [vmem:[#allocation9 + $0x100] sm:$0xff] }
 0x2f4   : > { %7433 = vmatpush1.bf16.msra.mxu0 %v7432_v62  ;;  %v7454_v30 = vpack.c.bf16 %v1961_v28, %v1959_v27  ;;  %v1960_v32 = vld [vmem:[#allocation9 + $0x110] sm:$0xff]  ;;  %v1963_v33 = vld [vmem:[#allocation9 + $0x128] sm:$0xff]  ;;  %v1965_v34 = vld [vmem:[#allocation9 + $0x138] sm:$0xff] }
 0x2f5   : > { %7435 = vmatprep.subr.bf16.mxu0 %v7434_v63  ;;  %v7456_v35 = vpack.c.bf16 %v1960_v32, %v1958_v31  ;;  %v7458_v36 = vpack.c.bf16 %v1965_v34, %v1963_v33  ;;  %v1962_v37 = vld [vmem:[#allocation9 + $0x120] sm:$0xff]  ;;  %v1964_v38 = vld [vmem:[#allocation9 + $0x130] sm:$0xff]  ;;  %v1967_v39 = vld [vmem:[#allocation9 + $0x148] sm:$0xff] }
 0x2f6   : > { %v1969_v40 = vld [vmem:[#allocation9 + $0x158] sm:$0xff]  ;;  %v7460_v41 = vpack.c.bf16 %v1964_v38, %v1962_v37  ;;  %v1966_v43 = vld [vmem:[#allocation9 + $0x140] sm:$0xff]  ;;  %v1968_v44 = vld [vmem:[#allocation9 + $0x150] sm:$0xff] }
 0x2f7   : > { %v7462_v42 = vpack.c.bf16 %v1969_v40, %v1967_v39  ;;  %v1971_v45 = vld [vmem:[#allocation9 + $0x168] sm:$0xff]  ;;  %v1973_v46 = vld [vmem:[#allocation9 + $0x178] sm:$0xff]  ;;  %v7464_v47 = vpack.c.bf16 %v1968_v44, %v1966_v43  ;;  %v1970_v48 = vld [vmem:[#allocation9 + $0x160] sm:$0xff] }
 0x2f8   : > { %7437 = vmatpush1.bf16.msra.mxu0 %v7436_v4  ;;  %v7466_v50 = vpack.c.bf16 %v1973_v46, %v1971_v45  ;;  %v1972_v49 = vld [vmem:[#allocation9 + $0x170] sm:$0xff]  ;;  %v1975_v53 = vld [vmem:[#allocation9 + $0x188] sm:$0xff]  ;;  %v1977_v51 = vld [vmem:[#allocation9 + $0x198] sm:$0xff] }
 0x2f9   : > { %7439 = vmatprep.subr.bf16.mxu0 %v7438_v5  ;;  %v7468_v55 = vpack.c.bf16 %v1972_v49, %v1970_v48  ;;  %v7470_v52 = vpack.c.bf16 %v1977_v51, %v1975_v53  ;;  %v1974_v56 = vld [vmem:[#allocation9 + $0x180] sm:$0xff]  ;;  %v1976_v54 = vld [vmem:[#allocation9 + $0x190] sm:$0xff]  ;;  %v1979_v57 = vld [vmem:[#allocation9 + $0x1a8] sm:$0xff] }
 0x2fa   : > { %v1981_v58 = vld [vmem:[#allocation9 + $0x1b8] sm:$0xff]  ;;  %v7472_v59 = vpack.c.bf16 %v1976_v54, %v1974_v56  ;;  %v1978_v61 = vld [vmem:[#allocation9 + $0x1a0] sm:$0xff]  ;;  %v1980_v62 = vld [vmem:[#allocation9 + $0x1b0] sm:$0xff] }
 0x2fb   : > { %v7474_v60 = vpack.c.bf16 %v1981_v58, %v1979_v57  ;;  %v1983_v63 = vld [vmem:[#allocation9 + $0x1c8] sm:$0xff]  ;;  %v1985_v0 = vld [vmem:[#allocation9 + $0x1d8] sm:$0xff]  ;;  %v7476_v1 = vpack.c.bf16 %v1980_v62, %v1978_v61  ;;  %v1982_v3 = vld [vmem:[#allocation9 + $0x1c0] sm:$0xff] }
 0x2fc   : > { %7441 = vmatpush1.bf16.msra.mxu0 %v7440_v10  ;;  %v7478_v2 = vpack.c.bf16 %v1985_v0, %v1983_v63  ;;  %v1984_v4 = vld [vmem:[#allocation9 + $0x1d0] sm:$0xff]  ;;  %v1987_v5 = vld [vmem:[#allocation9 + $0x1e8] sm:$0xff]  ;;  %v1989_v6 = vld [vmem:[#allocation9 + $0x1f8] sm:$0xff] }
 0x2fd   : > { %7443 = vmatprep.subr.bf16.mxu0 %v7442_v11  ;;  %v7480_v7 = vpack.c.bf16 %v1984_v4, %v1982_v3  ;;  %v7482_v8 = vpack.c.bf16 %v1989_v6, %v1987_v5  ;;  %v1986_v9 = vld [vmem:[#allocation9 + $0x1e0] sm:$0xff]  ;;  %v1988_v10 = vld [vmem:[#allocation9 + $0x1f0] sm:$0xff]  ;;  %v2329_v11 = vld [vmem:[#allocation2 + $0x600] sm:$0xff] }
 0x2fe   : > { %v2330_v12 = vld [vmem:[#allocation2 + $0x620] sm:$0xff]  ;;  %v7484_v13 = vpack.c.bf16 %v1988_v10, %v1986_v9  ;;  %v1865_v18 = vld [vmem:[%s9831_s26 + $0x18] sm:$0xff]  ;;  %v1867_v31 = vld [vmem:[%s9831_s26 + $0x28] sm:$0xff] }
 0x2ff   : > { %v7518_v14 = vpack.c.bf16 %v2330_v12, %v2329_v11  ;;  %v1862_v15 = vld [vmem:[%s9831_s26] sm:$0xff]  ;;  %v1869_v40 = vld [vmem:[%s9831_s26 + $0x38] sm:$0xff]  ;;  %v1868_v46 = vld [vmem:[%s9831_s26 + $0x30] sm:$0xff] }
 0x300   : > { %7445 = vmatpush1.bf16.msra.mxu0 %v7444_v16  ;;  %v2297_v16 = vld [vmem:[#allocation2 + $0x200] sm:$0xff]  ;;  %v1873_v54 = vld [vmem:[%s9831_s26 + $0x58] sm:$0xff]  ;;  %v1872_v62 = vld [vmem:[%s9831_s26 + $0x50] sm:$0xff] }
 0x301   : > { %7447 = vmatprep.subr.bf16.mxu0 %v7446_v17  ;;  %v2298_v17 = vld [vmem:[#allocation2 + $0x220] sm:$0xff]  ;;  %v1875_v63 = vld [vmem:[%s9831_s26 + $0x68] sm:$0xff] }
 0x302   : > { %v7486_v19 = vpack.c.bf16 %v2298_v17, %v2297_v16  ;;  %v2281_v20 = vld [vmem:[#allocation2] sm:$0xff] }
 0x303   : > { %v2282_v21 = vld [vmem:[#allocation2 + $0x20] sm:$0xff] }
 0x304   : > { %7449 = vmatpush1.bf16.msra.mxu0 %v7448_v23  ;;  %v2313_v22 = vld [vmem:[#allocation2 + $0x400] sm:$0xff]  ;;  %v7488_v25 = vpack.c.bf16 %v2282_v21, %v2281_v20  ;;  %7487 = vmatprep.subr.bf16.mxu1 %v7486_v19 }
 0x305   : > { %7451 = vmatprep.subr.bf16.mxu0 %v7450_v24  ;;  %v2314_v23 = vld [vmem:[#allocation2 + $0x420] sm:$0xff] }
 0x306   : > { %v2331_v24 = vld [vmem:[#allocation2 + $0x640] sm:$0xff]  ;;  %7489 = vmatpush3.bf16.xpose.msra.mxu1 %v7488_v25  ;;  %v7520_v32 = vpack.c.bf16 %v2314_v23, %v2313_v22 }
 0x307   : > { %v2332_v26 = vld [vmem:[#allocation2 + $0x660] sm:$0xff] }
 0x308   : > { %7453 = vmatpush1.bf16.msra.mxu0 %v7452_v29  ;;  %v2299_v27 = vld [vmem:[#allocation2 + $0x240] sm:$0xff]  ;;  %v1864_v29 = vld [vmem:[%s9831_s26 + $0x10] sm:$0xff] }
 0x309   : > { %7455 = vmatprep.subr.bf16.mxu0 %v7454_v30  ;;  %v2300_v28 = vld [vmem:[#allocation2 + $0x260] sm:$0xff] }
 0x30a   : > { %v7490_v30 = vpack.c.bf16 %v2300_v28, %v2299_v27  ;;  %v2283_v33 = vld [vmem:[#allocation2 + $0x40] sm:$0xff] }
 0x30b   : > { %v2284_v34 = vld [vmem:[#allocation2 + $0x60] sm:$0xff] }
 0x30c   : > { %7457 = vmatpush1.bf16.msra.mxu0 %v7456_v35  ;;  %v7522_v35 = vpack.c.bf16 %v2332_v26, %v2331_v24  ;;  %7491 = vmatprep.subr.bf16.mxu1 %v7490_v30  ;;  %v2302_v37 = vld [vmem:[#allocation2 + $0x2a0] sm:$0xff]  ;;  %v7492_v39 = vpack.c.bf16 %v2284_v34, %v2283_v33  ;;  %v1881_v24 = vld [vmem:[%s9831_s26 + $0x98] sm:$0xff]  ;;  %v1880_v30 = vld [vmem:[%s9831_s26 + $0x90] sm:$0xff] }
 0x30d   : > { %7459 = vmatprep.subr.bf16.mxu0 %v7458_v36  ;;  %v2301_v36 = vld [vmem:[#allocation2 + $0x280] sm:$0xff] }
 0x30e   : > { %v1866_v38 = vld [vmem:[%s9831_s26 + $0x20] sm:$0xff]  ;;  %7493 = vmatpush3.bf16.xpose.msra.mxu1 %v7492_v39 }
 0x30f   : > { %v2316_v43 = vld [vmem:[#allocation2 + $0x460] sm:$0xff] }
 0x310   : > { %7461 = vmatpush1.bf16.msra.mxu0 %v7460_v41  ;;  %v7494_v41 = vpack.c.bf16 %v2302_v37, %v2301_v36  ;;  %v2333_v44 = vld [vmem:[#allocation2 + $0x680] sm:$0xff] }
 0x311   : > { %7463 = vmatprep.subr.bf16.mxu0 %v7462_v42  ;;  %v2315_v42 = vld [vmem:[#allocation2 + $0x440] sm:$0xff] }
 0x312   : > { %v2334_v45 = vld [vmem:[#allocation2 + $0x6a0] sm:$0xff]  ;;  %7495 = vmatprep.subr.bf16.mxu1 %v7494_v41 }
 0x313   : > { %v2285_v48 = vld [vmem:[#allocation2 + $0x80] sm:$0xff]  ;;  %v7526_v53 = vpack.c.bf16 %v2334_v45, %v2333_v44 }
 0x314   : > { %7465 = vmatpush1.bf16.msra.mxu0 %v7464_v47  ;;  %v1871_v47 = vld [vmem:[%s9831_s26 + $0x48] sm:$0xff]  ;;  %v2286_v49 = vld [vmem:[#allocation2 + $0xa0] sm:$0xff] }
 0x315   : > { %7467 = vmatprep.subr.bf16.mxu0 %v7466_v50  ;;  %v7524_v50 = vpack.c.bf16 %v2316_v43, %v2315_v42  ;;  %v2303_v51 = vld [vmem:[#allocation2 + $0x2c0] sm:$0xff]  ;;  %v7496_v56 = vpack.c.bf16 %v2286_v49, %v2285_v48 }
 0x316   : > { %v2317_v58 = vld [vmem:[#allocation2 + $0x480] sm:$0xff] }
 0x317   : > { %v2336_v61 = vld [vmem:[#allocation2 + $0x6e0] sm:$0xff]  ;;  %7497 = vmatpush3.bf16.xpose.msra.mxu1 %v7496_v56 }
 0x318   : > { %7469 = vmatpush1.bf16.msra.mxu0 %v7468_v55  ;;  %v2304_v55 = vld [vmem:[#allocation2 + $0x2e0] sm:$0xff] }
 0x319   : > { %7471 = vmatprep.subr.bf16.mxu0 %v7470_v52  ;;  %v1870_v52 = vld [vmem:[%s9831_s26 + $0x40] sm:$0xff]  ;;  %v7498_v57 = vpack.c.bf16 %v2304_v55, %v2303_v51 }
 0x31a   : > { %v2305_v4 = vld [vmem:[#allocation2 + $0x300] sm:$0xff] }
 0x31b   : > { %7499 = vmatprep.subr.bf16.mxu1 %v7498_v57  ;;  %v2306_v5 = vld [vmem:[#allocation2 + $0x320] sm:$0xff] }
 0x31c   : > { %7473 = vmatpush1.bf16.msra.mxu0 %v7472_v59  ;;  %v2318_v59 = vld [vmem:[#allocation2 + $0x4a0] sm:$0xff]  ;;  %v7502_v9 = vpack.c.bf16 %v2306_v5, %v2305_v4 }
 0x31d   : > { %7475 = vmatprep.subr.bf16.mxu0 %v7474_v60  ;;  %v2335_v60 = vld [vmem:[#allocation2 + $0x6c0] sm:$0xff]  ;;  %v7528_v0 = vpack.c.bf16 %v2318_v59, %v2317_v58 }
 0x31e   : > { %v7530_v3 = vpack.c.bf16 %v2336_v61, %v2335_v60  ;;  %v1874_v6 = vld [vmem:[%s9831_s26 + $0x60] sm:$0xff] }
 0x31f   : > { %v2319_v10 = vld [vmem:[#allocation2 + $0x4c0] sm:$0xff] }
 0x320   : > { %7477 = vmatpush1.bf16.msra.mxu0 %v7476_v1  ;;  %v2287_v1 = vld [vmem:[#allocation2 + $0xc0] sm:$0xff] }
 0x321   : > { %7479 = vmatprep.subr.bf16.mxu0 %v7478_v2  ;;  %v2288_v2 = vld [vmem:[#allocation2 + $0xe0] sm:$0xff] }
 0x322   : > { %v2320_v11 = vld [vmem:[#allocation2 + $0x4e0] sm:$0xff] }
 0x323   : > { %v2337_v12 = vld [vmem:[#allocation2 + $0x700] sm:$0xff]  ;;  %v7532_v16 = vpack.c.bf16 %v2320_v11, %v2319_v10  ;;  %v1895_v10 = vld [vmem:[%s9831_s26 + $0x108] sm:$0xff] }
 0x324   : > { %7481 = vmatpush1.bf16.msra.mxu0 %v7480_v7  ;;  %v7500_v7 = vpack.c.bf16 %v2288_v2, %v2287_v1  ;;  %v2289_v17 = vld [vmem:[#allocation2 + $0x100] sm:$0xff] }
 0x325   : > { %7483 = vmatprep.subr.bf16.mxu0 %v7482_v8  ;;  %v1877_v8 = vld [vmem:[%s9831_s26 + $0x78] sm:$0xff]  ;;  %v2307_v20 = vld [vmem:[#allocation2 + $0x340] sm:$0xff] }
 0x326   : > { %7501 = vmatpush3.bf16.xpose.msra.mxu1 %v7500_v7  ;;  %v2308_v21 = vld [vmem:[#allocation2 + $0x360] sm:$0xff] }
 0x327   : > { %7503 = vmatprep.subr.bf16.mxu1 %v7502_v9  ;;  %v1878_v22 = vld [vmem:[%s9831_s26 + $0x80] sm:$0xff]  ;;  %v7506_v25 = vpack.c.bf16 %v2308_v21, %v2307_v20  ;;  %v1892_v9 = vld [vmem:[%s9831_s26 + $0xf0] sm:$0xff]  ;;  %v1905_v21 = vld [vmem:[%s9831_s26 + $0x158] sm:$0xff] }
 0x328   : > { %7485 = vmatpush1.bf16.msra.mxu0 %v7484_v13  ;;  %v2338_v13 = vld [vmem:[#allocation2 + $0x720] sm:$0xff] }
 0x329   : > { %7519 = vmatprep.subr.bf16.mxu0 %v7518_v14  ;;  %v1876_v14 = vld [vmem:[%s9831_s26 + $0x70] sm:$0xff]  ;;  %v7534_v19 = vpack.c.bf16 %v2338_v13, %v2337_v12  ;;  %v2321_v26 = vld [vmem:[#allocation2 + $0x500] sm:$0xff]  ;;  %v1897_v13 = vld [vmem:[%s9831_s26 + $0x118] sm:$0xff] }
 0x32a   : > { %v2322_v27 = vld [vmem:[#allocation2 + $0x520] sm:$0xff] }
 0x32b   : > { %2067 = vmatmul.mubr.f32.vlgmr.msra.gmra.mrb[0].mxu0 %v1862_v15  ;;  %v1879_v15 = vld [vmem:[%s9831_s26 + $0x88] sm:$0xff]  ;;  %v2339_v28 = vld [vmem:[#allocation2 + $0x740] sm:$0xff] }
 0x32c   : > { %2072 = vmatprep.mubr.f32.mxu0 %v1865_v18  ;;  %v2290_v18 = vld [vmem:[#allocation2 + $0x120] sm:$0xff] }
 0x32d   : > { %v7504_v23 = vpack.c.bf16 %v2290_v18, %v2289_v17  ;;  %v2291_v33 = vld [vmem:[#allocation2 + $0x140] sm:$0xff]  ;;  %v1901_v17 = vld [vmem:[%s9831_s26 + $0x138] sm:$0xff]  ;;  %v1900_v18 = vld [vmem:[%s9831_s26 + $0x130] sm:$0xff] }
 0x32e   : > { %v2292_v34 = vld [vmem:[#allocation2 + $0x160] sm:$0xff] }
 0x32f   : > { %2073 = vmatmul.mubr.f32.gmra.mrb[2].mxu0 %v1864_v29  ;;  %v2340_v29 = vld [vmem:[#allocation2 + $0x760] sm:$0xff]  ;;  %7505 = vmatpush3.bf16.xpose.msra.mxu1 %v7504_v23  ;;  %v7508_v39 = vpack.c.bf16 %v2292_v34, %v2291_v33  ;;  %v1907_v23 = vld [vmem:[%s9831_s26 + $0x168] sm:$0xff]  ;;  %v1917_v33 = vld [vmem:[%s9831_s26 + $0x1b8] sm:$0xff] }
 0x330   : > { %2078 = vmatprep.mubr.f32.mxu0 %v1867_v31  ;;  %v1883_v31 = vld [vmem:[%s9831_s26 + $0xa8] sm:$0xff]  ;;  %7507 = vmatprep.subr.bf16.mxu1 %v7506_v25  ;;  %v2309_v36 = vld [vmem:[#allocation2 + $0x380] sm:$0xff]  ;;  %v1909_v25 = vld [vmem:[%s9831_s26 + $0x178] sm:$0xff] }
 0x331   : > { %7521 = vmatpush3.bf16.xpose.msra.mxu0 %v7520_v32  ;;  %v7536_v32 = vpack.c.bf16 %v2322_v27, %v2321_v26  ;;  %v2310_v37 = vld [vmem:[#allocation2 + $0x3a0] sm:$0xff]  ;;  %v1908_v26 = vld [vmem:[%s9831_s26 + $0x170] sm:$0xff]  ;;  %v1911_v27 = vld [vmem:[%s9831_s26 + $0x188] sm:$0xff] }
 0x332   : > { %7523 = vmatprep.subr.bf16.mxu0 %v7522_v35  ;;  %v7538_v35 = vpack.c.bf16 %v2340_v29, %v2339_v28  ;;  %v7510_v41 = vpack.c.bf16 %v2310_v37, %v2309_v36  ;;  %v2323_v42 = vld [vmem:[#allocation2 + $0x540] sm:$0xff]  ;;  %v1913_v29 = vld [vmem:[%s9831_s26 + $0x198] sm:$0xff]  ;;  %v1916_v34 = vld [vmem:[%s9831_s26 + $0x1b0] sm:$0xff] }
 0x333   : > { %2079 = vmatmul.mubr.f32.gmra.mrb[4].mxu0 %v1866_v38  ;;  %v1882_v38 = vld [vmem:[%s9831_s26 + $0xa0] sm:$0xff]  ;;  %v1921_v37 = vld [vmem:[%s9831_s26 + $0x1d8] sm:$0xff] }
 0x334   : > { %2084 = vmatprep.mubr.f32.mxu0 %v1869_v40  ;;  %v1885_v40 = vld [vmem:[%s9831_s26 + $0xb8] sm:$0xff]  ;;  %v2324_v43 = vld [vmem:[#allocation2 + $0x560] sm:$0xff] }
 0x335   : > { %v2341_v44 = vld [vmem:[#allocation2 + $0x780] sm:$0xff] }
 0x336   : > { %v2342_v45 = vld [vmem:[#allocation2 + $0x7a0] sm:$0xff] }
 0x337   : > { %2085 = vmatmul.mubr.f32.gmra.mrb[6].mxu0 %v1868_v46  ;;  %v1884_v46 = vld [vmem:[%s9831_s26 + $0xb0] sm:$0xff]  ;;  %7509 = vmatpush3.bf16.xpose.msra.mxu1 %v7508_v39  ;;  %v2293_v48 = vld [vmem:[#allocation2 + $0x180] sm:$0xff]  ;;  %v1923_v39 = vld [vmem:[%s9831_s26 + $0x1e8] sm:$0xff] }
 0x338   : > { %2090 = vmatprep.mubr.f32.mxu0 %v1871_v47  ;;  %v1887_v47 = vld [vmem:[%s9831_s26 + $0xc8] sm:$0xff]  ;;  %7511 = vmatprep.subr.bf16.mxu1 %v7510_v41  ;;  %v2294_v49 = vld [vmem:[#allocation2 + $0x1a0] sm:$0xff]  ;;  %v1925_v41 = vld [vmem:[%s9831_s26 + $0x1f8] sm:$0xff] }
 0x339   : > { %7525 = vmatpush3.bf16.xpose.msra.mxu0 %v7524_v50  ;;  %v7540_v50 = vpack.c.bf16 %v2324_v43, %v2323_v42  ;;  %v2311_v51 = vld [vmem:[#allocation2 + $0x3c0] sm:$0xff]  ;;  %v7512_v56 = vpack.c.bf16 %v2294_v49, %v2293_v48  ;;  %v1924_v42 = vld [vmem:[%s9831_s26 + $0x1f0] sm:$0xff]  ;;  %v4285_v43 = vld [vmem:[#allocation2 + $0x208] sm:$0xff] }
 0x33a   : > { %7527 = vmatprep.subr.bf16.mxu0 %v7526_v53  ;;  %v7542_v53 = vpack.c.bf16 %v2342_v45, %v2341_v44  ;;  %v2312_v55 = vld [vmem:[#allocation2 + $0x3e0] sm:$0xff]  ;;  %v4286_v44 = vld [vmem:[#allocation2 + $0x228] sm:$0xff] }
 0x33b   : > { %2091 = vmatmul.mubr.f32.gmra.mrb[8].mxu0 %v1870_v52  ;;  %v1886_v52 = vld [vmem:[%s9831_s26 + $0xc0] sm:$0xff]  ;;  %v7514_v57 = vpack.c.bf16 %v2312_v55, %v2311_v51  ;;  %v7646_v45 = vpack.c.bf16 %v4286_v44, %v4285_v43  ;;  %v4270_v51 = vld [vmem:[#allocation2 + $0x28] sm:$0xff] }
 0x33c   : > { %2096 = vmatprep.mubr.f32.mxu0 %v1873_v54  ;;  %v1889_v54 = vld [vmem:[%s9831_s26 + $0xd8] sm:$0xff]  ;;  %v2325_v58 = vld [vmem:[#allocation2 + $0x580] sm:$0xff]  ;;  %v4287_v55 = vld [vmem:[#allocation2 + $0x248] sm:$0xff] }
 0x33d   : > { %v2326_v59 = vld [vmem:[#allocation2 + $0x5a0] sm:$0xff] }
 0x33e   : > { %v2343_v60 = vld [vmem:[#allocation2 + $0x7c0] sm:$0xff] }
 0x33f   : > { %2097 = vmatmul.mubr.f32.gmra.mrb[10].mxu0 %v1872_v62  ;;  %v2344_v61 = vld [vmem:[#allocation2 + $0x7e0] sm:$0xff]  ;;  %v1888_v62 = vld [vmem:[%s9831_s26 + $0xd0] sm:$0xff]  ;;  %7513 = vmatpush3.bf16.xpose.msra.mxu1 %v7512_v56 }
 0x340   : > { %2102 = vmatprep.mubr.f32.mxu0 %v1875_v63  ;;  %v1891_v63 = vld [vmem:[%s9831_s26 + $0xe8] sm:$0xff]  ;;  %7515 = vmatprep.subr.bf16.mxu1 %v7514_v57  ;;  %v2295_v1 = vld [vmem:[#allocation2 + $0x1c0] sm:$0xff] }
 0x341   : > { %7529 = vmatpush3.bf16.xpose.msra.mxu0 %v7528_v0  ;;  %v7544_v0 = vpack.c.bf16 %v2326_v59, %v2325_v58  ;;  %v2296_v2 = vld [vmem:[#allocation2 + $0x1e0] sm:$0xff] }
 0x342   : > { %7531 = vmatprep.subr.bf16.mxu0 %v7530_v3  ;;  %v7546_v3 = vpack.c.bf16 %v2344_v61, %v2343_v60  ;;  %v1890_v4 = vld [vmem:[%s9831_s26 + $0xe0] sm:$0xff]  ;;  %v7516_v5 = vpack.c.bf16 %v2296_v2, %v2295_v1  ;;  %v4289_v1 = vld [vmem:[#allocation2 + $0x288] sm:$0xff] }
 0x343   : > { %2103 = vmatmul.mubr.f32.gmra.mrb[12].mxu0 %v1874_v6  ;;  %v1893_v6 = vld [vmem:[%s9831_s26 + $0xf8] sm:$0xff]  ;;  %v2327_v7 = vld [vmem:[#allocation2 + $0x5c0] sm:$0xff]  ;;  %v4290_v2 = vld [vmem:[#allocation2 + $0x2a8] sm:$0xff] }
 0x344   : > { %2108 = vmatprep.mubr.f32.mxu0 %v1877_v8  ;;  %v2328_v8 = vld [vmem:[#allocation2 + $0x5e0] sm:$0xff] }
 0x345   : > { %v7548_v11 = vpack.c.bf16 %v2328_v8, %v2327_v7  ;;  %v1894_v12 = vld [vmem:[%s9831_s26 + $0x100] sm:$0xff]  ;;  %v7654_v7 = vpack.c.bf16 %v4290_v2, %v4289_v1  ;;  %v4281_v1 = vld [vmem:[#allocation2 + $0x188] sm:$0xff] }
 0x346   : > { %v1902_v20 = vld [vmem:[%s9831_s26 + $0x140] sm:$0xff]  ;;  %v4282_v2 = vld [vmem:[#allocation2 + $0x1a8] sm:$0xff] }
 0x347   : > { %2109 = vmatmul.mubr.f32.gmra.mrb[14].mxu0 %v1876_v14  ;;  %7517 = vmatpush3.bf16.xpose.msra.mxu1 %v7516_v5  ;;  %v1896_v14 = vld [vmem:[%s9831_s26 + $0x110] sm:$0xff]  ;;  %v1910_v28 = vld [vmem:[%s9831_s26 + $0x180] sm:$0xff] }
 0x348   : > { %2114 = vmatprep.mubr.f32.mxu0 %v1879_v15  ;;  %v1899_v15 = vld [vmem:[%s9831_s26 + $0x128] sm:$0xff]  ;;  %v1918_v36 = vld [vmem:[%s9831_s26 + $0x1c0] sm:$0xff] }
 0x349   : > { %7533 = vmatpush3.bf16.xpose.msra.mxu0 %v7532_v16  ;;  %v1898_v16 = vld [vmem:[%s9831_s26 + $0x120] sm:$0xff] }
 0x34a   : > { %7535 = vmatprep.subr.bf16.mxu0 %v7534_v19  ;;  %v1903_v19 = vld [vmem:[%s9831_s26 + $0x148] sm:$0xff]  ;;  %v9905_v48 = vld [vmem:[%s14474_s0] sm:$0x3]  ;;  %s8933_s0 = scalar_lea.vmem %s8932_s23, 16384 }
 0x34b   : > { %2115 = vmatmul.mubr.f32.gmra.mrb[16].mxu0 %v1878_v22  ;;  %v1904_v22 = vld [vmem:[%s9831_s26 + $0x150] sm:$0xff] }
 0x34c   : > { %2120 = vmatprep.mubr.f32.mxu0 %v1881_v24  ;;  %v1906_v24 = vld [vmem:[%s9831_s26 + $0x160] sm:$0xff] }
 0x34f   : > { %2121 = vmatmul.mubr.f32.gmra.mrb[18].mxu0 %v1880_v30  ;;  %v1912_v30 = vld [vmem:[%s9831_s26 + $0x190] sm:$0xff] }
 0x350   : > { %2126 = vmatprep.mubr.f32.mxu0 %v1883_v31  ;;  %v1915_v31 = vld [vmem:[%s9831_s26 + $0x1a8] sm:$0xff] }
 0x351   : > { %7537 = vmatpush3.bf16.xpose.msra.mxu0 %v7536_v32  ;;  %v1914_v32 = vld [vmem:[%s9831_s26 + $0x1a0] sm:$0xff] }
 0x352   : > { %7539 = vmatprep.subr.bf16.mxu0 %v7538_v35  ;;  %v1919_v35 = vld [vmem:[%s9831_s26 + $0x1c8] sm:$0xff] }
 0x353   : > { %2127 = vmatmul.mubr.f32.gmra.mrb[20].mxu0 %v1882_v38  ;;  %v1920_v38 = vld [vmem:[%s9831_s26 + $0x1d0] sm:$0xff] }
 0x354   : > { %2132 = vmatprep.mubr.f32.mxu0 %v1885_v40  ;;  %v1922_v40 = vld [vmem:[%s9831_s26 + $0x1e0] sm:$0xff]  ;;  %s8927_s26 = scalar_lea.vmem %s13904_s16, 8192 }
 0x355   : > { %p8928_p8 = scmp.ne.s32.totalorder %s13904_s16, %s8927_s26  ;;  %p8935_p7 = scmp.lt.s32.totalorder %s8933_s0, %s8927_s26 }
 0x357   : > { %2133 = vmatmul.mubr.f32.gmra.mrb[22].mxu0 %v1884_v46  ;;  %v1992_v46 = vlaneseq  ;;  %p8929_p2 = pnand %p8928_p8, %p15537_p12  ;;  %p8936_p9 = por %p8935_p7, %p8934_p1 }
 0x358   : > { %2138 = vmatprep.mubr.f32.mxu0 %v1887_v47 }
 0x359   : > { %7541 = vmatpush3.bf16.xpose.msra.mxu0 %v7540_v50  ;;  %v9897_v47 = vshrl.u32 %v1992_v46, 7  ;;  %p8930_p10 = pneg %p8929_p2 }
 0x35a   : > { %7543 = vmatprep.subr.bf16.mxu0 %v7542_v53  ;;  %v4269_v53 = vld [vmem:[#allocation2 + $0x8] sm:$0xff] }
 0x35b   : > { %2139 = vmatmul.mubr.f32.gmra.mrb[24].mxu0 %v1886_v52  ;;  %v9900_v50 = vsub.s32 0, %v9897_v47  ;;  %v4288_v52 = vld [vmem:[#allocation2 + $0x268] sm:$0xff]  ;;  %v7648_v58 = vpack.c.bf16 %v4270_v51, %v4269_v53  ;;  %p8937_p6 = pnand %p8936_p9, %p8930_p10 }
 0x35c   : > { %2144 = vmatprep.mubr.f32.mxu0 %v1889_v54  ;;  %v7650_v59 = vpack.c.bf16 %v4288_v52, %v4287_v55  ;;  %v4279_v53 = vld [vmem:[#allocation2 + $0x148] sm:$0xff] }
 0x35d   : > { %14473 = vst [vmem:[#allocation25_spill] sm:$0xff] %v9900_v50  ;;  %v9909_v49 = vrot.slane %v9905_v48, %v9900_v50  ;;  %v4280_v51 = vld [vmem:[#allocation2 + $0x168] sm:$0xff] }
 0x35e   : > { %v4297_v55 = vld [vmem:[#allocation2 + $0x388] sm:$0xff] }
 0x35f   : > { %2145 = vmatmul.mubr.f32.gmra.mrb[26].mxu0 %v1888_v62  ;;  %v4298_v52 = vld [vmem:[#allocation2 + $0x3a8] sm:$0xff] }
 0x360   : > { %2150 = vmatprep.mubr.f32.mxu0 %v1891_v63  ;;  %v4271_v63 = vld [vmem:[#allocation2 + $0x48] sm:$0xff] }
 0x361   : > { %7545 = vmatpush3.bf16.xpose.msra.mxu0 %v7544_v0  ;;  %v4272_v0 = vld [vmem:[#allocation2 + $0x68] sm:$0xff] }
 0x362   : > { %7547 = vmatprep.subr.bf16.mxu0 %v7546_v3 }
 0x363   : > { %2151 = vmatmul.mubr.f32.gmra.mrb[28].mxu0 %v1890_v4 }
 0x364   : > { %2156 = vmatprep.mubr.f32.mxu0 %v1893_v6  ;;  %v7652_v6 = vpack.c.bf16 %v4272_v0, %v4271_v63 }
 0x367   : > { %2157 = vmatmul.mubr.f32.gmra.mrb[30].mxu0 %v1892_v9 }
 0x368   : > { %2162 = vmatprep.mubr.f32.mxu0 %v1895_v10 }
 0x369   : > { %7549 = vmatpush3.bf16.xpose.msra.mxu0 %v7548_v11  ;;  %v4273_v11 = vld [vmem:[#allocation2 + $0x88] sm:$0xff] }
 0x36a   : > { %7647 = vmatprep.subr.bf16.mxu0 %v7646_v45 }
 0x36b   : > { %2163 = vmatmul.mubr.f32.gmra.mrb[32].mxu0 %v1894_v12  ;;  %v4274_v12 = vld [vmem:[#allocation2 + $0xa8] sm:$0xff] }
 0x36c   : > { %2168 = vmatprep.mubr.f32.mxu0 %v1897_v13  ;;  %v4291_v13 = vld [vmem:[#allocation2 + $0x2c8] sm:$0xff] }
 0x36f   : > { %2169 = vmatmul.mubr.f32.gmra.mrb[34].mxu0 %v1896_v14  ;;  %v4292_v14 = vld [vmem:[#allocation2 + $0x2e8] sm:$0xff] }
 0x370   : > { %2174 = vmatprep.mubr.f32.mxu0 %v1899_v15 }
 0x373   : > { %2175 = vmatmul.mubr.f32.gmra.mrb[36].mxu0 %v1898_v16 }
 0x374   : > { %2180 = vmatprep.mubr.f32.mxu0 %v1901_v17 }
 0x377   : > { %2181 = vmatmul.mubr.f32.gmra.mrb[38].mxu0 %v1900_v18  ;;  %v7656_v18 = vpack.c.bf16 %v4274_v12, %v4273_v11 }
 0x378   : > { %2186 = vmatprep.mubr.f32.mxu0 %v1903_v19  ;;  %v7658_v19 = vpack.c.bf16 %v4292_v14, %v4291_v13 }
 0x37b   : > { %2187 = vmatmul.mubr.f32.gmra.mrb[40].mxu0 %v1902_v20 }
 0x37c   : > { %2192 = vmatprep.mubr.f32.mxu0 %v1905_v21 }
 0x37f   : > { %2193 = vmatmul.mubr.f32.gmra.mrb[42].mxu0 %v1904_v22 }
 0x380   : > { %2198 = vmatprep.mubr.f32.mxu0 %v1907_v23  ;;  %v4275_v23 = vld [vmem:[#allocation2 + $0xc8] sm:$0xff] }
 0x383   : > { %2199 = vmatmul.mubr.f32.gmra.mrb[44].mxu0 %v1906_v24  ;;  %v4276_v24 = vld [vmem:[#allocation2 + $0xe8] sm:$0xff] }
 0x384   : > { %2204 = vmatprep.mubr.f32.mxu0 %v1909_v25  ;;  %v4293_v25 = vld [vmem:[#allocation2 + $0x308] sm:$0xff] }
 0x387   : > { %2205 = vmatmul.mubr.f32.gmra.mrb[46].mxu0 %v1908_v26  ;;  %v4294_v26 = vld [vmem:[#allocation2 + $0x328] sm:$0xff] }
 0x388   : > { %2210 = vmatprep.mubr.f32.mxu0 %v1911_v27 }
 0x38b   : > { %2211 = vmatmul.mubr.f32.gmra.mrb[48].mxu0 %v1910_v28 }
 0x38c   : > { %2216 = vmatprep.mubr.f32.mxu0 %v1913_v29 }
 0x38f   : > { %2217 = vmatmul.mubr.f32.gmra.mrb[50].mxu0 %v1912_v30  ;;  %v7660_v30 = vpack.c.bf16 %v4276_v24, %v4275_v23 }
 0x390   : > { %2222 = vmatprep.mubr.f32.mxu0 %v1915_v31  ;;  %v7662_v31 = vpack.c.bf16 %v4294_v26, %v4293_v25 }
 0x393   : > { %2223 = vmatmul.mubr.f32.gmra.mrb[52].mxu0 %v1914_v32 }
 0x394   : > { %2228 = vmatprep.mubr.f32.mxu0 %v1917_v33 }
 0x397   : > { %2229 = vmatmul.mubr.f32.gmra.mrb[54].mxu0 %v1916_v34 }
 0x398   : > { %2234 = vmatprep.mubr.f32.mxu0 %v1919_v35  ;;  %v4277_v35 = vld [vmem:[#allocation2 + $0x108] sm:$0xff] }
 0x39b   : > { %2235 = vmatmul.mubr.f32.gmra.mrb[56].mxu0 %v1918_v36  ;;  %v4278_v36 = vld [vmem:[#allocation2 + $0x128] sm:$0xff] }
 0x39c   : > { %2240 = vmatprep.mubr.f32.mxu0 %v1921_v37  ;;  %v4295_v37 = vld [vmem:[#allocation2 + $0x348] sm:$0xff] }
 0x39f   : > { %2241 = vmatmul.mubr.f32.gmra.mrb[58].mxu0 %v1920_v38  ;;  %v4296_v38 = vld [vmem:[#allocation2 + $0x368] sm:$0xff] }
 0x3a0   : > { %2246 = vmatprep.mubr.f32.mxu0 %v1923_v39  ;;  %v7666_v43 = vpack.c.bf16 %v4296_v38, %v4295_v37 }
 0x3a3   : > { %2247 = vmatmul.mubr.f32.gmra.mrb[60].mxu0 %v1922_v40 }
 0x3a4   : > { %2252 = vmatprep.mubr.f32.mxu0 %v1925_v41 }
 0x3a7   : > { %2253 = vmatmul.mubr.f32.gmra.mrb[62].mxu0 %v1924_v42  ;;  %v7664_v42 = vpack.c.bf16 %v4278_v36, %v4277_v35 }
 0x3fe   : > { %v2068_v56 = vpop.f32.mrb[0].mxu0 }
 0x3ff   : > { %v2069_v54 = vadd.f32 %v2068_v56, %v9909_v49  ;;  %v9912_v57 = vpop.f32.mrb[1].mxu0 }
 0x401   : > { %6942 = vmatprep.mubr.f32.mxu1 %v2069_v54  ;;  %7038 = vmatprep.mubr.f32.mxu0 %v2069_v54 }
 0x402   : > { %v2074_v60 = vpop.f32.mrb[2].mxu0  ;;  %6943 = vmatmul.mubr.f32.vlgmr.msra.gmra.mrb[0].mxu1 %v2069_v54  ;;  %7039 = vmatmul.mubr.f32.vlgmr.msra.gmra.mrb[64].mxu0 %v2069_v54 }
 0x403   : > { %v2075_v61 = vadd.f32 %v2074_v60, %v9909_v49  ;;  %v9915_v62 = vpop.f32.mrb[3].mxu0  ;;  %7649 = vmatpush3.bf16.xpose.msra.mxu0 %v7648_v58  ;;  %v7670_v60 = vpack.c.bf16 %v4298_v52, %v4297_v55 }
 0x404   : > { %7651 = vmatprep.subr.bf16.mxu0 %v7650_v59  ;;  %v7668_v59 = vpack.c.bf16 %v4280_v51, %v4279_v53 }
 0x405   : > { %6944 = vmatprep.mubr.f32.mxu1 %v2075_v61  ;;  %7040 = vmatprep.mubr.f32.mxu0 %v2075_v61 }
 0x406   : > { %v2080_v3 = vpop.f32.mrb[4].mxu0  ;;  %6945 = vmatmul.mubr.f32.gmra.mrb[2].mxu1 %v2075_v61  ;;  %7041 = vmatmul.mubr.f32.gmra.mrb[66].mxu0 %v2075_v61 }
 0x407   : > { %v2081_v4 = vadd.f32 %v2080_v3, %v9909_v49  ;;  %v9918_v5 = vpop.f32.mrb[5].mxu0  ;;  %v4299_v3 = vld [vmem:[#allocation2 + $0x3c8] sm:$0xff] }
 0x409   : > { %6946 = vmatprep.mubr.f32.mxu1 %v2081_v4  ;;  %7042 = vmatprep.mubr.f32.mxu0 %v2081_v4 }
 0x40a   : > { %v2086_v8 = vpop.f32.mrb[6].mxu0  ;;  %6947 = vmatmul.mubr.f32.gmra.mrb[4].mxu1 %v2081_v4  ;;  %7043 = vmatmul.mubr.f32.gmra.mrb[68].mxu0 %v2081_v4  ;;  %v4300_v4 = vld [vmem:[#allocation2 + $0x3e8] sm:$0xff] }
 0x40b   : > { %v2087_v9 = vadd.f32 %v2086_v8, %v9909_v49  ;;  %v9921_v10 = vpop.f32.mrb[7].mxu0  ;;  %7653 = vmatpush3.bf16.xpose.msra.mxu0 %v7652_v6  ;;  %v7674_v11 = vpack.c.bf16 %v4300_v4, %v4299_v3 }
 0x40c   : > { %7655 = vmatprep.subr.bf16.mxu0 %v7654_v7 }
 0x40d   : > { %6948 = vmatprep.mubr.f32.mxu1 %v2087_v9  ;;  %7044 = vmatprep.mubr.f32.mxu0 %v2087_v9 }
 0x40e   : > { %v2092_v15 = vpop.f32.mrb[8].mxu0  ;;  %6949 = vmatmul.mubr.f32.gmra.mrb[6].mxu1 %v2087_v9  ;;  %7045 = vmatmul.mubr.f32.gmra.mrb[70].mxu0 %v2087_v9  ;;  %v7672_v9 = vpack.c.bf16 %v4282_v2, %v4281_v1 }
 0x40f   : > { %v2093_v16 = vadd.f32 %v2092_v15, %v9909_v49  ;;  %v9924_v17 = vpop.f32.mrb[9].mxu0  ;;  %v4283_v15 = vld [vmem:[#allocation2 + $0x1c8] sm:$0xff] }
 0x411   : > { %6950 = vmatprep.mubr.f32.mxu1 %v2093_v16  ;;  %7046 = vmatprep.mubr.f32.mxu0 %v2093_v16 }
 0x412   : > { %v2098_v20 = vpop.f32.mrb[10].mxu0  ;;  %6951 = vmatmul.mubr.f32.gmra.mrb[8].mxu1 %v2093_v16  ;;  %7047 = vmatmul.mubr.f32.gmra.mrb[72].mxu0 %v2093_v16  ;;  %v4284_v16 = vld [vmem:[#allocation2 + $0x1e8] sm:$0xff] }
 0x413   : > { %v2099_v21 = vadd.f32 %v2098_v20, %v9909_v49  ;;  %v9927_v22 = vpop.f32.mrb[11].mxu0  ;;  %7657 = vmatpush3.bf16.xpose.msra.mxu0 %v7656_v18  ;;  %v4317_v18 = vld [vmem:[#allocation2 + $0x608] sm:$0xff]  ;;  %v7676_v24 = vpack.c.bf16 %v4284_v16, %v4283_v15 }
 0x414   : > { %7659 = vmatprep.subr.bf16.mxu0 %v7658_v19  ;;  %v4318_v19 = vld [vmem:[#allocation2 + $0x628] sm:$0xff] }
 0x415   : > { %6952 = vmatprep.mubr.f32.mxu1 %v2099_v21  ;;  %7048 = vmatprep.mubr.f32.mxu0 %v2099_v21  ;;  %v7678_v25 = vpack.c.bf16 %v4318_v19, %v4317_v18 }
 0x416   : > { %v2104_v27 = vpop.f32.mrb[12].mxu0  ;;  %6953 = vmatmul.mubr.f32.gmra.mrb[10].mxu1 %v2099_v21  ;;  %7049 = vmatmul.mubr.f32.gmra.mrb[74].mxu0 %v2099_v21 }
 0x417   : > { %v2105_v28 = vadd.f32 %v2104_v27, %v9909_v49  ;;  %v9930_v29 = vpop.f32.mrb[13].mxu0 }
 0x419   : > { %6954 = vmatprep.mubr.f32.mxu1 %v2105_v28  ;;  %7050 = vmatprep.mubr.f32.mxu0 %v2105_v28 }
 0x41a   : > { %v2110_v32 = vpop.f32.mrb[14].mxu0  ;;  %6955 = vmatmul.mubr.f32.gmra.mrb[12].mxu1 %v2105_v28  ;;  %7051 = vmatmul.mubr.f32.gmra.mrb[76].mxu0 %v2105_v28 }
 0x41b   : > { %v2111_v33 = vadd.f32 %v2110_v32, %v9909_v49  ;;  %v9933_v34 = vpop.f32.mrb[15].mxu0  ;;  %7661 = vmatpush3.bf16.xpose.msra.mxu0 %v7660_v30 }
 0x41c   : > { %7663 = vmatprep.subr.bf16.mxu0 %v7662_v31 }
 0x41d   : > { %6956 = vmatprep.mubr.f32.mxu1 %v2111_v33  ;;  %7052 = vmatprep.mubr.f32.mxu0 %v2111_v33 }
 0x41e   : > { %v2116_v39 = vpop.f32.mrb[16].mxu0  ;;  %6957 = vmatmul.mubr.f32.gmra.mrb[14].mxu1 %v2111_v33  ;;  %7053 = vmatmul.mubr.f32.gmra.mrb[78].mxu0 %v2111_v33 }
 0x41f   : > { %v2117_v40 = vadd.f32 %v2116_v39, %v9909_v49  ;;  %v9936_v41 = vpop.f32.mrb[17].mxu0 }
 0x421   : > { %6958 = vmatprep.mubr.f32.mxu1 %v2117_v40  ;;  %7054 = vmatprep.mubr.f32.mxu0 %v2117_v40 }
 0x422   : > { %v2122_v44 = vpop.f32.mrb[18].mxu0  ;;  %6959 = vmatmul.mubr.f32.gmra.mrb[16].mxu1 %v2117_v40  ;;  %7055 = vmatmul.mubr.f32.gmra.mrb[80].mxu0 %v2117_v40 }
 0x423   : > { %v2123_v45 = vadd.f32 %v2122_v44, %v9909_v49  ;;  %v9939_v46 = vpop.f32.mrb[19].mxu0  ;;  %7665 = vmatpush3.bf16.xpose.msra.mxu0 %v7664_v42 }
 0x424   : > { %7667 = vmatprep.subr.bf16.mxu0 %v7666_v43 }
 0x425   : > { %6960 = vmatprep.mubr.f32.mxu1 %v2123_v45  ;;  %7056 = vmatprep.mubr.f32.mxu0 %v2123_v45 }
 0x426   : > { %v2128_v56 = vpop.f32.mrb[20].mxu0  ;;  %6961 = vmatmul.mubr.f32.gmra.mrb[18].mxu1 %v2123_v45  ;;  %7057 = vmatmul.mubr.f32.gmra.mrb[82].mxu0 %v2123_v45 }
 0x427   : > { %v2129_v54 = vadd.f32 %v2128_v56, %v9909_v49  ;;  %v9942_v58 = vpop.f32.mrb[21].mxu0 }
 0x429   : > { %6962 = vmatprep.mubr.f32.mxu1 %v2129_v54  ;;  %7058 = vmatprep.mubr.f32.mxu0 %v2129_v54 }
 0x42a   : > { %v2134_v61 = vpop.f32.mrb[22].mxu0  ;;  %6963 = vmatmul.mubr.f32.gmra.mrb[20].mxu1 %v2129_v54  ;;  %7059 = vmatmul.mubr.f32.gmra.mrb[84].mxu0 %v2129_v54 }
 0x42b   : > { %v2135_v63 = vadd.f32 %v2134_v61, %v9909_v49  ;;  %v9945_v0 = vpop.f32.mrb[23].mxu0  ;;  %7669 = vmatpush3.bf16.xpose.msra.mxu0 %v7668_v59 }
 0x42c   : > { %7671 = vmatprep.subr.bf16.mxu0 %v7670_v60 }
 0x42d   : > { %6964 = vmatprep.mubr.f32.mxu1 %v2135_v63  ;;  %7060 = vmatprep.mubr.f32.mxu0 %v2135_v63 }
 0x42e   : > { %v2140_v6 = vpop.f32.mrb[24].mxu0  ;;  %6965 = vmatmul.mubr.f32.gmra.mrb[22].mxu1 %v2135_v63  ;;  %7061 = vmatmul.mubr.f32.gmra.mrb[86].mxu0 %v2135_v63 }
 0x42f   : > { %v2141_v7 = vadd.f32 %v2140_v6, %v9909_v49  ;;  %v9948_v8 = vpop.f32.mrb[25].mxu0 }
 0x431   : > { %6966 = vmatprep.mubr.f32.mxu1 %v2141_v7  ;;  %7062 = vmatprep.mubr.f32.mxu0 %v2141_v7 }
 0x432   : > { %v2146_v12 = vpop.f32.mrb[26].mxu0  ;;  %6967 = vmatmul.mubr.f32.gmra.mrb[24].mxu1 %v2141_v7  ;;  %7063 = vmatmul.mubr.f32.gmra.mrb[88].mxu0 %v2141_v7 }
 0x433   : > { %v2147_v13 = vadd.f32 %v2146_v12, %v9909_v49  ;;  %v9951_v14 = vpop.f32.mrb[27].mxu0  ;;  %7673 = vmatpush3.bf16.xpose.msra.mxu0 %v7672_v9 }
 0x434   : > { %7675 = vmatprep.subr.bf16.mxu0 %v7674_v11 }
 0x435   : > { %6968 = vmatprep.mubr.f32.mxu1 %v2147_v13  ;;  %7064 = vmatprep.mubr.f32.mxu0 %v2147_v13 }
 0x436   : > { %v2152_v20 = vpop.f32.mrb[28].mxu0  ;;  %6969 = vmatmul.mubr.f32.gmra.mrb[26].mxu1 %v2147_v13  ;;  %7065 = vmatmul.mubr.f32.gmra.mrb[90].mxu0 %v2147_v13 }
 0x437   : > { %v2153_v21 = vadd.f32 %v2152_v20, %v9909_v49  ;;  %v9954_v23 = vpop.f32.mrb[29].mxu0 }
 0x439   : > { %6970 = vmatprep.mubr.f32.mxu1 %v2153_v21  ;;  %7066 = vmatprep.mubr.f32.mxu0 %v2153_v21 }
 0x43a   : > { %v2158_v26 = vpop.f32.mrb[30].mxu0  ;;  %6971 = vmatmul.mubr.f32.gmra.mrb[28].mxu1 %v2153_v21  ;;  %7067 = vmatmul.mubr.f32.gmra.mrb[92].mxu0 %v2153_v21 }
 0x43b   : > { %v2159_v27 = vadd.f32 %v2158_v26, %v9909_v49  ;;  %v9957_v28 = vpop.f32.mrb[31].mxu0  ;;  %7677 = vmatpush3.bf16.xpose.msra.mxu0 %v7676_v24  ;;  %v10002_v26 = vsub.s32 1, %v9897_v47 }
 0x43c   : > { %7679 = vmatprep.subr.bf16.mxu0 %v7678_v25 }
 0x43d   : > { %6972 = vmatprep.mubr.f32.mxu1 %v2159_v27  ;;  %7068 = vmatprep.mubr.f32.mxu0 %v2159_v27  ;;  %14475 = vst [vmem:[#allocation26_spill] sm:$0xff] %v10002_v26 }
 0x43e   : > { %v2164_v30 = vpop.f32.mrb[32].mxu0  ;;  %6973 = vmatmul.mubr.f32.gmra.mrb[30].mxu1 %v2159_v27  ;;  %7069 = vmatmul.mubr.f32.gmra.mrb[94].mxu0 %v2159_v27 }
 0x43f   : > { %v2165_v31 = vadd.f32 %v2164_v30, %v9909_v49  ;;  %v9960_v32 = vpop.f32.mrb[33].mxu0 }
 0x441   : > { %6974 = vmatprep.mubr.f32.mxu1 %v2165_v31  ;;  %7070 = vmatprep.mubr.f32.mxu0 %v2165_v31 }
 0x442   : > { %v2170_v33 = vpop.f32.mrb[34].mxu0  ;;  %6975 = vmatmul.mubr.f32.gmra.mrb[32].mxu1 %v2165_v31  ;;  %7071 = vmatmul.mubr.f32.gmra.mrb[96].mxu0 %v2165_v31 }
 0x443   : > { %v2171_v35 = vadd.f32 %v2170_v33, %v9909_v49  ;;  %v9963_v36 = vpop.f32.mrb[35].mxu0  ;;  %v10009_v33 = vrot.slane %v9905_v48, %v10002_v26  ;;  %v4320_v48 = vld [vmem:[#allocation2 + $0x668] sm:$0xff] }
 0x445   : > { %6976 = vmatprep.mubr.f32.mxu1 %v2171_v35  ;;  %7072 = vmatprep.mubr.f32.mxu0 %v2171_v35 }
 0x446   : > { %v2176_v37 = vpop.f32.mrb[36].mxu0  ;;  %6977 = vmatmul.mubr.f32.gmra.mrb[34].mxu1 %v2171_v35  ;;  %7073 = vmatmul.mubr.f32.gmra.mrb[98].mxu0 %v2171_v35 }
 0x447   : > { %v2177_v38 = vadd.f32 %v2176_v37, %v9909_v49  ;;  %v9966_v39 = vpop.f32.mrb[37].mxu0 }
 0x449   : > { %6978 = vmatprep.mubr.f32.mxu1 %v2177_v38  ;;  %7074 = vmatprep.mubr.f32.mxu0 %v2177_v38 }
 0x44a   : > { %v2182_v40 = vpop.f32.mrb[38].mxu0  ;;  %6979 = vmatmul.mubr.f32.gmra.mrb[36].mxu1 %v2177_v38  ;;  %7075 = vmatmul.mubr.f32.gmra.mrb[100].mxu0 %v2177_v38 }
 0x44b   : > { %v2183_v42 = vadd.f32 %v2182_v40, %v9909_v49  ;;  %v9969_v43 = vpop.f32.mrb[39].mxu0  ;;  %v4301_v40 = vld [vmem:[#allocation2 + $0x408] sm:$0xff] }
 0x44d   : > { %6980 = vmatprep.mubr.f32.mxu1 %v2183_v42  ;;  %7076 = vmatprep.mubr.f32.mxu0 %v2183_v42 }
 0x44e   : > { %v2188_v44 = vpop.f32.mrb[40].mxu0  ;;  %6981 = vmatmul.mubr.f32.gmra.mrb[38].mxu1 %v2183_v42  ;;  %7077 = vmatmul.mubr.f32.gmra.mrb[102].mxu0 %v2183_v42  ;;  %v4302_v42 = vld [vmem:[#allocation2 + $0x428] sm:$0xff] }
 0x44f   : > { %v2189_v45 = vadd.f32 %v2188_v44, %v9909_v49  ;;  %v9972_v53 = vpop.f32.mrb[41].mxu0  ;;  %v10016_v44 = vadd.f32 %v9912_v57, %v10009_v33  ;;  %v4303_v57 = vld [vmem:[#allocation2 + $0x448] sm:$0xff] }
 0x451   : > { %6982 = vmatprep.mubr.f32.mxu1 %v2189_v45  ;;  %7078 = vmatprep.mubr.f32.mxu0 %v2189_v45 }
 0x452   : > { %v2194_v51 = vpop.f32.mrb[42].mxu0  ;;  %6983 = vmatmul.mubr.f32.gmra.mrb[40].mxu1 %v2189_v45  ;;  %7079 = vmatmul.mubr.f32.gmra.mrb[104].mxu0 %v2189_v45  ;;  %v4319_v45 = vld [vmem:[#allocation2 + $0x648] sm:$0xff] }
 0x453   : > { %v2195_v55 = vadd.f32 %v2194_v51, %v9909_v49  ;;  %v9975_v52 = vpop.f32.mrb[43].mxu0  ;;  %v7680_v51 = vpack.c.bf16 %v4302_v42, %v4301_v40  ;;  %v4327_v40 = vld [vmem:[#allocation2 + $0x748] sm:$0xff] }
 0x454   : > { %v4328_v42 = vld [vmem:[#allocation2 + $0x768] sm:$0xff] }
 0x455   : > { %6984 = vmatprep.mubr.f32.mxu1 %v2195_v55  ;;  %7080 = vmatprep.mubr.f32.mxu0 %v2195_v55 }
 0x456   : > { %v2200_v56 = vpop.f32.mrb[44].mxu0  ;;  %6985 = vmatmul.mubr.f32.gmra.mrb[42].mxu1 %v2195_v55  ;;  %7081 = vmatmul.mubr.f32.gmra.mrb[106].mxu0 %v2195_v55  ;;  %v7682_v55 = vpack.c.bf16 %v4320_v48, %v4319_v45  ;;  %v7698_v45 = vpack.c.bf16 %v4328_v42, %v4327_v40  ;;  %v10069_v48 = vadd.f32 %v9939_v46, %v10009_v33 }
 0x457   : > { %v2201_v54 = vadd.f32 %v2200_v56, %v9909_v49  ;;  %v9978_v59 = vpop.f32.mrb[45].mxu0  ;;  %v4304_v56 = vld [vmem:[#allocation2 + $0x468] sm:$0xff] }
 0x459   : > { %6986 = vmatprep.mubr.f32.mxu1 %v2201_v54  ;;  %7082 = vmatprep.mubr.f32.mxu0 %v2201_v54 }
 0x45a   : > { %v2206_v60 = vpop.f32.mrb[46].mxu0  ;;  %6987 = vmatmul.mubr.f32.gmra.mrb[44].mxu1 %v2201_v54  ;;  %7083 = vmatmul.mubr.f32.gmra.mrb[108].mxu0 %v2201_v54  ;;  %v10027_v54 = vadd.f32 %v9918_v5, %v10009_v33  ;;  %v4305_v5 = vld [vmem:[#allocation2 + $0x488] sm:$0xff] }
 0x45b   : > { %v2207_v61 = vadd.f32 %v2206_v60, %v9909_v49  ;;  %v9981_v63 = vpop.f32.mrb[47].mxu0  ;;  %v4321_v60 = vld [vmem:[#allocation2 + $0x688] sm:$0xff] }
 0x45d   : > { %6988 = vmatprep.mubr.f32.mxu1 %v2207_v61  ;;  %7084 = vmatprep.mubr.f32.mxu0 %v2207_v61 }
 0x45e   : > { %v2212_v1 = vpop.f32.mrb[48].mxu0  ;;  %6989 = vmatmul.mubr.f32.gmra.mrb[46].mxu1 %v2207_v61  ;;  %7085 = vmatmul.mubr.f32.gmra.mrb[110].mxu0 %v2207_v61  ;;  %v4322_v61 = vld [vmem:[#allocation2 + $0x6a8] sm:$0xff] }
 0x45f   : > { %v2213_v2 = vadd.f32 %v2212_v1, %v9909_v49  ;;  %v9984_v3 = vpop.f32.mrb[49].mxu0  ;;  %v7686_v1 = vpack.c.bf16 %v4322_v61, %v4321_v60  ;;  %v10081_v61 = vadd.f32 %v9945_v0, %v10009_v33 }
 0x461   : > { %6990 = vmatprep.mubr.f32.mxu1 %v2213_v2  ;;  %7086 = vmatprep.mubr.f32.mxu0 %v2213_v2 }
 0x462   : > { %v2218_v4 = vpop.f32.mrb[50].mxu0  ;;  %6991 = vmatmul.mubr.f32.gmra.mrb[48].mxu1 %v2213_v2  ;;  %7087 = vmatmul.mubr.f32.gmra.mrb[112].mxu0 %v2213_v2  ;;  %v10033_v2 = vadd.f32 %v9921_v10, %v10009_v33 }
 0x463   : > { %v2219_v6 = vadd.f32 %v2218_v4, %v9909_v49  ;;  %v9987_v7 = vpop.f32.mrb[51].mxu0  ;;  %v4306_v4 = vld [vmem:[#allocation2 + $0x4a8] sm:$0xff] }
 0x464   : > { %v7688_v10 = vpack.c.bf16 %v4306_v4, %v4305_v5  ;;  %v4331_v5 = vld [vmem:[#allocation2 + $0x7c8] sm:$0xff] }
 0x465   : > { %6992 = vmatprep.mubr.f32.mxu1 %v2219_v6  ;;  %7088 = vmatprep.mubr.f32.mxu0 %v2219_v6  ;;  %v4332_v4 = vld [vmem:[#allocation2 + $0x7e8] sm:$0xff] }
 0x466   : > { %v2224_v9 = vpop.f32.mrb[52].mxu0  ;;  %6993 = vmatmul.mubr.f32.gmra.mrb[50].mxu1 %v2219_v6  ;;  %7089 = vmatmul.mubr.f32.gmra.mrb[114].mxu0 %v2219_v6  ;;  %v10039_v6 = vadd.f32 %v9924_v17, %v10009_v33  ;;  %v4307_v17 = vld [vmem:[#allocation2 + $0x4c8] sm:$0xff] }
 0x467   : > { %v2225_v11 = vadd.f32 %v2224_v9, %v9909_v49  ;;  %v9990_v12 = vpop.f32.mrb[53].mxu0  ;;  %v4323_v9 = vld [vmem:[#allocation2 + $0x6c8] sm:$0xff] }
 0x469   : > { %6994 = vmatprep.mubr.f32.mxu1 %v2225_v11  ;;  %7090 = vmatprep.mubr.f32.mxu0 %v2225_v11 }
 0x46a   : > { %v2230_v13 = vpop.f32.mrb[54].mxu0  ;;  %6995 = vmatmul.mubr.f32.gmra.mrb[52].mxu1 %v2225_v11  ;;  %7091 = vmatmul.mubr.f32.gmra.mrb[116].mxu0 %v2225_v11  ;;  %v4324_v11 = vld [vmem:[#allocation2 + $0x6e8] sm:$0xff] }
 0x46b   : > { %v2231_v15 = vadd.f32 %v2230_v13, %v9909_v49  ;;  %v9993_v16 = vpop.f32.mrb[55].mxu0  ;;  %v7690_v13 = vpack.c.bf16 %v4324_v11, %v4323_v9  ;;  %v7706_v9 = vpack.c.bf16 %v4332_v4, %v4331_v5  ;;  %v10093_v11 = vadd.f32 %v9951_v14, %v10009_v33 }
 0x46c   : > { %v10105_v14 = vadd.f32 %v9957_v28, %v10009_v33  ;;  %v10123_v28 = vadd.f32 %v9966_v39, %v10009_v33  ;;  %v2259_v39 = vld [vmem:[%s9407_s25] sm:$0xf]  ;;  %v10193_v4 = vadd.f32 %v9984_v3, %v10009_v33  ;;  %s15531_s25 = sld [smem:[#allocation248_spill]] }
 0x46d   : > { %6996 = vmatprep.mubr.f32.mxu1 %v2231_v15  ;;  %7092 = vmatprep.mubr.f32.mxu0 %v2231_v15 }
 0x46e   : > { %v2236_v18 = vpop.f32.mrb[56].mxu0  ;;  %6997 = vmatmul.mubr.f32.gmra.mrb[54].mxu1 %v2231_v15  ;;  %7093 = vmatmul.mubr.f32.gmra.mrb[118].mxu0 %v2231_v15  ;;  %v10045_v15 = vadd.f32 %v9927_v22, %v10009_v33 }
 0x46f   : > { %v2237_v19 = vadd.f32 %v2236_v18, %v9909_v49  ;;  %v9996_v20 = vpop.f32.mrb[57].mxu0  ;;  %v4308_v18 = vld [vmem:[#allocation2 + $0x4e8] sm:$0xff] }
 0x470   : > { %v7692_v22 = vpack.c.bf16 %v4308_v18, %v4307_v17  ;;  %v10111_v18 = vadd.f32 %v9960_v32, %v10009_v33  ;;  %v10129_v32 = vadd.f32 %v9969_v43, %v10009_v33  ;;  %v10146_v43 = vrot.slane %v2259_v39, %v9900_v50 }
 0x471   : > { %6998 = vmatprep.mubr.f32.mxu1 %v2237_v19  ;;  %7094 = vmatprep.mubr.f32.mxu0 %v2237_v19 }
 0x472   : > { %v2242_v21 = vpop.f32.mrb[58].mxu0  ;;  %6999 = vmatmul.mubr.f32.gmra.mrb[56].mxu1 %v2237_v19  ;;  %7095 = vmatmul.mubr.f32.gmra.mrb[120].mxu0 %v2237_v19  ;;  %v10051_v19 = vadd.f32 %v9930_v29, %v10009_v33  ;;  %v4309_v29 = vld [vmem:[#allocation2 + $0x508] sm:$0xff]  ;;  %14476 = vst [vmem:[#allocation27_spill] sm:$0xff] %v10146_v43 }
 0x473   : > { %v2243_v24 = vadd.f32 %v2242_v21, %v9909_v49  ;;  %v9999_v25 = vpop.f32.mrb[59].mxu0  ;;  %v4325_v21 = vld [vmem:[#allocation2 + $0x708] sm:$0xff] }
 0x475   : > { %7000 = vmatprep.mubr.f32.mxu1 %v2243_v24  ;;  %7096 = vmatprep.mubr.f32.mxu0 %v2243_v24 }
 0x476   : > { %v2248_v27 = vpop.f32.mrb[60].mxu0  ;;  %7001 = vmatmul.mubr.f32.gmra.mrb[58].mxu1 %v2243_v24  ;;  %7097 = vmatmul.mubr.f32.gmra.mrb[122].mxu0 %v2243_v24  ;;  %v4326_v24 = vld [vmem:[#allocation2 + $0x728] sm:$0xff] }
 0x477   : > { %v2249_v30 = vadd.f32 %v2248_v27, %v9909_v49  ;;  %v10005_v31 = vpop.f32.mrb[61].mxu0  ;;  %v7694_v27 = vpack.c.bf16 %v4326_v24, %v4325_v21  ;;  %v2271_v21 = vsub.s32 2, %v9897_v47  ;;  %v10143_v24 = vadd.f32 %v9975_v52, %v10009_v33 }
 0x479   : > { %7002 = vmatprep.mubr.f32.mxu1 %v2249_v30  ;;  %7098 = vmatprep.mubr.f32.mxu0 %v2249_v30 }
 0x47a   : > { %v2254_v35 = vpop.f32.mrb[62].mxu0  ;;  %7003 = vmatmul.mubr.f32.gmra.mrb[60].mxu1 %v2249_v30  ;;  %7099 = vmatmul.mubr.f32.gmra.mrb[124].mxu0 %v2249_v30  ;;  %v10057_v30 = vadd.f32 %v9933_v34, %v10009_v33 }
 0x47b   : > { %v2255_v37 = vadd.f32 %v2254_v35, %v9909_v49  ;;  %v10012_v38 = vpop.f32.mrb[63].mxu0  ;;  %v10021_v49 = vadd.f32 %v9915_v62, %v10009_v33  ;;  %v7684_v62 = vpack.c.bf16 %v4304_v56, %v4303_v57  ;;  %v4310_v35 = vld [vmem:[#allocation2 + $0x528] sm:$0xff] }
 0x47c   : > { %v7696_v34 = vpack.c.bf16 %v4310_v35, %v4309_v29  ;;  %v4329_v57 = vld [vmem:[#allocation2 + $0x788] sm:$0xff]  ;;  %v10158_v29 = vadd.f32 %v9978_v59, %v10009_v33  ;;  %v10172_v59 = vadd.f32 %v9981_v63, %v10009_v33 }
 0x47d   : > { %7004 = vmatprep.mubr.f32.mxu1 %v2255_v37  ;;  %7100 = vmatprep.mubr.f32.mxu0 %v2255_v37  ;;  %v4330_v56 = vld [vmem:[#allocation2 + $0x7a8] sm:$0xff] }
 0x47e   : > { %7005 = vmatmul.mubr.f32.gmra.mrb[62].mxu1 %v2255_v37  ;;  %7101 = vmatmul.mubr.f32.gmra.mrb[126].mxu0 %v2255_v37  ;;  %v10063_v37 = vadd.f32 %v9936_v41, %v10009_v33  ;;  %v4311_v41 = vld [vmem:[#allocation2 + $0x548] sm:$0xff]  ;;  %v7702_v60 = vpack.c.bf16 %v4330_v56, %v4329_v57 }
 0x47f   : > { %7134 = vmatprep.mubr.f32.mxu0 %v10016_v44 }
 0x482   : > { %7135 = vmatmul.mubr.f32.vlgmr.msra.gmra.mrb[128].mxu0 %v10016_v44 }
 0x483   : > { %7136 = vmatprep.mubr.f32.mxu0 %v10021_v49  ;;  %7681 = vmatpush3.bf16.xpose.msra.mxu0 %v7680_v51  ;;  %v4312_v51 = vld [vmem:[#allocation2 + $0x568] sm:$0xff] }
 0x484   : > { %7683 = vmatprep.subr.bf16.mxu0 %v7682_v55  ;;  %v10075_v55 = vadd.f32 %v9942_v58, %v10009_v33  ;;  %v7700_v46 = vpack.c.bf16 %v4312_v51, %v4311_v41  ;;  %v4313_v58 = vld [vmem:[#allocation2 + $0x588] sm:$0xff] }
 0x486   : > { %7137 = vmatmul.mubr.f32.gmra.mrb[130].mxu0 %v10021_v49 }
 0x487   : > { %7138 = vmatprep.mubr.f32.mxu0 %v10027_v54 }
 0x48a   : > { %7139 = vmatmul.mubr.f32.gmra.mrb[132].mxu0 %v10027_v54 }
 0x48b   : > { %7140 = vmatprep.mubr.f32.mxu0 %v10033_v2  ;;  %7685 = vmatpush3.bf16.xpose.msra.mxu0 %v7684_v62  ;;  %v4314_v62 = vld [vmem:[#allocation2 + $0x5a8] sm:$0xff] }
 0x48c   : > { %7687 = vmatprep.subr.bf16.mxu0 %v7686_v1  ;;  %v10087_v1 = vadd.f32 %v9948_v8, %v10009_v33  ;;  %v7704_v0 = vpack.c.bf16 %v4314_v62, %v4313_v58  ;;  %v4315_v8 = vld [vmem:[#allocation2 + $0x5c8] sm:$0xff] }
 0x48e   : > { %7141 = vmatmul.mubr.f32.gmra.mrb[134].mxu0 %v10033_v2 }
 0x48f   : > { %7142 = vmatprep.mubr.f32.mxu0 %v10039_v6 }
 0x492   : > { %7143 = vmatmul.mubr.f32.gmra.mrb[136].mxu0 %v10039_v6 }
 0x493   : > { %7144 = vmatprep.mubr.f32.mxu0 %v10045_v15  ;;  %7689 = vmatpush3.bf16.xpose.msra.mxu0 %v7688_v10  ;;  %v4316_v10 = vld [vmem:[#allocation2 + $0x5e8] sm:$0xff] }
 0x494   : > { %7691 = vmatprep.subr.bf16.mxu0 %v7690_v13  ;;  %v10099_v13 = vadd.f32 %v9954_v23, %v10009_v33  ;;  %v7708_v17 = vpack.c.bf16 %v4316_v10, %v4315_v8  ;;  %v10117_v23 = vadd.f32 %v9963_v36, %v10009_v33  ;;  %v10135_v36 = vadd.f32 %v9972_v53, %v10009_v33 }
 0x495   : > { %v10151_v53 = vrot.slane %v2259_v39, %v10002_v26 }
 0x496   : > { %7145 = vmatmul.mubr.f32.gmra.mrb[138].mxu0 %v10045_v15 }
 0x497   : > { %7146 = vmatprep.mubr.f32.mxu0 %v10051_v19 }
 0x49a   : > { %7147 = vmatmul.mubr.f32.gmra.mrb[140].mxu0 %v10051_v19 }
 0x49b   : > { %7148 = vmatprep.mubr.f32.mxu0 %v10057_v30  ;;  %7693 = vmatpush3.bf16.xpose.msra.mxu0 %v7692_v22  ;;  %v2275_v22 = vsub.s32 3, %v9897_v47 }
 0x49c   : > { %7695 = vmatprep.subr.bf16.mxu0 %v7694_v27  ;;  %v10154_v27 = vrot.slane %v2259_v39, %v2271_v21 }
 0x49d   : > { %v10164_v47 = vrot.slane %v2259_v39, %v2275_v22 }
 0x49e   : > { %7149 = vmatmul.mubr.f32.gmra.mrb[142].mxu0 %v10057_v30  ;;  %14477 = vst [vmem:[#allocation28_spill] sm:$0xff] %v10154_v27 }
 0x49f   : > { %7150 = vmatprep.mubr.f32.mxu0 %v10063_v37  ;;  %14478 = vst [vmem:[#allocation29_spill] sm:$0xff] %v10164_v47 }
 0x4a2   : > { %7151 = vmatmul.mubr.f32.gmra.mrb[144].mxu0 %v10063_v37 }
 0x4a3   : > { %7152 = vmatprep.mubr.f32.mxu0 %v10069_v48  ;;  %7697 = vmatpush3.bf16.xpose.msra.mxu0 %v7696_v34 }
 0x4a4   : > { %7699 = vmatprep.subr.bf16.mxu0 %v7698_v45 }
 0x4a6   : > { %7153 = vmatmul.mubr.f32.gmra.mrb[146].mxu0 %v10069_v48 }
 0x4a7   : > { %7154 = vmatprep.mubr.f32.mxu0 %v10075_v55 }
 0x4aa   : > { %7155 = vmatmul.mubr.f32.gmra.mrb[148].mxu0 %v10075_v55 }
 0x4ab   : > { %7156 = vmatprep.mubr.f32.mxu0 %v10081_v61  ;;  %7701 = vmatpush3.bf16.xpose.msra.mxu0 %v7700_v46 }
 0x4ac   : > { %7703 = vmatprep.subr.bf16.mxu0 %v7702_v60 }
 0x4ae   : > { %7157 = vmatmul.mubr.f32.gmra.mrb[150].mxu0 %v10081_v61 }
 0x4af   : > { %7158 = vmatprep.mubr.f32.mxu0 %v10087_v1 }
 0x4b2   : > { %7159 = vmatmul.mubr.f32.gmra.mrb[152].mxu0 %v10087_v1 }
 0x4b3   : > { %7160 = vmatprep.mubr.f32.mxu0 %v10093_v11  ;;  %7705 = vmatpush3.bf16.xpose.msra.mxu0 %v7704_v0 }
 0x4b4   : > { %7707 = vmatprep.subr.bf16.mxu0 %v7706_v9 }
 0x4b6   : > { %7161 = vmatmul.mubr.f32.gmra.mrb[154].mxu0 %v10093_v11 }
 0x4b7   : > { %7162 = vmatprep.mubr.f32.mxu0 %v10099_v13 }
 0x4ba   : > { %7163 = vmatmul.mubr.f32.gmra.mrb[156].mxu0 %v10099_v13 }
 0x4bb   : > { %7164 = vmatprep.mubr.f32.mxu0 %v10105_v14  ;;  %7709 = vmatpush3.bf16.xpose.msra.mxu0 %v7708_v17 }
 0x4be   : > { %7165 = vmatmul.mubr.f32.gmra.mrb[158].mxu0 %v10105_v14 }
 0x4bf   : > { %7166 = vmatprep.mubr.f32.mxu0 %v10111_v18 }
 0x4c2   : > { %7167 = vmatmul.mubr.f32.gmra.mrb[160].mxu0 %v10111_v18 }
 0x4c3   : > { %7168 = vmatprep.mubr.f32.mxu0 %v10117_v23 }
 0x4c6   : > { %7169 = vmatmul.mubr.f32.gmra.mrb[162].mxu0 %v10117_v23 }
 0x4c7   : > { %7170 = vmatprep.mubr.f32.mxu0 %v10123_v28 }
 0x4ca   : > { %7171 = vmatmul.mubr.f32.gmra.mrb[164].mxu0 %v10123_v28 }
 0x4cb   : > { %7172 = vmatprep.mubr.f32.mxu0 %v10129_v32 }
 0x4ce   : > { %7173 = vmatmul.mubr.f32.gmra.mrb[166].mxu0 %v10129_v32 }
 0x4cf   : > { %7174 = vmatprep.mubr.f32.mxu0 %v10135_v36 }
 0x4d2   : > { %7175 = vmatmul.mubr.f32.gmra.mrb[168].mxu0 %v10135_v36 }
 0x4d3   : > { %7176 = vmatprep.mubr.f32.mxu0 %v10143_v24 }
 0x4d5   : > { %v2475_v52 = vpop.f32.mrb[0].mxu1  ;;  %v2732_v35 = vpop.f32.mrb[64].mxu0 }
 0x4d6   : > { %v10161_v40 = vadd.f32 %v2475_v52, %v10146_v43  ;;  %v2477_v42 = vpop.f32.mrb[1].mxu1  ;;  %v2734_v34 = vpop.f32.mrb[65].mxu0  ;;  %7177 = vmatmul.mubr.f32.gmra.mrb[170].mxu0 %v10143_v24  ;;  %v10175_v41 = vadd.f32 %v2732_v35, %v10154_v27 }
 0x4d7   : > { %v10167_v45 = vadd.f32 %v2477_v42, %v10151_v53  ;;  %7178 = vmatprep.mubr.f32.mxu0 %v10158_v29  ;;  %v10184_v62 = vadd.f32 %v2734_v34, %v10164_v47  ;;  %v10215_v42 = vadd.f32 %v9987_v7, %v10009_v33 }
 0x4d9   : > { %v2923_v51 = vmax.f32 %v10161_v40, %v10167_v45  ;;  %v2481_v57 = vpop.f32.mrb[2].mxu1  ;;  %v2738_v56 = vpop.f32.mrb[66].mxu0 }
 0x4da   : > { %v10180_v46 = vadd.f32 %v2481_v57, %v10146_v43  ;;  %v2483_v60 = vpop.f32.mrb[3].mxu1  ;;  %v2740_v58 = vpop.f32.mrb[67].mxu0  ;;  %7179 = vmatmul.mubr.f32.gmra.mrb[172].mxu0 %v10158_v29  ;;  %v10196_v0 = vadd.f32 %v2738_v56, %v10154_v27 }
 0x4db   : > { %v10187_v63 = vadd.f32 %v2483_v60, %v10151_v53  ;;  %7180 = vmatprep.mubr.f32.mxu0 %v10172_v59  ;;  %v2924_v5 = vmax.f32 %v2923_v51, %v10175_v41  ;;  %v10206_v3 = vadd.f32 %v2740_v58, %v10164_v47 }
 0x4dd   : > { %v2928_v9 = vmax.f32 %v10180_v46, %v10187_v63  ;;  %v2487_v8 = vpop.f32.mrb[4].mxu1  ;;  %v2744_v10 = vpop.f32.mrb[68].mxu0  ;;  %v2925_v17 = vmax.f32 %v2924_v5, %v10184_v62 }
 0x4de   : > { %v10202_v39 = vadd.f32 %v2487_v8, %v10146_v43  ;;  %v2489_v21 = vpop.f32.mrb[5].mxu1  ;;  %v2746_v22 = vpop.f32.mrb[69].mxu0  ;;  %7181 = vmatmul.mubr.f32.gmra.mrb[174].mxu0 %v10172_v59  ;;  %v10218_v34 = vadd.f32 %v2744_v10, %v10154_v27 }
 0x4df   : > { %v10209_v52 = vadd.f32 %v2489_v21, %v10151_v53  ;;  %7182 = vmatprep.mubr.f32.mxu0 %v10193_v4  ;;  %2926 = vmax.xlane.f32.xlu0 %v2925_v17  ;;  %v2929_v35 = vmax.f32 %v2928_v9, %v10196_v0  ;;  %v10228_v7 = vadd.f32 %v2746_v22, %v10164_v47 }
 0x4e0   : > { %14479 = vst [vmem:[#allocation30_spill] sm:$0xff] %v10218_v34  ;;  %v10237_v17 = vadd.f32 %v9990_v12, %v10009_v33 }
 0x4e1   : > { %v2933_v51 = vmax.f32 %v10202_v39, %v10209_v52  ;;  %v2493_v57 = vpop.f32.mrb[6].mxu1  ;;  %v2750_v56 = vpop.f32.mrb[70].mxu0  ;;  %v2930_v60 = vmax.f32 %v2929_v35, %v10206_v3  ;;  %14481 = vst [vmem:[#allocation32_spill] sm:$0xff] %v10228_v7 }
 0x4e2   : > { %v10224_v58 = vadd.f32 %v2493_v57, %v10146_v43  ;;  %v2495_v5 = vpop.f32.mrb[7].mxu1  ;;  %v2752_v8 = vpop.f32.mrb[71].mxu0  ;;  %7183 = vmatmul.mubr.f32.gmra.mrb[176].mxu0 %v10193_v4  ;;  %v10240_v21 = vadd.f32 %v2750_v56, %v10154_v27 }
 0x4e3   : > { %v10231_v9 = vadd.f32 %v2495_v5, %v10151_v53  ;;  %7184 = vmatprep.mubr.f32.mxu0 %v10215_v42  ;;  %2931 = vmax.xlane.f32.xlu0 %v2930_v60  ;;  %v2934_v10 = vmax.f32 %v2933_v51, %v10218_v34  ;;  %v10250_v12 = vadd.f32 %v2752_v8, %v10164_v47 }
 0x4e4   : > { %14480 = vst [vmem:[#allocation31_spill] sm:$0xff] %v10224_v58  ;;  %14483 = vst [vmem:[#allocation34_spill] sm:$0xff] %v10240_v21 }
 0x4e5   : > { %14482 = vst [vmem:[#allocation33_spill] sm:$0xff] %v10231_v9  ;;  %v2938_v35 = vmax.f32 %v10224_v58, %v10231_v9  ;;  %v2499_v22 = vpop.f32.mrb[8].mxu1  ;;  %v2756_v57 = vpop.f32.mrb[72].mxu0  ;;  %v2935_v5 = vmax.f32 %v2934_v10, %v10228_v7  ;;  %14485 = vst [vmem:[#allocation36_spill] sm:$0xff] %v10250_v12  ;;  %v10259_v10 = vadd.f32 %v9993_v16, %v10009_v33 }
 0x4e6   : > { %v10246_v26 = vadd.f32 %v2499_v22, %v10146_v43  ;;  %v2501_v60 = vpop.f32.mrb[9].mxu1  ;;  %v2758_v50 = vpop.f32.mrb[73].mxu0  ;;  %7185 = vmatmul.mubr.f32.gmra.mrb[178].mxu0 %v10215_v42  ;;  %v10262_v22 = vadd.f32 %v2756_v57, %v10154_v27 }
 0x4e7   : > { %v10253_v51 = vadd.f32 %v2501_v60, %v10151_v53  ;;  %7186 = vmatprep.mubr.f32.mxu0 %v10237_v17  ;;  %2936 = vmax.xlane.f32.xlu1 %v2935_v5  ;;  %v2939_v56 = vmax.f32 %v2938_v35, %v10240_v21  ;;  %v10272_v16 = vadd.f32 %v2758_v50, %v10164_v47 }
 0x4e8   : > { %14484 = vst [vmem:[#allocation35_spill] sm:$0xff] %v10246_v26  ;;  %14487 = vst [vmem:[#allocation38_spill] sm:$0xff] %v10262_v22 }
 0x4e9   : > { %14486 = vst [vmem:[#allocation37_spill] sm:$0xff] %v10253_v51  ;;  %v2943_v9 = vmax.f32 %v10246_v26, %v10253_v51  ;;  %v2505_v8 = vpop.f32.mrb[10].mxu1  ;;  %v2762_v58 = vpop.f32.mrb[74].mxu0  ;;  %v2940_v60 = vmax.f32 %v2939_v56, %v10250_v12  ;;  %14489 = vst [vmem:[#allocation40_spill] sm:$0xff] %v10272_v16  ;;  %v10281_v56 = vadd.f32 %v9996_v20, %v10009_v33 }
 0x4ea   : > { %v10268_v7 = vadd.f32 %v2505_v8, %v10146_v43  ;;  %v2507_v5 = vpop.f32.mrb[11].mxu1  ;;  %v2764_v34 = vpop.f32.mrb[75].mxu0  ;;  %7187 = vmatmul.mubr.f32.gmra.mrb[180].mxu0 %v10237_v17  ;;  %v10284_v8 = vadd.f32 %v2762_v58, %v10154_v27 }
 0x4eb   : > { %v10275_v35 = vadd.f32 %v2507_v5, %v10151_v53  ;;  %7188 = vmatprep.mubr.f32.mxu0 %v10259_v10  ;;  %2941 = vmax.xlane.f32.xlu1 %v2940_v60  ;;  %v2944_v57 = vmax.f32 %v2943_v9, %v10262_v22  ;;  %v10294_v20 = vadd.f32 %v2764_v34, %v10164_v47 }
 0x4ec   : > { %14488 = vst [vmem:[#allocation39_spill] sm:$0xff] %v10268_v7  ;;  %14491 = vst [vmem:[#allocation42_spill] sm:$0xff] %v10284_v8 }
 0x4ed   : > { %14490 = vst [vmem:[#allocation41_spill] sm:$0xff] %v10275_v35  ;;  %v2948_v51 = vmax.f32 %v10268_v7, %v10275_v35  ;;  %v2511_v50 = vpop.f32.mrb[12].mxu1  ;;  %v2768_v26 = vpop.f32.mrb[76].mxu0  ;;  %v2945_v5 = vmax.f32 %v2944_v57, %v10272_v16  ;;  %14493 = vst [vmem:[#allocation44_spill] sm:$0xff] %v10294_v20  ;;  %v10303_v57 = vadd.f32 %v9999_v25, %v10009_v33 }
 0x4ee   : > { %v10290_v12 = vadd.f32 %v2511_v50, %v10146_v43  ;;  %v2513_v60 = vpop.f32.mrb[13].mxu1  ;;  %v2770_v21 = vpop.f32.mrb[77].mxu0  ;;  %7189 = vmatmul.mubr.f32.gmra.mrb[182].mxu0 %v10259_v10  ;;  %v10306_v50 = vadd.f32 %v2768_v26, %v10154_v27 }
 0x4ef   : > { %v10297_v58 = vadd.f32 %v2513_v60, %v10151_v53  ;;  %7190 = vmatprep.mubr.f32.mxu0 %v10281_v56  ;;  %2946 = vmax.xlane.f32.xlu0 %v2945_v5  ;;  %v2949_v9 = vmax.f32 %v2948_v51, %v10284_v8  ;;  %v10316_v25 = vadd.f32 %v2770_v21, %v10164_v47 }
 0x4f0   : > { %14492 = vst [vmem:[#allocation43_spill] sm:$0xff] %v10290_v12  ;;  %14495 = vst [vmem:[#allocation46_spill] sm:$0xff] %v10306_v50 }
 0x4f1   : > { %14494 = vst [vmem:[#allocation45_spill] sm:$0xff] %v10297_v58  ;;  %v2953_v35 = vmax.f32 %v10290_v12, %v10297_v58  ;;  %v2517_v34 = vpop.f32.mrb[14].mxu1  ;;  %v2774_v7 = vpop.f32.mrb[78].mxu0  ;;  %v2950_v60 = vmax.f32 %v2949_v9, %v10294_v20  ;;  %14497 = vst [vmem:[#allocation48_spill] sm:$0xff] %v10316_v25  ;;  %v10325_v9 = vadd.f32 %v10005_v31, %v10009_v33 }
 0x4f2   : > { %v10312_v16 = vadd.f32 %v2517_v34, %v10146_v43  ;;  %v2519_v5 = vpop.f32.mrb[15].mxu1  ;;  %v2776_v22 = vpop.f32.mrb[79].mxu0  ;;  %7191 = vmatmul.mubr.f32.gmra.mrb[184].mxu0 %v10281_v56  ;;  %v10328_v34 = vadd.f32 %v2774_v7, %v10154_v27 }
 0x4f3   : > { %v10319_v26 = vadd.f32 %v2519_v5, %v10151_v53  ;;  %7192 = vmatprep.mubr.f32.mxu0 %v10303_v57  ;;  %2951 = vmax.xlane.f32.xlu1 %v2950_v60  ;;  %v2954_v51 = vmax.f32 %v2953_v35, %v10306_v50  ;;  %v10338_v31 = vadd.f32 %v2776_v22, %v10164_v47 }
 0x4f4   : > { %14496 = vst [vmem:[#allocation47_spill] sm:$0xff] %v10312_v16 }
 0x4f5   : > { %14498 = vst [vmem:[#allocation49_spill] sm:$0xff] %v10319_v26  ;;  %v2958_v58 = vmax.f32 %v10312_v16, %v10319_v26  ;;  %v2523_v21 = vpop.f32.mrb[16].mxu1  ;;  %v2780_v12 = vpop.f32.mrb[80].mxu0  ;;  %v2955_v5 = vmax.f32 %v2954_v51, %v10316_v25  ;;  %14500 = vst [vmem:[#allocation51_spill] sm:$0xff] %v10338_v31  ;;  %v10347_v51 = vadd.f32 %v10012_v38, %v10009_v33 }
 0x4f6   : > { %v10334_v20 = vadd.f32 %v2523_v21, %v10146_v43  ;;  %v2525_v60 = vpop.f32.mrb[17].mxu1  ;;  %v2782_v8 = vpop.f32.mrb[81].mxu0  ;;  %7193 = vmatmul.mubr.f32.gmra.mrb[186].mxu0 %v10303_v57  ;;  %v10350_v21 = vadd.f32 %v2780_v12, %v10154_v27 }
 0x4f7   : > { %v10341_v7 = vadd.f32 %v2525_v60, %v10151_v53  ;;  %7194 = vmatprep.mubr.f32.mxu0 %v10325_v9  ;;  %2956 = vmax.xlane.f32.xlu0 %v2955_v5  ;;  %v2959_v35 = vmax.f32 %v2958_v58, %v10328_v34  ;;  %v10360_v33 = vadd.f32 %v2782_v8, %v10164_v47 }
 0x4f8   : > { %14499 = vst [vmem:[#allocation50_spill] sm:$0xff] %v10334_v20  ;;  %14502 = vst [vmem:[#allocation53_spill] sm:$0xff] %v10350_v21 }
 0x4f9   : > { %14501 = vst [vmem:[#allocation52_spill] sm:$0xff] %v10341_v7  ;;  %v2963_v26 = vmax.f32 %v10334_v20, %v10341_v7  ;;  %v2529_v22 = vpop.f32.mrb[18].mxu1  ;;  %v2786_v16 = vpop.f32.mrb[82].mxu0  ;;  %v2960_v60 = vmax.f32 %v2959_v35, %v10338_v31  ;;  %14504 = vst [vmem:[#allocation55_spill] sm:$0xff] %v10360_v33 }
 0x4fa   : > { %v10356_v25 = vadd.f32 %v2529_v22, %v10146_v43  ;;  %v2531_v5 = vpop.f32.mrb[19].mxu1  ;;  %v2788_v50 = vpop.f32.mrb[83].mxu0  ;;  %7195 = vmatmul.mubr.f32.gmra.mrb[188].mxu0 %v10325_v9  ;;  %v10368_v58 = vadd.f32 %v2786_v16, %v10154_v27 }
 0x4fb   : > { %v10363_v38 = vadd.f32 %v2531_v5, %v10151_v53  ;;  %7196 = vmatprep.mubr.f32.mxu0 %v10347_v51  ;;  %2961 = vmax.xlane.f32.xlu1 %v2960_v60  ;;  %v2964_v12 = vmax.f32 %v2963_v26, %v10350_v21  ;;  %v10378_v60 = vadd.f32 %v2788_v50, %v10164_v47 }
 0x4fc   : > { %14503 = vst [vmem:[#allocation54_spill] sm:$0xff] %v10356_v25 }
 0x4fd   : > { %14505 = vst [vmem:[#allocation56_spill] sm:$0xff] %v10363_v38  ;;  %v2968_v35 = vmax.f32 %v10356_v25, %v10363_v38  ;;  %v2535_v22 = vpop.f32.mrb[20].mxu1  ;;  %v2792_v7 = vpop.f32.mrb[84].mxu0  ;;  %v2965_v20 = vmax.f32 %v2964_v12, %v10360_v33  ;;  %14507 = vst [vmem:[#allocation58_spill] sm:$0xff] %v10378_v60 }
 0x4fe   : > { %v10374_v8 = vadd.f32 %v2535_v22, %v10146_v43  ;;  %v2537_v5 = vpop.f32.mrb[21].mxu1  ;;  %v2794_v31 = vpop.f32.mrb[85].mxu0  ;;  %7197 = vmatmul.mubr.f32.gmra.mrb[190].mxu0 %v10347_v51  ;;  %v10386_v12 = vadd.f32 %v2792_v7, %v10154_v27 }
 0x4ff   : > { %v10381_v16 = vadd.f32 %v2537_v5, %v10151_v53  ;;  %7230 = vmatprep.mubr.f32.mxu0 %v10016_v44  ;;  %2966 = vmax.xlane.f32.xlu0 %v2965_v20  ;;  %v2969_v26 = vmax.f32 %v2968_v35, %v10368_v58  ;;  %v10396_v20 = vadd.f32 %v2794_v31, %v10164_v47 }
 0x500   : > { %14506 = vst [vmem:[#allocation57_spill] sm:$0xff] %v10374_v8 }
 0x501   : > { %14508 = vst [vmem:[#allocation59_spill] sm:$0xff] %v10381_v16  ;;  %v2973_v22 = vmax.f32 %v10374_v8, %v10381_v16  ;;  %v2541_v38 = vpop.f32.mrb[22].mxu1  ;;  %v2798_v25 = vpop.f32.mrb[86].mxu0  ;;  %v2970_v33 = vmax.f32 %v2969_v26, %v10378_v60  ;;  %14510 = vst [vmem:[#allocation61_spill] sm:$0xff] %v10396_v20 }
 0x502   : > { %v10392_v50 = vadd.f32 %v2541_v38, %v10146_v43  ;;  %v2543_v5 = vpop.f32.mrb[23].mxu1  ;;  %v2800_v21 = vpop.f32.mrb[87].mxu0  ;;  %7231 = vmatmul.mubr.f32.vlgmr.msra.gmra.mrb[192].mxu0 %v10016_v44  ;;  %v10404_v26 = vadd.f32 %v2798_v25, %v10154_v27 }
 0x503   : > { %v10399_v7 = vadd.f32 %v2543_v5, %v10151_v53  ;;  %7232 = vmatprep.mubr.f32.mxu0 %v10021_v49  ;;  %2971 = vmax.xlane.f32.xlu1 %v2970_v33  ;;  %v2974_v35 = vmax.f32 %v2973_v22, %v10386_v12  ;;  %v10414_v33 = vadd.f32 %v2800_v21, %v10164_v47 }
 0x504   : > { %14509 = vst [vmem:[#allocation60_spill] sm:$0xff] %v10392_v50 }
 0x505   : > { %14511 = vst [vmem:[#allocation62_spill] sm:$0xff] %v10399_v7  ;;  %v2978_v38 = vmax.f32 %v10392_v50, %v10399_v7  ;;  %v2547_v16 = vpop.f32.mrb[24].mxu1  ;;  %v2804_v8 = vpop.f32.mrb[88].mxu0  ;;  %v2975_v44 = vmax.f32 %v2974_v35, %v10396_v20  ;;  %14513 = vst [vmem:[#allocation64_spill] sm:$0xff] %v10414_v33 }
 0x506   : > { %v10410_v31 = vadd.f32 %v2547_v16, %v10146_v43  ;;  %v2549_v5 = vpop.f32.mrb[25].mxu1  ;;  %v2806_v60 = vpop.f32.mrb[89].mxu0  ;;  %7233 = vmatmul.mubr.f32.gmra.mrb[194].mxu0 %v10021_v49  ;;  %v10422_v35 = vadd.f32 %v2804_v8, %v10154_v27 }
 0x507   : > { %v10417_v25 = vadd.f32 %v2549_v5, %v10151_v53  ;;  %7234 = vmatprep.mubr.f32.mxu0 %v10027_v54  ;;  %2976 = vmax.xlane.f32.xlu0 %v2975_v44  ;;  %v2979_v22 = vmax.f32 %v2978_v38, %v10404_v26  ;;  %v10432_v44 = vadd.f32 %v2806_v60, %v10164_v47 }
 0x508   : > { %14512 = vst [vmem:[#allocation63_spill] sm:$0xff] %v10410_v31 }
 0x509   : > { %14514 = vst [vmem:[#allocation65_spill] sm:$0xff] %v10417_v25  ;;  %v2983_v16 = vmax.f32 %v10410_v31, %v10417_v25  ;;  %v2553_v7 = vpop.f32.mrb[26].mxu1  ;;  %v2810_v50 = vpop.f32.mrb[90].mxu0  ;;  %v2980_v49 = vmax.f32 %v2979_v22, %v10414_v33  ;;  %14516 = vst [vmem:[#allocation67_spill] sm:$0xff] %v10432_v44 }
 0x50a   : > { %v10428_v21 = vadd.f32 %v2553_v7, %v10146_v43  ;;  %v2555_v5 = vpop.f32.mrb[27].mxu1  ;;  %v2812_v20 = vpop.f32.mrb[91].mxu0  ;;  %7235 = vmatmul.mubr.f32.gmra.mrb[196].mxu0 %v10027_v54  ;;  %v10440_v22 = vadd.f32 %v2810_v50, %v10154_v27 }
 0x50b   : > { %v10435_v8 = vadd.f32 %v2555_v5, %v10151_v53  ;;  %7236 = vmatprep.mubr.f32.mxu0 %v10033_v2  ;;  %2981 = vmax.xlane.f32.xlu1 %v2980_v49  ;;  %v2984_v38 = vmax.f32 %v2983_v16, %v10422_v35  ;;  %v10450_v49 = vadd.f32 %v2812_v20, %v10164_v47 }
 0x50c   : > { %14515 = vst [vmem:[#allocation66_spill] sm:$0xff] %v10428_v21 }
 0x50d   : > { %14517 = vst [vmem:[#allocation68_spill] sm:$0xff] %v10435_v8  ;;  %v2988_v7 = vmax.f32 %v10428_v21, %v10435_v8  ;;  %v2559_v25 = vpop.f32.mrb[28].mxu1  ;;  %v2816_v31 = vpop.f32.mrb[92].mxu0  ;;  %v2985_v54 = vmax.f32 %v2984_v38, %v10432_v44  ;;  %14519 = vst [vmem:[#allocation70_spill] sm:$0xff] %v10450_v49 }
 0x50e   : > { %v10446_v60 = vadd.f32 %v2559_v25, %v10146_v43  ;;  %v2561_v5 = vpop.f32.mrb[29].mxu1  ;;  %v2818_v33 = vpop.f32.mrb[93].mxu0  ;;  %7237 = vmatmul.mubr.f32.gmra.mrb[198].mxu0 %v10033_v2  ;;  %v10458_v38 = vadd.f32 %v2816_v31, %v10154_v27 }
 0x50f   : > { %v10453_v50 = vadd.f32 %v2561_v5, %v10151_v53  ;;  %7238 = vmatprep.mubr.f32.mxu0 %v10039_v6  ;;  %2986 = vmax.xlane.f32.xlu0 %v2985_v54  ;;  %v2989_v16 = vmax.f32 %v2988_v7, %v10440_v22  ;;  %v10468_v54 = vadd.f32 %v2818_v33, %v10164_v47 }
 0x510   : > { %14518 = vst [vmem:[#allocation69_spill] sm:$0xff] %v10446_v60 }
 0x511   : > { %14520 = vst [vmem:[#allocation71_spill] sm:$0xff] %v10453_v50  ;;  %v2993_v25 = vmax.f32 %v10446_v60, %v10453_v50  ;;  %v2565_v8 = vpop.f32.mrb[30].mxu1  ;;  %v2822_v21 = vpop.f32.mrb[94].mxu0  ;;  %v2990_v2 = vmax.f32 %v2989_v16, %v10450_v49  ;;  %14522 = vst [vmem:[#allocation73_spill] sm:$0xff] %v10468_v54 }
 0x512   : > { %v10464_v20 = vadd.f32 %v2565_v8, %v10146_v43  ;;  %v2567_v5 = vpop.f32.mrb[31].mxu1  ;;  %v2824_v44 = vpop.f32.mrb[95].mxu0  ;;  %7239 = vmatmul.mubr.f32.gmra.mrb[200].mxu0 %v10039_v6  ;;  %v10476_v16 = vadd.f32 %v2822_v21, %v10154_v27 }
 0x513   : > { %v10471_v31 = vadd.f32 %v2567_v5, %v10151_v53  ;;  %7240 = vmatprep.mubr.f32.mxu0 %v10045_v15  ;;  %2991 = vmax.xlane.f32.xlu1 %v2990_v2  ;;  %v2994_v7 = vmax.f32 %v2993_v25, %v10458_v38  ;;  %v10486_v2 = vadd.f32 %v2824_v44, %v10164_v47 }
 0x514   : > { %14521 = vst [vmem:[#allocation72_spill] sm:$0xff] %v10464_v20 }
 0x515   : > { %14523 = vst [vmem:[#allocation74_spill] sm:$0xff] %v10471_v31  ;;  %v2998_v8 = vmax.f32 %v10464_v20, %v10471_v31  ;;  %v2571_v50 = vpop.f32.mrb[32].mxu1  ;;  %v2828_v60 = vpop.f32.mrb[96].mxu0  ;;  %v2995_v6 = vmax.f32 %v2994_v7, %v10468_v54  ;;  %14525 = vst [vmem:[#allocation76_spill] sm:$0xff] %v10486_v2 }
 0x516   : > { %v10482_v33 = vadd.f32 %v2571_v50, %v10146_v43  ;;  %v2573_v5 = vpop.f32.mrb[33].mxu1  ;;  %v2830_v49 = vpop.f32.mrb[97].mxu0  ;;  %7241 = vmatmul.mubr.f32.gmra.mrb[202].mxu0 %v10045_v15  ;;  %v10494_v7 = vadd.f32 %v2828_v60, %v10154_v27 }
 0x517   : > { %v10489_v21 = vadd.f32 %v2573_v5, %v10151_v53  ;;  %7242 = vmatprep.mubr.f32.mxu0 %v10051_v19  ;;  %2996 = vmax.xlane.f32.xlu0 %v2995_v6  ;;  %v2999_v25 = vmax.f32 %v2998_v8, %v10476_v16  ;;  %v10504_v6 = vadd.f32 %v2830_v49, %v10164_v47 }
 0x518   : > { %14524 = vst [vmem:[#allocation75_spill] sm:$0xff] %v10482_v33 }
 0x519   : > { %14526 = vst [vmem:[#allocation77_spill] sm:$0xff] %v10489_v21  ;;  %v3003_v50 = vmax.f32 %v10482_v33, %v10489_v21  ;;  %v2577_v31 = vpop.f32.mrb[34].mxu1  ;;  %v2834_v20 = vpop.f32.mrb[98].mxu0  ;;  %v3000_v15 = vmax.f32 %v2999_v25, %v10486_v2  ;;  %14528 = vst [vmem:[#allocation79_spill] sm:$0xff] %v10504_v6 }
 0x51a   : > { %v10500_v44 = vadd.f32 %v2577_v31, %v10146_v43  ;;  %v2579_v5 = vpop.f32.mrb[35].mxu1  ;;  %v2836_v54 = vpop.f32.mrb[99].mxu0  ;;  %7243 = vmatmul.mubr.f32.gmra.mrb[204].mxu0 %v10051_v19  ;;  %v10512_v25 = vadd.f32 %v2834_v20, %v10154_v27 }
 0x51b   : > { %v10507_v60 = vadd.f32 %v2579_v5, %v10151_v53  ;;  %7244 = vmatprep.mubr.f32.mxu0 %v10057_v30  ;;  %3001 = vmax.xlane.f32.xlu1 %v3000_v15  ;;  %v3004_v8 = vmax.f32 %v3003_v50, %v10494_v7  ;;  %v10522_v15 = vadd.f32 %v2836_v54, %v10164_v47 }
 0x51c   : > { %14527 = vst [vmem:[#allocation78_spill] sm:$0xff] %v10500_v44 }
 0x51d   : > { %14529 = vst [vmem:[#allocation80_spill] sm:$0xff] %v10507_v60  ;;  %v3008_v31 = vmax.f32 %v10500_v44, %v10507_v60  ;;  %v2583_v21 = vpop.f32.mrb[36].mxu1  ;;  %v2840_v33 = vpop.f32.mrb[100].mxu0  ;;  %v3005_v19 = vmax.f32 %v3004_v8, %v10504_v6  ;;  %14531 = vst [vmem:[#allocation82_spill] sm:$0xff] %v10522_v15 }
 0x51e   : > { %v10518_v49 = vadd.f32 %v2583_v21, %v10146_v43  ;;  %v2585_v5 = vpop.f32.mrb[37].mxu1  ;;  %v2842_v2 = vpop.f32.mrb[101].mxu0  ;;  %7245 = vmatmul.mubr.f32.gmra.mrb[206].mxu0 %v10057_v30  ;;  %v10530_v8 = vadd.f32 %v2840_v33, %v10154_v27 }
 0x51f   : > { %v10525_v20 = vadd.f32 %v2585_v5, %v10151_v53  ;;  %7246 = vmatprep.mubr.f32.mxu0 %v10063_v37  ;;  %3006 = vmax.xlane.f32.xlu0 %v3005_v19  ;;  %v3009_v50 = vmax.f32 %v3008_v31, %v10512_v25  ;;  %v10540_v19 = vadd.f32 %v2842_v2, %v10164_v47 }
 0x520   : > { %14530 = vst [vmem:[#allocation81_spill] sm:$0xff] %v10518_v49 }
 0x521   : > { %14532 = vst [vmem:[#allocation83_spill] sm:$0xff] %v10525_v20  ;;  %v3013_v21 = vmax.f32 %v10518_v49, %v10525_v20  ;;  %v2589_v60 = vpop.f32.mrb[38].mxu1  ;;  %v2846_v44 = vpop.f32.mrb[102].mxu0  ;;  %v3010_v30 = vmax.f32 %v3009_v50, %v10522_v15  ;;  %14534 = vst [vmem:[#allocation85_spill] sm:$0xff] %v10540_v19 }
 0x522   : > { %v10536_v54 = vadd.f32 %v2589_v60, %v10146_v43  ;;  %v2591_v5 = vpop.f32.mrb[39].mxu1  ;;  %v2848_v6 = vpop.f32.mrb[103].mxu0  ;;  %7247 = vmatmul.mubr.f32.gmra.mrb[208].mxu0 %v10063_v37  ;;  %v10548_v50 = vadd.f32 %v2846_v44, %v10154_v27 }
 0x523   : > { %v10543_v33 = vadd.f32 %v2591_v5, %v10151_v53  ;;  %7248 = vmatprep.mubr.f32.mxu0 %v10069_v48  ;;  %3011 = vmax.xlane.f32.xlu1 %v3010_v30  ;;  %v3014_v31 = vmax.f32 %v3013_v21, %v10530_v8  ;;  %v10558_v30 = vadd.f32 %v2848_v6, %v10164_v47 }
 0x524   : > { %14533 = vst [vmem:[#allocation84_spill] sm:$0xff] %v10536_v54 }
 0x525   : > { %14535 = vst [vmem:[#allocation86_spill] sm:$0xff] %v10543_v33  ;;  %v3018_v60 = vmax.f32 %v10536_v54, %v10543_v33  ;;  %v2595_v20 = vpop.f32.mrb[40].mxu1  ;;  %v2852_v49 = vpop.f32.mrb[104].mxu0  ;;  %v3015_v37 = vmax.f32 %v3014_v31, %v10540_v19  ;;  %14537 = vst [vmem:[#allocation88_spill] sm:$0xff] %v10558_v30 }
 0x526   : > { %v10554_v2 = vadd.f32 %v2595_v20, %v10146_v43  ;;  %v2597_v5 = vpop.f32.mrb[41].mxu1  ;;  %v2854_v15 = vpop.f32.mrb[105].mxu0  ;;  %7249 = vmatmul.mubr.f32.gmra.mrb[210].mxu0 %v10069_v48  ;;  %v10566_v31 = vadd.f32 %v2852_v49, %v10154_v27 }
 0x527   : > { %v10561_v44 = vadd.f32 %v2597_v5, %v10151_v53  ;;  %7250 = vmatprep.mubr.f32.mxu0 %v10075_v55  ;;  %3016 = vmax.xlane.f32.xlu0 %v3015_v37  ;;  %v3019_v21 = vmax.f32 %v3018_v60, %v10548_v50  ;;  %v10576_v37 = vadd.f32 %v2854_v15, %v10164_v47 }
 0x528   : > { %14536 = vst [vmem:[#allocation87_spill] sm:$0xff] %v10554_v2 }
 0x529   : > { %14538 = vst [vmem:[#allocation89_spill] sm:$0xff] %v10561_v44  ;;  %v3023_v20 = vmax.f32 %v10554_v2, %v10561_v44  ;;  %v2601_v33 = vpop.f32.mrb[42].mxu1  ;;  %v2858_v54 = vpop.f32.mrb[106].mxu0  ;;  %v3020_v48 = vmax.f32 %v3019_v21, %v10558_v30  ;;  %14540 = vst [vmem:[#allocation91_spill] sm:$0xff] %v10576_v37 }
 0x52a   : > { %v10572_v6 = vadd.f32 %v2601_v33, %v10146_v43  ;;  %v2603_v5 = vpop.f32.mrb[43].mxu1  ;;  %v2860_v19 = vpop.f32.mrb[107].mxu0  ;;  %7251 = vmatmul.mubr.f32.gmra.mrb[212].mxu0 %v10075_v55  ;;  %v10584_v21 = vadd.f32 %v2858_v54, %v10154_v27 }
 0x52b   : > { %v10579_v49 = vadd.f32 %v2603_v5, %v10151_v53  ;;  %7252 = vmatprep.mubr.f32.mxu0 %v10081_v61  ;;  %3021 = vmax.xlane.f32.xlu1 %v3020_v48  ;;  %v3024_v60 = vmax.f32 %v3023_v20, %v10566_v31  ;;  %v10594_v48 = vadd.f32 %v2860_v19, %v10164_v47 }
 0x52c   : > { %14539 = vst [vmem:[#allocation90_spill] sm:$0xff] %v10572_v6 }
 0x52d   : > { %14541 = vst [vmem:[#allocation92_spill] sm:$0xff] %v10579_v49  ;;  %v3028_v33 = vmax.f32 %v10572_v6, %v10579_v49  ;;  %v2607_v44 = vpop.f32.mrb[44].mxu1  ;;  %v2864_v2 = vpop.f32.mrb[108].mxu0  ;;  %v3025_v55 = vmax.f32 %v3024_v60, %v10576_v37  ;;  %14543 = vst [vmem:[#allocation94_spill] sm:$0xff] %v10594_v48 }
 0x52e   : > { %v10590_v15 = vadd.f32 %v2607_v44, %v10146_v43  ;;  %v2609_v5 = vpop.f32.mrb[45].mxu1  ;;  %v2866_v30 = vpop.f32.mrb[109].mxu0  ;;  %7253 = vmatmul.mubr.f32.gmra.mrb[214].mxu0 %v10081_v61  ;;  %v10602_v60 = vadd.f32 %v2864_v2, %v10154_v27 }
 0x52f   : > { %v10597_v54 = vadd.f32 %v2609_v5, %v10151_v53  ;;  %7254 = vmatprep.mubr.f32.mxu0 %v10087_v1  ;;  %3026 = vmax.xlane.f32.xlu0 %v3025_v55  ;;  %v3029_v20 = vmax.f32 %v3028_v33, %v10584_v21  ;;  %v10612_v55 = vadd.f32 %v2866_v30, %v10164_v47 }
 0x530   : > { %14542 = vst [vmem:[#allocation93_spill] sm:$0xff] %v10590_v15 }
 0x531   : > { %14544 = vst [vmem:[#allocation95_spill] sm:$0xff] %v10597_v54  ;;  %v3033_v44 = vmax.f32 %v10590_v15, %v10597_v54  ;;  %v2613_v49 = vpop.f32.mrb[46].mxu1  ;;  %v2870_v6 = vpop.f32.mrb[110].mxu0  ;;  %v3030_v61 = vmax.f32 %v3029_v20, %v10594_v48  ;;  %14546 = vst [vmem:[#allocation97_spill] sm:$0xff] %v10612_v55 }
 0x532   : > { %v10608_v19 = vadd.f32 %v2613_v49, %v10146_v43  ;;  %v2615_v5 = vpop.f32.mrb[47].mxu1  ;;  %v2872_v37 = vpop.f32.mrb[111].mxu0  ;;  %7255 = vmatmul.mubr.f32.gmra.mrb[216].mxu0 %v10087_v1  ;;  %v10620_v20 = vadd.f32 %v2870_v6, %v10154_v27 }
 0x533   : > { %v10615_v2 = vadd.f32 %v2615_v5, %v10151_v53  ;;  %7256 = vmatprep.mubr.f32.mxu0 %v10093_v11  ;;  %3031 = vmax.xlane.f32.xlu1 %v3030_v61  ;;  %v3034_v33 = vmax.f32 %v3033_v44, %v10602_v60  ;;  %v10630_v61 = vadd.f32 %v2872_v37, %v10164_v47 }
 0x534   : > { %14545 = vst [vmem:[#allocation96_spill] sm:$0xff] %v10608_v19 }
 0x535   : > { %14547 = vst [vmem:[#allocation98_spill] sm:$0xff] %v10615_v2  ;;  %v3038_v49 = vmax.f32 %v10608_v19, %v10615_v2  ;;  %v2619_v54 = vpop.f32.mrb[48].mxu1  ;;  %v2876_v15 = vpop.f32.mrb[112].mxu0  ;;  %v3035_v1 = vmax.f32 %v3034_v33, %v10612_v55  ;;  %14549 = vst [vmem:[#allocation100_spill] sm:$0xff] %v10630_v61 }
 0x536   : > { %v10626_v30 = vadd.f32 %v2619_v54, %v10146_v43  ;;  %v2621_v5 = vpop.f32.mrb[49].mxu1  ;;  %v2878_v48 = vpop.f32.mrb[113].mxu0  ;;  %7257 = vmatmul.mubr.f32.gmra.mrb[218].mxu0 %v10093_v11  ;;  %v10638_v33 = vadd.f32 %v2876_v15, %v10154_v27 }
 0x537   : > { %v10633_v6 = vadd.f32 %v2621_v5, %v10151_v53  ;;  %7258 = vmatprep.mubr.f32.mxu0 %v10099_v13  ;;  %3036 = vmax.xlane.f32.xlu0 %v3035_v1  ;;  %v3039_v44 = vmax.f32 %v3038_v49, %v10620_v20  ;;  %v10648_v1 = vadd.f32 %v2878_v48, %v10164_v47 }
 0x538   : > { %14548 = vst [vmem:[#allocation99_spill] sm:$0xff] %v10626_v30 }
 0x539   : > { %14550 = vst [vmem:[#allocation101_spill] sm:$0xff] %v10633_v6  ;;  %v3043_v54 = vmax.f32 %v10626_v30, %v10633_v6  ;;  %v2625_v2 = vpop.f32.mrb[50].mxu1  ;;  %v2882_v19 = vpop.f32.mrb[114].mxu0  ;;  %v3040_v11 = vmax.f32 %v3039_v44, %v10630_v61  ;;  %14552 = vst [vmem:[#allocation103_spill] sm:$0xff] %v10648_v1 }
 0x53a   : > { %v10644_v37 = vadd.f32 %v2625_v2, %v10146_v43  ;;  %v2627_v5 = vpop.f32.mrb[51].mxu1  ;;  %v2884_v55 = vpop.f32.mrb[115].mxu0  ;;  %7259 = vmatmul.mubr.f32.gmra.mrb[220].mxu0 %v10099_v13  ;;  %v10656_v44 = vadd.f32 %v2882_v19, %v10154_v27 }
 0x53b   : > { %v10651_v15 = vadd.f32 %v2627_v5, %v10151_v53  ;;  %7260 = vmatprep.mubr.f32.mxu0 %v10105_v14  ;;  %3041 = vmax.xlane.f32.xlu1 %v3040_v11  ;;  %v3044_v49 = vmax.f32 %v3043_v54, %v10638_v33  ;;  %v10666_v11 = vadd.f32 %v2884_v55, %v10164_v47 }
 0x53c   : > { %14551 = vst [vmem:[#allocation102_spill] sm:$0xff] %v10644_v37 }
 0x53d   : > { %14553 = vst [vmem:[#allocation104_spill] sm:$0xff] %v10651_v15  ;;  %v3048_v2 = vmax.f32 %v10644_v37, %v10651_v15  ;;  %v2631_v6 = vpop.f32.mrb[52].mxu1  ;;  %v2888_v30 = vpop.f32.mrb[116].mxu0  ;;  %v3045_v13 = vmax.f32 %v3044_v49, %v10648_v1  ;;  %14555 = vst [vmem:[#allocation106_spill] sm:$0xff] %v10666_v11 }
 0x53e   : > { %v10662_v48 = vadd.f32 %v2631_v6, %v10146_v43  ;;  %v2633_v5 = vpop.f32.mrb[53].mxu1  ;;  %v2890_v61 = vpop.f32.mrb[117].mxu0  ;;  %7261 = vmatmul.mubr.f32.gmra.mrb[222].mxu0 %v10105_v14  ;;  %v10674_v49 = vadd.f32 %v2888_v30, %v10154_v27 }
 0x53f   : > { %v10669_v19 = vadd.f32 %v2633_v5, %v10151_v53  ;;  %7262 = vmatprep.mubr.f32.mxu0 %v10111_v18  ;;  %3046 = vmax.xlane.f32.xlu1 %v3045_v13  ;;  %v3049_v54 = vmax.f32 %v3048_v2, %v10656_v44  ;;  %v10684_v13 = vadd.f32 %v2890_v61, %v10164_v47 }
 0x540   : > { %14554 = vst [vmem:[#allocation105_spill] sm:$0xff] %v10662_v48  ;;  %14557 = vst [vmem:[#allocation108_spill] sm:$0xff] %v10674_v49 }
 0x541   : > { %14556 = vst [vmem:[#allocation107_spill] sm:$0xff] %v10669_v19  ;;  %v3053_v6 = vmax.f32 %v10662_v48, %v10669_v19  ;;  %v2637_v15 = vpop.f32.mrb[54].mxu1  ;;  %v2894_v37 = vpop.f32.mrb[118].mxu0  ;;  %v3050_v14 = vmax.f32 %v3049_v54, %v10666_v11  ;;  %14559 = vst [vmem:[#allocation110_spill] sm:$0xff] %v10684_v13 }
 0x542   : > { %v10680_v55 = vadd.f32 %v2637_v15, %v10146_v43  ;;  %v2639_v5 = vpop.f32.mrb[55].mxu1  ;;  %v2896_v1 = vpop.f32.mrb[119].mxu0  ;;  %7263 = vmatmul.mubr.f32.gmra.mrb[224].mxu0 %v10111_v18  ;;  %v10692_v54 = vadd.f32 %v2894_v37, %v10154_v27 }
 0x543   : > { %v10687_v30 = vadd.f32 %v2639_v5, %v10151_v53  ;;  %7264 = vmatprep.mubr.f32.mxu0 %v10117_v23  ;;  %3051 = vmax.xlane.f32.xlu1 %v3050_v14  ;;  %v3054_v2 = vmax.f32 %v3053_v6, %v10674_v49  ;;  %v10702_v14 = vadd.f32 %v2896_v1, %v10164_v47 }
 0x544   : > { %14558 = vst [vmem:[#allocation109_spill] sm:$0xff] %v10680_v55  ;;  %14561 = vst [vmem:[#allocation112_spill] sm:$0xff] %v10692_v54 }
 0x545   : > { %14560 = vst [vmem:[#allocation111_spill] sm:$0xff] %v10687_v30  ;;  %v3058_v15 = vmax.f32 %v10680_v55, %v10687_v30  ;;  %v2643_v19 = vpop.f32.mrb[56].mxu1  ;;  %v2900_v48 = vpop.f32.mrb[120].mxu0  ;;  %v3055_v18 = vmax.f32 %v3054_v2, %v10684_v13  ;;  %14563 = vst [vmem:[#allocation114_spill] sm:$0xff] %v10702_v14 }
 0x546   : > { %v10698_v61 = vadd.f32 %v2643_v19, %v10146_v43  ;;  %v2645_v5 = vpop.f32.mrb[57].mxu1  ;;  %v2902_v11 = vpop.f32.mrb[121].mxu0  ;;  %7265 = vmatmul.mubr.f32.gmra.mrb[226].mxu0 %v10117_v23  ;;  %v10710_v2 = vadd.f32 %v2900_v48, %v10154_v27 }
 0x547   : > { %v10705_v37 = vadd.f32 %v2645_v5, %v10151_v53  ;;  %7266 = vmatprep.mubr.f32.mxu0 %v10123_v28  ;;  %3056 = vmax.xlane.f32.xlu1 %v3055_v18  ;;  %v3059_v6 = vmax.f32 %v3058_v15, %v10692_v54  ;;  %v14087_v18 = vmov 0.0|0.0   ;;  %v10721_v48 = vadd.f32 %v2902_v11, %v10164_v47 }
 0x548   : > { %14562 = vst [vmem:[#allocation113_spill] sm:$0xff] %v10698_v61  ;;  %7550 = vmatprep.subr.bf16.mxu1 %v14087_v18 }
 0x549   : > { %14564 = vst [vmem:[#allocation115_spill] sm:$0xff] %v10705_v37  ;;  %v3063_v19 = vmax.f32 %v10698_v61, %v10705_v37  ;;  %v2649_v30 = vpop.f32.mrb[58].mxu1  ;;  %v2906_v55 = vpop.f32.mrb[122].mxu0  ;;  %v3060_v23 = vmax.f32 %v3059_v6, %v10702_v14  ;;  %v2346_v37 = vld [vmem:[#allocation2 + $0x30] sm:$0xff] }
 0x54a   : > { %v10716_v1 = vadd.f32 %v2649_v30, %v10146_v43  ;;  %v2651_v5 = vpop.f32.mrb[59].mxu1  ;;  %v2908_v13 = vpop.f32.mrb[123].mxu0  ;;  %7267 = vmatmul.mubr.f32.gmra.mrb[228].mxu0 %v10123_v28  ;;  %v2345_v30 = vld [vmem:[#allocation2 + $0x10] sm:$0xff]  ;;  %v10729_v14 = vadd.f32 %v2906_v55, %v10154_v27 }
 0x54b   : > { %v10724_v15 = vadd.f32 %v2651_v5, %v10151_v53  ;;  %7268 = vmatprep.mubr.f32.mxu0 %v10129_v32  ;;  %3061 = vmax.xlane.f32.xlu1 %v3060_v23  ;;  %v3064_v6 = vmax.f32 %v3063_v19, %v10710_v2  ;;  %v7551_v61 = vpack.c.bf16 %v2346_v37, %v2345_v30 }
 0x54c   : > { %14565 = vst [vmem:[#allocation116_spill] sm:$0xff] %v10716_v1  ;;  %v10739_v37 = vadd.f32 %v2908_v13, %v10164_v47 }
 0x54d   : > { %14566 = vst [vmem:[#allocation117_spill] sm:$0xff] %v10724_v15  ;;  %v3068_v28 = vmax.f32 %v10716_v1, %v10724_v15  ;;  %v2655_v18 = vpop.f32.mrb[60].mxu1  ;;  %v2912_v11 = vpop.f32.mrb[124].mxu0  ;;  %v3065_v54 = vmax.f32 %v3064_v6, %v10721_v48  ;;  %7552 = vmatpush1.bf16.msra.mxu1 %v7551_v61  ;;  %v14569_v6 = vmov 0.0|0.0  }
 0x54e   : > { %v10735_v5 = vadd.f32 %v2655_v18, %v10146_v43  ;;  %v2657_v49 = vpop.f32.mrb[61].mxu1  ;;  %v2914_v23 = vpop.f32.mrb[125].mxu0  ;;  %7269 = vmatmul.mubr.f32.gmra.mrb[230].mxu0 %v10129_v32  ;;  %7553 = vmatprep.subr.bf16.mxu1 %v14569_v6  ;;  %v10748_v18 = vadd.f32 %v2912_v11, %v10154_v27 }
 0x54f   : > { %v10742_v55 = vadd.f32 %v2657_v49, %v10151_v53  ;;  %7270 = vmatprep.mubr.f32.mxu0 %v10135_v36  ;;  %3066 = vmax.xlane.f32.xlu1 %v3065_v54  ;;  %v3069_v19 = vmax.f32 %v3068_v28, %v10729_v14  ;;  %v10758_v54 = vadd.f32 %v2914_v23, %v10164_v47 }
 0x550   : > { %14567 = vst [vmem:[#allocation118_spill] sm:$0xff] %v10735_v5 }
 0x551   : > { %14568 = vst [vmem:[#allocation119_spill] sm:$0xff] %v10742_v55  ;;  %v3073_v32 = vmax.f32 %v10735_v5, %v10742_v55  ;;  %v2661_v61 = vpop.f32.mrb[62].mxu1  ;;  %v2918_v30 = vpop.f32.mrb[126].mxu0  ;;  %v3070_v13 = vmax.f32 %v3069_v19, %v10739_v37  ;;  %v2347_v55 = vld [vmem:[#allocation2 + $0x50] sm:$0xff] }
 0x552   : > { %v10754_v49 = vadd.f32 %v2661_v61, %v10146_v43  ;;  %v2663_v15 = vpop.f32.mrb[63].mxu1  ;;  %v2920_v1 = vpop.f32.mrb[127].mxu0  ;;  %7271 = vmatmul.mubr.f32.gmra.mrb[232].mxu0 %v10135_v36  ;;  %v2348_v19 = vld [vmem:[#allocation2 + $0x70] sm:$0xff]  ;;  %v10766_v61 = vadd.f32 %v2918_v30, %v10154_v27 }
 0x553   : > { %v10761_v28 = vadd.f32 %v2663_v15, %v10151_v53  ;;  %7272 = vmatprep.mubr.f32.mxu0 %v10143_v24  ;;  %3071 = vmax.xlane.f32.xlu1 %v3070_v13  ;;  %v3074_v11 = vmax.f32 %v3073_v32, %v10748_v18  ;;  %v7554_v43 = vpack.c.bf16 %v2348_v19, %v2347_v55 }
 0x554   : > { %v10777_v13 = vadd.f32 %v2920_v1, %v10164_v47  ;;  %v2349_v1 = vld [vmem:[#allocation2 + $0x90] sm:$0xff] }
 0x555   : > { %v3078_v5 = vmax.f32 %v10754_v49, %v10761_v28  ;;  %v10770_v36 = vpop.f32.mrb[128].mxu0  ;;  %v3075_v23 = vmax.f32 %v3074_v11, %v10758_v54  ;;  %7555 = vmatpush1.bf16.msra.mxu1 %v7554_v43  ;;  %v2350_v11 = vld [vmem:[#allocation2 + $0xb0] sm:$0xff] }
 0x556   : > { %v10773_v15 = vpop.f32.mrb[129].mxu0  ;;  %7273 = vmatmul.mubr.f32.gmra.mrb[234].mxu0 %v10143_v24  ;;  %7556 = vmatprep.subr.bf16.mxu1 %v14569_v6  ;;  %v7557_v43 = vpack.c.bf16 %v2350_v11, %v2349_v1 }
 0x557   : > { %7274 = vmatprep.mubr.f32.mxu0 %v10158_v29  ;;  %3076 = vmax.xlane.f32.xlu1 %v3075_v23  ;;  %v3079_v32 = vmax.f32 %v3078_v5, %v10766_v61 }
 0x559   : > { %v10781_v30 = vpop.f32.mrb[130].mxu0  ;;  %v3080_v27 = vmax.f32 %v3079_v32, %v10777_v13  ;;  %7558 = vmatpush1.bf16.msra.mxu1 %v7557_v43  ;;  %v2352_v32 = vld [vmem:[#allocation2 + $0xf0] sm:$0xff] }
 0x55a   : > { %v10785_v55 = vpop.f32.mrb[131].mxu0  ;;  %7275 = vmatmul.mubr.f32.gmra.mrb[236].mxu0 %v10158_v29  ;;  %7559 = vmatprep.subr.bf16.mxu1 %v14569_v6 }
 0x55b   : > { %7276 = vmatprep.mubr.f32.mxu0 %v10172_v59  ;;  %3081 = vmax.xlane.f32.xlu1 %v3080_v27 }
 0x55d   : > { %v10789_v24 = vpop.f32.mrb[132].mxu0 }
 0x55e   : > { %v10791_v19 = vpop.f32.mrb[133].mxu0  ;;  %7277 = vmatmul.mubr.f32.gmra.mrb[238].mxu0 %v10172_v59  ;;  %v2351_v59 = vld [vmem:[#allocation2 + $0xd0] sm:$0xff] }
 0x55f   : > { %14570 = vst [vmem:[#allocation120_spill] sm:$0xff] %v10791_v19  ;;  %7278 = vmatprep.mubr.f32.mxu0 %v10193_v4  ;;  %v7560_v1 = vpack.c.bf16 %v2352_v32, %v2351_v59 }
 0x561   : > { %v10795_v5 = vpop.f32.mrb[134].mxu0  ;;  %7561 = vmatpush1.bf16.msra.mxu1 %v7560_v1 }
 0x562   : > { %14571 = vst [vmem:[#allocation121_spill] sm:$0xff] %v10795_v5  ;;  %v10798_v29 = vpop.f32.mrb[135].mxu0  ;;  %7279 = vmatmul.mubr.f32.gmra.mrb[240].mxu0 %v10193_v4  ;;  %7562 = vmatprep.subr.bf16.mxu1 %v14569_v6  ;;  %v2354_v5 = vld [vmem:[#allocation2 + $0x130] sm:$0xff] }
 0x563   : > { %14572 = vst [vmem:[#allocation122_spill] sm:$0xff] %v10798_v29  ;;  %7280 = vmatprep.mubr.f32.mxu0 %v10215_v42 }
 0x565   : > { %v10802_v27 = vpop.f32.mrb[136].mxu0 }
 0x566   : > { %14573 = vst [vmem:[#allocation123_spill] sm:$0xff] %v10802_v27  ;;  %v10804_v23 = vpop.f32.mrb[137].mxu0  ;;  %7281 = vmatmul.mubr.f32.gmra.mrb[242].mxu0 %v10215_v42 }
 0x567   : > { %14574 = vst [vmem:[#allocation124_spill] sm:$0xff] %v10804_v23  ;;  %7282 = vmatprep.mubr.f32.mxu0 %v10237_v17 }
 0x569   : > { %v10808_v11 = vpop.f32.mrb[138].mxu0 }
 0x56a   : > { %14575 = vst [vmem:[#allocation125_spill] sm:$0xff] %v10808_v11  ;;  %v10810_v43 = vpop.f32.mrb[139].mxu0  ;;  %7283 = vmatmul.mubr.f32.gmra.mrb[244].mxu0 %v10237_v17 }
 0x56b   : > { %14576 = vst [vmem:[#allocation126_spill] sm:$0xff] %v10810_v43  ;;  %7284 = vmatprep.mubr.f32.mxu0 %v10259_v10 }
 0x56c   : > { %v2927_v4 = vpop.xlane.xlu0 %2926 }
 0x56d   : > { %v3083_v47 = vsub.f32 %v10161_v40, %v2927_v4  ;;  %v3084_v42 = vsub.f32 %v10167_v45, %v2927_v4  ;;  %v3085_v23 = vsub.f32 %v10175_v41, %v2927_v4  ;;  %v10818_v27 = vpop.f32.mrb[140].mxu0  ;;  %v3086_v59 = vsub.f32 %v10184_v62, %v2927_v4 }
 0x56e   : > { %14577 = vst [vmem:[#allocation127_spill] sm:$0xff] %v10818_v27  ;;  %v10821_v32 = vpop.f32.mrb[141].mxu0  ;;  %7285 = vmatmul.mubr.f32.gmra.mrb[246].mxu0 %v10259_v10  ;;  %v2353_v27 = vld [vmem:[#allocation2 + $0x110] sm:$0xff] }
 0x56f   : > { %14578 = vst [vmem:[#allocation128_spill] sm:$0xff] %v10821_v32  ;;  %v3211_v17 = vmul.f32 1.442695, %v3083_v47  ;;  %v3213_v1 = vmul.f32 1.442695, %v3084_v42  ;;  %7286 = vmatprep.mubr.f32.mxu0 %v10281_v56  ;;  %v7563_v42 = vpack.c.bf16 %v2354_v5, %v2353_v27 }
 0x570   : > { %v3215_v43 = vmul.f32 1.442695, %v3085_v23  ;;  %v2932_v11 = vpop.xlane.xlu0 %2931  ;;  %v3217_v29 = vmul.f32 1.442695, %v3086_v59 }
 0x571   : > { %v3087_v40 = vsub.f32 %v10180_v46, %v2932_v11  ;;  %v3088_v45 = vsub.f32 %v10187_v63, %v2932_v11  ;;  %v10827_v41 = vpop.f32.mrb[142].mxu0  ;;  %8143 = vpow2.f32 %v3211_v17  ;;  %v3089_v62 = vsub.f32 %v10196_v0, %v2932_v11  ;;  %7564 = vmatpush1.bf16.msra.mxu1 %v7563_v42  ;;  %v2356_v42 = vld [vmem:[#allocation2 + $0x170] sm:$0xff] }
 0x572   : > { %14579 = vst [vmem:[#allocation129_spill] sm:$0xff] %v10827_v41  ;;  %v3090_v10 = vsub.f32 %v10206_v3, %v2932_v11  ;;  %v10831_v47 = vpop.f32.mrb[143].mxu0  ;;  %7287 = vmatmul.mubr.f32.gmra.mrb[248].mxu0 %v10281_v56  ;;  %8145 = vpow2.f32 %v3213_v1  ;;  %v14582_v11 = vld [vmem:[#allocation30_spill] sm:$0xff]  ;;  %v14583_v1 = vld [vmem:[#allocation32_spill] sm:$0xff]  ;;  %7565 = vmatprep.subr.bf16.mxu1 %v14569_v6 }
 0x573   : > { %14580 = vst [vmem:[#allocation130_spill] sm:$0xff] %v10831_v47  ;;  %v3219_v23 = vmul.f32 1.442695, %v3087_v40  ;;  %v3221_v4 = vmul.f32 1.442695, %v3088_v45  ;;  %7288 = vmatprep.mubr.f32.mxu0 %v10303_v57  ;;  %8147 = vpow2.f32 %v3215_v43  ;;  %v14585_v43 = vld [vmem:[#allocation31_spill] sm:$0xff] }
 0x574   : > { %v3223_v46 = vmul.f32 1.442695, %v3089_v62  ;;  %v2937_v63 = vpop.xlane.xlu1 %2936  ;;  %8149 = vpow2.f32 %v3217_v29  ;;  %v3225_v59 = vmul.f32 1.442695, %v3090_v10  ;;  %v14586_v10 = vld [vmem:[#allocation33_spill] sm:$0xff] }
 0x575   : > { %v3091_v17 = vsub.f32 %v10202_v39, %v2937_v63  ;;  %v3092_v0 = vsub.f32 %v10209_v52, %v2937_v63  ;;  %v10837_v3 = vpop.f32.mrb[144].mxu0  ;;  %8151 = vpow2.f32 %v3219_v23  ;;  %v3093_v56 = vsub.f32 %v14582_v11, %v2937_v63 }
 0x576   : > { %14581 = vst [vmem:[#allocation131_spill] sm:$0xff] %v10837_v3  ;;  %v3094_v40 = vsub.f32 %v14583_v1, %v2937_v63  ;;  %v10841_v45 = vpop.f32.mrb[145].mxu0  ;;  %7289 = vmatmul.mubr.f32.gmra.mrb[250].mxu0 %v10303_v57  ;;  %8153 = vpow2.f32 %v3221_v4  ;;  %v2355_v57 = vld [vmem:[#allocation2 + $0x150] sm:$0xff] }
 0x577   : > { %14584 = vst [vmem:[#allocation30_spill] sm:$0xff] %v10841_v45  ;;  %v3227_v5 = vmul.f32 1.442695, %v3091_v17  ;;  %v3229_v29 = vmul.f32 1.442695, %v3092_v0  ;;  %7290 = vmatprep.mubr.f32.mxu0 %v10325_v9  ;;  %8155 = vpow2.f32 %v3223_v46  ;;  %v14588_v4 = vld [vmem:[#allocation34_spill] sm:$0xff] }
 0x578   : > { %v3231_v39 = vmul.f32 1.442695, %v3093_v56  ;;  %v2942_v52 = vpop.xlane.xlu1 %2941  ;;  %8157 = vpow2.f32 %v3225_v59  ;;  %v3233_v27 = vmul.f32 1.442695, %v3094_v40  ;;  %v14589_v0 = vld [vmem:[#allocation36_spill] sm:$0xff] }
 0x579   : > { %v3095_v62 = vsub.f32 %v14585_v43, %v2942_v52  ;;  %v3096_v23 = vsub.f32 %v14586_v10, %v2942_v52  ;;  %v10848_v63 = vpop.f32.mrb[146].mxu0  ;;  %8159 = vpow2.f32 %v3227_v5  ;;  %v3097_v17 = vsub.f32 %v14588_v4, %v2942_v52  ;;  %v14598_v45 = vld [vmem:[#allocation40_spill] sm:$0xff] }
 0x57a   : > { %14587 = vst [vmem:[#allocation32_spill] sm:$0xff] %v10848_v63  ;;  %v3098_v11 = vsub.f32 %v14589_v0, %v2942_v52  ;;  %v10852_v1 = vpop.f32.mrb[147].mxu0  ;;  %7291 = vmatmul.mubr.f32.gmra.mrb[252].mxu0 %v10325_v9  ;;  %8161 = vpow2.f32 %v3229_v29  ;;  %v7566_v10 = vpack.c.bf16 %v2356_v42, %v2355_v57  ;;  %v14593_v52 = vld [vmem:[#allocation35_spill] sm:$0xff] }
 0x57b   : > { %14590 = vst [vmem:[#allocation31_spill] sm:$0xff] %v10852_v1  ;;  %v3235_v46 = vmul.f32 1.442695, %v3095_v62  ;;  %v3237_v59 = vmul.f32 1.442695, %v3096_v23  ;;  %7292 = vmatprep.mubr.f32.mxu0 %v10347_v51  ;;  %v10856_v56 = vpop.eup %8143  ;;  %8163 = vpow2.f32 %v3231_v39  ;;  %v14594_v1 = vld [vmem:[#allocation37_spill] sm:$0xff] }
 0x57c   : > { %14591 = vst [vmem:[#allocation33_spill] sm:$0xff] %v10856_v56  ;;  %v3239_v40 = vmul.f32 1.442695, %v3097_v17  ;;  %v2947_v43 = vpop.xlane.xlu0 %2946  ;;  %v10858_v5 = vpop.eup %8145  ;;  %8165 = vpow2.f32 %v3233_v27  ;;  %v3241_v4 = vmul.f32 1.442695, %v3098_v11  ;;  %v14597_v62 = vld [vmem:[#allocation38_spill] sm:$0xff]  ;;  %7567 = vmatpush1.bf16.msra.mxu1 %v7566_v10 }
 0x57d   : > { %14592 = vst [vmem:[#allocation34_spill] sm:$0xff] %v10858_v5  ;;  %v3099_v0 = vsub.f32 %v14593_v52, %v2947_v43  ;;  %v3100_v63 = vsub.f32 %v14594_v1, %v2947_v43  ;;  %v10862_v9 = vpop.f32.mrb[148].mxu0  ;;  %v10864_v29 = vpop.eup %8147  ;;  %8167 = vpow2.f32 %v3235_v46  ;;  %v3101_v23 = vsub.f32 %v14597_v62, %v2947_v43  ;;  %7568 = vmatprep.subr.bf16.mxu1 %v14569_v6  ;;  %v14603_v10 = vld [vmem:[#allocation39_spill] sm:$0xff]  ;;  %v14604_v62 = vld [vmem:[#allocation41_spill] sm:$0xff] }
 0x57e   : > { %14595 = vst [vmem:[#allocation36_spill] sm:$0xff] %v10862_v9  ;;  %14596 = vst [vmem:[#allocation35_spill] sm:$0xff] %v10864_v29  ;;  %v3102_v39 = vsub.f32 %v14598_v45, %v2947_v43  ;;  %v10868_v17 = vpop.f32.mrb[149].mxu0  ;;  %7293 = vmatmul.mubr.f32.gmra.mrb[254].mxu0 %v10347_v51  ;;  %v10871_v27 = vpop.eup %8149  ;;  %8169 = vpow2.f32 %v3237_v59  ;;  %v3467_v45 = vadd.f32 %v10858_v5, %v10856_v56 }
 0x57f   : > { %14599 = vst [vmem:[#allocation37_spill] sm:$0xff] %v10868_v17  ;;  %14600 = vst [vmem:[#allocation38_spill] sm:$0xff] %v10871_v27  ;;  %v3243_v57 = vmul.f32 1.442695, %v3099_v0  ;;  %v3245_v42 = vmul.f32 1.442695, %v3100_v63  ;;  %v10874_v11 = vpop.eup %8151  ;;  %8171 = vpow2.f32 %v3239_v40 }
 0x580   : > { %14601 = vst [vmem:[#allocation40_spill] sm:$0xff] %v10874_v11  ;;  %v3247_v1 = vmul.f32 1.442695, %v3101_v23  ;;  %v2952_v46 = vpop.xlane.xlu1 %2951  ;;  %v10878_v43 = vpop.eup %8153  ;;  %8173 = vpow2.f32 %v3241_v4  ;;  %v3249_v51 = vmul.f32 1.442695, %v3102_v39  ;;  %v14607_v17 = vld [vmem:[#allocation42_spill] sm:$0xff] }
 0x581   : > { %14602 = vst [vmem:[#allocation132_spill] sm:$0xff] %v10878_v43  ;;  %v3103_v52 = vsub.f32 %v14603_v10, %v2952_v46  ;;  %v3104_v59 = vsub.f32 %v14604_v62, %v2952_v46  ;;  %v10882_v0 = vpop.f32.mrb[150].mxu0  ;;  %v10884_v63 = vpop.eup %8155  ;;  %8175 = vpow2.f32 %v3243_v57  ;;  %v3105_v40 = vsub.f32 %v14607_v17, %v2952_v46  ;;  %v14608_v23 = vld [vmem:[#allocation44_spill] sm:$0xff]  ;;  %v14613_v57 = vld [vmem:[#allocation43_spill] sm:$0xff] }
 0x582   : > { %14605 = vst [vmem:[#allocation39_spill] sm:$0xff] %v10882_v0  ;;  %14606 = vst [vmem:[#allocation41_spill] sm:$0xff] %v10884_v63  ;;  %v3106_v9 = vsub.f32 %v14608_v23, %v2952_v46  ;;  %v10888_v3 = vpop.f32.mrb[151].mxu0  ;;  %v10890_v56 = vpop.eup %8157  ;;  %8177 = vpow2.f32 %v3245_v42  ;;  %v3468_v62 = vadd.f32 %v10864_v29, %v3467_v45  ;;  %v14614_v23 = vld [vmem:[#allocation45_spill] sm:$0xff] }
 0x583   : > { %14609 = vst [vmem:[#allocation42_spill] sm:$0xff] %v10888_v3  ;;  %14610 = vst [vmem:[#allocation44_spill] sm:$0xff] %v10890_v56  ;;  %v3251_v4 = vmul.f32 1.442695, %v3103_v52  ;;  %v3253_v39 = vmul.f32 1.442695, %v3104_v59  ;;  %v10892_v5 = vpop.eup %8159  ;;  %8179 = vpow2.f32 %v3247_v1 }
 0x584   : > { %14611 = vst [vmem:[#allocation133_spill] sm:$0xff] %v10892_v5  ;;  %v3255_v10 = vmul.f32 1.442695, %v3105_v40  ;;  %v2957_v0 = vpop.xlane.xlu0 %2956  ;;  %v10895_v47 = vpop.eup %8161  ;;  %8181 = vpow2.f32 %v3249_v51  ;;  %v3257_v17 = vmul.f32 1.442695, %v3106_v9  ;;  %v3469_v52 = vadd.f32 %v10871_v27, %v3468_v62  ;;  %v14617_v1 = vld [vmem:[#allocation46_spill] sm:$0xff] }
 0x585   : > { %14612 = vst [vmem:[#allocation134_spill] sm:$0xff] %v10895_v47  ;;  %v3107_v46 = vsub.f32 %v14613_v57, %v2957_v0  ;;  %v3108_v3 = vsub.f32 %v14614_v23, %v2957_v0  ;;  %v10899_v41 = vpop.f32.mrb[152].mxu0  ;;  %v10901_v42 = vpop.eup %8163  ;;  %8183 = vpow2.f32 %v3251_v4  ;;  %v3109_v59 = vsub.f32 %v14617_v1, %v2957_v0  ;;  %v14618_v40 = vld [vmem:[#allocation48_spill] sm:$0xff]  ;;  %v14623_v1 = vld [vmem:[#allocation47_spill] sm:$0xff] }
 0x586   : > { %14615 = vst [vmem:[#allocation43_spill] sm:$0xff] %v10899_v41  ;;  %14616 = vst [vmem:[#allocation45_spill] sm:$0xff] %v10901_v42  ;;  %v3110_v45 = vsub.f32 %v14618_v40, %v2957_v0  ;;  %v10906_v29 = vpop.f32.mrb[153].mxu0  ;;  %v10908_v32 = vpop.eup %8165  ;;  %8185 = vpow2.f32 %v3253_v39  ;;  %3470 = vadd.xlane.f32.xlu0 %v3469_v52  ;;  %v3472_v62 = vadd.f32 %v10878_v43, %v10874_v11  ;;  %v14624_v40 = vld [vmem:[#allocation49_spill] sm:$0xff]  ;;  %v14629_v11 = vld [vmem:[#allocation51_spill] sm:$0xff] }
 0x587   : > { %14619 = vst [vmem:[#allocation46_spill] sm:$0xff] %v10906_v29  ;;  %14620 = vst [vmem:[#allocation48_spill] sm:$0xff] %v10908_v32  ;;  %v3259_v9 = vmul.f32 1.442695, %v3107_v46  ;;  %v10910_v51 = vpop.eup %8167  ;;  %8187 = vpow2.f32 %v3255_v10  ;;  %v3261_v57 = vmul.f32 1.442695, %v3108_v3 }
 0x588   : > { %14621 = vst [vmem:[#allocation135_spill] sm:$0xff] %v10910_v51  ;;  %v2962_v23 = vpop.xlane.xlu1 %2961  ;;  %v10912_v41 = vpop.eup %8169  ;;  %v3263_v4 = vmul.f32 1.442695, %v3109_v59  ;;  %8189 = vpow2.f32 %v3257_v17  ;;  %v3265_v46 = vmul.f32 1.442695, %v3110_v45  ;;  %v3473_v59 = vadd.f32 %v10884_v63, %v3472_v62 }
 0x589   : > { %14622 = vst [vmem:[#allocation136_spill] sm:$0xff] %v10912_v41  ;;  %v3111_v0 = vsub.f32 %v14623_v1, %v2962_v23  ;;  %v3112_v27 = vsub.f32 %v14624_v40, %v2962_v23  ;;  %v10918_v29 = vpop.f32.mrb[154].mxu0  ;;  %v10920_v39 = vpop.eup %8171  ;;  %v3113_v10 = vsub.f32 %v10328_v34, %v2962_v23  ;;  %8191 = vpow2.f32 %v3259_v9 }
 0x58a   : > { %14625 = vst [vmem:[#allocation47_spill] sm:$0xff] %v10918_v29  ;;  %14626 = vst [vmem:[#allocation49_spill] sm:$0xff] %v10920_v39  ;;  %v10923_v3 = vpop.f32.mrb[155].mxu0  ;;  %v10925_v52 = vpop.eup %8173  ;;  %v3114_v43 = vsub.f32 %v14629_v11, %v2962_v23  ;;  %8193 = vpow2.f32 %v3261_v57  ;;  %v3474_v34 = vadd.f32 %v10890_v56, %v3473_v59  ;;  %v3477_v45 = vadd.f32 %v10895_v47, %v10892_v5  ;;  %v14634_v11 = vld [vmem:[#allocation50_spill] sm:$0xff]  ;;  %v14639_v56 = vld [vmem:[#allocation55_spill] sm:$0xff] }
 0x58b   : > { %14627 = vst [vmem:[#allocation137_spill] sm:$0xff] %v10923_v3  ;;  %14628 = vst [vmem:[#allocation138_spill] sm:$0xff] %v10925_v52  ;;  %v3267_v1 = vmul.f32 1.442695, %v3111_v0  ;;  %v10929_v6 = vpop.eup %8175  ;;  %v3269_v40 = vmul.f32 1.442695, %v3112_v27  ;;  %8195 = vpow2.f32 %v3263_v4 }
 0x58c   : > { %14630 = vst [vmem:[#allocation51_spill] sm:$0xff] %v10929_v6  ;;  %v2967_v29 = vpop.xlane.xlu0 %2966  ;;  %v10931_v19 = vpop.eup %8177  ;;  %v3271_v17 = vmul.f32 1.442695, %v3113_v10  ;;  %8197 = vpow2.f32 %v3265_v46  ;;  %v14635_v0 = vld [vmem:[#allocation52_spill] sm:$0xff]  ;;  %v14636_v27 = vld [vmem:[#allocation53_spill] sm:$0xff]  ;;  %3475 = vadd.xlane.f32.xlu0 %v3474_v34  ;;  %v3478_v59 = vadd.f32 %v10901_v42, %v3477_v45 }
 0x58d   : > { %14631 = vst [vmem:[#allocation139_spill] sm:$0xff] %v10931_v19  ;;  %v10936_v9 = vpop.f32.mrb[156].mxu0  ;;  %v10938_v62 = vpop.eup %8179  ;;  %v3115_v23 = vsub.f32 %v14634_v11, %v2967_v29  ;;  %v3116_v57 = vsub.f32 %v14635_v0, %v2967_v29  ;;  %v3117_v63 = vsub.f32 %v14636_v27, %v2967_v29  ;;  %8199 = vpow2.f32 %v3267_v1  ;;  %v14645_v45 = vld [vmem:[#allocation56_spill] sm:$0xff] }
 0x58e   : > { %14632 = vst [vmem:[#allocation140_spill] sm:$0xff] %v10936_v9  ;;  %14633 = vst [vmem:[#allocation141_spill] sm:$0xff] %v10938_v62  ;;  %v10943_v3 = vpop.f32.mrb[157].mxu0  ;;  %v10945_v4 = vpop.eup %8181  ;;  %v3273_v10 = vmul.f32 1.442695, %v3114_v43  ;;  %v3118_v5 = vsub.f32 %v14639_v56, %v2967_v29  ;;  %8201 = vpow2.f32 %v3269_v40  ;;  %v3479_v0 = vadd.f32 %v10908_v32, %v3478_v59  ;;  %v14644_v56 = vld [vmem:[#allocation54_spill] sm:$0xff] }
 0x58f   : > { %14637 = vst [vmem:[#allocation50_spill] sm:$0xff] %v10943_v3  ;;  %14638 = vst [vmem:[#allocation52_spill] sm:$0xff] %v10945_v4  ;;  %v10949_v47 = vpop.eup %8183  ;;  %v3275_v46 = vmul.f32 1.442695, %v3115_v23  ;;  %8203 = vpow2.f32 %v3271_v17  ;;  %v3277_v27 = vmul.f32 1.442695, %v3116_v57  ;;  %v3482_v1 = vadd.f32 %v10912_v41, %v10910_v51 }
 0x590   : > { %14640 = vst [vmem:[#allocation53_spill] sm:$0xff] %v10949_v47  ;;  %v2972_v11 = vpop.xlane.xlu1 %2971  ;;  %v10951_v9 = vpop.eup %8185  ;;  %v3279_v43 = vmul.f32 1.442695, %v3117_v63  ;;  %8205 = vpow2.f32 %v3273_v10  ;;  %3480 = vadd.xlane.f32.xlu0 %v3479_v0  ;;  %v3281_v17 = vmul.f32 1.442695, %v3118_v5  ;;  %v14647_v63 = vld [vmem:[#allocation58_spill] sm:$0xff] }
 0x591   : > { %14641 = vst [vmem:[#allocation55_spill] sm:$0xff] %v10951_v9  ;;  %v10954_v3 = vpop.f32.mrb[158].mxu0  ;;  %v10956_v34 = vpop.eup %8187  ;;  %v3119_v29 = vsub.f32 %v14644_v56, %v2972_v11  ;;  %v3120_v40 = vsub.f32 %v14645_v45, %v2972_v11  ;;  %v3121_v59 = vsub.f32 %v10368_v58, %v2972_v11  ;;  %8207 = vpow2.f32 %v3275_v46 }
 0x592   : > { %14642 = vst [vmem:[#allocation142_spill] sm:$0xff] %v10954_v3  ;;  %14643 = vst [vmem:[#allocation143_spill] sm:$0xff] %v10956_v34  ;;  %v10962_v23 = vpop.f32.mrb[159].mxu0  ;;  %v10965_v57 = vpop.eup %8189  ;;  %v3483_v42 = vadd.f32 %v10920_v39, %v3482_v1  ;;  %v3122_v32 = vsub.f32 %v14647_v63, %v2972_v11  ;;  %8209 = vpow2.f32 %v3277_v27  ;;  %v3487_v46 = vadd.f32 %v10931_v19, %v10929_v6  ;;  %v14652_v1 = vld [vmem:[#allocation57_spill] sm:$0xff]  ;;  %v14653_v27 = vld [vmem:[#allocation59_spill] sm:$0xff] }
 0x593   : > { %14646 = vst [vmem:[#allocation54_spill] sm:$0xff] %v10965_v57  ;;  %v3283_v3 = vmul.f32 1.442695, %v3119_v29  ;;  %v10969_v41 = vpop.eup %8191  ;;  %v3285_v56 = vmul.f32 1.442695, %v3120_v40  ;;  %8211 = vpow2.f32 %v3279_v43 }
 0x594   : > { %v2977_v51 = vpop.xlane.xlu0 %2976  ;;  %14648 = vst [vmem:[#allocation56_spill] sm:$0xff] %v10969_v41  ;;  %v10973_v10 = vpop.eup %8193  ;;  %v3484_v58 = vadd.f32 %v10925_v52, %v3483_v42  ;;  %v3287_v5 = vmul.f32 1.442695, %v3121_v59  ;;  %8213 = vpow2.f32 %v3281_v17  ;;  %v3289_v42 = vmul.f32 1.442695, %v3122_v32  ;;  %v14655_v59 = vld [vmem:[#allocation61_spill] sm:$0xff] }
 0x595   : > { %v10971_v45 = vpop.f32.mrb[160].mxu0  ;;  %14649 = vst [vmem:[#allocation58_spill] sm:$0xff] %v10973_v10  ;;  %v10980_v11 = vpop.eup %8195  ;;  %v3123_v29 = vsub.f32 %v14652_v1, %v2977_v51  ;;  %v3124_v40 = vsub.f32 %v14653_v27, %v2977_v51  ;;  %v3125_v63 = vsub.f32 %v10386_v12, %v2977_v51  ;;  %8215 = vpow2.f32 %v3283_v3 }
 0x596   : > { %v10978_v0 = vpop.f32.mrb[161].mxu0  ;;  %14651 = vst [vmem:[#allocation145_spill] sm:$0xff] %v10980_v11  ;;  %v10985_v39 = vpop.eup %8197  ;;  %3485 = vadd.xlane.f32.xlu0 %v3484_v58  ;;  %v3488_v43 = vadd.f32 %v10938_v62, %v3487_v46  ;;  %v3126_v52 = vsub.f32 %v14655_v59, %v2977_v51  ;;  %8217 = vpow2.f32 %v3285_v56  ;;  %v3492_v3 = vadd.f32 %v10951_v9, %v10949_v47  ;;  %v14660_v51 = vld [vmem:[#allocation60_spill] sm:$0xff]  ;;  %v14661_v59 = vld [vmem:[#allocation62_spill] sm:$0xff] }
 0x597   : > { %14650 = vst [vmem:[#allocation144_spill] sm:$0xff] %v10978_v0  ;;  %14654 = vst [vmem:[#allocation57_spill] sm:$0xff] %v10985_v39  ;;  %v10989_v19 = vpop.eup %8199  ;;  %v3291_v17 = vmul.f32 1.442695, %v3123_v29  ;;  %8219 = vpow2.f32 %v3287_v5  ;;  %v3293_v12 = vmul.f32 1.442695, %v3124_v40 }
 0x598   : > { %v2982_v6 = vpop.xlane.xlu1 %2981  ;;  %14656 = vst [vmem:[#allocation59_spill] sm:$0xff] %v10989_v19  ;;  %v10991_v0 = vpop.eup %8201  ;;  %v3489_v1 = vadd.f32 %v10945_v4, %v3488_v43  ;;  %v3295_v32 = vmul.f32 1.442695, %v3125_v63  ;;  %8221 = vpow2.f32 %v3289_v42  ;;  %v3297_v5 = vmul.f32 1.442695, %v3126_v52  ;;  %v14663_v63 = vld [vmem:[#allocation64_spill] sm:$0xff] }
 0x599   : > { %14657 = vst [vmem:[#allocation61_spill] sm:$0xff] %v10991_v0  ;;  %v10994_v27 = vpop.f32.mrb[162].mxu0  ;;  %v10996_v58 = vpop.eup %8203  ;;  %v3127_v46 = vsub.f32 %v14660_v51, %v2982_v6  ;;  %v3128_v62 = vsub.f32 %v14661_v59, %v2982_v6  ;;  %v3129_v29 = vsub.f32 %v10404_v26, %v2982_v6  ;;  %8223 = vpow2.f32 %v3291_v17 }
 0x59a   : > { %14658 = vst [vmem:[#allocation146_spill] sm:$0xff] %v10994_v27  ;;  %14659 = vst [vmem:[#allocation147_spill] sm:$0xff] %v10996_v58  ;;  %v11002_v56 = vpop.f32.mrb[163].mxu0  ;;  %3490 = vadd.xlane.f32.xlu0 %v3489_v1  ;;  %v11005_v40 = vpop.eup %8205  ;;  %v3493_v43 = vadd.f32 %v10956_v34, %v3492_v3  ;;  %v3130_v4 = vsub.f32 %v14663_v63, %v2982_v6  ;;  %8225 = vpow2.f32 %v3293_v12  ;;  %v14669_v3 = vld [vmem:[#allocation63_spill] sm:$0xff]  ;;  %v14670_v63 = vld [vmem:[#allocation65_spill] sm:$0xff] }
 0x59b   : > { %14662 = vst [vmem:[#allocation60_spill] sm:$0xff] %v11005_v40  ;;  %v3299_v27 = vmul.f32 1.442695, %v3127_v46  ;;  %v11011_v51 = vpop.eup %8207  ;;  %v3301_v59 = vmul.f32 1.442695, %v3128_v62  ;;  %8227 = vpow2.f32 %v3295_v32  ;;  %v3497_v1 = vadd.f32 %v10973_v10, %v10969_v41 }
 0x59c   : > { %v2987_v47 = vpop.xlane.xlu0 %2986  ;;  %14665 = vst [vmem:[#allocation64_spill] sm:$0xff] %v11011_v51  ;;  %v11015_v52 = vpop.eup %8209  ;;  %v3494_v26 = vadd.f32 %v10965_v57, %v3493_v43  ;;  %v3303_v17 = vmul.f32 1.442695, %v3129_v29  ;;  %8229 = vpow2.f32 %v3297_v5  ;;  %v3305_v32 = vmul.f32 1.442695, %v3130_v4  ;;  %v14672_v29 = vld [vmem:[#allocation67_spill] sm:$0xff] }
 0x59d   : > { %v11009_v9 = vpop.f32.mrb[164].mxu0  ;;  %14667 = vst [vmem:[#allocation149_spill] sm:$0xff] %v11015_v52  ;;  %v11020_v6 = vpop.eup %8211  ;;  %v3131_v46 = vsub.f32 %v14669_v3, %v2987_v47  ;;  %v3132_v34 = vsub.f32 %v14670_v63, %v2987_v47  ;;  %v3133_v62 = vsub.f32 %v10422_v35, %v2987_v47  ;;  %8231 = vpow2.f32 %v3299_v27 }
 0x59e   : > { %14664 = vst [vmem:[#allocation62_spill] sm:$0xff] %v11009_v9  ;;  %v11013_v42 = vpop.f32.mrb[165].mxu0  ;;  %14668 = vst [vmem:[#allocation150_spill] sm:$0xff] %v11020_v6  ;;  %v11025_v12 = vpop.eup %8213  ;;  %3495 = vadd.xlane.f32.xlu0 %v3494_v26  ;;  %v3498_v43 = vadd.f32 %v10980_v11, %v3497_v1  ;;  %v3134_v57 = vsub.f32 %v14672_v29, %v2987_v47  ;;  %8233 = vpow2.f32 %v3301_v59  ;;  %v14678_v1 = vld [vmem:[#allocation66_spill] sm:$0xff]  ;;  %v14679_v11 = vld [vmem:[#allocation68_spill] sm:$0xff] }
 0x59f   : > { %14666 = vst [vmem:[#allocation148_spill] sm:$0xff] %v11013_v42  ;;  %14671 = vst [vmem:[#allocation63_spill] sm:$0xff] %v11025_v12  ;;  %v11031_v10 = vpop.eup %8215  ;;  %v3307_v5 = vmul.f32 1.442695, %v3131_v46  ;;  %8235 = vpow2.f32 %v3303_v17  ;;  %v3309_v63 = vmul.f32 1.442695, %v3132_v34  ;;  %v3502_v47 = vadd.f32 %v10991_v0, %v10989_v19 }
 0x5a0   : > { %v2992_v42 = vpop.xlane.xlu1 %2991  ;;  %14674 = vst [vmem:[#allocation67_spill] sm:$0xff] %v11031_v10  ;;  %v11033_v3 = vpop.eup %8217  ;;  %v3499_v35 = vadd.f32 %v10985_v39, %v3498_v43  ;;  %v3311_v27 = vmul.f32 1.442695, %v3133_v62  ;;  %8237 = vpow2.f32 %v3305_v32  ;;  %v3313_v59 = vmul.f32 1.442695, %v3134_v57  ;;  %v14682_v62 = vld [vmem:[#allocation70_spill] sm:$0xff] }
 0x5a1   : > { %v11029_v41 = vpop.f32.mrb[166].mxu0  ;;  %14675 = vst [vmem:[#allocation151_spill] sm:$0xff] %v11033_v3  ;;  %v11038_v4 = vpop.eup %8219  ;;  %v3135_v29 = vsub.f32 %v14678_v1, %v2992_v42  ;;  %v3137_v17 = vsub.f32 %v10440_v22, %v2992_v42  ;;  %8239 = vpow2.f32 %v3307_v5  ;;  %v3503_v43 = vadd.f32 %v10996_v58, %v3502_v47 }
 0x5a2   : > { %14673 = vst [vmem:[#allocation65_spill] sm:$0xff] %v11029_v41  ;;  %v11036_v26 = vpop.f32.mrb[167].mxu0  ;;  %14677 = vst [vmem:[#allocation153_spill] sm:$0xff] %v11038_v4  ;;  %v3136_v41 = vsub.f32 %v14679_v11, %v2992_v42  ;;  %3500 = vadd.xlane.f32.xlu0 %v3499_v35  ;;  %v11047_v34 = vpop.eup %8221  ;;  %v3138_v39 = vsub.f32 %v14682_v62, %v2992_v42  ;;  %8241 = vpow2.f32 %v3309_v63  ;;  %v14687_v42 = vld [vmem:[#allocation69_spill] sm:$0xff] }
 0x5a3   : > { %14676 = vst [vmem:[#allocation152_spill] sm:$0xff] %v11036_v26  ;;  %14681 = vst [vmem:[#allocation68_spill] sm:$0xff] %v11047_v34  ;;  %v3315_v26 = vmul.f32 1.442695, %v3135_v29  ;;  %v11053_v1 = vpop.eup %8223  ;;  %8243 = vpow2.f32 %v3311_v27  ;;  %v3504_v22 = vadd.f32 %v11005_v40, %v3503_v43  ;;  %v3319_v32 = vmul.f32 1.442695, %v3137_v17 }
 0x5a4   : > { %v2997_v19 = vpop.xlane.xlu0 %2996  ;;  %14684 = vst [vmem:[#allocation154_spill] sm:$0xff] %v11053_v1  ;;  %v3317_v11 = vmul.f32 1.442695, %v3136_v41  ;;  %v11055_v57 = vpop.eup %8225  ;;  %v3507_v5 = vadd.f32 %v11015_v52, %v11011_v51  ;;  %8245 = vpow2.f32 %v3313_v59  ;;  %v14688_v29 = vld [vmem:[#allocation71_spill] sm:$0xff]  ;;  %v3321_v27 = vmul.f32 1.442695, %v3138_v39 }
 0x5a5   : > { %v11045_v46 = vpop.f32.mrb[168].mxu0  ;;  %14685 = vst [vmem:[#allocation155_spill] sm:$0xff] %v11055_v57  ;;  %v11060_v35 = vpop.eup %8227  ;;  %v3139_v47 = vsub.f32 %v14687_v42, %v2997_v19  ;;  %v3140_v62 = vsub.f32 %v14688_v29, %v2997_v19  ;;  %v3141_v58 = vsub.f32 %v10458_v38, %v2997_v19  ;;  %8247 = vpow2.f32 %v3315_v26  ;;  %v14691_v43 = vld [vmem:[#allocation73_spill] sm:$0xff] }
 0x5a6   : > { %14680 = vst [vmem:[#allocation66_spill] sm:$0xff] %v11045_v46  ;;  %v11051_v0 = vpop.f32.mrb[169].mxu0  ;;  %14686 = vst [vmem:[#allocation156_spill] sm:$0xff] %v11060_v35  ;;  %v11067_v41 = vpop.eup %8229  ;;  %3505 = vadd.xlane.f32.xlu0 %v3504_v22  ;;  %v3508_v17 = vadd.f32 %v11020_v6, %v3507_v5  ;;  %v3142_v40 = vsub.f32 %v14691_v43, %v2997_v19  ;;  %8249 = vpow2.f32 %v3317_v11  ;;  %v14696_v19 = vld [vmem:[#allocation72_spill] sm:$0xff]  ;;  %v14697_v43 = vld [vmem:[#allocation74_spill] sm:$0xff] }
 0x5a7   : > { %14683 = vst [vmem:[#allocation70_spill] sm:$0xff] %v11051_v0  ;;  %14690 = vst [vmem:[#allocation71_spill] sm:$0xff] %v11067_v41  ;;  %v11073_v59 = vpop.eup %8231  ;;  %v3323_v42 = vmul.f32 1.442695, %v3139_v47  ;;  %8251 = vpow2.f32 %v3319_v32  ;;  %v3327_v39 = vmul.f32 1.442695, %v3141_v58  ;;  %v3512_v26 = vadd.f32 %v11033_v3, %v11031_v10 }
 0x5a8   : > { %v3002_v51 = vpop.xlane.xlu1 %3001  ;;  %14693 = vst [vmem:[#allocation157_spill] sm:$0xff] %v11073_v59  ;;  %v11075_v29 = vpop.eup %8233  ;;  %v3509_v38 = vadd.f32 %v11025_v12, %v3508_v17  ;;  %8253 = vpow2.f32 %v3321_v27  ;;  %v3329_v11 = vmul.f32 1.442695, %v3142_v40  ;;  %v14701_v17 = vld [vmem:[#allocation76_spill] sm:$0xff] }
 0x5a9   : > { %v11065_v63 = vpop.f32.mrb[170].mxu0  ;;  %14694 = vst [vmem:[#allocation158_spill] sm:$0xff] %v11075_v29  ;;  %v11078_v22 = vpop.eup %8235  ;;  %v3143_v5 = vsub.f32 %v14696_v19, %v3002_v51  ;;  %v3144_v6 = vsub.f32 %v14697_v43, %v3002_v51  ;;  %v3145_v32 = vsub.f32 %v10476_v16, %v3002_v51  ;;  %8255 = vpow2.f32 %v3323_v42 }
 0x5aa   : > { %14689 = vst [vmem:[#allocation69_spill] sm:$0xff] %v11065_v63  ;;  %v11071_v52 = vpop.f32.mrb[171].mxu0  ;;  %v3325_v63 = vmul.f32 1.442695, %v3140_v62  ;;  %14695 = vst [vmem:[#allocation159_spill] sm:$0xff] %v11078_v22  ;;  %3510 = vadd.xlane.f32.xlu0 %v3509_v38  ;;  %v11089_v62 = vpop.eup %8237  ;;  %v3513_v58 = vadd.f32 %v11038_v4, %v3512_v26  ;;  %v3146_v12 = vsub.f32 %v14701_v17, %v3002_v51  ;;  %v14706_v51 = vld [vmem:[#allocation75_spill] sm:$0xff] }
 0x5ab   : > { %14692 = vst [vmem:[#allocation73_spill] sm:$0xff] %v11071_v52  ;;  %14700 = vst [vmem:[#allocation160_spill] sm:$0xff] %v11089_v62  ;;  %v3331_v10 = vmul.f32 1.442695, %v3143_v5  ;;  %v11093_v3 = vpop.eup %8239  ;;  %v3333_v43 = vmul.f32 1.442695, %v3144_v6  ;;  %v3517_v38 = vadd.f32 %v11055_v57, %v11053_v1 }
 0x5ac   : > { %v3007_v19 = vpop.xlane.xlu0 %3006  ;;  %14702 = vst [vmem:[#allocation76_spill] sm:$0xff] %v11093_v3  ;;  %8257 = vpow2.f32 %v3325_v63  ;;  %v11095_v27 = vpop.eup %8241  ;;  %v3514_v16 = vadd.f32 %v11047_v34, %v3513_v58  ;;  %v3335_v40 = vmul.f32 1.442695, %v3145_v32  ;;  %v14707_v17 = vld [vmem:[#allocation77_spill] sm:$0xff]  ;;  %v3337_v32 = vmul.f32 1.442695, %v3146_v12 }
 0x5ad   : > { %v11084_v52 = vpop.f32.mrb[172].mxu0  ;;  %14703 = vst [vmem:[#allocation161_spill] sm:$0xff] %v11095_v27  ;;  %8259 = vpow2.f32 %v3327_v39  ;;  %v11102_v26 = vpop.eup %8243  ;;  %v3147_v5 = vsub.f32 %v14706_v51, %v3007_v19  ;;  %v3148_v4 = vsub.f32 %v14707_v17, %v3007_v19  ;;  %v3149_v6 = vsub.f32 %v10494_v7, %v3007_v19  ;;  %v14710_v34 = vld [vmem:[#allocation79_spill] sm:$0xff] }
 0x5ae   : > { %14698 = vst [vmem:[#allocation72_spill] sm:$0xff] %v11084_v52  ;;  %v11087_v47 = vpop.f32.mrb[173].mxu0  ;;  %14705 = vst [vmem:[#allocation163_spill] sm:$0xff] %v11102_v26  ;;  %8261 = vpow2.f32 %v3329_v11  ;;  %v11109_v39 = vpop.eup %8245  ;;  %3515 = vadd.xlane.f32.xlu1 %v3514_v16  ;;  %v3518_v58 = vadd.f32 %v11060_v35, %v3517_v38  ;;  %v3150_v1 = vsub.f32 %v14710_v34, %v3007_v19  ;;  %v14715_v34 = vld [vmem:[#allocation78_spill] sm:$0xff]  ;;  %v14716_v38 = vld [vmem:[#allocation80_spill] sm:$0xff] }
 0x5af   : > { %14699 = vst [vmem:[#allocation74_spill] sm:$0xff] %v11087_v47  ;;  %14709 = vst [vmem:[#allocation77_spill] sm:$0xff] %v11109_v39  ;;  %8263 = vpow2.f32 %v3331_v10  ;;  %v3339_v11 = vmul.f32 1.442695, %v3147_v5  ;;  %v3341_v17 = vmul.f32 1.442695, %v3148_v4  ;;  %v3522_v12 = vadd.f32 %v11075_v29, %v11073_v59 }
 0x5b0   : > { %v3012_v57 = vpop.xlane.xlu1 %3011  ;;  %8265 = vpow2.f32 %v3333_v43  ;;  %v3519_v7 = vadd.f32 %v11067_v41, %v3518_v58  ;;  %v3343_v10 = vmul.f32 1.442695, %v3149_v6  ;;  %v14719_v6 = vld [vmem:[#allocation82_spill] sm:$0xff] }
 0x5b1   : > { %v11100_v42 = vpop.f32.mrb[174].mxu0  ;;  %8267 = vpow2.f32 %v3335_v40  ;;  %v3151_v19 = vsub.f32 %v14715_v34, %v3012_v57  ;;  %v3152_v35 = vsub.f32 %v14716_v38, %v3012_v57  ;;  %v3345_v40 = vmul.f32 1.442695, %v3150_v1 }
 0x5b2   : > { %14704 = vst [vmem:[#allocation162_spill] sm:$0xff] %v11100_v42  ;;  %v11107_v63 = vpop.f32.mrb[175].mxu0  ;;  %v11113_v42 = vpop.eup %8247  ;;  %8269 = vpow2.f32 %v3337_v32  ;;  %3520 = vadd.xlane.f32.xlu0 %v3519_v7  ;;  %v3153_v5 = vsub.f32 %v10512_v25, %v3012_v57  ;;  %v3523_v58 = vadd.f32 %v11078_v22, %v3522_v12  ;;  %v3154_v41 = vsub.f32 %v14719_v6, %v3012_v57  ;;  %v14725_v12 = vld [vmem:[#allocation81_spill] sm:$0xff] }
 0x5b3   : > { %14708 = vst [vmem:[#allocation75_spill] sm:$0xff] %v11107_v63  ;;  %14711 = vst [vmem:[#allocation79_spill] sm:$0xff] %v11113_v42  ;;  %v11115_v51 = vpop.eup %8249  ;;  %8271 = vpow2.f32 %v3339_v11  ;;  %v3349_v34 = vmul.f32 1.442695, %v3152_v35  ;;  %v3527_v11 = vadd.f32 %v11095_v27, %v11093_v3 }
 0x5b4   : > { %14712 = vst [vmem:[#allocation164_spill] sm:$0xff] %v11115_v51  ;;  %v11120_v16 = vpop.eup %8251  ;;  %v3017_v59 = vpop.xlane.xlu0 %3016  ;;  %8273 = vpow2.f32 %v3341_v17  ;;  %v3524_v25 = vadd.f32 %v11089_v62, %v3523_v58  ;;  %v3351_v1 = vmul.f32 1.442695, %v3153_v5  ;;  %v14726_v17 = vld [vmem:[#allocation83_spill] sm:$0xff]  ;;  %v14728_v58 = vld [vmem:[#allocation85_spill] sm:$0xff] }
 0x5b5   : > { %v11118_v63 = vpop.f32.mrb[176].mxu0  ;;  %14714 = vst [vmem:[#allocation166_spill] sm:$0xff] %v11120_v16  ;;  %v11129_v4 = vpop.eup %8253  ;;  %8275 = vpow2.f32 %v3343_v10  ;;  %v3156_v35 = vsub.f32 %v14726_v17, %v3017_v59  ;;  %v3157_v6 = vsub.f32 %v10530_v8, %v3017_v59  ;;  %v3353_v10 = vmul.f32 1.442695, %v3154_v41 }
 0x5b6   : > { %14713 = vst [vmem:[#allocation165_spill] sm:$0xff] %v11118_v63  ;;  %v11126_v43 = vpop.f32.mrb[177].mxu0  ;;  %14718 = vst [vmem:[#allocation80_spill] sm:$0xff] %v11129_v4  ;;  %v3347_v63 = vmul.f32 1.442695, %v3151_v19  ;;  %v11133_v29 = vpop.eup %8255  ;;  %8277 = vpow2.f32 %v3345_v40  ;;  %v3155_v19 = vsub.f32 %v14725_v12, %v3017_v59  ;;  %3525 = vadd.xlane.f32.xlu1 %v3524_v25  ;;  %v3528_v5 = vadd.f32 %v11102_v26, %v3527_v11 }
 0x5b7   : > { %14717 = vst [vmem:[#allocation78_spill] sm:$0xff] %v11126_v43  ;;  %14720 = vst [vmem:[#allocation82_spill] sm:$0xff] %v11133_v29  ;;  %v11137_v32 = vpop.eup %8257  ;;  %v3158_v62 = vsub.f32 %v14728_v58, %v3017_v59  ;;  %v3357_v8 = vmul.f32 1.442695, %v3156_v35  ;;  %v3359_v41 = vmul.f32 1.442695, %v3157_v6 }
 0x5b8   : > { %14722 = vst [vmem:[#allocation168_spill] sm:$0xff] %v11137_v32  ;;  %v11144_v57 = vpop.eup %8259  ;;  %8279 = vpow2.f32 %v3347_v63  ;;  %v3022_v3 = vpop.xlane.xlu1 %3021  ;;  %v3355_v40 = vmul.f32 1.442695, %v3155_v19  ;;  %v3529_v12 = vadd.f32 %v11109_v39, %v3528_v5  ;;  %v3532_v63 = vadd.f32 %v11115_v51, %v11113_v42  ;;  %v14733_v59 = vld [vmem:[#allocation84_spill] sm:$0xff]  ;;  %v14734_v58 = vld [vmem:[#allocation86_spill] sm:$0xff] }
 0x5b9   : > { %v11135_v38 = vpop.f32.mrb[178].mxu0  ;;  %14724 = vst [vmem:[#allocation170_spill] sm:$0xff] %v11144_v57  ;;  %v11149_v22 = vpop.eup %8261  ;;  %8281 = vpow2.f32 %v3349_v34  ;;  %v3159_v11 = vsub.f32 %v14733_v59, %v3022_v3  ;;  %v3160_v26 = vsub.f32 %v14734_v58, %v3022_v3  ;;  %v3161_v19 = vsub.f32 %v10548_v50, %v3022_v3  ;;  %v14737_v6 = vld [vmem:[#allocation88_spill] sm:$0xff] }
 0x5ba   : > { %14721 = vst [vmem:[#allocation167_spill] sm:$0xff] %v11135_v38  ;;  %v11142_v7 = vpop.f32.mrb[179].mxu0  ;;  %14727 = vst [vmem:[#allocation81_spill] sm:$0xff] %v11149_v22  ;;  %v11153_v27 = vpop.eup %8263  ;;  %8283 = vpow2.f32 %v3351_v1  ;;  %3530 = vadd.xlane.f32.xlu0 %v3529_v12  ;;  %v3361_v1 = vmul.f32 1.442695, %v3158_v62  ;;  %v3533_v5 = vadd.f32 %v11120_v16, %v3532_v63  ;;  %v3162_v39 = vsub.f32 %v14737_v6, %v3022_v3  ;;  %v14743_v63 = vld [vmem:[#allocation87_spill] sm:$0xff] }
 0x5bb   : > { %14723 = vst [vmem:[#allocation169_spill] sm:$0xff] %v11142_v7  ;;  %14729 = vst [vmem:[#allocation83_spill] sm:$0xff] %v11153_v27  ;;  %v11155_v7 = vpop.eup %8265  ;;  %8285 = vpow2.f32 %v3353_v10  ;;  %v3365_v58 = vmul.f32 1.442695, %v3160_v26  ;;  %v3537_v12 = vadd.f32 %v11137_v32, %v11133_v29  ;;  %v14744_v6 = vld [vmem:[#allocation89_spill] sm:$0xff] }
 0x5bc   : > { %14730 = vst [vmem:[#allocation85_spill] sm:$0xff] %v11155_v7  ;;  %v11160_v25 = vpop.eup %8267  ;;  %8287 = vpow2.f32 %v3355_v40  ;;  %v3027_v42 = vpop.xlane.xlu0 %3026  ;;  %v3534_v50 = vadd.f32 %v11129_v4, %v3533_v5  ;;  %v3367_v40 = vmul.f32 1.442695, %v3161_v19  ;;  %v14746_v5 = vld [vmem:[#allocation91_spill] sm:$0xff] }
 0x5bd   : > { %v11158_v17 = vpop.f32.mrb[180].mxu0  ;;  %14732 = vst [vmem:[#allocation172_spill] sm:$0xff] %v11160_v25  ;;  %v11169_v35 = vpop.eup %8269  ;;  %8289 = vpow2.f32 %v3357_v8  ;;  %v3164_v16 = vsub.f32 %v14744_v6, %v3027_v42  ;;  %v3165_v26 = vsub.f32 %v10566_v31, %v3027_v42  ;;  %v3538_v19 = vadd.f32 %v11144_v57, %v3537_v12 }
 0x5be   : > { %14731 = vst [vmem:[#allocation171_spill] sm:$0xff] %v11158_v17  ;;  %v11166_v34 = vpop.f32.mrb[181].mxu0  ;;  %14736 = vst [vmem:[#allocation86_spill] sm:$0xff] %v11169_v35  ;;  %v3363_v17 = vmul.f32 1.442695, %v3159_v11  ;;  %v11175_v59 = vpop.eup %8271  ;;  %8291 = vpow2.f32 %v3359_v41  ;;  %v3163_v11 = vsub.f32 %v14743_v63, %v3027_v42  ;;  %3535 = vadd.xlane.f32.xlu1 %v3534_v50  ;;  %v3166_v4 = vsub.f32 %v14746_v5, %v3027_v42  ;;  %v14752_v50 = vld [vmem:[#allocation90_spill] sm:$0xff] }
 0x5bf   : > { %14735 = vst [vmem:[#allocation84_spill] sm:$0xff] %v11166_v34  ;;  %14739 = vst [vmem:[#allocation173_spill] sm:$0xff] %v11175_v59  ;;  %v11179_v62 = vpop.eup %8273  ;;  %8293 = vpow2.f32 %v3361_v1  ;;  %v3369_v41 = vmul.f32 1.442695, %v3162_v39  ;;  %v3539_v31 = vadd.f32 %v11149_v22, %v3538_v19  ;;  %v3373_v6 = vmul.f32 1.442695, %v3164_v16 }
 0x5c0   : > { %14741 = vst [vmem:[#allocation175_spill] sm:$0xff] %v11179_v62  ;;  %v11184_v3 = vpop.eup %8275  ;;  %v3032_v8 = vpop.xlane.xlu1 %3031  ;;  %8295 = vpow2.f32 %v3363_v17  ;;  %v3371_v1 = vmul.f32 1.442695, %v3163_v11  ;;  %v3375_v39 = vmul.f32 1.442695, %v3165_v26  ;;  %v3542_v42 = vadd.f32 %v11155_v7, %v11153_v27  ;;  %v14753_v5 = vld [vmem:[#allocation92_spill] sm:$0xff] }
 0x5c1   : > { %v11173_v51 = vpop.f32.mrb[182].mxu0  ;;  %14742 = vst [vmem:[#allocation176_spill] sm:$0xff] %v11184_v3  ;;  %8297 = vpow2.f32 %v3365_v58  ;;  %v3167_v12 = vsub.f32 %v14752_v50, %v3032_v8  ;;  %v3168_v57 = vsub.f32 %v14753_v5, %v3032_v8  ;;  %3540 = vadd.xlane.f32.xlu0 %v3539_v31  ;;  %v3169_v11 = vsub.f32 %v10584_v21, %v3032_v8  ;;  %v14756_v22 = vld [vmem:[#allocation94_spill] sm:$0xff] }
 0x5c2   : > { %14738 = vst [vmem:[#allocation88_spill] sm:$0xff] %v11173_v51  ;;  %v11177_v10 = vpop.f32.mrb[183].mxu0  ;;  %8299 = vpow2.f32 %v3367_v40  ;;  %v3377_v40 = vmul.f32 1.442695, %v3166_v4  ;;  %v3543_v26 = vadd.f32 %v11160_v25, %v3542_v42  ;;  %v3170_v27 = vsub.f32 %v14756_v22, %v3032_v8  ;;  %v14761_v8 = vld [vmem:[#allocation93_spill] sm:$0xff]  ;;  %v14762_v25 = vld [vmem:[#allocation95_spill] sm:$0xff] }
 0x5c3   : > { %14740 = vst [vmem:[#allocation174_spill] sm:$0xff] %v11177_v10  ;;  %v11189_v10 = vpop.eup %8277  ;;  %8301 = vpow2.f32 %v3369_v41  ;;  %v3379_v7 = vmul.f32 1.442695, %v3167_v12  ;;  %v3381_v41 = vmul.f32 1.442695, %v3168_v57 }
 0x5c4   : > { %14745 = vst [vmem:[#allocation87_spill] sm:$0xff] %v11189_v10  ;;  %v11195_v32 = vpop.eup %8279  ;;  %8303 = vpow2.f32 %v3371_v1  ;;  %v3037_v50 = vpop.xlane.xlu0 %3036  ;;  %v3544_v21 = vadd.f32 %v11169_v35, %v3543_v26  ;;  %v3383_v31 = vmul.f32 1.442695, %v3169_v11  ;;  %v3547_v1 = vadd.f32 %v11179_v62, %v11175_v59  ;;  %v14765_v35 = vld [vmem:[#allocation97_spill] sm:$0xff] }
 0x5c5   : > { %v11193_v29 = vpop.f32.mrb[184].mxu0  ;;  %14748 = vst [vmem:[#allocation91_spill] sm:$0xff] %v11195_v32  ;;  %v11197_v63 = vpop.eup %8281  ;;  %8305 = vpow2.f32 %v3373_v6  ;;  %v3171_v12 = vsub.f32 %v14761_v8, %v3037_v50  ;;  %v3173_v57 = vsub.f32 %v10602_v60, %v3037_v50  ;;  %v3385_v11 = vmul.f32 1.442695, %v3170_v27 }
 0x5c6   : > { %14747 = vst [vmem:[#allocation89_spill] sm:$0xff] %v11193_v29  ;;  %14749 = vst [vmem:[#allocation177_spill] sm:$0xff] %v11197_v63  ;;  %v11200_v51 = vpop.f32.mrb[185].mxu0  ;;  %v11202_v17 = vpop.eup %8283  ;;  %8307 = vpow2.f32 %v3375_v39  ;;  %3545 = vadd.xlane.f32.xlu1 %v3544_v21  ;;  %v3548_v26 = vadd.f32 %v11184_v3, %v3547_v1  ;;  %v3174_v59 = vsub.f32 %v14765_v35, %v3037_v50 }
 0x5c7   : > { %14750 = vst [vmem:[#allocation178_spill] sm:$0xff] %v11200_v51  ;;  %14751 = vst [vmem:[#allocation179_spill] sm:$0xff] %v11202_v17  ;;  %v11213_v19 = vpop.eup %8285  ;;  %8309 = vpow2.f32 %v3377_v40  ;;  %v3387_v8 = vmul.f32 1.442695, %v3171_v12  ;;  %v3391_v27 = vmul.f32 1.442695, %v3173_v57  ;;  %v3552_v35 = vadd.f32 %v11197_v63, %v11195_v32 }
 0x5c8   : > { %v11208_v58 = vpop.xlane.xlu1 %3041  ;;  %14755 = vst [vmem:[#allocation92_spill] sm:$0xff] %v11213_v19  ;;  %v11219_v5 = vpop.eup %8287  ;;  %8311 = vpow2.f32 %v3379_v7  ;;  %v3549_v60 = vadd.f32 %v11189_v10, %v3548_v26 }
 0x5c9   : > { %v11211_v16 = vpop.f32.mrb[186].mxu0  ;;  %14758 = vst [vmem:[#allocation180_spill] sm:$0xff] %v11219_v5  ;;  %v11221_v4 = vpop.eup %8289  ;;  %8313 = vpow2.f32 %v3381_v41  ;;  %v14771_v41 = vld [vmem:[#allocation98_spill] sm:$0xff]  ;;  %v3553_v3 = vadd.f32 %v11202_v17, %v3552_v35 }
 0x5ca   : > { %14754 = vst [vmem:[#allocation90_spill] sm:$0xff] %v11211_v16  ;;  %v11217_v51 = vpop.f32.mrb[187].mxu0  ;;  %14759 = vst [vmem:[#allocation181_spill] sm:$0xff] %v11221_v4  ;;  %v11228_v22 = vpop.eup %8291  ;;  %8315 = vpow2.f32 %v3383_v31  ;;  %v3176_v1 = vsub.f32 %v14771_v41, %v11208_v58  ;;  %3550 = vadd.xlane.f32.xlu0 %v3549_v60  ;;  %v3393_v31 = vmul.f32 1.442695, %v3174_v59 }
 0x5cb   : > { %14757 = vst [vmem:[#allocation94_spill] sm:$0xff] %v11217_v51  ;;  %14760 = vst [vmem:[#allocation182_spill] sm:$0xff] %v11228_v22  ;;  %v3172_v51 = vsub.f32 %v14762_v25, %v3037_v50  ;;  %v11235_v39 = vpop.eup %8293  ;;  %v14770_v50 = vld [vmem:[#allocation96_spill] sm:$0xff]  ;;  %8317 = vpow2.f32 %v3385_v11 }
 0x5cc   : > { %v11226_v42 = vpop.xlane.xlu1 %3046  ;;  %14764 = vst [vmem:[#allocation95_spill] sm:$0xff] %v11235_v39  ;;  %v11241_v40 = vpop.eup %8295  ;;  %v3175_v21 = vsub.f32 %v14770_v50, %v11208_v58  ;;  %8319 = vpow2.f32 %v3387_v8  ;;  %v14775_v50 = vld [vmem:[#allocation100_spill] sm:$0xff]  ;;  %v3397_v11 = vmul.f32 1.442695, %v3176_v1  ;;  %v3557_v8 = vadd.f32 %v11221_v4, %v11219_v5 }
 0x5cd   : > { %v11233_v6 = vpop.f32.mrb[188].mxu0  ;;  %14767 = vst [vmem:[#allocation183_spill] sm:$0xff] %v11241_v40  ;;  %v11243_v25 = vpop.eup %8297  ;;  %v3178_v10 = vsub.f32 %v14775_v50, %v11208_v58 }
 0x5ce   : > { %14763 = vst [vmem:[#allocation93_spill] sm:$0xff] %v11233_v6  ;;  %v11239_v62 = vpop.f32.mrb[189].mxu0  ;;  %14768 = vst [vmem:[#allocation184_spill] sm:$0xff] %v11243_v25  ;;  %v3389_v6 = vmul.f32 1.442695, %v3172_v51  ;;  %v11248_v7 = vpop.eup %8299  ;;  %v3177_v51 = vsub.f32 %v10620_v20, %v11208_v58  ;;  %v3554_v20 = vadd.f32 %v11213_v19, %v3553_v3  ;;  %v14779_v58 = vld [vmem:[#allocation99_spill] sm:$0xff]  ;;  %v3558_v19 = vadd.f32 %v11228_v22, %v3557_v8 }
 0x5cf   : > { %14766 = vst [vmem:[#allocation97_spill] sm:$0xff] %v11239_v62  ;;  %14769 = vst [vmem:[#allocation185_spill] sm:$0xff] %v11248_v7  ;;  %v11262_v57 = vpop.eup %8301  ;;  %v3395_v32 = vmul.f32 1.442695, %v3175_v21  ;;  %v14780_v21 = vld [vmem:[#allocation101_spill] sm:$0xff] }
 0x5d0   : > { %v11246_v16 = vpop.xlane.xlu1 %3051  ;;  %14774 = vst [vmem:[#allocation186_spill] sm:$0xff] %v11262_v57  ;;  %v11267_v41 = vpop.eup %8303  ;;  %8321 = vpow2.f32 %v3389_v6  ;;  %v3399_v63 = vmul.f32 1.442695, %v3177_v51  ;;  %v3179_v6 = vsub.f32 %v14779_v58, %v11226_v42  ;;  %v3180_v1 = vsub.f32 %v14780_v21, %v11226_v42  ;;  %3555 = vadd.xlane.f32.xlu1 %v3554_v20 }
 0x5d1   : > { %v11256_v12 = vpop.f32.mrb[190].mxu0  ;;  %14776 = vst [vmem:[#allocation100_spill] sm:$0xff] %v11267_v41  ;;  %v11271_v59 = vpop.eup %8305  ;;  %8323 = vpow2.f32 %v3391_v27  ;;  %v3181_v27 = vsub.f32 %v10638_v33, %v11226_v42  ;;  %v3401_v51 = vmul.f32 1.442695, %v3178_v10  ;;  %v3559_v33 = vadd.f32 %v11235_v39, %v3558_v19 }
 0x5d2   : > { %14772 = vst [vmem:[#allocation96_spill] sm:$0xff] %v11256_v12  ;;  %v11260_v26 = vpop.f32.mrb[191].mxu0  ;;  %14777 = vst [vmem:[#allocation187_spill] sm:$0xff] %v11271_v59  ;;  %v11278_v17 = vpop.eup %8307  ;;  %8325 = vpow2.f32 %v3393_v31  ;;  %v14782_v31 = vld [vmem:[#allocation103_spill] sm:$0xff]  ;;  %v3403_v58 = vmul.f32 1.442695, %v3179_v6  ;;  %v3562_v10 = vadd.f32 %v11243_v25, %v11241_v40 }
 0x5d3   : > { %14773 = vst [vmem:[#allocation98_spill] sm:$0xff] %v11260_v26  ;;  %14778 = vst [vmem:[#allocation188_spill] sm:$0xff] %v11278_v17  ;;  %v11288_v3 = vpop.eup %8309  ;;  %8327 = vpow2.f32 %v3395_v32  ;;  %v3182_v5 = vsub.f32 %v14782_v31, %v11226_v42  ;;  %v3405_v26 = vmul.f32 1.442695, %v3180_v1  ;;  %v3407_v32 = vmul.f32 1.442695, %v3181_v27  ;;  %3560 = vadd.xlane.f32.xlu0 %v3559_v33 }
 0x5d4   : > { %v11269_v60 = vpop.xlane.xlu1 %3056  ;;  %14781 = vst [vmem:[#allocation99_spill] sm:$0xff] %v11288_v3  ;;  %v11293_v4 = vpop.eup %8311  ;;  %8329 = vpow2.f32 %v3397_v11  ;;  %v14786_v42 = vld [vmem:[#allocation102_spill] sm:$0xff]  ;;  %v14787_v11 = vld [vmem:[#allocation104_spill] sm:$0xff]  ;;  %v3185_v1 = vsub.f32 %v10656_v44, %v11246_v16  ;;  %v3563_v22 = vadd.f32 %v11248_v7, %v3562_v10 }
 0x5d5   : > { %v11276_v35 = vpop.f32.mrb[192].mxu0  ;;  %14783 = vst [vmem:[#allocation101_spill] sm:$0xff] %v11293_v4  ;;  %v11295_v21 = vpop.eup %8313  ;;  %8331 = vpow2.f32 %v3399_v63  ;;  %v3183_v8 = vsub.f32 %v14786_v42, %v11246_v16  ;;  %v3184_v6 = vsub.f32 %v14787_v11, %v11246_v16  ;;  %v3409_v19 = vmul.f32 1.442695, %v3182_v5  ;;  %v14789_v42 = vld [vmem:[#allocation106_spill] sm:$0xff] }
 0x5d6   : > { %v11286_v50 = vpop.f32.mrb[193].mxu0  ;;  %14784 = vst [vmem:[#allocation103_spill] sm:$0xff] %v11295_v21  ;;  %v11300_v20 = vpop.eup %8315  ;;  %8333 = vpow2.f32 %v3401_v51  ;;  %v3186_v39 = vsub.f32 %v14789_v42, %v11246_v16  ;;  %v3564_v44 = vadd.f32 %v11262_v57, %v3563_v22  ;;  %v3415_v5 = vmul.f32 1.442695, %v3185_v1  ;;  %v14793_v16 = vld [vmem:[#allocation105_spill] sm:$0xff]  ;;  %v14795_v42 = vld [vmem:[#allocation108_spill] sm:$0xff] }
 0x5d7   : > { %14785 = vst [vmem:[#allocation189_spill] sm:$0xff] %v11300_v20  ;;  %v11314_v27 = vpop.eup %8317  ;;  %8335 = vpow2.f32 %v3403_v58  ;;  %v3411_v40 = vmul.f32 1.442695, %v3183_v8  ;;  %v3413_v25 = vmul.f32 1.442695, %v3184_v6  ;;  %v3567_v58 = vadd.f32 %v11271_v59, %v11267_v41  ;;  %v14794_v8 = vld [vmem:[#allocation107_spill] sm:$0xff] }
 0x5d8   : > { %v11308_v31 = vpop.xlane.xlu1 %3061  ;;  %14788 = vst [vmem:[#allocation102_spill] sm:$0xff] %v11314_v27  ;;  %v11319_v11 = vpop.eup %8319  ;;  %8337 = vpow2.f32 %v3405_v26  ;;  %v3187_v26 = vsub.f32 %v14793_v16, %v11269_v60  ;;  %v3188_v6 = vsub.f32 %v14794_v8, %v11269_v60  ;;  %3565 = vadd.xlane.f32.xlu1 %v3564_v44  ;;  %v3417_v22 = vmul.f32 1.442695, %v3186_v39  ;;  %v14797_v57 = vld [vmem:[#allocation110_spill] sm:$0xff] }
 0x5d9   : > { %v11298_v12 = vpop.f32.mrb[194].mxu0  ;;  %14790 = vst [vmem:[#allocation104_spill] sm:$0xff] %v11319_v11  ;;  %8339 = vpow2.f32 %v3407_v32  ;;  %v3189_v32 = vsub.f32 %v14795_v42, %v11269_v60  ;;  %v3568_v1 = vadd.f32 %v11278_v17, %v3567_v58  ;;  %v3190_v41 = vsub.f32 %v14797_v57, %v11269_v60  ;;  %v14801_v60 = vld [vmem:[#allocation109_spill] sm:$0xff] }
 0x5da   : > { %v11310_v63 = vpop.f32.mrb[195].mxu0  ;;  %v11323_v51 = vpop.eup %8321  ;;  %8341 = vpow2.f32 %v3409_v19  ;;  %v3419_v16 = vmul.f32 1.442695, %v3187_v26  ;;  %v3421_v29 = vmul.f32 1.442695, %v3188_v6  ;;  %v3572_v57 = vadd.f32 %v11295_v21, %v11293_v4  ;;  %v14803_v6 = vld [vmem:[#allocation112_spill] sm:$0xff] }
 0x5db   : > { %14791 = vst [vmem:[#allocation106_spill] sm:$0xff] %v11323_v51  ;;  %v11330_v10 = vpop.eup %8323  ;;  %8343 = vpow2.f32 %v3411_v40  ;;  %v3569_v42 = vadd.f32 %v11288_v3, %v3568_v1  ;;  %v3423_v40 = vmul.f32 1.442695, %v3189_v32  ;;  %v3191_v58 = vsub.f32 %v14801_v60, %v11308_v31  ;;  %v14804_v3 = vld [vmem:[#allocation114_spill] sm:$0xff] }
 0x5dc   : > { %14792 = vst [vmem:[#allocation190_spill] sm:$0xff] %v11330_v10  ;;  %v11338_v7 = vpop.eup %8325  ;;  %v11343_v19 = vpop.xlane.xlu1 %3066  ;;  %8345 = vpow2.f32 %v3413_v25  ;;  %v14802_v25 = vld [vmem:[#allocation111_spill] sm:$0xff]  ;;  %v3193_v1 = vsub.f32 %v14803_v6, %v11308_v31  ;;  %v3194_v32 = vsub.f32 %v14804_v3, %v11308_v31  ;;  %v3573_v4 = vadd.f32 %v11300_v20, %v3572_v57  ;;  %v14809_v6 = vld [vmem:[#allocation113_spill] sm:$0xff] }
 0x5dd   : > { %v11321_v62 = vpop.f32.mrb[196].mxu0  ;;  %14796 = vst [vmem:[#allocation105_spill] sm:$0xff] %v11338_v7  ;;  %v11345_v59 = vpop.eup %8327  ;;  %8347 = vpow2.f32 %v3415_v5  ;;  %v3192_v26 = vsub.f32 %v14802_v25, %v11308_v31  ;;  %3570 = vadd.xlane.f32.xlu0 %v3569_v42  ;;  %v3425_v5 = vmul.f32 1.442695, %v3190_v41  ;;  %v3427_v60 = vmul.f32 1.442695, %v3191_v58 }
 0x5de   : > { %v11328_v33 = vpop.f32.mrb[197].mxu0  ;;  %14798 = vst [vmem:[#allocation107_spill] sm:$0xff] %v11345_v59  ;;  %v11347_v8 = vpop.eup %8329  ;;  %8349 = vpow2.f32 %v3417_v22  ;;  %v3574_v3 = vadd.f32 %v11314_v27, %v3573_v4  ;;  %v3431_v31 = vmul.f32 1.442695, %v3193_v1  ;;  %v3433_v58 = vmul.f32 1.442695, %v3194_v32 }
 0x5df   : > { %14799 = vst [vmem:[#allocation108_spill] sm:$0xff] %v11347_v8  ;;  %v11352_v39 = vpop.eup %8331  ;;  %8351 = vpow2.f32 %v3419_v16  ;;  %v3429_v22 = vmul.f32 1.442695, %v3192_v26  ;;  %v3577_v16 = vadd.f32 %v11323_v51, %v11319_v11  ;;  %v14810_v26 = vld [vmem:[#allocation115_spill] sm:$0xff] }
 0x5e0   : > { %14800 = vst [vmem:[#allocation110_spill] sm:$0xff] %v11352_v39  ;;  %v11366_v34 = vpop.eup %8333  ;;  %8353 = vpow2.f32 %v3421_v29  ;;  %v3072_v42 = vpop.xlane.xlu1 %3071  ;;  %v3195_v29 = vsub.f32 %v14809_v6, %v11343_v19  ;;  %v3196_v20 = vsub.f32 %v14810_v26, %v11343_v19  ;;  %3575 = vadd.xlane.f32.xlu1 %v3574_v3 }
 0x5e1   : > { %v11350_v44 = vpop.f32.mrb[198].mxu0  ;;  %14805 = vst [vmem:[#allocation109_spill] sm:$0xff] %v11366_v34  ;;  %v11371_v25 = vpop.eup %8335  ;;  %8355 = vpow2.f32 %v3423_v40  ;;  %v3578_v4 = vadd.f32 %v11330_v10, %v3577_v16  ;;  %v3197_v40 = vsub.f32 %v10710_v2, %v11343_v19  ;;  %v3582_v2 = vadd.f32 %v11347_v8, %v11345_v59 }
 0x5e2   : > { %v11360_v17 = vpop.f32.mrb[199].mxu0  ;;  %14806 = vst [vmem:[#allocation111_spill] sm:$0xff] %v11371_v25  ;;  %v11375_v38 = vpop.eup %8337  ;;  %8357 = vpow2.f32 %v3425_v5  ;;  %v3198_v5 = vsub.f32 %v10721_v48, %v11343_v19  ;;  %v3435_v32 = vmul.f32 1.442695, %v3195_v29  ;;  %v3437_v6 = vmul.f32 1.442695, %v3196_v20 }
 0x5e3   : > { %14807 = vst [vmem:[#allocation112_spill] sm:$0xff] %v11375_v38  ;;  %v11380_v57 = vpop.eup %8339  ;;  %8359 = vpow2.f32 %v3427_v60  ;;  %v3579_v60 = vadd.f32 %v11338_v7, %v3578_v4  ;;  %v3439_v3 = vmul.f32 1.442695, %v3197_v40  ;;  %v14816_v48 = vld [vmem:[#allocation117_spill] sm:$0xff]  ;;  %v3201_v19 = vsub.f32 %v10729_v14, %v3072_v42 }
 0x5e4   : > { %14808 = vst [vmem:[#allocation114_spill] sm:$0xff] %v11380_v57  ;;  %v11386_v43 = vpop.eup %8341  ;;  %8361 = vpow2.f32 %v3429_v22  ;;  %v14815_v22 = vld [vmem:[#allocation116_spill] sm:$0xff]  ;;  %v3077_v51 = vpop.xlane.xlu1 %3076  ;;  %v3200_v20 = vsub.f32 %v14816_v48, %v3072_v42  ;;  %v3583_v40 = vadd.f32 %v11352_v39, %v3582_v2  ;;  %v14822_v48 = vld [vmem:[#allocation118_spill] sm:$0xff] }
 0x5e5   : > { %v11369_v21 = vpop.f32.mrb[200].mxu0  ;;  %14811 = vst [vmem:[#allocation113_spill] sm:$0xff] %v11386_v43  ;;  %v11393_v27 = vpop.eup %8343  ;;  %8363 = vpow2.f32 %v3431_v31  ;;  %v3199_v10 = vsub.f32 %v14815_v22, %v3072_v42  ;;  %3580 = vadd.xlane.f32.xlu0 %v3579_v60  ;;  %v3202_v31 = vsub.f32 %v10739_v37, %v3072_v42  ;;  %v3447_v37 = vmul.f32 1.442695, %v3201_v19 }
 0x5e6   : > { %v11373_v41 = vpop.f32.mrb[201].mxu0  ;;  %14812 = vst [vmem:[#allocation115_spill] sm:$0xff] %v11393_v27  ;;  %v11399_v11 = vpop.eup %8345  ;;  %8365 = vpow2.f32 %v3433_v58  ;;  %v3441_v58 = vmul.f32 1.442695, %v3198_v5  ;;  %v3445_v14 = vmul.f32 1.442695, %v3200_v20  ;;  %v3584_v5 = vadd.f32 %v11366_v34, %v3583_v40 }
 0x5e7   : > { %14813 = vst [vmem:[#allocation191_spill] sm:$0xff] %v11399_v11  ;;  %v11402_v16 = vpop.eup %8347  ;;  %8367 = vpow2.f32 %v3435_v32  ;;  %v3443_v7 = vmul.f32 1.442695, %v3199_v10  ;;  %v14819_v32 = vld [vmem:[#allocation27_spill] sm:$0xff]  ;;  %v3449_v10 = vmul.f32 1.442695, %v3202_v31  ;;  %v3206_v31 = vsub.f32 %v10758_v54, %v3077_v51 }
 0x5e8   : > { %14814 = vst [vmem:[#allocation192_spill] sm:$0xff] %v11402_v16  ;;  %v11412_v4 = vpop.eup %8349  ;;  %8369 = vpow2.f32 %v3437_v6  ;;  %v11421_v60 = vadd.f32 %v10770_v36, %v14819_v32  ;;  %v11427_v6 = vadd.f32 %v10773_v15, %v10151_v53  ;;  %v3587_v36 = vadd.f32 %v11375_v38, %v11371_v25  ;;  %v14823_v20 = vld [vmem:[#allocation119_spill] sm:$0xff]  ;;  %3585 = vadd.xlane.f32.xlu1 %v3584_v5  ;;  %v3082_v40 = vpop.xlane.xlu1 %3081 }
 0x5e9   : > { %v11391_v1 = vpop.f32.mrb[202].mxu0  ;;  %14817 = vst [vmem:[#allocation116_spill] sm:$0xff] %v11412_v4  ;;  %v11417_v22 = vpop.eup %8351  ;;  %8371 = vpow2.f32 %v3439_v3  ;;  %v3203_v3 = vsub.f32 %v14822_v48, %v3077_v51  ;;  %v3204_v19 = vsub.f32 %v14823_v20, %v3077_v51  ;;  %v11442_v15 = vadd.f32 %v10781_v30, %v14819_v32 }
 0x5ea   : > { %v11397_v26 = vpop.f32.mrb[203].mxu0  ;;  %14818 = vst [vmem:[#allocation117_spill] sm:$0xff] %v11417_v22  ;;  %v11423_v42 = vpop.eup %8353  ;;  %8373 = vpow2.f32 %v3443_v7  ;;  %v3205_v7 = vsub.f32 %v10748_v18, %v3077_v51  ;;  %v3588_v20 = vadd.f32 %v11380_v57, %v3587_v36  ;;  %v11455_v30 = vadd.f32 %v10785_v55, %v10151_v53  ;;  %v2358_v57 = vld [vmem:[#allocation2 + $0x1b0] sm:$0xff] }
 0x5eb   : > { %14820 = vst [vmem:[#allocation27_spill] sm:$0xff] %v11423_v42  ;;  %v11430_v2 = vpop.eup %8355  ;;  %8375 = vpow2.f32 %v3445_v14  ;;  %14825 = vst [vmem:[#allocation119_spill] sm:$0xff] %v11442_v15  ;;  %v3451_v34 = vmul.f32 1.442695, %v3203_v3  ;;  %v3453_v25 = vmul.f32 1.442695, %v3204_v19  ;;  %v3207_v5 = vsub.f32 %v10754_v49, %v3082_v40 }
 0x5ec   : > { %14821 = vst [vmem:[#allocation193_spill] sm:$0xff] %v11430_v2  ;;  %v11438_v8 = vpop.eup %8357  ;;  %8377 = vpow2.f32 %v3441_v58  ;;  %14828 = vst [vmem:[#allocation196_spill] sm:$0xff] %v11455_v30  ;;  %v3455_v18 = vmul.f32 1.442695, %v3205_v7  ;;  %v3457_v58 = vmul.f32 1.442695, %v3206_v31  ;;  %v3589_v51 = vadd.f32 %v11386_v43, %v3588_v20 }
 0x5ed   : > { %v11410_v29 = vpop.f32.mrb[204].mxu0  ;;  %14824 = vst [vmem:[#allocation118_spill] sm:$0xff] %v11438_v8  ;;  %v11448_v48 = vpop.eup %8359  ;;  %8379 = vpow2.f32 %v3447_v37  ;;  %v3592_v37 = vadd.f32 %v11399_v11, %v11393_v27  ;;  %v3208_v55 = vsub.f32 %v10761_v28, %v3082_v40  ;;  %v3210_v19 = vsub.f32 %v10777_v13, %v3082_v40  ;;  %v2360_v11 = vld [vmem:[#allocation2 + $0x1f0] sm:$0xff] }
 0x5ee   : > { %v11415_v59 = vpop.f32.mrb[205].mxu0  ;;  %14826 = vst [vmem:[#allocation194_spill] sm:$0xff] %v11448_v48  ;;  %v11451_v38 = vpop.eup %8361  ;;  %8381 = vpow2.f32 %v3449_v10  ;;  %v3209_v10 = vsub.f32 %v10766_v61, %v3082_v40  ;;  %3590 = vadd.xlane.f32.xlu0 %v3589_v51  ;;  %v3459_v20 = vmul.f32 1.442695, %v3207_v5  ;;  %v14834_v61 = vld [vmem:[#allocation120_spill] sm:$0xff]  ;;  %v3597_v5 = vadd.f32 %v11423_v42, %v11417_v22  ;;  %v2362_v42 = vld [vmem:[#allocation2 + $0x230] sm:$0xff] }
 0x5ef   : > { %14827 = vst [vmem:[#allocation195_spill] sm:$0xff] %v11451_v38  ;;  %v11457_v54 = vpop.eup %8363  ;;  %8383 = vpow2.f32 %v3451_v34  ;;  %v11476_v34 = vadd.f32 %v10789_v24, %v14819_v32  ;;  %v3593_v49 = vadd.f32 %v11402_v16, %v3592_v37  ;;  %v11483_v13 = vadd.f32 %v14834_v61, %v10151_v53  ;;  %v2359_v61 = vld [vmem:[#allocation2 + $0x1d0] sm:$0xff] }
 0x5f0   : > { %14829 = vst [vmem:[#allocation197_spill] sm:$0xff] %v11457_v54  ;;  %v11465_v3 = vpop.eup %8365  ;;  %8385 = vpow2.f32 %v3453_v25  ;;  %v2357_v25 = vld [vmem:[#allocation2 + $0x190] sm:$0xff]  ;;  %v3461_v40 = vmul.f32 1.442695, %v3208_v55  ;;  %v3463_v43 = vmul.f32 1.442695, %v3209_v10  ;;  %v7572_v22 = vpack.c.bf16 %v2360_v11, %v2359_v61 }
 0x5f1   : > { %v11436_v39 = vpop.f32.mrb[206].mxu0  ;;  %14830 = vst [vmem:[#allocation198_spill] sm:$0xff] %v11465_v3  ;;  %v11472_v31 = vpop.eup %8367  ;;  %14832 = vst [vmem:[#allocation200_spill] sm:$0xff] %v11476_v34  ;;  %8387 = vpow2.f32 %v3455_v18  ;;  %v3594_v24 = vadd.f32 %v11412_v4, %v3593_v49  ;;  %v3465_v37 = vmul.f32 1.442695, %v3210_v19  ;;  %v7569_v16 = vpack.c.bf16 %v2358_v57, %v2357_v25  ;;  %v14840_v25 = vld [vmem:[#allocation121_spill] sm:$0xff] }
 0x5f2   : > { %v11446_v14 = vpop.f32.mrb[207].mxu0  ;;  %14831 = vst [vmem:[#allocation199_spill] sm:$0xff] %v11472_v31  ;;  %v11479_v28 = vpop.eup %8369  ;;  %14835 = vst [vmem:[#allocation120_spill] sm:$0xff] %v11483_v13  ;;  %8389 = vpow2.f32 %v3457_v58  ;;  %v3602_v19 = vadd.f32 %v11451_v38, %v11448_v48  ;;  %v3598_v4 = vadd.f32 %v11430_v2, %v3597_v5  ;;  %v14845_v57 = vmov 0.0|0.0   ;;  %v14851_v11 = vld [vmem:[#allocation124_spill] sm:$0xff] }
 0x5f3   : > { %14833 = vst [vmem:[#allocation201_spill] sm:$0xff] %v11479_v28  ;;  %v11485_v27 = vpop.eup %8371  ;;  %8391 = vpow2.f32 %v3459_v20  ;;  %3595 = vadd.xlane.f32.xlu1 %v3594_v24  ;;  %7570 = vmatpush1.bf16.msra.mxu1 %v7569_v16  ;;  %v14843_v24 = vld [vmem:[#allocation122_spill] sm:$0xff]  ;;  %v3607_v38 = vadd.f32 %v11479_v28, %v11472_v31  ;;  %v14847_v16 = vld [vmem:[#allocation123_spill] sm:$0xff]  ;;  %v11540_v61 = vadd.f32 %v14851_v11, %v10151_v53  ;;  %v14853_v28 = vld [vmem:[#allocation125_spill] sm:$0xff] }
 0x5f4   : > { %14836 = vst [vmem:[#allocation202_spill] sm:$0xff] %v11485_v27  ;;  %v11490_v51 = vpop.eup %8373  ;;  %8393 = vpow2.f32 %v3461_v40  ;;  %v11510_v40 = vadd.f32 %v14840_v25, %v14819_v32  ;;  %v11517_v49 = vadd.f32 %v14843_v24, %v10151_v53  ;;  %v3603_v48 = vadd.f32 %v11457_v54, %v3602_v19  ;;  %7571 = vmatprep.subr.bf16.mxu1 %v14845_v57  ;;  %v2361_v25 = vld [vmem:[#allocation2 + $0x210] sm:$0xff] }
 0x5f5   : > { %v11463_v36 = vpop.f32.mrb[208].mxu0  ;;  %14837 = vst [vmem:[#allocation203_spill] sm:$0xff] %v11490_v51  ;;  %v11496_v55 = vpop.eup %8375  ;;  %8395 = vpow2.f32 %v3463_v43  ;;  %v11529_v2 = vadd.f32 %v14847_v16, %v14819_v32  ;;  %v3599_v24 = vadd.f32 %v11438_v8, %v3598_v4  ;;  %14852 = vst [vmem:[#allocation124_spill] sm:$0xff] %v11540_v61  ;;  %v11544_v47 = vadd.f32 %v14853_v28, %v14819_v32  ;;  %v14856_v8 = vld [vmem:[#allocation126_spill] sm:$0xff]  ;;  %v14859_v28 = vld [vmem:[#allocation127_spill] sm:$0xff] }
 0x5f6   : > { %v11470_v7 = vpop.f32.mrb[209].mxu0  ;;  %14838 = vst [vmem:[#allocation204_spill] sm:$0xff] %v11496_v55  ;;  %v11504_v20 = vpop.eup %8377  ;;  %14841 = vst [vmem:[#allocation121_spill] sm:$0xff] %v11510_v40  ;;  %8397 = vpow2.f32 %v3465_v37  ;;  %v3612_v19 = vadd.f32 %v11496_v55, %v11490_v51  ;;  %v3604_v16 = vadd.f32 %v11465_v3, %v3603_v48  ;;  %v3608_v37 = vadd.f32 %v11485_v27, %v3607_v38 }
 0x5f7   : > { %14839 = vst [vmem:[#allocation205_spill] sm:$0xff] %v11504_v20  ;;  %v11513_v10 = vpop.eup %8379  ;;  %14844 = vst [vmem:[#allocation122_spill] sm:$0xff] %v11517_v49  ;;  %v11552_v51 = vadd.f32 %v14856_v8, %v10151_v53  ;;  %3600 = vadd.xlane.f32.xlu0 %v3599_v24  ;;  %7573 = vmatpush1.bf16.msra.mxu1 %v7572_v22  ;;  %v7575_v11 = vpack.c.bf16 %v2362_v42, %v2361_v25  ;;  %v2363_v22 = vld [vmem:[#allocation2 + $0x250] sm:$0xff]  ;;  %v14861_v42 = vld [vmem:[#allocation128_spill] sm:$0xff] }
 0x5f8   : > { %14842 = vst [vmem:[#allocation206_spill] sm:$0xff] %v11513_v10  ;;  %v11525_v5 = vpop.eup %8381  ;;  %14848 = vst [vmem:[#allocation123_spill] sm:$0xff] %v11529_v2  ;;  %v3613_v55 = vadd.f32 %v11513_v10, %v3612_v19  ;;  %v11559_v0 = vadd.f32 %v14859_v28, %v14819_v32  ;;  %3605 = vadd.xlane.f32.xlu1 %v3604_v16  ;;  %v3609_v38 = vadd.f32 %v11504_v20, %v3608_v37  ;;  %v2364_v24 = vld [vmem:[#allocation2 + $0x270] sm:$0xff]  ;;  %v14863_v28 = vld [vmem:[#allocation129_spill] sm:$0xff] }
 0x5f9   : > { %v11488_v18 = vpop.f32.mrb[210].mxu0  ;;  %14846 = vst [vmem:[#allocation207_spill] sm:$0xff] %v11525_v5  ;;  %v11536_v31 = vpop.eup %8383  ;;  %14854 = vst [vmem:[#allocation125_spill] sm:$0xff] %v11544_v47  ;;  %7574 = vmatprep.subr.bf16.mxu1 %v14845_v57  ;;  %v11571_v25 = vadd.f32 %v14861_v42, %v10151_v53  ;;  %v11575_v16 = vadd.f32 %v14863_v28, %v14819_v32  ;;  %v14865_v37 = vld [vmem:[#allocation28_spill] sm:$0xff]  ;;  %v14869_v42 = vld [vmem:[#allocation131_spill] sm:$0xff] }
 0x5fa   : > { %v11494_v58 = vpop.f32.mrb[211].mxu0  ;;  %14850 = vst [vmem:[#allocation209_spill] sm:$0xff] %v11536_v31  ;;  %v11548_v4 = vpop.eup %8385  ;;  %14857 = vst [vmem:[#allocation126_spill] sm:$0xff] %v11552_v51  ;;  %v11579_v10 = vadd.f32 %v11276_v35, %v14865_v37  ;;  %v3614_v27 = vadd.f32 %v11525_v5, %v3613_v55  ;;  %v11592_v46 = vadd.f32 %v14869_v42, %v14819_v32  ;;  %v14870_v28 = vld [vmem:[#allocation30_spill] sm:$0xff] }
 0x5fb   : > { %14855 = vst [vmem:[#allocation210_spill] sm:$0xff] %v11548_v4  ;;  %v11555_v52 = vpop.eup %8387  ;;  %v3617_v48 = vadd.f32 %v11548_v4, %v11536_v31  ;;  %14862 = vst [vmem:[#allocation128_spill] sm:$0xff] %v11571_v25  ;;  %v14867_v31 = vld [vmem:[#allocation130_spill] sm:$0xff]  ;;  %v11596_v9 = vadd.f32 %v14870_v28, %v10151_v53  ;;  %v4926_v55 = vmax.f32 %v11510_v40, %v11517_v49  ;;  %3610 = vadd.xlane.f32.xlu0 %v3609_v38  ;;  %v14876_v38 = vld [vmem:[#allocation29_spill] sm:$0xff] }
 0x5fc   : > { %14858 = vst [vmem:[#allocation211_spill] sm:$0xff] %v11555_v52  ;;  %v11567_v19 = vpop.eup %8389  ;;  %14864 = vst [vmem:[#allocation129_spill] sm:$0xff] %v11575_v16  ;;  %v11588_v4 = vadd.f32 %v14867_v31, %v10151_v53  ;;  %v4931_v5 = vmax.f32 %v11529_v2, %v11540_v61  ;;  %7576 = vmatpush1.bf16.msra.mxu1 %v7575_v11  ;;  %v7578_v31 = vpack.c.bf16 %v2364_v24, %v2363_v22  ;;  %v2365_v49 = vld [vmem:[#allocation2 + $0x290] sm:$0xff] }
 0x5fd   : > { %v11523_v43 = vpop.f32.mrb[212].mxu0  ;;  %14860 = vst [vmem:[#allocation127_spill] sm:$0xff] %v11567_v19  ;;  %v11584_v3 = vpop.eup %8391  ;;  %14871 = vst [vmem:[#allocation131_spill] sm:$0xff] %v11596_v9  ;;  %v3618_v35 = vadd.f32 %v11555_v52, %v3617_v48  ;;  %v11607_v42 = vadd.f32 %v11298_v12, %v14865_v37  ;;  %3615 = vadd.xlane.f32.xlu1 %v3614_v27  ;;  %7577 = vmatprep.subr.bf16.mxu1 %v14845_v57  ;;  %v2366_v40 = vld [vmem:[#allocation2 + $0x2b0] sm:$0xff] }
 0x5fe   : > { %v11534_v54 = vpop.f32.mrb[213].mxu0  ;;  %14866 = vst [vmem:[#allocation28_spill] sm:$0xff] %v11584_v3  ;;  %14868 = vst [vmem:[#allocation130_spill] sm:$0xff] %v11588_v4  ;;  %v4936_v11 = vmax.f32 %v11544_v47, %v11552_v51  ;;  %v14875_v12 = vmax.f32 %v11421_v60, %v11427_v6  ;;  %v11625_v22 = vadd.f32 %v11286_v50, %v14876_v38  ;;  %v14880_v50 = vld [vmem:[#allocation32_spill] sm:$0xff] }
 0x5ff   : > { %14849 = vst [vmem:[#allocation208_spill] sm:$0xff] %v11534_v54  ;;  %v11599_v54 = vpop.eup %8393  ;;  %14873 = vst [vmem:[#allocation212_spill] sm:$0xff] %v11607_v42  ;;  %v3619_v28 = vadd.f32 %v11567_v19, %v3618_v35  ;;  %v11629_v24 = vadd.f32 %v11321_v62, %v14865_v37  ;;  %v11644_v47 = vadd.f32 %v14880_v50, %v14819_v32  ;;  %v14882_v62 = vld [vmem:[#allocation31_spill] sm:$0xff] }
 0x600   : > { %14872 = vst [vmem:[#allocation30_spill] sm:$0xff] %v11599_v54  ;;  %v3622_v48 = vadd.f32 %v11599_v54, %v11584_v3  ;;  %v11615_v61 = vpop.eup %8395  ;;  %v4912_v27 = vmax.f32 %v14875_v12, %v11579_v10  ;;  %14877 = vst [vmem:[#allocation29_spill] sm:$0xff] %v11625_v22  ;;  %v11648_v2 = vadd.f32 %v14882_v62, %v10151_v53  ;;  %7579 = vmatpush1.bf16.msra.mxu1 %v7578_v31 }
 0x601   : > { %v11565_v8 = vpop.f32.mrb[214].mxu0  ;;  %14874 = vst [vmem:[#allocation213_spill] sm:$0xff] %v11615_v61  ;;  %14878 = vst [vmem:[#allocation214_spill] sm:$0xff] %v11629_v24  ;;  %v11640_v51 = vpop.eup %8397  ;;  %3620 = vadd.xlane.f32.xlu0 %v3619_v28  ;;  %v7581_v19 = vpack.c.bf16 %v2366_v40, %v2365_v49  ;;  %v14884_v3 = vmax.f32 %v11442_v15, %v11455_v30  ;;  %v11660_v50 = vadd.f32 %v11350_v44, %v14865_v37  ;;  %v2367_v49 = vld [vmem:[#allocation2 + $0x2d0] sm:$0xff]  ;;  %v14890_v30 = vld [vmem:[#allocation37_spill] sm:$0xff] }
 0x602   : > { %v11582_v20 = vpop.f32.mrb[215].mxu0  ;;  %v3623_v12 = vadd.f32 %v11615_v61, %v3622_v48  ;;  %14879 = vst [vmem:[#allocation215_spill] sm:$0xff] %v11640_v51  ;;  %14881 = vst [vmem:[#allocation32_spill] sm:$0xff] %v11644_v47  ;;  %v11656_v48 = vadd.f32 %v11310_v63, %v14876_v38  ;;  %7580 = vmatprep.subr.bf16.mxu1 %v14845_v57  ;;  %v2368_v40 = vld [vmem:[#allocation2 + $0x2f0] sm:$0xff]  ;;  %v11672_v63 = vadd.f32 %v11328_v33, %v14876_v38 }
 0x603   : > { %14883 = vst [vmem:[#allocation31_spill] sm:$0xff] %v11648_v2  ;;  %v4917_v54 = vmax.f32 %v14884_v3, %v11607_v42  ;;  %14885 = vst [vmem:[#allocation216_spill] sm:$0xff] %v11660_v50  ;;  %v14886_v3 = vmax.f32 %v11476_v34, %v11483_v13  ;;  %v11676_v44 = vadd.f32 %v11369_v21, %v14865_v37 }
 0x604   : > { %v3624_v61 = vadd.f32 %v11640_v51, %v3623_v12  ;;  %v4913_v12 = vmax.f32 %v4912_v27, %v11625_v22  ;;  %v14888_v51 = vld [vmem:[#allocation36_spill] sm:$0xff]  ;;  %v11687_v13 = vadd.f32 %v14890_v30, %v10151_v53  ;;  %v14896_v27 = vld [vmem:[#allocation43_spill] sm:$0xff]  ;;  %7582 = vmatpush1.bf16.msra.mxu1 %v7581_v19  ;;  %v7584_v30 = vpack.c.bf16 %v2368_v40, %v2367_v49 }
 0x605   : > { %v11613_v52 = vpop.f32.mrb[216].mxu0  ;;  %v4922_v31 = vmax.f32 %v14886_v3, %v11629_v24  ;;  %14887 = vst [vmem:[#allocation217_spill] sm:$0xff] %v11676_v44  ;;  %v11683_v42 = vadd.f32 %v14888_v51, %v14819_v32  ;;  %v14892_v3 = vld [vmem:[#allocation39_spill] sm:$0xff]  ;;  %v14894_v24 = vld [vmem:[#allocation42_spill] sm:$0xff]  ;;  %v11699_v34 = vadd.f32 %v14896_v27, %v14819_v32  ;;  %v4927_v22 = vmax.f32 %v4926_v55, %v11660_v50 }
 0x606   : > { %v11631_v35 = vpop.f32.mrb[217].mxu0  ;;  %14891 = vst [vmem:[#allocation37_spill] sm:$0xff] %v11687_v13  ;;  %v11691_v33 = vadd.f32 %v14892_v3, %v14819_v32  ;;  %v11695_v21 = vadd.f32 %v14894_v24, %v10151_v53  ;;  %3625 = vadd.xlane.f32.xlu1 %v3624_v61  ;;  %v14897_v51 = vld [vmem:[#allocation46_spill] sm:$0xff]  ;;  %4914 = vmax.xlane.f32.xlu0 %v4913_v12 }
 0x607   : > { %14889 = vst [vmem:[#allocation36_spill] sm:$0xff] %v11683_v42  ;;  %v11703_v15 = vadd.f32 %v14897_v51, %v10151_v53  ;;  %v11708_v3 = vadd.f32 %v11360_v17, %v14876_v38  ;;  %v11712_v61 = vadd.f32 %v11391_v1, %v14865_v37  ;;  %v4918_v24 = vmax.f32 %v4917_v54, %v11656_v48  ;;  %v2369_v51 = vld [vmem:[#allocation2 + $0x310] sm:$0xff] }
 0x608   : > { %14893 = vst [vmem:[#allocation39_spill] sm:$0xff] %v11691_v33  ;;  %14895 = vst [vmem:[#allocation42_spill] sm:$0xff] %v11695_v21  ;;  %7583 = vmatprep.subr.bf16.mxu1 %v14845_v57  ;;  %v2370_v12 = vld [vmem:[#allocation2 + $0x330] sm:$0xff]  ;;  %v4932_v19 = vmax.f32 %v4931_v5, %v11676_v44  ;;  %v11721_v55 = vadd.f32 %v11373_v41, %v14876_v38  ;;  %v11725_v17 = vadd.f32 %v11410_v29, %v14865_v37  ;;  %v14901_v5 = vld [vmem:[#allocation47_spill] sm:$0xff] }
 0x609   : > { %v11664_v28 = vpop.f32.mrb[218].mxu0  ;;  %14898 = vst [vmem:[#allocation43_spill] sm:$0xff] %v11703_v15  ;;  %14899 = vst [vmem:[#allocation46_spill] sm:$0xff] %v11712_v61  ;;  %v4923_v1 = vmax.f32 %v4922_v31, %v11672_v63  ;;  %v4956_v54 = vmax.f32 %v11644_v47, %v11648_v2  ;;  %v11736_v44 = vadd.f32 %v14901_v5, %v14819_v32  ;;  %v14903_v41 = vld [vmem:[#allocation137_spill] sm:$0xff]  ;;  %7585 = vmatpush1.bf16.msra.mxu1 %v7584_v30  ;;  %v2371_v31 = vld [vmem:[#allocation2 + $0x350] sm:$0xff] }
 0x60a   : > { %v11679_v62 = vpop.f32.mrb[219].mxu0  ;;  %14900 = vst [vmem:[#allocation218_spill] sm:$0xff] %v11725_v17  ;;  %v11740_v50 = vadd.f32 %v14903_v41, %v10151_v53  ;;  %4919 = vmax.xlane.f32.xlu1 %v4918_v24  ;;  %v7587_v2 = vpack.c.bf16 %v2370_v12, %v2369_v51  ;;  %v4937_v40 = vmax.f32 %v4936_v11, %v11712_v61  ;;  %v14907_v47 = vld [vmem:[#allocation140_spill] sm:$0xff] }
 0x60b   : > { %14902 = vst [vmem:[#allocation47_spill] sm:$0xff] %v11736_v44  ;;  %4924 = vmax.xlane.f32.xlu0 %v4923_v1  ;;  %v11749_v5 = vadd.f32 %v11397_v26, %v14876_v38  ;;  %v11753_v41 = vadd.f32 %v11436_v39, %v14865_v37  ;;  %v4928_v24 = vmax.f32 %v4927_v22, %v11708_v3  ;;  %v2372_v1 = vld [vmem:[#allocation2 + $0x370] sm:$0xff] }
 0x60c   : > { %14904 = vst [vmem:[#allocation137_spill] sm:$0xff] %v11740_v50  ;;  %7586 = vmatprep.subr.bf16.mxu1 %v14845_v57  ;;  %v14906_v11 = vmax.f32 %v11559_v0, %v11571_v25  ;;  %v11765_v26 = vadd.f32 %v11415_v59, %v14876_v38  ;;  %v11769_v39 = vadd.f32 %v11463_v36, %v14865_v37  ;;  %v14911_v59 = vld [vmem:[#allocation142_spill] sm:$0xff] }
 0x60d   : > { %v11716_v27 = vpop.f32.mrb[220].mxu0  ;;  %14905 = vst [vmem:[#allocation219_spill] sm:$0xff] %v11753_v41  ;;  %v4933_v22 = vmax.f32 %v4932_v19, %v11721_v55  ;;  %v11778_v61 = vadd.f32 %v14907_v47, %v14819_v32  ;;  %v11786_v25 = vadd.f32 %v14911_v59, %v14819_v32  ;;  %v11790_v36 = vadd.f32 %v10962_v23, %v10151_v53 }
 0x60e   : > { %v11728_v49 = vpop.f32.mrb[221].mxu0  ;;  %v4942_v30 = vmax.f32 %v14906_v11, %v11725_v17  ;;  %v14909_v11 = vld [vmem:[#allocation50_spill] sm:$0xff]  ;;  %4929 = vmax.xlane.f32.xlu1 %v4928_v24  ;;  %v11794_v19 = vadd.f32 %v11446_v14, %v14876_v38  ;;  %7588 = vmatpush1.bf16.msra.mxu1 %v7587_v2  ;;  %v7590_v47 = vpack.c.bf16 %v2372_v1, %v2371_v31 }
 0x60f   : > { %14908 = vst [vmem:[#allocation140_spill] sm:$0xff] %v11778_v61  ;;  %v11782_v17 = vadd.f32 %v14909_v11, %v10151_v53  ;;  %14912 = vst [vmem:[#allocation142_spill] sm:$0xff] %v11786_v25  ;;  %4934 = vmax.xlane.f32.xlu0 %v4933_v22  ;;  %v14914_v11 = vmax.f32 %v11575_v16, %v11588_v4  ;;  %v11802_v59 = vadd.f32 %v11470_v7, %v14876_v38  ;;  %v2373_v31 = vld [vmem:[#allocation2 + $0x390] sm:$0xff]  ;;  %v14918_v16 = vld [vmem:[#allocation144_spill] sm:$0xff] }
 0x610   : > { %14913 = vst [vmem:[#allocation220_spill] sm:$0xff] %v11790_v36  ;;  %v11806_v23 = vadd.f32 %v11488_v18, %v14865_v37  ;;  %v4938_v24 = vmax.f32 %v4937_v40, %v11749_v5  ;;  %7589 = vmatprep.subr.bf16.mxu1 %v14845_v57  ;;  %v2374_v1 = vld [vmem:[#allocation2 + $0x3b0] sm:$0xff]  ;;  %v14915_v22 = vmax.f32 %v11592_v46, %v11596_v9 }
 0x611   : > { %v11757_v29 = vpop.f32.mrb[222].mxu0  ;;  %14910 = vst [vmem:[#allocation50_spill] sm:$0xff] %v11782_v17  ;;  %v4947_v12 = vmax.f32 %v14914_v11, %v11753_v41  ;;  %v11818_v7 = vadd.f32 %v11523_v43, %v14865_v37  ;;  %v4943_v18 = vmax.f32 %v4942_v30, %v11765_v26  ;;  %v4981_v41 = vmax.f32 %v11778_v61, %v11782_v17  ;;  %v14921_v30 = vld [vmem:[#allocation146_spill] sm:$0xff] }
 0x612   : > { %v11772_v51 = vpop.f32.mrb[223].mxu0  ;;  %v4952_v11 = vmax.f32 %v14915_v22, %v11769_v39  ;;  %v11827_v4 = vadd.f32 %v10971_v45, %v14819_v32  ;;  %v11831_v9 = vadd.f32 %v14918_v16, %v10151_v53  ;;  %v11835_v43 = vadd.f32 %v11565_v8, %v14865_v37  ;;  %4939 = vmax.xlane.f32.xlu1 %v4938_v24  ;;  %v2376_v61 = vld [vmem:[#allocation2 + $0x3f0] sm:$0xff] }
 0x613   : > { %v3471_v14 = vpop.xlane.xlu0 %3470  ;;  %14916 = vst [vmem:[#allocation221_spill] sm:$0xff] %v11818_v7  ;;  %v11843_v22 = vadd.f32 %v11002_v56, %v10151_v53  ;;  %4944 = vmax.xlane.f32.xlu0 %v4943_v18  ;;  %7591 = vmatpush1.bf16.msra.mxu1 %v7590_v47  ;;  %v7593_v45 = vpack.c.bf16 %v2374_v1, %v2373_v31  ;;  %v2375_v56 = vld [vmem:[#allocation2 + $0x3d0] sm:$0xff]  ;;  %v14926_v1 = vld [vmem:[#allocation208_spill] sm:$0xff] }
 0x614   : > { %8399 = vrcp.f32 %v3471_v14  ;;  %14917 = vst [vmem:[#allocation222_spill] sm:$0xff] %v11827_v4  ;;  %14919 = vst [vmem:[#allocation144_spill] sm:$0xff] %v11831_v9  ;;  %v11839_v14 = vadd.f32 %v14921_v30, %v14819_v32  ;;  %v4957_v17 = vmax.f32 %v4956_v54, %v11806_v23  ;;  %v11850_v8 = vadd.f32 %v11494_v58, %v14876_v38 }
 0x615   : > { %v11810_v2 = vpop.f32.mrb[224].mxu0  ;;  %14920 = vst [vmem:[#allocation223_spill] sm:$0xff] %v11835_v43  ;;  %14923 = vst [vmem:[#allocation224_spill] sm:$0xff] %v11843_v22  ;;  %v4948_v24 = vmax.f32 %v4947_v12, %v11794_v19  ;;  %7592 = vmatprep.subr.bf16.mxu1 %v14845_v57  ;;  %v14925_v47 = vmax.f32 %v11683_v42, %v11687_v13  ;;  %v11862_v54 = vadd.f32 %v14926_v1, %v14876_v38 }
 0x616   : > { %v11821_v40 = vpop.f32.mrb[225].mxu0  ;;  %14922 = vst [vmem:[#allocation146_spill] sm:$0xff] %v11839_v14  ;;  %14924 = vst [vmem:[#allocation225_spill] sm:$0xff] %v11850_v8  ;;  %v11866_v58 = vadd.f32 %v11613_v52, %v14865_v37  ;;  %v4953_v12 = vmax.f32 %v4952_v11, %v11802_v59  ;;  %v14928_v13 = vmax.f32 %v11691_v33, %v11695_v21  ;;  %v14933_v21 = vld [vmem:[#allocation148_spill] sm:$0xff]  ;;  %v2378_v33 = vld [vmem:[#allocation2 + $0x430] sm:$0xff] }
 0x617   : > { %v4962_v31 = vmax.f32 %v14925_v47, %v11818_v7  ;;  %v11879_v1 = vadd.f32 %v11582_v20, %v14876_v38  ;;  %v11883_v52 = vadd.f32 %v11664_v28, %v14865_v37  ;;  %4949 = vmax.xlane.f32.xlu1 %v4948_v24  ;;  %v11889_v16 = vadd.f32 %v11716_v27, %v14865_v37  ;;  %v2377_v27 = vld [vmem:[#allocation2 + $0x410] sm:$0xff] }
 0x618   : > { %14927 = vst [vmem:[#allocation208_spill] sm:$0xff] %v11866_v58  ;;  %v4967_v47 = vmax.f32 %v14928_v13, %v11835_v43  ;;  %4954 = vmax.xlane.f32.xlu0 %v4953_v12  ;;  %7594 = vmatpush1.bf16.msra.mxu1 %v7593_v45  ;;  %v7596_v13 = vpack.c.bf16 %v2376_v61, %v2375_v56  ;;  %v14931_v43 = vld [vmem:[#allocation62_spill] sm:$0xff]  ;;  %v14935_v12 = vld [vmem:[#allocation65_spill] sm:$0xff]  ;;  %v14938_v56 = vld [vmem:[#allocation152_spill] sm:$0xff] }
 0x619   : > { %v11854_v30 = vpop.f32.mrb[226].mxu0  ;;  %14929 = vst [vmem:[#allocation226_spill] sm:$0xff] %v11883_v52  ;;  %14930 = vst [vmem:[#allocation227_spill] sm:$0xff] %v11889_v16  ;;  %v3476_v7 = vpop.xlane.xlu0 %3475  ;;  %v11893_v20 = vadd.f32 %v14931_v43, %v14819_v32  ;;  %v11897_v28 = vadd.f32 %v14933_v21, %v10151_v53  ;;  %v4958_v24 = vmax.f32 %v4957_v17, %v11850_v8  ;;  %7595 = vmatprep.subr.bf16.mxu1 %v14845_v57 }
 0x61a   : > { %v11869_v18 = vpop.f32.mrb[227].mxu0  ;;  %8401 = vrcp.f32 %v3476_v7  ;;  %v11903_v45 = vadd.f32 %v14935_v12, %v14819_v32  ;;  %v14937_v61 = vmax.f32 %v11699_v34, %v11703_v15  ;;  %v11911_v21 = vadd.f32 %v11631_v35, %v14876_v38 }
 0x61b   : > { %14932 = vst [vmem:[#allocation62_spill] sm:$0xff] %v11893_v20  ;;  %14934 = vst [vmem:[#allocation148_spill] sm:$0xff] %v11897_v28  ;;  %v4963_v17 = vmax.f32 %v4962_v31, %v11862_v54  ;;  %v11916_v42 = vadd.f32 %v14938_v56, %v10151_v53  ;;  %v14940_v12 = vmax.f32 %v11736_v44, %v11740_v50  ;;  %4959 = vmax.xlane.f32.xlu1 %v4958_v24  ;;  %v14945_v24 = vld [vmem:[#allocation33_spill] sm:$0xff]  ;;  %v14950_v44 = vld [vmem:[#allocation70_spill] sm:$0xff] }
 0x61c   : > { %14936 = vst [vmem:[#allocation65_spill] sm:$0xff] %v11903_v45  ;;  %v4972_v43 = vmax.f32 %v14937_v61, %v11866_v58  ;;  %v11924_v15 = vadd.f32 %v11679_v62, %v14876_v38  ;;  %v4968_v35 = vmax.f32 %v4967_v47, %v11879_v1  ;;  %v4982_v31 = vmax.f32 %v4981_v41, %v11889_v16  ;;  %v14944_v62 = vld [vmem:[#allocation34_spill] sm:$0xff] }
 0x61d   : > { %v4828_v11 = vpop.f32.mrb[228].mxu0  ;;  %14939 = vst [vmem:[#allocation152_spill] sm:$0xff] %v11916_v42  ;;  %v4977_v8 = vmax.f32 %v14940_v12, %v11883_v52  ;;  %v11932_v56 = vadd.f32 %v11728_v49, %v14876_v38  ;;  %4964 = vmax.xlane.f32.xlu0 %v4963_v17  ;;  %v3481_v58 = vpop.xlane.xlu0 %3480  ;;  %7597 = vmatpush1.bf16.msra.mxu1 %v7596_v13  ;;  %v2379_v49 = vld [vmem:[#allocation2 + $0x450] sm:$0xff] }
 0x61e   : > { %v4830_v7 = vpop.f32.mrb[229].mxu0  ;;  %14941 = vst [vmem:[#allocation228_spill] sm:$0xff] %v11924_v15  ;;  %v11927_v61 = vpop.eup %8399  ;;  %v7599_v50 = vpack.c.bf16 %v2378_v33, %v2377_v27  ;;  %v11936_v12 = vadd.f32 %v11757_v29, %v14865_v37  ;;  %8403 = vrcp.f32 %v3481_v58  ;;  %7598 = vmatprep.subr.bf16.mxu1 %v14845_v57  ;;  %v2380_v16 = vld [vmem:[#allocation2 + $0x470] sm:$0xff]  ;;  %v5001_v13 = vmax.f32 %v11893_v20, %v11897_v28 }
 0x61f   : > { %14942 = vst [vmem:[#allocation229_spill] sm:$0xff] %v11932_v56  ;;  %v3660_v47 = vmul.f32 %v11927_v61, %v14944_v62  ;;  %v3659_v52 = vmul.f32 %v11927_v61, %v14945_v24  ;;  %v11947_v33 = vadd.f32 %v11810_v2, %v14865_v37  ;;  %v4973_v29 = vmax.f32 %v4972_v43, %v11911_v21  ;;  %v14948_v62 = vld [vmem:[#allocation66_spill] sm:$0xff] }
 0x620   : > { %14943 = vst [vmem:[#allocation230_spill] sm:$0xff] %v11936_v12  ;;  %v11951_v58 = vadd.f32 %v4828_v11, %v14865_v37  ;;  %v5006_v17 = vmax.f32 %v11903_v45, %v11916_v42  ;;  %v11957_v24 = vadd.f32 %v14948_v62, %v14819_v32  ;;  %v11961_v28 = vadd.f32 %v14950_v44, %v10151_v53  ;;  %v14965_v20 = vld [vmem:[#allocation74_spill] sm:$0xff] }
 0x621   : > { %v4834_v41 = vpop.f32.mrb[230].mxu0  ;;  %14946 = vst [vmem:[#allocation34_spill] sm:$0xff] %v11947_v33  ;;  %4969 = vmax.xlane.f32.xlu1 %v4968_v35  ;;  %3851 = vmatprep.mubr.f32.mxu1 %v3660_v47  ;;  %v4978_v2 = vmax.f32 %v4977_v8, %v11924_v15  ;;  %v4983_v11 = vmax.f32 %v4982_v31, %v11932_v56  ;;  %v2382_v47 = vld [vmem:[#allocation2 + $0x4b0] sm:$0xff]  ;;  %v15094_v15 = vld [vmem:[#allocation57_spill] sm:$0xff] }
 0x622   : > { %14947 = vst [vmem:[#allocation33_spill] sm:$0xff] %v11951_v58  ;;  %v4836_v27 = vpop.f32.mrb[231].mxu0  ;;  %14949 = vst [vmem:[#allocation66_spill] sm:$0xff] %v11957_v24  ;;  %4974 = vmax.xlane.f32.xlu0 %v4973_v29  ;;  %3852 = vmatmul.mubr.f32.vlgmr.msra.gmra.mrb[64].mxu1 %v3659_v52  ;;  %v7602_v43 = vpack.c.bf16 %v2380_v16, %v2379_v49  ;;  %v14952_v42 = vmax.f32 %v11786_v25, %v11790_v36 }
 0x623   : > { %14951 = vst [vmem:[#allocation70_spill] sm:$0xff] %v11961_v28  ;;  %v11971_v62 = vadd.f32 %v11772_v51, %v14876_v38  ;;  %v11975_v44 = vadd.f32 %v11821_v40, %v14876_v38  ;;  %v11979_v8 = vadd.f32 %v11854_v30, %v14865_v37  ;;  %v3486_v35 = vpop.xlane.xlu0 %3485  ;;  %7600 = vmatpush1.bf16.msra.mxu1 %v7599_v50  ;;  %v2381_v30 = vld [vmem:[#allocation2 + $0x490] sm:$0xff]  ;;  %v14958_v50 = vld [vmem:[#allocation69_spill] sm:$0xff] }
 0x624   : > { %v4987_v45 = vmax.f32 %v14952_v42, %v11936_v12  ;;  %v14956_v16 = vmax.f32 %v11827_v4, %v11831_v9  ;;  %8405 = vrcp.f32 %v3486_v35  ;;  %v11986_v51 = vmax.f32 %v5001_v13, %v11951_v58  ;;  %7601 = vmatprep.subr.bf16.mxu1 %v14845_v57  ;;  %v11992_v49 = vpop.eup %8401  ;;  %v14962_v13 = vld [vmem:[#allocation72_spill] sm:$0xff] }
 0x625   : > { %14953 = vst [vmem:[#allocation231_spill] sm:$0xff] %v11971_v62  ;;  %14954 = vst [vmem:[#allocation232_spill] sm:$0xff] %v11975_v44  ;;  %v4840_v52 = vpop.f32.mrb[232].mxu0  ;;  %v11989_v31 = vadd.f32 %v4830_v7, %v14876_v38  ;;  %v11996_v29 = vadd.f32 %v14958_v50, %v14819_v32  ;;  %v12004_v58 = vadd.f32 %v14962_v13, %v14819_v32  ;;  %4979 = vmax.xlane.f32.xlu1 %v4978_v2  ;;  %v14967_v9 = vld [vmem:[#allocation132_spill] sm:$0xff] }
 0x626   : > { %14955 = vst [vmem:[#allocation233_spill] sm:$0xff] %v11979_v8  ;;  %v4992_v42 = vmax.f32 %v14956_v16, %v11947_v33  ;;  %v4842_v40 = vpop.f32.mrb[233].mxu0  ;;  %v14960_v16 = vld [vmem:[#allocation73_spill] sm:$0xff]  ;;  %v12007_v7 = vadd.f32 %v4834_v41, %v14865_v37  ;;  %v12011_v33 = vadd.f32 %v14965_v20, %v10151_v53  ;;  %4984 = vmax.xlane.f32.xlu0 %v4983_v11  ;;  %v14968_v4 = vld [vmem:[#allocation40_spill] sm:$0xff] }
 0x627   : > { %14957 = vst [vmem:[#allocation234_spill] sm:$0xff] %v11989_v31  ;;  %14959 = vst [vmem:[#allocation69_spill] sm:$0xff] %v11996_v29  ;;  %v12000_v35 = vadd.f32 %v14960_v16, %v10151_v53  ;;  %v3664_v50 = vmul.f32 %v11992_v49, %v14967_v9  ;;  %v3663_v16 = vmul.f32 %v11992_v49, %v14968_v4  ;;  %v3491_v11 = vpop.xlane.xlu0 %3490  ;;  %7603 = vmatpush1.bf16.msra.mxu1 %v7602_v43 }
 0x628   : > { %14963 = vst [vmem:[#allocation72_spill] sm:$0xff] %v12004_v58  ;;  %14964 = vst [vmem:[#allocation235_spill] sm:$0xff] %v12007_v7  ;;  %v12018_v12 = vadd.f32 %v4840_v52, %v14865_v37  ;;  %v14970_v2 = vmax.f32 %v11839_v14, %v11843_v22  ;;  %v12026_v13 = vadd.f32 %v11869_v18, %v14876_v38  ;;  %8407 = vrcp.f32 %v3491_v11  ;;  %v2383_v18 = vld [vmem:[#allocation2 + $0x4d0] sm:$0xff]  ;;  %v14975_v11 = vld [vmem:[#allocation133_spill] sm:$0xff] }
 0x629   : > { %14961 = vst [vmem:[#allocation73_spill] sm:$0xff] %v12000_v35  ;;  %14966 = vst [vmem:[#allocation74_spill] sm:$0xff] %v12011_v33  ;;  %v4988_v20 = vmax.f32 %v4987_v45, %v11971_v62  ;;  %v4846_v36 = vpop.f32.mrb[234].mxu0  ;;  %v7605_v9 = vpack.c.bf16 %v2382_v47, %v2381_v30  ;;  %v5011_v4 = vmax.f32 %v11957_v24, %v11961_v28  ;;  %3856 = vmatprep.mubr.f32.mxu1 %v3664_v50  ;;  %v2384_v22 = vld [vmem:[#allocation2 + $0x4f0] sm:$0xff]  ;;  %v12035_v45 = vpop.eup %8403 }
 0x62a   : > { %14969 = vst [vmem:[#allocation132_spill] sm:$0xff] %v12018_v12  ;;  %v4997_v41 = vmax.f32 %v14970_v2, %v11979_v8  ;;  %14971 = vst [vmem:[#allocation40_spill] sm:$0xff] %v12026_v13  ;;  %v4993_v52 = vmax.f32 %v4992_v42, %v11975_v44  ;;  %v5003_v2 = vmax.f32 %v11986_v51, %v11989_v31  ;;  %v4848_v8 = vpop.f32.mrb[235].mxu0  ;;  %7604 = vmatprep.subr.bf16.mxu1 %v14845_v57  ;;  %v14974_v47 = vld [vmem:[#allocation134_spill] sm:$0xff] }
 0x62b   : > { %4989 = vmax.xlane.f32.xlu1 %v4988_v20  ;;  %v5007_v43 = vmax.f32 %v5006_v17, %v12007_v7  ;;  %v12039_v30 = vadd.f32 %v4836_v27, %v14876_v38  ;;  %3857 = vmatmul.mubr.f32.gmra.mrb[66].mxu1 %v3663_v16  ;;  %v12042_v42 = vadd.f32 %v4846_v36, %v14865_v37  ;;  %v2400_v7 = vld [vmem:[#allocation2 + $0x6f0] sm:$0xff] }
 0x62c   : > { %4994 = vmax.xlane.f32.xlu0 %v4993_v52  ;;  %v3668_v51 = vmul.f32 %v12035_v45, %v14974_v47  ;;  %v5012_v50 = vmax.f32 %v5011_v4, %v12018_v12  ;;  %v3667_v28 = vmul.f32 %v12035_v45, %v14975_v11  ;;  %v12050_v20 = vadd.f32 %v4842_v40, %v14876_v38  ;;  %v14977_v47 = vld [vmem:[#allocation162_spill] sm:$0xff]  ;;  %v14979_v11 = vld [vmem:[#allocation75_spill] sm:$0xff]  ;;  %v3496_v40 = vpop.xlane.xlu0 %3495 }
 0x62d   : > { %14972 = vst [vmem:[#allocation236_spill] sm:$0xff] %v12039_v30  ;;  %14973 = vst [vmem:[#allocation237_spill] sm:$0xff] %v12042_v42  ;;  %v5016_v27 = vmax.f32 %v11996_v29, %v12000_v35  ;;  %v5021_v17 = vmax.f32 %v12004_v58, %v12011_v33  ;;  %v4998_v36 = vmax.f32 %v4997_v41, %v12026_v13  ;;  %v4852_v16 = vpop.f32.mrb[236].mxu0  ;;  %7606 = vmatpush1.bf16.msra.mxu1 %v7605_v9  ;;  %v2385_v41 = vld [vmem:[#allocation2 + $0x510] sm:$0xff] }
 0x62e   : > { %14976 = vst [vmem:[#allocation134_spill] sm:$0xff] %v12050_v20  ;;  %v7608_v52 = vpack.c.bf16 %v2384_v22, %v2383_v18  ;;  %v12059_v4 = vadd.f32 %v14977_v47, %v14819_v32  ;;  %v12063_v12 = vadd.f32 %v14979_v11, %v10151_v53  ;;  %3861 = vmatprep.mubr.f32.mxu1 %v3668_v51  ;;  %v4854_v29 = vpop.f32.mrb[237].mxu0  ;;  %v2386_v33 = vld [vmem:[#allocation2 + $0x530] sm:$0xff]  ;;  %8409 = vrcp.f32 %v3496_v40  ;;  %v12074_v47 = vpop.eup %8405  ;;  %v14985_v40 = vld [vmem:[#allocation135_spill] sm:$0xff] }
 0x62f   : > { %v12066_v35 = vadd.f32 %v4852_v16, %v14865_v37  ;;  %7607 = vmatprep.subr.bf16.mxu1 %v14845_v57  ;;  %4999 = vmax.xlane.f32.xlu1 %v4998_v36  ;;  %v5008_v22 = vmax.f32 %v5007_v43, %v12039_v30  ;;  %v5017_v9 = vmax.f32 %v5016_v27, %v12042_v42  ;;  %v14984_v36 = vld [vmem:[#allocation136_spill] sm:$0xff]  ;;  %v15039_v30 = vld [vmem:[#allocation67_spill] sm:$0xff]  ;;  %v15079_v31 = vld [vmem:[#allocation38_spill] sm:$0xff] }
 0x630   : > { %14978 = vst [vmem:[#allocation133_spill] sm:$0xff] %v12059_v4  ;;  %14980 = vst [vmem:[#allocation162_spill] sm:$0xff] %v12063_v12  ;;  %3862 = vmatmul.mubr.f32.gmra.mrb[68].mxu1 %v3667_v28  ;;  %v12072_v18 = vadd.f32 %v4848_v8, %v14876_v38  ;;  %5004 = vmax.xlane.f32.xlu0 %v5003_v2  ;;  %v5013_v51 = vmax.f32 %v5012_v50, %v12050_v20  ;;  %v14986_v2 = vld [vmem:[#allocation165_spill] sm:$0xff] }
 0x631   : > { %14981 = vst [vmem:[#allocation75_spill] sm:$0xff] %v12066_v35  ;;  %v5022_v16 = vmax.f32 %v5021_v17, %v12066_v35  ;;  %v12079_v11 = vadd.f32 %v4854_v29, %v14876_v38  ;;  %v3672_v28 = vmul.f32 %v12074_v47, %v14984_v36  ;;  %v3671_v43 = vmul.f32 %v12074_v47, %v14985_v40  ;;  %v4858_v27 = vpop.f32.mrb[238].mxu0  ;;  %v14988_v17 = vld [vmem:[#allocation78_spill] sm:$0xff]  ;;  %v3501_v35 = vpop.xlane.xlu0 %3500 }
 0x632   : > { %14982 = vst [vmem:[#allocation238_spill] sm:$0xff] %v12072_v18  ;;  %7609 = vmatpush1.bf16.msra.mxu1 %v7608_v52  ;;  %v7611_v8 = vpack.c.bf16 %v2386_v33, %v2385_v41  ;;  %v5026_v58 = vmax.f32 %v12059_v4, %v12063_v12  ;;  %v12089_v50 = vadd.f32 %v14986_v2, %v14819_v32  ;;  %v4860_v42 = vpop.f32.mrb[239].mxu0  ;;  %v2387_v52 = vld [vmem:[#allocation2 + $0x550] sm:$0xff]  ;;  %8411 = vrcp.f32 %v3501_v35  ;;  %v12103_v2 = vpop.eup %8407  ;;  %v14994_v35 = vld [vmem:[#allocation169_spill] sm:$0xff] }
 0x633   : > { %14983 = vst [vmem:[#allocation239_spill] sm:$0xff] %v12079_v11  ;;  %v12093_v29 = vadd.f32 %v14988_v17, %v10151_v53  ;;  %v12096_v36 = vadd.f32 %v4858_v27, %v14865_v37  ;;  %7610 = vmatprep.subr.bf16.mxu1 %v14845_v57  ;;  %v2388_v33 = vld [vmem:[#allocation2 + $0x570] sm:$0xff]  ;;  %5009 = vmax.xlane.f32.xlu1 %v5008_v22  ;;  %v14992_v17 = vld [vmem:[#allocation167_spill] sm:$0xff] }
 0x634   : > { %14987 = vst [vmem:[#allocation136_spill] sm:$0xff] %v12089_v50  ;;  %3866 = vmatprep.mubr.f32.mxu1 %v3672_v28  ;;  %v5018_v41 = vmax.f32 %v5017_v9, %v12072_v18  ;;  %v12101_v40 = vadd.f32 %v4860_v42, %v14876_v38  ;;  %v12107_v12 = vadd.f32 %v14992_v17, %v14819_v32  ;;  %v14996_v9 = vld [vmem:[#allocation139_spill] sm:$0xff] }
 0x635   : > { %14989 = vst [vmem:[#allocation135_spill] sm:$0xff] %v12093_v29  ;;  %14990 = vst [vmem:[#allocation165_spill] sm:$0xff] %v12096_v36  ;;  %3867 = vmatmul.mubr.f32.gmra.mrb[70].mxu1 %v3671_v43  ;;  %5014 = vmax.xlane.f32.xlu0 %v5013_v51  ;;  %v5027_v27 = vmax.f32 %v5026_v58, %v12096_v36  ;;  %v5023_v4 = vmax.f32 %v5022_v16, %v12079_v11  ;;  %v14997_v28 = vld [vmem:[#allocation51_spill] sm:$0xff]  ;;  %v4864_v20 = vpop.f32.mrb[240].mxu0  ;;  %v3506_v43 = vpop.xlane.xlu0 %3505  ;;  %v2394_v36 = vld [vmem:[#allocation2 + $0x630] sm:$0xff] }
 0x636   : > { %14991 = vst [vmem:[#allocation78_spill] sm:$0xff] %v12101_v40  ;;  %14993 = vst [vmem:[#allocation167_spill] sm:$0xff] %v12107_v12  ;;  %v12113_v22 = vadd.f32 %v14994_v35, %v10151_v53  ;;  %v3676_v42 = vmul.f32 %v12103_v2, %v14996_v9  ;;  %v3675_v18 = vmul.f32 %v12103_v2, %v14997_v28  ;;  %7612 = vmatpush1.bf16.msra.mxu1 %v7611_v8  ;;  %v4866_v16 = vpop.f32.mrb[241].mxu0  ;;  %v2389_v28 = vld [vmem:[#allocation2 + $0x590] sm:$0xff] }
 0x637   : > { %v7614_v17 = vpack.c.bf16 %v2388_v33, %v2387_v52  ;;  %v5031_v51 = vmax.f32 %v12089_v50, %v12093_v29  ;;  %v12122_v58 = vadd.f32 %v4864_v20, %v14865_v37  ;;  %7613 = vmatprep.subr.bf16.mxu1 %v14845_v57  ;;  %5019 = vmax.xlane.f32.xlu1 %v5018_v41  ;;  %v2390_v8 = vld [vmem:[#allocation2 + $0x5b0] sm:$0xff]  ;;  %8413 = vrcp.f32 %v3506_v43  ;;  %v15004_v43 = vld [vmem:[#allocation55_spill] sm:$0xff] }
 0x638   : > { %14995 = vst [vmem:[#allocation169_spill] sm:$0xff] %v12113_v22  ;;  %3871 = vmatprep.mubr.f32.mxu1 %v3676_v42  ;;  %v12126_v35 = vadd.f32 %v4866_v16, %v14876_v38  ;;  %v5028_v9 = vmax.f32 %v5027_v27, %v12101_v40  ;;  %v12130_v20 = vpop.eup %8409  ;;  %v5036_v33 = vmax.f32 %v12107_v12, %v12113_v22  ;;  %v15000_v42 = vld [vmem:[#allocation171_spill] sm:$0xff]  ;;  %v15002_v16 = vld [vmem:[#allocation84_spill] sm:$0xff]  ;;  %v2391_v50 = vld [vmem:[#allocation2 + $0x5d0] sm:$0xff] }
 0x639   : > { %14998 = vst [vmem:[#allocation139_spill] sm:$0xff] %v12122_v58  ;;  %3872 = vmatmul.mubr.f32.gmra.mrb[72].mxu1 %v3675_v18  ;;  %5024 = vmax.xlane.f32.xlu0 %v5023_v4  ;;  %v5032_v52 = vmax.f32 %v5031_v51, %v12122_v58  ;;  %v12136_v41 = vadd.f32 %v15000_v42, %v14819_v32  ;;  %v4870_v27 = vpop.f32.mrb[242].mxu0  ;;  %v15005_v18 = vld [vmem:[#allocation53_spill] sm:$0xff]  ;;  %v3511_v12 = vpop.xlane.xlu0 %3510  ;;  %v2392_v40 = vld [vmem:[#allocation2 + $0x5f0] sm:$0xff] }
 0x63a   : > { %14999 = vst [vmem:[#allocation51_spill] sm:$0xff] %v12126_v35  ;;  %v12140_v29 = vadd.f32 %v15002_v16, %v10151_v53  ;;  %7615 = vmatpush1.bf16.msra.mxu1 %v7614_v17  ;;  %v3680_v4 = vmul.f32 %v12130_v20, %v15004_v43  ;;  %v3679_v51 = vmul.f32 %v12130_v20, %v15005_v18  ;;  %v4872_v22 = vpop.f32.mrb[243].mxu0  ;;  %8415 = vrcp.f32 %v3511_v12 }
 0x63b   : > { %15001 = vst [vmem:[#allocation171_spill] sm:$0xff] %v12136_v41  ;;  %v12147_v58 = vadd.f32 %v4870_v27, %v14865_v37  ;;  %7616 = vmatprep.subr.bf16.mxu1 %v14845_v57  ;;  %v7617_v42 = vpack.c.bf16 %v2390_v8, %v2389_v28  ;;  %5029 = vmax.xlane.f32.xlu1 %v5028_v9  ;;  %v15008_v28 = vld [vmem:[#allocation88_spill] sm:$0xff] }
 0x63c   : > { %15003 = vst [vmem:[#allocation84_spill] sm:$0xff] %v12140_v29  ;;  %v12151_v16 = vadd.f32 %v4872_v22, %v14876_v38  ;;  %v5033_v17 = vmax.f32 %v5032_v52, %v12126_v35  ;;  %3876 = vmatprep.mubr.f32.mxu1 %v3680_v4  ;;  %v12155_v18 = vpop.eup %8411  ;;  %v5041_v27 = vmax.f32 %v12136_v41, %v12140_v29  ;;  %v15010_v22 = vld [vmem:[#allocation174_spill] sm:$0xff]  ;;  %v15013_v4 = vld [vmem:[#allocation56_spill] sm:$0xff] }
 0x63d   : > { %15006 = vst [vmem:[#allocation55_spill] sm:$0xff] %v12147_v58  ;;  %v5037_v43 = vmax.f32 %v5036_v33, %v12147_v58  ;;  %v12161_v8 = vadd.f32 %v15008_v28, %v14819_v32  ;;  %v12165_v9 = vadd.f32 %v15010_v22, %v10151_v53  ;;  %3877 = vmatmul.mubr.f32.gmra.mrb[74].mxu1 %v3679_v51  ;;  %v4876_v52 = vpop.f32.mrb[244].mxu0  ;;  %v15012_v35 = vld [vmem:[#allocation58_spill] sm:$0xff] }
 0x63e   : > { %15007 = vst [vmem:[#allocation53_spill] sm:$0xff] %v12151_v16  ;;  %v3684_v12 = vmul.f32 %v12155_v18, %v15012_v35  ;;  %v3683_v33 = vmul.f32 %v12155_v18, %v15013_v4  ;;  %v12172_v58 = vadd.f32 %v4876_v52, %v14865_v37  ;;  %v4878_v29 = vpop.f32.mrb[245].mxu0  ;;  %7618 = vmatpush1.bf16.msra.mxu1 %v7617_v42  ;;  %v2393_v51 = vld [vmem:[#allocation2 + $0x610] sm:$0xff]  ;;  %v3516_v35 = vpop.xlane.xlu1 %3515  ;;  %v15016_v52 = vld [vmem:[#allocation89_spill] sm:$0xff] }
 0x63f   : > { %15009 = vst [vmem:[#allocation88_spill] sm:$0xff] %v12161_v8  ;;  %15011 = vst [vmem:[#allocation174_spill] sm:$0xff] %v12165_v9  ;;  %v7620_v41 = vpack.c.bf16 %v2392_v40, %v2391_v50  ;;  %5034 = vmax.xlane.f32.xlu1 %v5033_v17  ;;  %v12175_v28 = vadd.f32 %v4878_v29, %v14876_v38  ;;  %v5038_v22 = vmax.f32 %v5037_v43, %v12151_v16  ;;  %v15018_v50 = vld [vmem:[#allocation178_spill] sm:$0xff]  ;;  %v15022_v16 = vld [vmem:[#allocation59_spill] sm:$0xff] }
 0x640   : > { %15014 = vst [vmem:[#allocation58_spill] sm:$0xff] %v12172_v58  ;;  %7619 = vmatprep.subr.bf16.mxu1 %v14845_v57  ;;  %3881 = vmatprep.mubr.f32.mxu1 %v3684_v12  ;;  %v5042_v4 = vmax.f32 %v5041_v27, %v12172_v58  ;;  %v12182_v11 = vadd.f32 %v15016_v52, %v14819_v32  ;;  %8417 = vrcp.f32 %v3516_v35  ;;  %v15021_v58 = vld [vmem:[#allocation61_spill] sm:$0xff] }
 0x641   : > { %15015 = vst [vmem:[#allocation56_spill] sm:$0xff] %v12175_v28  ;;  %v12186_v40 = vadd.f32 %v15018_v50, %v10151_v53  ;;  %3882 = vmatmul.mubr.f32.gmra.mrb[76].mxu1 %v3683_v33  ;;  %v4882_v29 = vpop.f32.mrb[246].mxu0  ;;  %v12188_v42 = vpop.eup %8413  ;;  %v5046_v17 = vmax.f32 %v12161_v8, %v12165_v9  ;;  %v7623_v52 = vpack.c.bf16 %v2394_v36, %v2393_v51  ;;  %v2395_v9 = vld [vmem:[#allocation2 + $0x650] sm:$0xff] }
 0x642   : > { %15017 = vst [vmem:[#allocation89_spill] sm:$0xff] %v12182_v11  ;;  %v12193_v43 = vadd.f32 %v4882_v29, %v14865_v37  ;;  %v4884_v27 = vpop.f32.mrb[247].mxu0  ;;  %v5043_v12 = vmax.f32 %v5042_v4, %v12175_v28  ;;  %7621 = vmatpush1.bf16.msra.mxu1 %v7620_v41  ;;  %v3688_v50 = vmul.f32 %v12188_v42, %v15021_v58  ;;  %v2396_v29 = vld [vmem:[#allocation2 + $0x670] sm:$0xff]  ;;  %v3521_v8 = vpop.xlane.xlu0 %3520 }
 0x643   : > { %15019 = vst [vmem:[#allocation178_spill] sm:$0xff] %v12186_v40  ;;  %v3687_v33 = vmul.f32 %v12188_v42, %v15022_v16  ;;  %5039 = vmax.xlane.f32.xlu1 %v5038_v22  ;;  %v12201_v35 = vadd.f32 %v4884_v27, %v14876_v38  ;;  %7622 = vmatprep.subr.bf16.mxu1 %v14845_v57  ;;  %v15024_v41 = vld [vmem:[#allocation90_spill] sm:$0xff]  ;;  %8419 = vrcp.f32 %v3521_v8  ;;  %v15030_v8 = vld [vmem:[#allocation64_spill] sm:$0xff] }
 0x644   : > { %15020 = vst [vmem:[#allocation240_spill] sm:$0xff] %v12193_v43  ;;  %v5047_v24 = vmax.f32 %v5046_v17, %v12193_v43  ;;  %v5051_v36 = vmax.f32 %v12182_v11, %v12186_v40  ;;  %v12209_v58 = vadd.f32 %v15024_v41, %v14819_v32  ;;  %3886 = vmatprep.mubr.f32.mxu1 %v3688_v50  ;;  %v12211_v22 = vpop.eup %8415  ;;  %v15026_v51 = vld [vmem:[#allocation94_spill] sm:$0xff]  ;;  %v15029_v43 = vld [vmem:[#allocation149_spill] sm:$0xff] }
 0x645   : > { %15023 = vst [vmem:[#allocation61_spill] sm:$0xff] %v12201_v35  ;;  %v4888_v16 = vpop.f32.mrb[248].mxu0  ;;  %v12215_v4 = vadd.f32 %v15026_v51, %v10151_v53  ;;  %3887 = vmatmul.mubr.f32.gmra.mrb[78].mxu1 %v3687_v33  ;;  %v7626_v11 = vpack.c.bf16 %v2396_v29, %v2395_v9  ;;  %v3692_v41 = vmul.f32 %v12211_v22, %v15029_v43  ;;  %v3526_v43 = vpop.xlane.xlu1 %3525 }
 0x646   : > { %15025 = vst [vmem:[#allocation59_spill] sm:$0xff] %v12209_v58  ;;  %v12218_v27 = vadd.f32 %v4888_v16, %v14865_v37  ;;  %v4890_v17 = vpop.f32.mrb[249].mxu0  ;;  %v5048_v40 = vmax.f32 %v5047_v24, %v12201_v35  ;;  %v3691_v50 = vmul.f32 %v12211_v22, %v15030_v8  ;;  %7624 = vmatpush1.bf16.msra.mxu1 %v7623_v52  ;;  %v15032_v16 = vld [vmem:[#allocation93_spill] sm:$0xff]  ;;  %v2398_v8 = vld [vmem:[#allocation2 + $0x6b0] sm:$0xff]  ;;  %8421 = vrcp.f32 %v3526_v43 }
 0x647   : > { %15027 = vst [vmem:[#allocation90_spill] sm:$0xff] %v12215_v4  ;;  %5044 = vmax.xlane.f32.xlu1 %v5043_v12  ;;  %v12226_v28 = vadd.f32 %v4890_v17, %v14876_v38  ;;  %7625 = vmatprep.subr.bf16.mxu1 %v14845_v57  ;;  %v12232_v51 = vadd.f32 %v15032_v16, %v14819_v32  ;;  %v15034_v24 = vld [vmem:[#allocation97_spill] sm:$0xff]  ;;  %v2397_v12 = vld [vmem:[#allocation2 + $0x690] sm:$0xff] }
 0x648   : > { %15028 = vst [vmem:[#allocation94_spill] sm:$0xff] %v12218_v27  ;;  %v5052_v33 = vmax.f32 %v5051_v36, %v12218_v27  ;;  %v12236_v9 = vadd.f32 %v15034_v24, %v10151_v53  ;;  %3891 = vmatprep.mubr.f32.mxu1 %v3692_v41  ;;  %v5056_v52 = vmax.f32 %v12209_v58, %v12215_v4  ;;  %v15038_v27 = vld [vmem:[#allocation151_spill] sm:$0xff]  ;;  %v3531_v4 = vpop.xlane.xlu0 %3530  ;;  %v2399_v58 = vld [vmem:[#allocation2 + $0x6d0] sm:$0xff] }
 0x649   : > { %15031 = vst [vmem:[#allocation149_spill] sm:$0xff] %v12226_v28  ;;  %15033 = vst [vmem:[#allocation64_spill] sm:$0xff] %v12232_v51  ;;  %v4894_v29 = vpop.f32.mrb[250].mxu0  ;;  %3892 = vmatmul.mubr.f32.gmra.mrb[80].mxu1 %v3691_v50  ;;  %8423 = vrcp.f32 %v3531_v4 }
 0x64a   : > { %15035 = vst [vmem:[#allocation93_spill] sm:$0xff] %v12236_v9  ;;  %v12241_v36 = vadd.f32 %v4894_v29, %v14865_v37  ;;  %v4896_v17 = vpop.f32.mrb[251].mxu0  ;;  %v12243_v16 = vpop.eup %8417  ;;  %v5053_v41 = vmax.f32 %v5052_v33, %v12226_v28  ;;  %7627 = vmatpush1.bf16.msra.mxu1 %v7626_v11  ;;  %v7629_v29 = vpack.c.bf16 %v2398_v8, %v2397_v12  ;;  %v15040_v11 = vld [vmem:[#allocation96_spill] sm:$0xff] }
 0x64b   : > { %5049 = vmax.xlane.f32.xlu1 %v5048_v40  ;;  %v12246_v24 = vadd.f32 %v4896_v17, %v14876_v38  ;;  %v3696_v35 = vmul.f32 %v12243_v16, %v15038_v27  ;;  %v3695_v43 = vmul.f32 %v12243_v16, %v15039_v30  ;;  %7628 = vmatprep.subr.bf16.mxu1 %v14845_v57  ;;  %v15042_v27 = vld [vmem:[#allocation98_spill] sm:$0xff] }
 0x64c   : > { %15036 = vst [vmem:[#allocation97_spill] sm:$0xff] %v12241_v36  ;;  %v5057_v50 = vmax.f32 %v5056_v52, %v12241_v36  ;;  %v5061_v40 = vmax.f32 %v12232_v51, %v12236_v9  ;;  %v12259_v33 = vadd.f32 %v15040_v11, %v14819_v32  ;;  %v12263_v28 = vadd.f32 %v15042_v27, %v10151_v53  ;;  %v15046_v32 = vld [vmem:[#allocation155_spill] sm:$0xff]  ;;  %v15047_v53 = vld [vmem:[#allocation154_spill] sm:$0xff] }
 0x64d   : > { %15037 = vst [vmem:[#allocation241_spill] sm:$0xff] %v12246_v24  ;;  %v4900_v17 = vpop.f32.mrb[252].mxu0  ;;  %3896 = vmatprep.mubr.f32.mxu1 %v3696_v35  ;;  %v12268_v8 = vpop.eup %8419  ;;  %v2402_v51 = vld [vmem:[#allocation2 + $0x730] sm:$0xff] }
 0x64e   : > { %15041 = vst [vmem:[#allocation151_spill] sm:$0xff] %v12259_v33  ;;  %15043 = vst [vmem:[#allocation67_spill] sm:$0xff] %v12263_v28  ;;  %v12266_v30 = vadd.f32 %v4900_v17, %v14865_v37  ;;  %v4902_v12 = vpop.f32.mrb[253].mxu0  ;;  %3897 = vmatmul.mubr.f32.gmra.mrb[82].mxu1 %v3695_v43  ;;  %v5058_v52 = vmax.f32 %v5057_v50, %v12246_v24  ;;  %v3700_v11 = vmul.f32 %v12268_v8, %v15046_v32  ;;  %v2401_v32 = vld [vmem:[#allocation2 + $0x710] sm:$0xff] }
 0x64f   : > { %5054 = vmax.xlane.f32.xlu1 %v5053_v41  ;;  %v12272_v9 = vadd.f32 %v4902_v12, %v14876_v38  ;;  %v3699_v4 = vmul.f32 %v12268_v8, %v15047_v53  ;;  %7630 = vmatpush1.bf16.msra.mxu1 %v7629_v29  ;;  %v7632_v17 = vpack.c.bf16 %v2400_v7, %v2399_v58  ;;  %v3536_v41 = vpop.xlane.xlu1 %3535  ;;  %v15051_v53 = vld [vmem:[#allocation157_spill] sm:$0xff] }
 0x650   : > { %15044 = vst [vmem:[#allocation96_spill] sm:$0xff] %v12266_v30  ;;  %v5062_v35 = vmax.f32 %v5061_v40, %v12266_v30  ;;  %7631 = vmatprep.subr.bf16.mxu1 %v14845_v57  ;;  %v5066_v43 = vmax.f32 %v12259_v33, %v12263_v28  ;;  %3901 = vmatprep.mubr.f32.mxu1 %v3700_v11  ;;  %8425 = vrcp.f32 %v3536_v41  ;;  %v12289_v58 = vpop.eup %8421  ;;  %v15050_v11 = vld [vmem:[#allocation158_spill] sm:$0xff]  ;;  %v3541_v41 = vpop.xlane.xlu0 %3540  ;;  %v15070_v33 = vld [vmem:[#allocation103_spill] sm:$0xff]  ;;  %v15074_v30 = vld [vmem:[#allocation108_spill] sm:$0xff] }
 0x651   : > { %15045 = vst [vmem:[#allocation98_spill] sm:$0xff] %v12272_v9  ;;  %v4906_v27 = vpop.f32.mrb[254].mxu0  ;;  %8427 = vrcp.f32 %v3541_v41  ;;  %v15055_v41 = vld [vmem:[#allocation79_spill] sm:$0xff] }
 0x652   : > { %v12283_v50 = vadd.f32 %v4906_v27, %v14865_v37  ;;  %v4908_v12 = vpop.f32.mrb[255].mxu0  ;;  %3902 = vmatmul.mubr.f32.gmra.mrb[84].mxu1 %v3699_v4  ;;  %v5063_v40 = vmax.f32 %v5062_v35, %v12272_v9  ;;  %v3704_v37 = vmul.f32 %v12289_v58, %v15050_v11  ;;  %v3703_v27 = vmul.f32 %v12289_v58, %v15051_v53  ;;  %v2403_v35 = vld [vmem:[#allocation2 + $0x750] sm:$0xff]  ;;  %v15053_v11 = vld [vmem:[#allocation76_spill] sm:$0xff] }
 0x653   : > { %5059 = vmax.xlane.f32.xlu1 %v5058_v52  ;;  %v12287_v7 = vadd.f32 %v4908_v12, %v14876_v38  ;;  %7633 = vmatpush1.bf16.msra.mxu1 %v7632_v17  ;;  %v7635_v4 = vpack.c.bf16 %v2402_v51, %v2401_v32  ;;  %v2404_v52 = vld [vmem:[#allocation2 + $0x770] sm:$0xff]  ;;  %v12298_v12 = vpop.eup %8423  ;;  %v15052_v17 = vld [vmem:[#allocation161_spill] sm:$0xff]  ;;  %v3546_v51 = vpop.xlane.xlu1 %3545 }
 0x654   : > { %15048 = vst [vmem:[#allocation155_spill] sm:$0xff] %v12283_v50  ;;  %v5067_v29 = vmax.f32 %v5066_v43, %v12283_v50  ;;  %7634 = vmatprep.subr.bf16.mxu1 %v14845_v57  ;;  %3906 = vmatprep.mubr.f32.mxu1 %v3704_v37  ;;  %v3708_v43 = vmul.f32 %v12298_v12, %v15052_v17  ;;  %v2405_v32 = vld [vmem:[#allocation2 + $0x790] sm:$0xff]  ;;  %8429 = vrcp.f32 %v3546_v51 }
 0x655   : > { %15049 = vst [vmem:[#allocation154_spill] sm:$0xff] %v12287_v7  ;;  %v3707_v53 = vmul.f32 %v12298_v12, %v15053_v11  ;;  %v7638_v50 = vpack.c.bf16 %v2404_v52, %v2403_v35  ;;  %v2406_v37 = vld [vmem:[#allocation2 + $0x7b0] sm:$0xff]  ;;  %v15056_v11 = vld [vmem:[#allocation168_spill] sm:$0xff] }
 0x656   : > { %v5068_v38 = vmax.f32 %v5067_v29, %v12287_v7  ;;  %3907 = vmatmul.mubr.f32.gmra.mrb[86].mxu1 %v3703_v27  ;;  %v15054_v29 = vld [vmem:[#allocation164_spill] sm:$0xff]  ;;  %v2407_v52 = vld [vmem:[#allocation2 + $0x7d0] sm:$0xff] }
 0x657   : > { %5064 = vmax.xlane.f32.xlu1 %v5063_v40  ;;  %7636 = vmatpush1.bf16.msra.mxu1 %v7635_v4  ;;  %v7641_v4 = vpack.c.bf16 %v2406_v37, %v2405_v32  ;;  %v3551_v35 = vpop.xlane.xlu0 %3550  ;;  %v15058_v37 = vld [vmem:[#allocation85_spill] sm:$0xff]  ;;  %v15066_v7 = vld [vmem:[#allocation184_spill] sm:$0xff] }
 0x658   : > { %7637 = vmatprep.subr.bf16.mxu1 %v14845_v57  ;;  %3911 = vmatprep.mubr.f32.mxu1 %v3708_v43  ;;  %v2408_v43 = vld [vmem:[#allocation2 + $0x7f0] sm:$0xff]  ;;  %8431 = vrcp.f32 %v3551_v35 }
 0x65a   : > { %3912 = vmatmul.mubr.f32.gmra.mrb[88].mxu1 %v3707_v53  ;;  %v12305_v40 = vpop.eup %8425  ;;  %v15057_v53 = vld [vmem:[#allocation82_spill] sm:$0xff] }
 0x65b   : > { %5069 = vmax.xlane.f32.xlu1 %v5068_v38  ;;  %7639 = vmatpush1.bf16.msra.mxu1 %v7638_v50  ;;  %v3712_v27 = vmul.f32 %v12305_v40, %v15054_v29  ;;  %v3711_v17 = vmul.f32 %v12305_v40, %v15055_v41  ;;  %v12312_v38 = vpop.eup %8427  ;;  %v7644_v29 = vpack.c.bf16 %v2408_v43, %v2407_v52  ;;  %v15060_v52 = vld [vmem:[#allocation175_spill] sm:$0xff] }
 0x65c   : > { %7640 = vmatprep.subr.bf16.mxu1 %v14845_v57  ;;  %v3716_v50 = vmul.f32 %v12312_v38, %v15056_v11  ;;  %v3715_v51 = vmul.f32 %v12312_v38, %v15057_v53 }
 0x65d   : > { %3916 = vmatprep.mubr.f32.mxu1 %v3712_v27  ;;  %v3556_v41 = vpop.xlane.xlu1 %3555 }
 0x65e   : > { %3917 = vmatmul.mubr.f32.gmra.mrb[90].mxu1 %v3711_v17  ;;  %8433 = vrcp.f32 %v3556_v41  ;;  %v12319_v32 = vpop.eup %8429  ;;  %v15059_v17 = vld [vmem:[#allocation83_spill] sm:$0xff]  ;;  %v15062_v41 = vld [vmem:[#allocation177_spill] sm:$0xff] }
 0x65f   : > { %7642 = vmatpush1.bf16.msra.mxu1 %v7641_v4  ;;  %3921 = vmatprep.mubr.f32.mxu1 %v3716_v50  ;;  %v3720_v27 = vmul.f32 %v12319_v32, %v15058_v37  ;;  %v3719_v35 = vmul.f32 %v12319_v32, %v15059_v17  ;;  %v15061_v50 = vld [vmem:[#allocation173_spill] sm:$0xff]  ;;  %v15063_v17 = vld [vmem:[#allocation91_spill] sm:$0xff] }
 0x660   : > { %7643 = vmatprep.subr.bf16.mxu1 %v14845_v57  ;;  %v3561_v11 = vpop.xlane.xlu0 %3560 }
 0x661   : > { %8435 = vrcp.f32 %v3561_v11 }
 0x662   : > { %3922 = vmatmul.mubr.f32.gmra.mrb[92].mxu1 %v3715_v51  ;;  %v12326_v4 = vpop.eup %8431 }
 0x663   : > { %7645 = vmatpush1.bf16.msra.mxu1 %v7644_v29  ;;  %3926 = vmatprep.mubr.f32.mxu1 %v3720_v27  ;;  %v3724_v43 = vmul.f32 %v12326_v4, %v15060_v52  ;;  %v3723_v53 = vmul.f32 %v12326_v4, %v15061_v50  ;;  %v15064_v52 = vld [vmem:[#allocation181_spill] sm:$0xff] }
 0x664   : > { %7710 = vmatprep.subr.bf16.mxu1 %v14845_v57 }
 0x665   : > { %v3566_v51 = vpop.xlane.xlu1 %3565 }
 0x666   : > { %3927 = vmatmul.mubr.f32.gmra.mrb[94].mxu1 %v3719_v35  ;;  %8437 = vrcp.f32 %v3566_v51 }
 0x667   : > { %3931 = vmatprep.mubr.f32.mxu1 %v3724_v43  ;;  %v15065_v43 = vld [vmem:[#allocation180_spill] sm:$0xff] }
 0x668   : > { %v12332_v29 = vpop.eup %8433 }
 0x669   : > { %v3728_v37 = vmul.f32 %v12332_v29, %v15062_v41  ;;  %v3727_v27 = vmul.f32 %v12332_v29, %v15063_v17 }
 0x66a   : > { %3932 = vmatmul.mubr.f32.gmra.mrb[96].mxu1 %v3723_v53  ;;  %v3571_v11 = vpop.xlane.xlu0 %3570 }
 0x66b   : > { %8439 = vrcp.f32 %v3571_v11  ;;  %3936 = vmatprep.mubr.f32.mxu1 %v3728_v37  ;;  %v12338_v35 = vpop.eup %8435  ;;  %v15067_v11 = vld [vmem:[#allocation183_spill] sm:$0xff] }
 0x66c   : > { %v3732_v50 = vmul.f32 %v12338_v35, %v15064_v52  ;;  %v3731_v53 = vmul.f32 %v12338_v35, %v15065_v43  ;;  %v15068_v52 = vld [vmem:[#allocation187_spill] sm:$0xff] }
 0x66d   : > { %v3576_v51 = vpop.xlane.xlu1 %3575 }
 0x66e   : > { %3937 = vmatmul.mubr.f32.gmra.mrb[98].mxu1 %v3727_v27  ;;  %8441 = vrcp.f32 %v3576_v51 }
 0x66f   : > { %3941 = vmatprep.mubr.f32.mxu1 %v3732_v50  ;;  %v15069_v50 = vld [vmem:[#allocation100_spill] sm:$0xff] }
 0x670   : > { %v12344_v41 = vpop.eup %8437 }
 0x671   : > { %v3736_v17 = vmul.f32 %v12344_v41, %v15066_v7  ;;  %v3735_v37 = vmul.f32 %v12344_v41, %v15067_v11 }
 0x672   : > { %3942 = vmatmul.mubr.f32.gmra.mrb[100].mxu1 %v3731_v53  ;;  %v3581_v28 = vpop.xlane.xlu0 %3580 }
 0x673   : > { %8443 = vrcp.f32 %v3581_v28  ;;  %3946 = vmatprep.mubr.f32.mxu1 %v3736_v17  ;;  %v15071_v28 = vld [vmem:[#allocation101_spill] sm:$0xff] }
 0x675   : > { %v12350_v27 = vpop.eup %8439  ;;  %v3586_v51 = vpop.xlane.xlu1 %3585 }
 0x676   : > { %3947 = vmatmul.mubr.f32.gmra.mrb[102].mxu1 %v3735_v37  ;;  %v3740_v43 = vmul.f32 %v12350_v27, %v15068_v52  ;;  %v3739_v53 = vmul.f32 %v12350_v27, %v15069_v50  ;;  %8445 = vrcp.f32 %v3586_v51  ;;  %v15072_v52 = vld [vmem:[#allocation106_spill] sm:$0xff] }
 0x678   : > { %3951 = vmatprep.mubr.f32.mxu1 %v3740_v43  ;;  %v12356_v7 = vpop.eup %8441  ;;  %v15073_v43 = vld [vmem:[#allocation104_spill] sm:$0xff] }
 0x679   : > { %v3744_v11 = vmul.f32 %v12356_v7, %v15070_v33  ;;  %v3743_v17 = vmul.f32 %v12356_v7, %v15071_v28 }
 0x67a   : > { %3952 = vmatmul.mubr.f32.gmra.mrb[104].mxu1 %v3739_v53 }
 0x67b   : > { %v3591_v9 = vpop.xlane.xlu0 %3590  ;;  %3956 = vmatprep.mubr.f32.mxu1 %v3744_v11  ;;  %v15075_v11 = vld [vmem:[#allocation107_spill] sm:$0xff] }
 0x67c   : > { %8447 = vrcp.f32 %v3591_v9 }
 0x67d   : > { %v12362_v37 = vpop.eup %8443 }
 0x67e   : > { %3957 = vmatmul.mubr.f32.gmra.mrb[106].mxu1 %v3743_v17  ;;  %v3748_v50 = vmul.f32 %v12362_v37, %v15072_v52  ;;  %v3747_v53 = vmul.f32 %v12362_v37, %v15073_v43  ;;  %v15077_v43 = vld [vmem:[#allocation112_spill] sm:$0xff] }
 0x680   : > { %v3596_v51 = vpop.xlane.xlu1 %3595  ;;  %3961 = vmatprep.mubr.f32.mxu1 %v3748_v50  ;;  %v12368_v33 = vpop.eup %8445 }
 0x681   : > { %8449 = vrcp.f32 %v3596_v51  ;;  %v3752_v28 = vmul.f32 %v12368_v33, %v15074_v30  ;;  %v3751_v24 = vmul.f32 %v12368_v33, %v15075_v11  ;;  %v12382_v30 = vmul.f32 %v11927_v61, %v15079_v31  ;;  %v15080_v11 = vld [vmem:[#allocation35_spill] sm:$0xff] }
 0x682   : > { %3962 = vmatmul.mubr.f32.gmra.mrb[108].mxu1 %v3747_v53  ;;  %v15078_v53 = vld [vmem:[#allocation111_spill] sm:$0xff] }
 0x683   : > { %3966 = vmatprep.mubr.f32.mxu1 %v3752_v28  ;;  %v12386_v28 = vmul.f32 %v11927_v61, %v15080_v11  ;;  %v15085_v61 = vld [vmem:[#allocation45_spill] sm:$0xff] }
 0x684   : > { %v3601_v9 = vpop.xlane.xlu0 %3600 }
 0x685   : > { %8451 = vrcp.f32 %v3601_v9  ;;  %v3606_v17 = vpop.xlane.xlu1 %3605  ;;  %v15081_v9 = vld [vmem:[#allocation44_spill] sm:$0xff] }
 0x686   : > { %3967 = vmatmul.mubr.f32.gmra.mrb[110].mxu1 %v3751_v24  ;;  %v12374_v52 = vpop.eup %8447  ;;  %8453 = vrcp.f32 %v3606_v17  ;;  %v12390_v17 = vmul.f32 %v11992_v49, %v15081_v9  ;;  %v15087_v9 = vld [vmem:[#allocation49_spill] sm:$0xff] }
 0x687   : > { %15076 = vst [vmem:[#allocation158_spill] sm:$0xff] %v12374_v52  ;;  %v3756_v50 = vmul.f32 %v12374_v52, %v15077_v43  ;;  %v3755_v51 = vmul.f32 %v12374_v52, %v15078_v53  ;;  %v15082_v43 = vld [vmem:[#allocation41_spill] sm:$0xff]  ;;  %v15083_v53 = vld [vmem:[#allocation48_spill] sm:$0xff]  ;;  %v12412_v44 = vmul.f32 %v12074_v47, %v15087_v9  ;;  %v15093_v9 = vld [vmem:[#allocation143_spill] sm:$0xff] }
 0x688   : > { %v3611_v36 = vpop.xlane.xlu0 %3610  ;;  %v12394_v13 = vmul.f32 %v11992_v49, %v15082_v43  ;;  %v12398_v14 = vmul.f32 %v12035_v45, %v15083_v53  ;;  %v15088_v49 = vld [vmem:[#allocation52_spill] sm:$0xff]  ;;  %v15089_v53 = vld [vmem:[#allocation191_spill] sm:$0xff]  ;;  %v15095_v52 = vld [vmem:[#allocation145_spill] sm:$0xff] }
 0x689   : > { %3971 = vmatprep.mubr.f32.mxu1 %v3756_v50  ;;  %8455 = vrcp.f32 %v3611_v36  ;;  %v12404_v50 = vmul.f32 %v12035_v45, %v15085_v61  ;;  %v15086_v36 = vld [vmem:[#allocation138_spill] sm:$0xff]  ;;  %v12416_v43 = vmul.f32 %v12103_v2, %v15088_v49  ;;  %v15091_v45 = vld [vmem:[#allocation141_spill] sm:$0xff]  ;;  %v12432_v49 = vmul.f32 %v12130_v20, %v15093_v9 }
 0x68a   : > { %v3616_v24 = vpop.xlane.xlu1 %3615  ;;  %3972 = vmatmul.mubr.f32.gmra.mrb[112].mxu1 %v3755_v51  ;;  %v12408_v11 = vmul.f32 %v12074_v47, %v15086_v36  ;;  %v15090_v51 = vld [vmem:[#allocation115_spill] sm:$0xff]  ;;  %v12424_v61 = vmul.f32 %v12103_v2, %v15091_v45  ;;  %v15092_v36 = vld [vmem:[#allocation54_spill] sm:$0xff]  ;;  %v15097_v2 = vld [vmem:[#allocation60_spill] sm:$0xff] }
 0x68b   : > { %v12400_v31 = vpop.eup %8449  ;;  %v12428_v56 = vmul.f32 %v12130_v20, %v15092_v36  ;;  %8457 = vrcp.f32 %v3616_v24  ;;  %v12444_v45 = vmul.f32 %v12188_v42, %v15097_v2  ;;  %v15099_v36 = vld [vmem:[#allocation147_spill] sm:$0xff]  ;;  %v15103_v9 = vld [vmem:[#allocation150_spill] sm:$0xff] }
 0x68c   : > { %15084 = vst [vmem:[#allocation157_spill] sm:$0xff] %v12400_v31  ;;  %v3760_v62 = vmul.f32 %v12400_v31, %v15089_v53  ;;  %v3759_v25 = vmul.f32 %v12400_v31, %v15090_v51  ;;  %v12436_v53 = vmul.f32 %v12155_v18, %v15094_v15  ;;  %v12440_v51 = vmul.f32 %v12155_v18, %v15095_v52  ;;  %v15101_v31 = vld [vmem:[#allocation63_spill] sm:$0xff]  ;;  %v15105_v18 = vld [vmem:[#allocation68_spill] sm:$0xff]  ;;  %v15107_v52 = vld [vmem:[#allocation153_spill] sm:$0xff] }
 0x68d   : > { %15098 = vst [vmem:[#allocation76_spill] sm:$0xff] %v12444_v45  ;;  %v12448_v24 = vmul.f32 %v12188_v42, %v15099_v36  ;;  %v12452_v20 = vmul.f32 %v12211_v22, %v15101_v31  ;;  %v12456_v15 = vmul.f32 %v12211_v22, %v15103_v9  ;;  %v12464_v2 = vmul.f32 %v12243_v16, %v15107_v52  ;;  %v15109_v45 = vld [vmem:[#allocation71_spill] sm:$0xff]  ;;  %v15111_v36 = vld [vmem:[#allocation156_spill] sm:$0xff] }
 0x68e   : > { %v3621_v47 = vpop.xlane.xlu0 %3620  ;;  %15096 = vst [vmem:[#allocation161_spill] sm:$0xff] %v12440_v51  ;;  %3976 = vmatprep.mubr.f32.mxu1 %v3760_v62  ;;  %v12460_v62 = vmul.f32 %v12243_v16, %v15105_v18  ;;  %v12468_v42 = vmul.f32 %v12268_v8, %v15109_v45  ;;  %v12472_v31 = vmul.f32 %v12268_v8, %v15111_v36  ;;  %v15116_v18 = vld [vmem:[#allocation159_spill] sm:$0xff]  ;;  %v15118_v16 = vld [vmem:[#allocation77_spill] sm:$0xff] }
 0x68f   : > { %15100 = vst [vmem:[#allocation164_spill] sm:$0xff] %v12448_v24  ;;  %15102 = vst [vmem:[#allocation79_spill] sm:$0xff] %v12452_v20  ;;  %3977 = vmatmul.mubr.f32.gmra.mrb[114].mxu1 %v3759_v25  ;;  %v12474_v20 = vpop.eup %8451  ;;  %v15114_v25 = vld [vmem:[#allocation160_spill] sm:$0xff]  ;;  %v12486_v52 = vmul.f32 %v12298_v12, %v15118_v16  ;;  %v15120_v45 = vld [vmem:[#allocation163_spill] sm:$0xff]  ;;  %8459 = vrcp.f32 %v3621_v47 }
 0x690   : > { %15104 = vst [vmem:[#allocation168_spill] sm:$0xff] %v12456_v15  ;;  %15106 = vst [vmem:[#allocation82_spill] sm:$0xff] %v12460_v62  ;;  %v12478_v9 = vmul.f32 %v12289_v58, %v15114_v25  ;;  %v12482_v62 = vmul.f32 %v12289_v58, %v15116_v18  ;;  %v12492_v8 = vpop.eup %8453  ;;  %v15123_v36 = vld [vmem:[#allocation27_spill] sm:$0xff]  ;;  %v15125_v15 = vld [vmem:[#allocation80_spill] sm:$0xff] }
 0x691   : > { %15108 = vst [vmem:[#allocation85_spill] sm:$0xff] %v12464_v2  ;;  %15110 = vst [vmem:[#allocation83_spill] sm:$0xff] %v12468_v42  ;;  %v12490_v42 = vmul.f32 %v12298_v12, %v15120_v45  ;;  %v15124_v2 = vld [vmem:[#allocation117_spill] sm:$0xff]  ;;  %v12500_v58 = vmul.f32 %v12305_v40, %v15125_v15  ;;  %v15127_v18 = vld [vmem:[#allocation166_spill] sm:$0xff] }
 0x692   : > { %15112 = vst [vmem:[#allocation175_spill] sm:$0xff] %v12472_v31  ;;  %15113 = vst [vmem:[#allocation173_spill] sm:$0xff] %v12474_v20  ;;  %v3764_v31 = vmul.f32 %v12474_v20, %v15123_v36  ;;  %v3763_v25 = vmul.f32 %v12474_v20, %v15124_v2  ;;  %v12504_v16 = vmul.f32 %v12305_v40, %v15127_v18  ;;  %v15130_v36 = vld [vmem:[#allocation81_spill] sm:$0xff] }
 0x693   : > { %v3626_v22 = vpop.xlane.xlu1 %3625  ;;  %15115 = vst [vmem:[#allocation177_spill] sm:$0xff] %v12478_v9  ;;  %15117 = vst [vmem:[#allocation91_spill] sm:$0xff] %v12482_v62  ;;  %v4915_v9 = vpop.xlane.xlu0 %4914  ;;  %v12512_v62 = vmul.f32 %v12312_v38, %v15130_v36  ;;  %v15132_v2 = vld [vmem:[#allocation29_spill] sm:$0xff] }
 0x694   : > { %15119 = vst [vmem:[#allocation181_spill] sm:$0xff] %v12486_v52  ;;  %15121 = vst [vmem:[#allocation180_spill] sm:$0xff] %v12490_v42  ;;  %v15129_v52 = vld [vmem:[#allocation195_spill] sm:$0xff]  ;;  %v5071_v45 = vsub.f32 %v11421_v60, %v4915_v9  ;;  %v5072_v42 = vsub.f32 %v11427_v6, %v4915_v9  ;;  %3981 = vmatprep.mubr.f32.mxu1 %v3764_v31  ;;  %v5073_v15 = vsub.f32 %v11579_v10, %v4915_v9  ;;  %v12520_v18 = vpop.eup %8455  ;;  %v15136_v60 = vld [vmem:[#allocation194_spill] sm:$0xff] }
 0x695   : > { %15122 = vst [vmem:[#allocation184_spill] sm:$0xff] %v12492_v8  ;;  %15126 = vst [vmem:[#allocation183_spill] sm:$0xff] %v12500_v58  ;;  %v3768_v12 = vmul.f32 %v12492_v8, %v15129_v52  ;;  %v5074_v20 = vsub.f32 %v15132_v2, %v4915_v9  ;;  %v15133_v58 = vld [vmem:[#allocation170_spill] sm:$0xff]  ;;  %3982 = vmatmul.mubr.f32.gmra.mrb[116].mxu1 %v3763_v25  ;;  %v3767_v6 = vmul.f32 %v12492_v8, %v15136_v60  ;;  %v15137_v10 = vld [vmem:[#allocation201_spill] sm:$0xff] }
 0x696   : > { %15128 = vst [vmem:[#allocation187_spill] sm:$0xff] %v12504_v16  ;;  %15131 = vst [vmem:[#allocation100_spill] sm:$0xff] %v12512_v62  ;;  %v12518_v40 = vmul.f32 %v12312_v38, %v15133_v58  ;;  %8461 = vrcp.f32 %v3626_v22  ;;  %v5199_v52 = vmul.f32 1.442695, %v5071_v45  ;;  %v5201_v36 = vmul.f32 1.442695, %v5072_v42  ;;  %v12531_v45 = vpop.eup %8457 }
 0x697   : > { %15135 = vst [vmem:[#allocation101_spill] sm:$0xff] %v12520_v18  ;;  %v4920_v62 = vpop.xlane.xlu1 %4919  ;;  %3986 = vmatprep.mubr.f32.mxu1 %v3768_v12  ;;  %v5203_v47 = vmul.f32 1.442695, %v5073_v15  ;;  %v5205_v31 = vmul.f32 1.442695, %v5074_v20  ;;  %v3772_v9 = vmul.f32 %v12520_v18, %v15137_v10  ;;  %v15138_v2 = vld [vmem:[#allocation199_spill] sm:$0xff] }
 0x698   : > { %15134 = vst [vmem:[#allocation103_spill] sm:$0xff] %v12518_v40  ;;  %v3771_v38 = vmul.f32 %v12520_v18, %v15138_v2  ;;  %v4925_v58 = vpop.xlane.xlu0 %4924  ;;  %8463 = vpow2.f32 %v5199_v52  ;;  %v15139_v40 = vld [vmem:[#allocation119_spill] sm:$0xff]  ;;  %v15140_v16 = vld [vmem:[#allocation196_spill] sm:$0xff]  ;;  %15142 = vst [vmem:[#allocation106_spill] sm:$0xff] %v12531_v45  ;;  %v5078_v42 = vsub.f32 %v11656_v48, %v4920_v62 }
 0x699   : > { %v5075_v25 = vsub.f32 %v15139_v40, %v4920_v62  ;;  %v5076_v24 = vsub.f32 %v15140_v16, %v4920_v62  ;;  %v15141_v60 = vld [vmem:[#allocation212_spill] sm:$0xff]  ;;  %8465 = vpow2.f32 %v5201_v36  ;;  %3987 = vmatmul.mubr.f32.gmra.mrb[118].mxu1 %v3767_v6  ;;  %v15145_v16 = vld [vmem:[#allocation214_spill] sm:$0xff] }
 0x69a   : > { %v5077_v22 = vsub.f32 %v15141_v60, %v4920_v62  ;;  %v15143_v20 = vld [vmem:[#allocation200_spill] sm:$0xff]  ;;  %8467 = vpow2.f32 %v5203_v47  ;;  %3991 = vmatprep.mubr.f32.mxu1 %v3772_v9  ;;  %v5213_v40 = vmul.f32 1.442695, %v5078_v42  ;;  %v5081_v8 = vsub.f32 %v15145_v16, %v4925_v58 }
 0x69b   : > { %v5079_v12 = vsub.f32 %v15143_v20, %v4925_v58  ;;  %v15144_v15 = vld [vmem:[#allocation120_spill] sm:$0xff]  ;;  %v5207_v2 = vmul.f32 1.442695, %v5075_v25  ;;  %v5209_v18 = vmul.f32 1.442695, %v5076_v24  ;;  %8469 = vpow2.f32 %v5205_v31  ;;  %v4930_v51 = vpop.xlane.xlu1 %4929  ;;  %v15147_v20 = vld [vmem:[#allocation86_spill] sm:$0xff] }
 0x69c   : > { %v5080_v10 = vsub.f32 %v15144_v15, %v4925_v58  ;;  %v5211_v52 = vmul.f32 1.442695, %v5077_v22  ;;  %v5082_v60 = vsub.f32 %v11672_v63, %v4925_v58  ;;  %v15146_v48 = vld [vmem:[#allocation204_spill] sm:$0xff]  ;;  %v12542_v6 = vmul.f32 %v12319_v32, %v15147_v20  ;;  %v15149_v31 = vld [vmem:[#allocation203_spill] sm:$0xff]  ;;  %v4935_v25 = vpop.xlane.xlu0 %4934  ;;  %v15150_v63 = vld [vmem:[#allocation121_spill] sm:$0xff] }
 0x69d   : > { %8471 = vpow2.f32 %v5207_v2  ;;  %v5215_v36 = vmul.f32 1.442695, %v5079_v12  ;;  %v3776_v62 = vmul.f32 %v12531_v45, %v15146_v48  ;;  %v5219_v47 = vmul.f32 1.442695, %v5081_v8  ;;  %3992 = vmatmul.mubr.f32.gmra.mrb[120].mxu1 %v3771_v38  ;;  %v15151_v22 = vld [vmem:[#allocation122_spill] sm:$0xff]  ;;  %v15152_v12 = vld [vmem:[#allocation216_spill] sm:$0xff]  ;;  %v12549_v2 = vpop.eup %8459 }
 0x69e   : > { %15148 = vst [vmem:[#allocation104_spill] sm:$0xff] %v12542_v6  ;;  %8473 = vpow2.f32 %v5209_v18  ;;  %v5217_v24 = vmul.f32 1.442695, %v5080_v10  ;;  %v3775_v9 = vmul.f32 %v12531_v45, %v15149_v31  ;;  %v5083_v58 = vsub.f32 %v15150_v63, %v4930_v51  ;;  %15153 = vst [vmem:[#allocation108_spill] sm:$0xff] %v12549_v2  ;;  %v15154_v8 = vld [vmem:[#allocation172_spill] sm:$0xff]  ;;  %v15158_v31 = vld [vmem:[#allocation87_spill] sm:$0xff] }
 0x69f   : > { %8475 = vpow2.f32 %v5211_v52  ;;  %v5084_v42 = vsub.f32 %v15151_v22, %v4930_v51  ;;  %v5085_v15 = vsub.f32 %v15152_v12, %v4930_v51  ;;  %v5221_v16 = vmul.f32 1.442695, %v5082_v60  ;;  %3996 = vmatprep.mubr.f32.mxu1 %v3776_v62  ;;  %v15157_v52 = vld [vmem:[#allocation123_spill] sm:$0xff]  ;;  %v15160_v60 = vld [vmem:[#allocation124_spill] sm:$0xff]  ;;  %v4940_v22 = vpop.xlane.xlu1 %4939 }
 0x6a0   : > { %8477 = vpow2.f32 %v5213_v40  ;;  %v5086_v18 = vsub.f32 %v11708_v3, %v4930_v51  ;;  %v12554_v10 = vmul.f32 %v12319_v32, %v15154_v8  ;;  %v12556_v48 = vpop.eup %8461  ;;  %v5223_v38 = vmul.f32 1.442695, %v5083_v58  ;;  %v15161_v3 = vld [vmem:[#allocation176_spill] sm:$0xff]  ;;  %v15164_v58 = vld [vmem:[#allocation217_spill] sm:$0xff]  ;;  %v15165_v8 = vld [vmem:[#allocation210_spill] sm:$0xff] }
 0x6a1   : > { %15156 = vst [vmem:[#allocation112_spill] sm:$0xff] %v12556_v48  ;;  %8479 = vpow2.f32 %v5215_v36  ;;  %v5087_v20 = vsub.f32 %v15157_v52, %v4935_v25  ;;  %v12561_v63 = vmul.f32 %v12326_v4, %v15158_v31  ;;  %v5225_v40 = vmul.f32 1.442695, %v5084_v42  ;;  %3997 = vmatmul.mubr.f32.gmra.mrb[122].mxu1 %v3775_v9  ;;  %v15168_v9 = vld [vmem:[#allocation125_spill] sm:$0xff] }
 0x6a2   : > { %15155 = vst [vmem:[#allocation107_spill] sm:$0xff] %v12554_v10  ;;  %8481 = vpow2.f32 %v5217_v24  ;;  %v5088_v62 = vsub.f32 %v15160_v60, %v4935_v25  ;;  %v12566_v51 = vmul.f32 %v12326_v4, %v15161_v3  ;;  %v12568_v32 = vpop.eup %8463  ;;  %v5227_v36 = vmul.f32 1.442695, %v5085_v15  ;;  %v15166_v60 = vld [vmem:[#allocation209_spill] sm:$0xff] }
 0x6a3   : > { %15159 = vst [vmem:[#allocation111_spill] sm:$0xff] %v12561_v63  ;;  %15163 = vst [vmem:[#allocation35_spill] sm:$0xff] %v12568_v32  ;;  %8483 = vpow2.f32 %v5219_v47  ;;  %v5089_v12 = vsub.f32 %v15164_v58, %v4935_v25  ;;  %v3780_v52 = vmul.f32 %v12549_v2, %v15165_v8  ;;  %v12573_v31 = vpop.eup %8465  ;;  %v5229_v24 = vmul.f32 1.442695, %v5086_v18  ;;  %v15169_v58 = vld [vmem:[#allocation92_spill] sm:$0xff]  ;;  %v15172_v18 = vld [vmem:[#allocation126_spill] sm:$0xff] }
 0x6a4   : > { %15162 = vst [vmem:[#allocation38_spill] sm:$0xff] %v12566_v51  ;;  %8485 = vpow2.f32 %v5221_v16  ;;  %v5090_v42 = vsub.f32 %v11721_v55, %v4935_v25  ;;  %v3779_v4 = vmul.f32 %v12549_v2, %v15166_v60  ;;  %v12578_v3 = vpop.eup %8467  ;;  %v5231_v47 = vmul.f32 1.442695, %v5087_v20  ;;  %v4945_v25 = vpop.xlane.xlu0 %4944  ;;  %v15173_v51 = vld [vmem:[#allocation179_spill] sm:$0xff] }
 0x6a5   : > { %15167 = vst [vmem:[#allocation44_spill] sm:$0xff] %v12578_v3  ;;  %8487 = vpow2.f32 %v5223_v38  ;;  %4001 = vmatprep.mubr.f32.mxu1 %v3780_v52  ;;  %v5091_v15 = vsub.f32 %v15168_v9, %v4940_v22  ;;  %v12583_v45 = vmul.f32 %v12332_v29, %v15169_v58  ;;  %v12585_v8 = vpop.eup %8469  ;;  %v5233_v16 = vmul.f32 1.442695, %v5088_v62  ;;  %v15176_v52 = vld [vmem:[#allocation46_spill] sm:$0xff]  ;;  %v15177_v58 = vld [vmem:[#allocation95_spill] sm:$0xff] }
 0x6a6   : > { %15171 = vst [vmem:[#allocation48_spill] sm:$0xff] %v12585_v8  ;;  %8489 = vpow2.f32 %v5225_v40  ;;  %v5092_v55 = vsub.f32 %v15172_v18, %v4940_v22  ;;  %v12590_v60 = vmul.f32 %v12332_v29, %v15173_v51  ;;  %v5235_v20 = vmul.f32 1.442695, %v5089_v12  ;;  %4002 = vmatmul.mubr.f32.gmra.mrb[124].mxu1 %v3779_v4  ;;  %v4334_v29 = vld [vmem:[#allocation2 + $0x38] sm:$0xff]  ;;  %v15179_v51 = vld [vmem:[#allocation182_spill] sm:$0xff] }
 0x6a7   : > { %15170 = vst [vmem:[#allocation41_spill] sm:$0xff] %v12583_v45  ;;  %v12592_v38 = vpop.eup %8471  ;;  %8491 = vpow2.f32 %v5227_v36  ;;  %v5093_v9 = vsub.f32 %v15176_v52, %v4940_v22  ;;  %v12597_v2 = vmul.f32 %v12338_v35, %v15177_v58  ;;  %v5237_v62 = vmul.f32 1.442695, %v5090_v42  ;;  %v4333_v45 = vld [vmem:[#allocation2 + $0x18] sm:$0xff]  ;;  %v15182_v52 = vld [vmem:[#allocation30_spill] sm:$0xff]  ;;  %v15185_v42 = vld [vmem:[#allocation28_spill] sm:$0xff] }
 0x6a8   : > { %15174 = vst [vmem:[#allocation45_spill] sm:$0xff] %v12590_v60  ;;  %15175 = vst [vmem:[#allocation138_spill] sm:$0xff] %v12592_v38  ;;  %v12599_v40 = vpop.eup %8473  ;;  %8493 = vpow2.f32 %v5229_v24  ;;  %v5094_v18 = vsub.f32 %v11749_v5, %v4940_v22  ;;  %v12604_v60 = vmul.f32 %v12338_v35, %v15179_v51  ;;  %v5239_v12 = vmul.f32 1.442695, %v5091_v15  ;;  %v15184_v5 = vld [vmem:[#allocation128_spill] sm:$0xff]  ;;  %v4950_v35 = vpop.xlane.xlu1 %4949  ;;  %v15187_v15 = vld [vmem:[#allocation218_spill] sm:$0xff] }
 0x6a9   : > { %15178 = vst [vmem:[#allocation49_spill] sm:$0xff] %v12597_v2  ;;  %v12606_v36 = vpop.eup %8475  ;;  %8495 = vpow2.f32 %v5231_v47  ;;  %v5095_v4 = vsub.f32 %v11559_v0, %v4945_v25  ;;  %v3784_v58 = vmul.f32 %v12556_v48, %v15182_v52  ;;  %v5241_v24 = vmul.f32 1.442695, %v5092_v55  ;;  %v15189_v55 = vld [vmem:[#allocation186_spill] sm:$0xff] }
 0x6aa   : > { %15180 = vst [vmem:[#allocation52_spill] sm:$0xff] %v12604_v60  ;;  %15181 = vst [vmem:[#allocation191_spill] sm:$0xff] %v12606_v36  ;;  %v12611_v2 = vpop.eup %8477  ;;  %8497 = vpow2.f32 %v5233_v16  ;;  %v5096_v22 = vsub.f32 %v15184_v5, %v4945_v25  ;;  %v3783_v63 = vmul.f32 %v12556_v48, %v15185_v42  ;;  %v5243_v47 = vmul.f32 1.442695, %v5093_v9  ;;  %v15192_v9 = vld [vmem:[#allocation129_spill] sm:$0xff] }
 0x6ab   : > { %15183 = vst [vmem:[#allocation115_spill] sm:$0xff] %v12611_v2  ;;  %v12616_v51 = vpop.eup %8479  ;;  %8499 = vpow2.f32 %v5235_v20  ;;  %v5097_v60 = vsub.f32 %v15187_v15, %v4945_v25  ;;  %4006 = vmatprep.mubr.f32.mxu1 %v3784_v58  ;;  %v7711_v0 = vpack.c.bf16 %v4334_v29, %v4333_v45  ;;  %v5245_v52 = vmul.f32 1.442695, %v5094_v18  ;;  %v4335_v45 = vld [vmem:[#allocation2 + $0x58] sm:$0xff]  ;;  %v15193_v58 = vld [vmem:[#allocation185_spill] sm:$0xff]  ;;  %v12637_v15 = vpop.xlane.xlu0 %4954 }
 0x6ac   : > { %15186 = vst [vmem:[#allocation141_spill] sm:$0xff] %v12616_v51  ;;  %v12619_v10 = vpop.eup %8481  ;;  %8501 = vpow2.f32 %v5237_v62  ;;  %v5098_v16 = vsub.f32 %v11765_v26, %v4945_v25  ;;  %4007 = vmatmul.mubr.f32.gmra.mrb[126].mxu1 %v3783_v63  ;;  %v12624_v5 = vmul.f32 %v12344_v41, %v15189_v55  ;;  %v5247_v20 = vmul.f32 1.442695, %v5095_v4  ;;  %v4336_v29 = vld [vmem:[#allocation2 + $0x78] sm:$0xff]  ;;  %v15196_v25 = vld [vmem:[#allocation130_spill] sm:$0xff] }
 0x6ad   : > { %15188 = vst [vmem:[#allocation54_spill] sm:$0xff] %v12619_v10  ;;  %v12626_v42 = vpop.eup %8483  ;;  %8503 = vpow2.f32 %v5239_v12  ;;  %v5099_v48 = vsub.f32 %v15192_v9, %v4950_v35  ;;  %4076 = vmatprep.mubr.f32.mxu1 %v12382_v30  ;;  %v12632_v62 = vmul.f32 %v12344_v41, %v15193_v58  ;;  %v5249_v63 = vmul.f32 1.442695, %v5096_v22  ;;  %v15197_v12 = vld [vmem:[#allocation99_spill] sm:$0xff]  ;;  %v15201_v41 = vld [vmem:[#allocation188_spill] sm:$0xff] }
 0x6ae   : > { %15190 = vst [vmem:[#allocation143_spill] sm:$0xff] %v12624_v5  ;;  %15191 = vst [vmem:[#allocation57_spill] sm:$0xff] %v12626_v42  ;;  %v12634_v26 = vpop.eup %8485  ;;  %8505 = vpow2.f32 %v5241_v24  ;;  %v5100_v18 = vsub.f32 %v15196_v25, %v4950_v35  ;;  %v12641_v4 = vmul.f32 %v12350_v27, %v15197_v12  ;;  %v5251_v30 = vmul.f32 1.442695, %v5097_v60  ;;  %v15200_v9 = vld [vmem:[#allocation219_spill] sm:$0xff] }
 0x6af   : > { %15194 = vst [vmem:[#allocation145_spill] sm:$0xff] %v12632_v62  ;;  %15195 = vst [vmem:[#allocation60_spill] sm:$0xff] %v12634_v26  ;;  %v12643_v55 = vpop.eup %8487  ;;  %8507 = vpow2.f32 %v5243_v47  ;;  %v5101_v5 = vsub.f32 %v15200_v9, %v4950_v35  ;;  %v12648_v58 = vmul.f32 %v12350_v27, %v15201_v41  ;;  %v5253_v22 = vmul.f32 1.442695, %v5098_v16  ;;  %v4338_v62 = vld [vmem:[#allocation2 + $0xb8] sm:$0xff]  ;;  %v15204_v27 = vld [vmem:[#allocation102_spill] sm:$0xff] }
 0x6b0   : > { %15198 = vst [vmem:[#allocation147_spill] sm:$0xff] %v12641_v4  ;;  %15199 = vst [vmem:[#allocation63_spill] sm:$0xff] %v12643_v55  ;;  %v12650_v24 = vpop.eup %8489  ;;  %8509 = vpow2.f32 %v5245_v52  ;;  %v5102_v25 = vsub.f32 %v11794_v19, %v4950_v35  ;;  %4077 = vmatmul.mubr.f32.vlgmr.msra.gmra.mrb[64].mxu1 %v12386_v28  ;;  %v7714_v12 = vpack.c.bf16 %v4336_v29, %v4335_v45  ;;  %v4337_v4 = vld [vmem:[#allocation2 + $0x98] sm:$0xff]  ;;  %v5255_v60 = vmul.f32 1.442695, %v5099_v48  ;;  %v12667_v45 = vpop.xlane.xlu1 %4959  ;;  %v15207_v48 = vld [vmem:[#allocation189_spill] sm:$0xff] }
 0x6b1   : > { %15202 = vst [vmem:[#allocation150_spill] sm:$0xff] %v12650_v24  ;;  %v12654_v6 = vpop.eup %8491  ;;  %8511 = vpow2.f32 %v5247_v20  ;;  %v5103_v47 = vsub.f32 %v11592_v46, %v12637_v15  ;;  %4081 = vmatprep.mubr.f32.mxu1 %v12390_v17  ;;  %7712 = vmatpush1.bf16.msra.mxu1 %v7711_v0  ;;  %v12661_v52 = vmul.f32 %v12356_v7, %v15204_v27  ;;  %v5257_v28 = vmul.f32 1.442695, %v5100_v18  ;;  %v15206_v35 = vld [vmem:[#allocation131_spill] sm:$0xff]  ;;  %v15209_v41 = vld [vmem:[#allocation105_spill] sm:$0xff] }
 0x6b2   : > { %15203 = vst [vmem:[#allocation68_spill] sm:$0xff] %v12654_v6  ;;  %v12663_v19 = vpop.eup %8493  ;;  %8513 = vpow2.f32 %v5249_v63  ;;  %v5104_v16 = vsub.f32 %v15206_v35, %v12637_v15  ;;  %7713 = vmatprep.subr.bf16.mxu1 %v14845_v57  ;;  %v12672_v46 = vmul.f32 %v12356_v7, %v15207_v48  ;;  %v5259_v0 = vmul.f32 1.442695, %v5101_v5 }
 0x6b3   : > { %15205 = vst [vmem:[#allocation153_spill] sm:$0xff] %v12663_v19  ;;  %v12674_v17 = vpop.eup %8495  ;;  %8515 = vpow2.f32 %v5251_v30  ;;  %v5105_v20 = vsub.f32 %v11769_v39, %v12637_v15  ;;  %v7717_v29 = vpack.c.bf16 %v4338_v62, %v4337_v4  ;;  %v5261_v18 = vmul.f32 1.442695, %v5102_v25  ;;  %v15211_v39 = vld [vmem:[#allocation32_spill] sm:$0xff] }
 0x6b4   : > { %15208 = vst [vmem:[#allocation71_spill] sm:$0xff] %v12674_v17  ;;  %v12678_v63 = vpop.eup %8497  ;;  %8517 = vpow2.f32 %v5253_v22  ;;  %v5106_v9 = vsub.f32 %v11802_v59, %v12637_v15  ;;  %4082 = vmatmul.mubr.f32.gmra.mrb[66].mxu1 %v12394_v13  ;;  %v12685_v7 = vmul.f32 %v12362_v37, %v15209_v41  ;;  %v5263_v5 = vmul.f32 1.442695, %v5103_v47  ;;  %v4339_v59 = vld [vmem:[#allocation2 + $0xd8] sm:$0xff]  ;;  %v15214_v47 = vld [vmem:[#allocation190_spill] sm:$0xff] }
 0x6b5   : > { %v12687_v27 = vpop.eup %8499  ;;  %8519 = vpow2.f32 %v5255_v60  ;;  %v5107_v62 = vsub.f32 %v15211_v39, %v12667_v45  ;;  %v5455_v4 = vadd.f32 %v12573_v31, %v12568_v32  ;;  %4086 = vmatprep.mubr.f32.mxu1 %v12398_v14  ;;  %7715 = vmatpush1.bf16.msra.mxu1 %v7714_v12  ;;  %v4340_v15 = vld [vmem:[#allocation2 + $0xf8] sm:$0xff]  ;;  %v5265_v30 = vmul.f32 1.442695, %v5104_v16  ;;  %v12698_v60 = vpop.xlane.xlu0 %4964  ;;  %v15216_v39 = vld [vmem:[#allocation225_spill] sm:$0xff] }
 0x6b6   : > { %15210 = vst [vmem:[#allocation156_spill] sm:$0xff] %v12687_v27  ;;  %v12694_v13 = vpop.eup %8501  ;;  %8521 = vpow2.f32 %v5257_v28  ;;  %v15213_v22 = vld [vmem:[#allocation31_spill] sm:$0xff]  ;;  %7716 = vmatprep.subr.bf16.mxu1 %v14845_v57  ;;  %v12703_v35 = vmul.f32 %v12362_v37, %v15214_v47  ;;  %v5267_v14 = vmul.f32 1.442695, %v5105_v20  ;;  %v5109_v12 = vsub.f32 %v11806_v23, %v12667_v45  ;;  %v15218_v20 = vld [vmem:[#allocation36_spill] sm:$0xff] }
 0x6b7   : > { %15212 = vst [vmem:[#allocation160_spill] sm:$0xff] %v12694_v13  ;;  %v5108_v25 = vsub.f32 %v15213_v22, %v12667_v45  ;;  %v12705_v48 = vpop.eup %8503  ;;  %8523 = vpow2.f32 %v5259_v0  ;;  %v5456_v28 = vadd.f32 %v12578_v3, %v5455_v4  ;;  %v5269_v41 = vmul.f32 1.442695, %v5106_v9  ;;  %v12720_v4 = vpop.xlane.xlu1 %4969 }
 0x6b8   : > { %15215 = vst [vmem:[#allocation159_spill] sm:$0xff] %v12705_v48  ;;  %v12710_v16 = vpop.eup %8505  ;;  %8525 = vpow2.f32 %v5261_v18  ;;  %v5110_v22 = vsub.f32 %v15216_v39, %v12667_v45  ;;  %4087 = vmatmul.mubr.f32.gmra.mrb[68].mxu1 %v12404_v50  ;;  %v7720_v37 = vpack.c.bf16 %v4340_v15, %v4339_v59  ;;  %v5271_v0 = vmul.f32 1.442695, %v5107_v62  ;;  %v15220_v50 = vld [vmem:[#allocation37_spill] sm:$0xff] }
 0x6b9   : > { %v12715_v47 = vpop.eup %8507  ;;  %8527 = vpow2.f32 %v5263_v5  ;;  %v5111_v32 = vsub.f32 %v15218_v20, %v12698_v60  ;;  %v5457_v23 = vadd.f32 %v12585_v8, %v5456_v28  ;;  %4091 = vmatprep.mubr.f32.mxu1 %v12408_v11  ;;  %7718 = vmatpush1.bf16.msra.mxu1 %v7717_v29  ;;  %v5273_v45 = vmul.f32 1.442695, %v5108_v25  ;;  %v15221_v5 = vld [vmem:[#allocation109_spill] sm:$0xff]  ;;  %v4341_v25 = vld [vmem:[#allocation2 + $0x118] sm:$0xff] }
 0x6ba   : > { %15217 = vst [vmem:[#allocation77_spill] sm:$0xff] %v12715_v47  ;;  %v12723_v18 = vpop.eup %8509  ;;  %8529 = vpow2.f32 %v5265_v30  ;;  %v5112_v9 = vsub.f32 %v15220_v50, %v12698_v60  ;;  %7719 = vmatprep.subr.bf16.mxu1 %v14845_v57  ;;  %v12730_v62 = vmul.f32 %v12368_v33, %v15221_v5  ;;  %v5275_v15 = vmul.f32 1.442695, %v5109_v12  ;;  %v15222_v11 = vld [vmem:[#allocation221_spill] sm:$0xff]  ;;  %v4342_v28 = vld [vmem:[#allocation2 + $0x138] sm:$0xff] }
 0x6bb   : > { %15219 = vst [vmem:[#allocation163_spill] sm:$0xff] %v12723_v18  ;;  %v12732_v59 = vpop.eup %8511  ;;  %8531 = vpow2.f32 %v5267_v14  ;;  %v5113_v29 = vsub.f32 %v15222_v11, %v12698_v60  ;;  %5458 = vadd.xlane.f32.xlu0 %v5457_v23  ;;  %v5460_v30 = vadd.f32 %v12599_v40, %v12592_v38  ;;  %v5277_v20 = vmul.f32 1.442695, %v5110_v22  ;;  %v15223_v5 = vld [vmem:[#allocation39_spill] sm:$0xff]  ;;  %v15225_v11 = vld [vmem:[#allocation42_spill] sm:$0xff] }
 0x6bc   : > { %v12738_v39 = vpop.eup %8513  ;;  %8533 = vpow2.f32 %v5269_v41  ;;  %v5114_v50 = vsub.f32 %v11862_v54, %v12698_v60  ;;  %v5115_v14 = vsub.f32 %v15223_v5, %v12720_v4  ;;  %4092 = vmatmul.mubr.f32.gmra.mrb[70].mxu1 %v12412_v44  ;;  %v5279_v23 = vmul.f32 1.442695, %v5111_v32  ;;  %v15227_v60 = vld [vmem:[#allocation223_spill] sm:$0xff]  ;;  %v4975_v44 = vpop.xlane.xlu0 %4974 }
 0x6bd   : > { %v12745_v12 = vpop.eup %8515  ;;  %8535 = vpow2.f32 %v5271_v0  ;;  %v5116_v3 = vsub.f32 %v15225_v11, %v12720_v4  ;;  %v5461_v8 = vadd.f32 %v12606_v36, %v5460_v30  ;;  %4096 = vmatprep.mubr.f32.mxu1 %v12416_v43  ;;  %7721 = vmatpush1.bf16.msra.mxu1 %v7720_v37  ;;  %v5281_v54 = vmul.f32 1.442695, %v5112_v9  ;;  %v15228_v11 = vld [vmem:[#allocation110_spill] sm:$0xff]  ;;  %v4980_v36 = vpop.xlane.xlu1 %4979 }
 0x6be   : > { %15224 = vst [vmem:[#allocation27_spill] sm:$0xff] %v12745_v12  ;;  %v12751_v41 = vpop.eup %8517  ;;  %8537 = vpow2.f32 %v5273_v45  ;;  %v5117_v22 = vsub.f32 %v15227_v60, %v12720_v4  ;;  %7722 = vmatprep.subr.bf16.mxu1 %v14845_v57  ;;  %v7723_v0 = vpack.c.bf16 %v4342_v28, %v4341_v25  ;;  %v5283_v5 = vmul.f32 1.442695, %v5113_v29 }
 0x6bf   : > { %15226 = vst [vmem:[#allocation117_spill] sm:$0xff] %v12751_v41  ;;  %v12756_v32 = vpop.eup %8519  ;;  %8539 = vpow2.f32 %v5275_v15  ;;  %v5462_v30 = vadd.f32 %v12611_v2, %v5461_v8  ;;  %v12761_v43 = vmul.f32 %v12368_v33, %v15228_v11  ;;  %v5285_v45 = vmul.f32 1.442695, %v5114_v50  ;;  %v15235_v11 = vld [vmem:[#allocation226_spill] sm:$0xff] }
 0x6c0   : > { %v12763_v37 = vpop.eup %8521  ;;  %8541 = vpow2.f32 %v5277_v20  ;;  %v5118_v9 = vsub.f32 %v11879_v1, %v12720_v4  ;;  %v5287_v60 = vmul.f32 1.442695, %v5115_v14  ;;  %4097 = vmatmul.mubr.f32.gmra.mrb[72].mxu1 %v12424_v61  ;;  %v5289_v15 = vmul.f32 1.442695, %v5116_v3  ;;  %v15231_v4 = vld [vmem:[#allocation43_spill] sm:$0xff]  ;;  %v15232_v20 = vld [vmem:[#allocation208_spill] sm:$0xff] }
 0x6c1   : > { %v12768_v25 = vpop.eup %8523  ;;  %8543 = vpow2.f32 %v5279_v23  ;;  %v5119_v8 = vsub.f32 %v11699_v34, %v4975_v44  ;;  %5463 = vadd.xlane.f32.xlu0 %v5462_v30  ;;  %v5465_v33 = vadd.f32 %v12619_v10, %v12616_v51  ;;  %4101 = vmatprep.mubr.f32.mxu1 %v12428_v56  ;;  %v5291_v1 = vmul.f32 1.442695, %v5117_v22  ;;  %v15233_v3 = vld [vmem:[#allocation47_spill] sm:$0xff]  ;;  %v15234_v22 = vld [vmem:[#allocation137_spill] sm:$0xff]  ;;  %v15248_v51 = vld [vmem:[#allocation76_spill] sm:$0xff] }
 0x6c2   : > { %15229 = vst [vmem:[#allocation80_spill] sm:$0xff] %v12768_v25  ;;  %v12774_v29 = vpop.eup %8525  ;;  %8545 = vpow2.f32 %v5281_v54  ;;  %v5120_v28 = vsub.f32 %v15231_v4, %v4975_v44  ;;  %v5121_v61 = vsub.f32 %v15232_v20, %v4975_v44  ;;  %7724 = vmatpush1.bf16.msra.mxu1 %v7723_v0  ;;  %v5122_v34 = vsub.f32 %v11911_v21, %v4975_v44  ;;  %v4985_v44 = vpop.xlane.xlu0 %4984  ;;  %v15238_v20 = vld [vmem:[#allocation158_spill] sm:$0xff] }
 0x6c3   : > { %15230 = vst [vmem:[#allocation166_spill] sm:$0xff] %v12774_v29  ;;  %v12778_v50 = vpop.eup %8527  ;;  %8547 = vpow2.f32 %v5283_v5  ;;  %v5123_v14 = vsub.f32 %v15233_v3, %v4980_v36  ;;  %v5466_v23 = vadd.f32 %v12626_v42, %v5465_v33  ;;  %7725 = vmatprep.subr.bf16.mxu1 %v14845_v57  ;;  %v5293_v54 = vmul.f32 1.442695, %v5118_v9  ;;  %v15237_v33 = vld [vmem:[#allocation113_spill] sm:$0xff] }
 0x6c4   : > { %v12784_v56 = vpop.eup %8529  ;;  %8549 = vpow2.f32 %v5285_v45  ;;  %v5124_v30 = vsub.f32 %v15234_v22, %v4980_v36  ;;  %v5125_v4 = vsub.f32 %v15235_v11, %v4980_v36  ;;  %4102 = vmatmul.mubr.f32.gmra.mrb[74].mxu1 %v12432_v49  ;;  %v5295_v21 = vmul.f32 1.442695, %v5119_v8  ;;  %v15240_v11 = vld [vmem:[#allocation228_spill] sm:$0xff] }
 0x6c5   : > { %v12789_v0 = vpop.eup %8531  ;;  %8551 = vpow2.f32 %v5287_v60  ;;  %v5467_v5 = vadd.f32 %v12634_v26, %v5466_v23  ;;  %4106 = vmatprep.mubr.f32.mxu1 %v12436_v53  ;;  %v12795_v3 = vmul.f32 %v15238_v20, %v15237_v33  ;;  %v5297_v9 = vmul.f32 1.442695, %v5120_v28  ;;  %v4990_v23 = vpop.xlane.xlu1 %4989 }
 0x6c6   : > { %15236 = vst [vmem:[#allocation195_spill] sm:$0xff] %v12789_v0  ;;  %v12797_v45 = vpop.eup %8533  ;;  %8553 = vpow2.f32 %v5289_v15  ;;  %v5299_v22 = vmul.f32 1.442695, %v5121_v61  ;;  %v5126_v49 = vsub.f32 %v15240_v11, %v4980_v36  ;;  %v5301_v60 = vmul.f32 1.442695, %v5122_v34  ;;  %v15243_v15 = vld [vmem:[#allocation140_spill] sm:$0xff] }
 0x6c7   : > { %15239 = vst [vmem:[#allocation81_spill] sm:$0xff] %v12797_v45  ;;  %v12800_v42 = vpop.eup %8535  ;;  %8555 = vpow2.f32 %v5291_v1  ;;  %v5303_v8 = vmul.f32 1.442695, %v5123_v14  ;;  %5468 = vadd.xlane.f32.xlu0 %v5467_v5  ;;  %v5470_v53 = vadd.f32 %v12650_v24, %v12643_v55  ;;  %v5305_v33 = vmul.f32 1.442695, %v5124_v30  ;;  %v15244_v61 = vld [vmem:[#allocation161_spill] sm:$0xff] }
 0x6c8   : > { %15241 = vst [vmem:[#allocation29_spill] sm:$0xff] %v12800_v42  ;;  %v12804_v26 = vpop.eup %8537  ;;  %8557 = vpow2.f32 %v5293_v54  ;;  %v5307_v2 = vmul.f32 1.442695, %v5125_v4  ;;  %v5127_v28 = vsub.f32 %v15243_v15, %v4985_v44  ;;  %4107 = vmatmul.mubr.f32.gmra.mrb[76].mxu1 %v15244_v61  ;;  %v15246_v1 = vld [vmem:[#allocation50_spill] sm:$0xff]  ;;  %v15247_v14 = vld [vmem:[#allocation227_spill] sm:$0xff]  ;;  %v15250_v30 = vld [vmem:[#allocation229_spill] sm:$0xff] }
 0x6c9   : > { %15242 = vst [vmem:[#allocation170_spill] sm:$0xff] %v12804_v26  ;;  %v12808_v36 = vpop.eup %8539  ;;  %8559 = vpow2.f32 %v5295_v21  ;;  %v5128_v34 = vsub.f32 %v15246_v1, %v4985_v44  ;;  %v5129_v5 = vsub.f32 %v15247_v14, %v4985_v44  ;;  %v5471_v11 = vadd.f32 %v12654_v6, %v5470_v53  ;;  %4111 = vmatprep.mubr.f32.mxu1 %v15248_v51  ;;  %v15251_v15 = vld [vmem:[#allocation142_spill] sm:$0xff]  ;;  %v15252_v21 = vld [vmem:[#allocation220_spill] sm:$0xff]  ;;  %v12821_v1 = vpop.xlane.xlu0 %4994 }
 0x6ca   : > { %15245 = vst [vmem:[#allocation194_spill] sm:$0xff] %v12808_v36  ;;  %v12814_v55 = vpop.eup %8541  ;;  %8561 = vpow2.f32 %v5297_v9  ;;  %v5309_v54 = vmul.f32 1.442695, %v5126_v49  ;;  %v5130_v4 = vsub.f32 %v15250_v30, %v4985_v44  ;;  %v5131_v24 = vsub.f32 %v15251_v15, %v4990_v23  ;;  %v15253_v49 = vld [vmem:[#allocation230_spill] sm:$0xff]  ;;  %v15254_v30 = vld [vmem:[#allocation231_spill] sm:$0xff]  ;;  %v15255_v6 = vld [vmem:[#allocation164_spill] sm:$0xff] }
 0x6cb   : > { %15249 = vst [vmem:[#allocation201_spill] sm:$0xff] %v12814_v55  ;;  %v12818_v61 = vpop.eup %8543  ;;  %8563 = vpow2.f32 %v5299_v22  ;;  %v5132_v10 = vsub.f32 %v15252_v21, %v4990_v23  ;;  %v5472_v14 = vadd.f32 %v12663_v19, %v5471_v11  ;;  %v5475_v51 = vadd.f32 %v12678_v63, %v12674_v17  ;;  %v15257_v19 = vld [vmem:[#allocation79_spill] sm:$0xff] }
 0x6cc   : > { %v12826_v53 = vpop.eup %8545  ;;  %8565 = vpow2.f32 %v5301_v60  ;;  %v5311_v9 = vmul.f32 1.442695, %v5127_v28  ;;  %v5133_v44 = vsub.f32 %v15253_v49, %v4990_v23  ;;  %v5134_v15 = vsub.f32 %v15254_v30, %v4990_v23  ;;  %4112 = vmatmul.mubr.f32.gmra.mrb[78].mxu1 %v15255_v6  ;;  %v15259_v28 = vld [vmem:[#allocation222_spill] sm:$0xff]  ;;  %v12839_v23 = vpop.xlane.xlu1 %4999  ;;  %v15262_v30 = vld [vmem:[#allocation168_spill] sm:$0xff] }
 0x6cd   : > { %v12831_v22 = vpop.eup %8547  ;;  %8567 = vpow2.f32 %v5303_v8  ;;  %v5313_v21 = vmul.f32 1.442695, %v5128_v34  ;;  %v5315_v38 = vmul.f32 1.442695, %v5129_v5  ;;  %5473 = vadd.xlane.f32.xlu0 %v5472_v14  ;;  %v5476_v11 = vadd.f32 %v12687_v27, %v5475_v51  ;;  %4116 = vmatprep.mubr.f32.mxu1 %v15257_v19  ;;  %v15264_v27 = vld [vmem:[#allocation144_spill] sm:$0xff] }
 0x6ce   : > { %15256 = vst [vmem:[#allocation199_spill] sm:$0xff] %v12831_v22  ;;  %v12835_v17 = vpop.eup %8549  ;;  %8569 = vpow2.f32 %v5305_v33  ;;  %v5317_v60 = vmul.f32 1.442695, %v5130_v4  ;;  %v5135_v49 = vsub.f32 %v15259_v28, %v12821_v1  ;;  %v5500_v6 = vadd.f32 %v12804_v26, %v12800_v42 }
 0x6cf   : > { %15258 = vst [vmem:[#allocation119_spill] sm:$0xff] %v12835_v17  ;;  %v12843_v8 = vpop.eup %8551  ;;  %8571 = vpow2.f32 %v5307_v2  ;;  %v5319_v34 = vmul.f32 1.442695, %v5131_v24  ;;  %v5321_v5 = vmul.f32 1.442695, %v5132_v10  ;;  %v5477_v14 = vadd.f32 %v12694_v13, %v5476_v11  ;;  %v15265_v2 = vld [vmem:[#allocation34_spill] sm:$0xff] }
 0x6d0   : > { %15260 = vst [vmem:[#allocation196_spill] sm:$0xff] %v12843_v8  ;;  %v12846_v19 = vpop.eup %8553  ;;  %8573 = vpow2.f32 %v5309_v54  ;;  %v5323_v33 = vmul.f32 1.442695, %v5133_v44  ;;  %v5325_v4 = vmul.f32 1.442695, %v5134_v15  ;;  %v5501_v51 = vadd.f32 %v12808_v36, %v5500_v6  ;;  %4117 = vmatmul.mubr.f32.gmra.mrb[80].mxu1 %v15262_v30  ;;  %v15266_v24 = vld [vmem:[#allocation232_spill] sm:$0xff]  ;;  %v12862_v30 = vpop.xlane.xlu1 %5009 }
 0x6d1   : > { %15261 = vst [vmem:[#allocation212_spill] sm:$0xff] %v12846_v19  ;;  %v12850_v28 = vpop.eup %8555  ;;  %8575 = vpow2.f32 %v5311_v9  ;;  %v5136_v42 = vsub.f32 %v15264_v27, %v12821_v1  ;;  %v5137_v10 = vsub.f32 %v15265_v2, %v12821_v1  ;;  %v5138_v11 = vsub.f32 %v15266_v24, %v12821_v1  ;;  %5478 = vadd.xlane.f32.xlu0 %v5477_v14  ;;  %v15267_v54 = vld [vmem:[#allocation82_spill] sm:$0xff]  ;;  %v15270_v14 = vld [vmem:[#allocation224_spill] sm:$0xff] }
 0x6d2   : > { %15263 = vst [vmem:[#allocation200_spill] sm:$0xff] %v12850_v28  ;;  %4121 = vmatprep.mubr.f32.mxu1 %v15267_v54  ;;  %v12859_v44 = vpop.eup %8557  ;;  %8577 = vpow2.f32 %v5313_v21  ;;  %v5327_v15 = vmul.f32 1.442695, %v5135_v49  ;;  %v5502_v6 = vadd.f32 %v12814_v55, %v5501_v51  ;;  %v5480_v27 = vadd.f32 %v12710_v16, %v12705_v48  ;;  %v15269_v2 = vld [vmem:[#allocation146_spill] sm:$0xff]  ;;  %v15271_v54 = vld [vmem:[#allocation233_spill] sm:$0xff]  ;;  %v12876_v51 = vpop.xlane.xlu0 %5004  ;;  %v15275_v48 = vld [vmem:[#allocation83_spill] sm:$0xff] }
 0x6d3   : > { %15268 = vst [vmem:[#allocation120_spill] sm:$0xff] %v12859_v44  ;;  %v12866_v9 = vpop.eup %8559  ;;  %8579 = vpow2.f32 %v5315_v38  ;;  %v5139_v1 = vsub.f32 %v15269_v2, %v12839_v23  ;;  %v5140_v24 = vsub.f32 %v15270_v14, %v12839_v23  ;;  %v5141_v21 = vsub.f32 %v15271_v54, %v12839_v23  ;;  %v15272_v55 = vld [vmem:[#allocation85_spill] sm:$0xff] }
 0x6d4   : > { %v12874_v49 = vpop.eup %8561  ;;  %8581 = vpow2.f32 %v5317_v60  ;;  %5503 = vadd.xlane.f32.xlu1 %v5502_v6  ;;  %v5481_v36 = vadd.f32 %v12715_v47, %v5480_v27  ;;  %v5510_v38 = vadd.f32 %v12846_v19, %v12843_v8  ;;  %v5485_v2 = vadd.f32 %v12738_v39, %v12732_v59  ;;  %4122 = vmatmul.mubr.f32.gmra.mrb[82].mxu1 %v15272_v55  ;;  %v15274_v60 = vld [vmem:[#allocation40_spill] sm:$0xff]  ;;  %v12894_v55 = vpop.xlane.xlu1 %5019 }
 0x6d5   : > { %v12884_v14 = vpop.eup %8563  ;;  %8583 = vpow2.f32 %v5319_v34  ;;  %v5329_v54 = vmul.f32 1.442695, %v5136_v42  ;;  %v5331_v13 = vmul.f32 1.442695, %v5137_v10  ;;  %v5142_v26 = vsub.f32 %v15274_v60, %v12839_v23  ;;  %4126 = vmatprep.mubr.f32.mxu1 %v15275_v48  ;;  %v15278_v23 = vld [vmem:[#allocation62_spill] sm:$0xff] }
 0x6d6   : > { %15273 = vst [vmem:[#allocation214_spill] sm:$0xff] %v12884_v14  ;;  %v12889_v6 = vpop.eup %8565  ;;  %8585 = vpow2.f32 %v5321_v5  ;;  %v5482_v27 = vadd.f32 %v12723_v18, %v5481_v36  ;;  %v5511_v47 = vadd.f32 %v12850_v28, %v5510_v38  ;;  %v5486_v8 = vadd.f32 %v12745_v12, %v5485_v2  ;;  %v15280_v38 = vld [vmem:[#allocation175_spill] sm:$0xff] }
 0x6d7   : > { %15276 = vst [vmem:[#allocation204_spill] sm:$0xff] %v12889_v6  ;;  %v12896_v19 = vpop.eup %8567  ;;  %8587 = vpow2.f32 %v5323_v33  ;;  %v5333_v42 = vmul.f32 1.442695, %v5138_v11  ;;  %v5335_v34 = vmul.f32 1.442695, %v5139_v1  ;;  %v5143_v10 = vsub.f32 %v15278_v23, %v12876_v51  ;;  %v15282_v33 = vld [vmem:[#allocation148_spill] sm:$0xff] }
 0x6d8   : > { %15277 = vst [vmem:[#allocation86_spill] sm:$0xff] %v12896_v19  ;;  %v12900_v48 = vpop.eup %8569  ;;  %8589 = vpow2.f32 %v5325_v4  ;;  %v5337_v5 = vmul.f32 1.442695, %v5140_v24  ;;  %v5339_v60 = vmul.f32 1.442695, %v5141_v21  ;;  %5483 = vadd.xlane.f32.xlu0 %v5482_v27  ;;  %v5512_v36 = vadd.f32 %v12859_v44, %v5511_v47  ;;  %4127 = vmatmul.mubr.f32.gmra.mrb[84].mxu1 %v15280_v38  ;;  %v15283_v23 = vld [vmem:[#allocation177_spill] sm:$0xff] }
 0x6d9   : > { %15279 = vst [vmem:[#allocation203_spill] sm:$0xff] %v12900_v48  ;;  %v12904_v2 = vpop.eup %8571  ;;  %8591 = vpow2.f32 %v5327_v15  ;;  %v5341_v28 = vmul.f32 1.442695, %v5142_v26  ;;  %v5144_v11 = vsub.f32 %v15282_v33, %v12876_v51  ;;  %v5520_v1 = vadd.f32 %v12900_v48, %v12896_v19  ;;  %4131 = vmatprep.mubr.f32.mxu1 %v15283_v23  ;;  %v15285_v24 = vld [vmem:[#allocation33_spill] sm:$0xff]  ;;  %v15286_v21 = vld [vmem:[#allocation234_spill] sm:$0xff]  ;;  %v12918_v15 = vpop.xlane.xlu1 %5029 }
 0x6da   : > { %15281 = vst [vmem:[#allocation121_spill] sm:$0xff] %v12904_v2  ;;  %v12911_v4 = vpop.eup %8573  ;;  %8593 = vpow2.f32 %v5329_v54  ;;  %v5145_v47 = vsub.f32 %v15285_v24, %v12876_v51  ;;  %v5146_v27 = vsub.f32 %v15286_v21, %v12876_v51  ;;  %5513 = vadd.xlane.f32.xlu1 %v5512_v36  ;;  %v5487_v26 = vadd.f32 %v12751_v41, %v5486_v8  ;;  %v15287_v24 = vld [vmem:[#allocation65_spill] sm:$0xff]  ;;  %v15288_v36 = vld [vmem:[#allocation152_spill] sm:$0xff]  ;;  %v15289_v21 = vld [vmem:[#allocation235_spill] sm:$0xff] }
 0x6db   : > { %15284 = vst [vmem:[#allocation122_spill] sm:$0xff] %v12911_v4  ;;  %v12920_v38 = vpop.eup %8575  ;;  %8595 = vpow2.f32 %v5331_v13  ;;  %v5343_v33 = vmul.f32 1.442695, %v5143_v10  ;;  %v5521_v23 = vadd.f32 %v12904_v2, %v5520_v1  ;;  %v5490_v54 = vadd.f32 %v12763_v37, %v12756_v32  ;;  %v15290_v13 = vld [vmem:[#allocation91_spill] sm:$0xff]  ;;  %v5015_v1 = vpop.xlane.xlu0 %5014  ;;  %v15292_v41 = vld [vmem:[#allocation181_spill] sm:$0xff] }
 0x6dc   : > { %v12925_v44 = vpop.eup %8577  ;;  %8597 = vpow2.f32 %v5333_v42  ;;  %v5147_v51 = vsub.f32 %v15287_v24, %v12862_v30  ;;  %v5148_v8 = vsub.f32 %v15288_v36, %v12862_v30  ;;  %v5149_v12 = vsub.f32 %v15289_v21, %v12862_v30  ;;  %5488 = vadd.xlane.f32.xlu0 %v5487_v26  ;;  %4132 = vmatmul.mubr.f32.gmra.mrb[86].mxu1 %v15290_v13  ;;  %v15294_v13 = vld [vmem:[#allocation236_spill] sm:$0xff] }
 0x6dd   : > { %v12934_v10 = vpop.eup %8579  ;;  %8599 = vpow2.f32 %v5335_v34  ;;  %v5522_v2 = vadd.f32 %v12911_v4, %v5521_v23  ;;  %v5491_v42 = vadd.f32 %v12768_v25, %v5490_v54  ;;  %v5495_v24 = vadd.f32 %v12784_v56, %v12778_v50  ;;  %4136 = vmatprep.mubr.f32.mxu1 %v15292_v41  ;;  %v15297_v25 = vld [vmem:[#allocation66_spill] sm:$0xff]  ;;  %v12953_v48 = vpop.xlane.xlu1 %5034 }
 0x6de   : > { %15291 = vst [vmem:[#allocation216_spill] sm:$0xff] %v12934_v10  ;;  %v12941_v36 = vpop.eup %8581  ;;  %8601 = vpow2.f32 %v5337_v5  ;;  %v5345_v21 = vmul.f32 1.442695, %v5144_v11  ;;  %v5347_v26 = vmul.f32 1.442695, %v5145_v47  ;;  %v5150_v18 = vsub.f32 %v15294_v13, %v12862_v30  ;;  %v15298_v11 = vld [vmem:[#allocation70_spill] sm:$0xff] }
 0x6df   : > { %15293 = vst [vmem:[#allocation172_spill] sm:$0xff] %v12941_v36  ;;  %v12945_v19 = vpop.eup %8583  ;;  %8603 = vpow2.f32 %v5339_v60  ;;  %v5349_v34 = vmul.f32 1.442695, %v5146_v27  ;;  %5523 = vadd.xlane.f32.xlu1 %v5522_v2  ;;  %v5492_v23 = vadd.f32 %v12774_v29, %v5491_v42  ;;  %v5496_v54 = vadd.f32 %v12789_v0, %v5495_v24  ;;  %v15299_v30 = vld [vmem:[#allocation180_spill] sm:$0xff]  ;;  %v15301_v42 = vld [vmem:[#allocation183_spill] sm:$0xff] }
 0x6e0   : > { %15295 = vst [vmem:[#allocation123_spill] sm:$0xff] %v12945_v19  ;;  %v12949_v4 = vpop.eup %8585  ;;  %8605 = vpow2.f32 %v5341_v28  ;;  %v5351_v41 = vmul.f32 1.442695, %v5147_v51  ;;  %v5151_v5 = vsub.f32 %v15297_v25, %v5015_v1  ;;  %v5152_v47 = vsub.f32 %v15298_v11, %v5015_v1  ;;  %4137 = vmatmul.mubr.f32.gmra.mrb[88].mxu1 %v15299_v30  ;;  %v15303_v51 = vld [vmem:[#allocation132_spill] sm:$0xff]  ;;  %v15304_v11 = vld [vmem:[#allocation134_spill] sm:$0xff]  ;;  %v15306_v29 = vld [vmem:[#allocation187_spill] sm:$0xff] }
 0x6e1   : > { %15296 = vst [vmem:[#allocation87_spill] sm:$0xff] %v12949_v4  ;;  %v12956_v13 = vpop.eup %8587  ;;  %8607 = vpow2.f32 %v5343_v33  ;;  %v5353_v60 = vmul.f32 1.442695, %v5148_v8  ;;  %v5355_v2 = vmul.f32 1.442695, %v5149_v12  ;;  %5493 = vadd.xlane.f32.xlu0 %v5492_v23  ;;  %v5530_v27 = vadd.f32 %v12949_v4, %v12945_v19  ;;  %4141 = vmatprep.mubr.f32.mxu1 %v15301_v42 }
 0x6e2   : > { %15300 = vst [vmem:[#allocation124_spill] sm:$0xff] %v12956_v13  ;;  %v12961_v28 = vpop.eup %8589  ;;  %8609 = vpow2.f32 %v5345_v21  ;;  %v5357_v25 = vmul.f32 1.442695, %v5150_v18  ;;  %v5153_v24 = vsub.f32 %v15303_v51, %v5015_v1  ;;  %v5154_v0 = vsub.f32 %v15304_v11, %v5015_v1  ;;  %v15305_v18 = vld [vmem:[#allocation69_spill] sm:$0xff]  ;;  %v5025_v11 = vpop.xlane.xlu0 %5024 }
 0x6e3   : > { %15302 = vst [vmem:[#allocation176_spill] sm:$0xff] %v12961_v28  ;;  %v12965_v30 = vpop.eup %8591  ;;  %8611 = vpow2.f32 %v5347_v26  ;;  %v5531_v33 = vadd.f32 %v12956_v13, %v5530_v27  ;;  %v5497_v12 = vadd.f32 %v12797_v45, %v5496_v54  ;;  %v5505_v8 = vadd.f32 %v12826_v53, %v12818_v61  ;;  %v15308_v26 = vld [vmem:[#allocation73_spill] sm:$0xff] }
 0x6e4   : > { %v12971_v23 = vpop.eup %8593  ;;  %8613 = vpow2.f32 %v5349_v34  ;;  %v5359_v42 = vmul.f32 1.442695, %v5151_v5  ;;  %v5361_v21 = vmul.f32 1.442695, %v5152_v47  ;;  %v5155_v51 = vsub.f32 %v15305_v18, %v12894_v55  ;;  %4142 = vmatmul.mubr.f32.gmra.mrb[90].mxu1 %v15306_v29  ;;  %v15309_v34 = vld [vmem:[#allocation100_spill] sm:$0xff]  ;;  %v15311_v29 = vld [vmem:[#allocation237_spill] sm:$0xff] }
 0x6e5   : > { %v12976_v1 = vpop.eup %8595  ;;  %8615 = vpow2.f32 %v5351_v41  ;;  %v5156_v27 = vsub.f32 %v15308_v26, %v12894_v55  ;;  %v5532_v54 = vadd.f32 %v12961_v28, %v5531_v33  ;;  %5498 = vadd.xlane.f32.xlu0 %v5497_v12  ;;  %v5506_v13 = vadd.f32 %v12831_v22, %v5505_v8  ;;  %4146 = vmatprep.mubr.f32.mxu1 %v15309_v34  ;;  %v12987_v41 = vpop.xlane.xlu1 %5039  ;;  %v15313_v33 = vld [vmem:[#allocation238_spill] sm:$0xff]  ;;  %v15316_v22 = vld [vmem:[#allocation103_spill] sm:$0xff] }
 0x6e6   : > { %15307 = vst [vmem:[#allocation217_spill] sm:$0xff] %v12976_v1  ;;  %v12983_v5 = vpop.eup %8597  ;;  %8617 = vpow2.f32 %v5353_v60  ;;  %v5363_v47 = vmul.f32 1.442695, %v5153_v24  ;;  %v5365_v18 = vmul.f32 1.442695, %v5154_v0  ;;  %v5157_v45 = vsub.f32 %v15311_v29, %v12894_v55  ;;  %v15314_v24 = vld [vmem:[#allocation72_spill] sm:$0xff] }
 0x6e7   : > { %15310 = vst [vmem:[#allocation210_spill] sm:$0xff] %v12983_v5  ;;  %v12989_v19 = vpop.eup %8599  ;;  %8619 = vpow2.f32 %v5355_v2  ;;  %v5158_v12 = vsub.f32 %v15313_v33, %v12894_v55  ;;  %5533 = vadd.xlane.f32.xlu1 %v5532_v54  ;;  %v5507_v8 = vadd.f32 %v12835_v17, %v5506_v13  ;;  %v5515_v26 = vadd.f32 %v12874_v49, %v12866_v9  ;;  %v15315_v29 = vld [vmem:[#allocation74_spill] sm:$0xff]  ;;  %v15318_v33 = vld [vmem:[#allocation104_spill] sm:$0xff]  ;;  %v15321_v17 = vld [vmem:[#allocation239_spill] sm:$0xff] }
 0x6e8   : > { %15312 = vst [vmem:[#allocation209_spill] sm:$0xff] %v12989_v19  ;;  %v12996_v60 = vpop.eup %8601  ;;  %8621 = vpow2.f32 %v5357_v25  ;;  %v5367_v0 = vmul.f32 1.442695, %v5155_v51  ;;  %v5159_v34 = vsub.f32 %v15314_v24, %v5025_v11  ;;  %v5160_v28 = vsub.f32 %v15315_v29, %v5025_v11  ;;  %4147 = vmatmul.mubr.f32.gmra.mrb[92].mxu1 %v15316_v22  ;;  %v15320_v24 = vld [vmem:[#allocation75_spill] sm:$0xff] }
 0x6e9   : > { %v13001_v2 = vpop.eup %8603  ;;  %8623 = vpow2.f32 %v5359_v42  ;;  %v5369_v55 = vmul.f32 1.442695, %v5156_v27  ;;  %v5540_v13 = vadd.f32 %v12996_v60, %v12989_v19  ;;  %5508 = vadd.xlane.f32.xlu0 %v5507_v8  ;;  %v5516_v54 = vadd.f32 %v12884_v14, %v5515_v26  ;;  %4151 = vmatprep.mubr.f32.mxu1 %v15318_v33  ;;  %v13019_v14 = vpop.xlane.xlu1 %5044 }
 0x6ea   : > { %15317 = vst [vmem:[#allocation125_spill] sm:$0xff] %v13001_v2  ;;  %v13007_v25 = vpop.eup %8605  ;;  %8625 = vpow2.f32 %v5361_v21  ;;  %v5371_v51 = vmul.f32 1.442695, %v5157_v45  ;;  %v5161_v29 = vsub.f32 %v15320_v24, %v5025_v11  ;;  %v5162_v22 = vsub.f32 %v15321_v17, %v5025_v11  ;;  %v15322_v21 = vld [vmem:[#allocation133_spill] sm:$0xff]  ;;  %v15323_v24 = vld [vmem:[#allocation107_spill] sm:$0xff] }
 0x6eb   : > { %15319 = vst [vmem:[#allocation92_spill] sm:$0xff] %v13007_v25  ;;  %v13011_v4 = vpop.eup %8607  ;;  %8627 = vpow2.f32 %v5363_v47  ;;  %v5373_v42 = vmul.f32 1.442695, %v5158_v12  ;;  %v5541_v27 = vadd.f32 %v13001_v2, %v5540_v13  ;;  %v5517_v8 = vadd.f32 %v12889_v6, %v5516_v54  ;;  %v15325_v47 = vld [vmem:[#allocation162_spill] sm:$0xff] }
 0x6ec   : > { %v13015_v19 = vpop.eup %8609  ;;  %8629 = vpow2.f32 %v5365_v18  ;;  %v5375_v26 = vmul.f32 1.442695, %v5159_v34  ;;  %v5377_v33 = vmul.f32 1.442695, %v5160_v28  ;;  %v5163_v45 = vsub.f32 %v15322_v21, %v12918_v15  ;;  %4152 = vmatmul.mubr.f32.gmra.mrb[94].mxu1 %v15323_v24  ;;  %v15326_v28 = vld [vmem:[#allocation111_spill] sm:$0xff]  ;;  %v15328_v21 = vld [vmem:[#allocation165_spill] sm:$0xff] }
 0x6ed   : > { %v13022_v17 = vpop.eup %8611  ;;  %8631 = vpow2.f32 %v5367_v0  ;;  %v5542_v11 = vadd.f32 %v13007_v25, %v5541_v27  ;;  %v5164_v12 = vsub.f32 %v15325_v47, %v12918_v15  ;;  %5518 = vadd.xlane.f32.xlu0 %v5517_v8  ;;  %v5525_v18 = vadd.f32 %v12925_v44, %v12920_v38  ;;  %4156 = vmatprep.mubr.f32.mxu1 %v15326_v28  ;;  %v15330_v27 = vld [vmem:[#allocation78_spill] sm:$0xff]  ;;  %v13059_v6 = vpop.xlane.xlu1 %5049 }
 0x6ee   : > { %15324 = vst [vmem:[#allocation126_spill] sm:$0xff] %v13022_v17  ;;  %v13030_v34 = vpop.eup %8613  ;;  %8633 = vpow2.f32 %v5369_v55  ;;  %v5379_v13 = vmul.f32 1.442695, %v5161_v29  ;;  %v5381_v54 = vmul.f32 1.442695, %v5162_v22  ;;  %v5165_v24 = vsub.f32 %v15328_v21, %v12918_v15  ;;  %v15332_v29 = vld [vmem:[#allocation136_spill] sm:$0xff] }
 0x6ef   : > { %15327 = vst [vmem:[#allocation179_spill] sm:$0xff] %v13030_v34  ;;  %v13034_v0 = vpop.eup %8615  ;;  %8635 = vpow2.f32 %v5371_v51  ;;  %5543 = vadd.xlane.f32.xlu1 %v5542_v11  ;;  %v5166_v8 = vsub.f32 %v15330_v27, %v12918_v15  ;;  %v5526_v47 = vadd.f32 %v12934_v10, %v5525_v18  ;;  %v5535_v28 = vadd.f32 %v12971_v23, %v12965_v30  ;;  %v15333_v21 = vld [vmem:[#allocation135_spill] sm:$0xff]  ;;  %v15334_v51 = vld [vmem:[#allocation38_spill] sm:$0xff]  ;;  %v15336_v10 = vld [vmem:[#allocation41_spill] sm:$0xff] }
 0x6f0   : > { %15329 = vst [vmem:[#allocation46_spill] sm:$0xff] %v13034_v0  ;;  %v13041_v2 = vpop.eup %8617  ;;  %8637 = vpow2.f32 %v5373_v42  ;;  %v5383_v55 = vmul.f32 1.442695, %v5163_v45  ;;  %v5167_v22 = vsub.f32 %v15332_v29, %v12953_v48  ;;  %v5168_v25 = vsub.f32 %v15333_v21, %v12953_v48  ;;  %4157 = vmatmul.mubr.f32.gmra.mrb[96].mxu1 %v15334_v51  ;;  %v15338_v29 = vld [vmem:[#allocation139_spill] sm:$0xff] }
 0x6f1   : > { %15331 = vst [vmem:[#allocation95_spill] sm:$0xff] %v13041_v2  ;;  %v13048_v11 = vpop.eup %8619  ;;  %8639 = vpow2.f32 %v5375_v26  ;;  %v5385_v15 = vmul.f32 1.442695, %v5164_v12  ;;  %v5550_v18 = vadd.f32 %v13041_v2, %v13034_v0  ;;  %v5527_v27 = vadd.f32 %v12941_v36, %v5526_v47  ;;  %4161 = vmatprep.mubr.f32.mxu1 %v15336_v10  ;;  %v15339_v0 = vld [vmem:[#allocation51_spill] sm:$0xff] }
 0x6f2   : > { %15335 = vst [vmem:[#allocation182_spill] sm:$0xff] %v13048_v11  ;;  %v13054_v42 = vpop.eup %8621  ;;  %8641 = vpow2.f32 %v5377_v33  ;;  %v5387_v45 = vmul.f32 1.442695, %v5165_v24  ;;  %v5169_v21 = vsub.f32 %v15338_v29, %v12953_v48  ;;  %v5536_v51 = vadd.f32 %v12976_v1, %v5535_v28  ;;  %v15340_v29 = vld [vmem:[#allocation167_spill] sm:$0xff]  ;;  %v15341_v1 = vld [vmem:[#allocation45_spill] sm:$0xff] }
 0x6f3   : > { %15337 = vst [vmem:[#allocation30_spill] sm:$0xff] %v13054_v42  ;;  %v13061_v26 = vpop.eup %8623  ;;  %8643 = vpow2.f32 %v5379_v13  ;;  %v5389_v12 = vmul.f32 1.442695, %v5166_v8  ;;  %v5170_v47 = vsub.f32 %v15339_v0, %v12953_v48  ;;  %v5551_v10 = vadd.f32 %v13048_v11, %v5550_v18  ;;  %5528 = vadd.xlane.f32.xlu0 %v5527_v27  ;;  %v15343_v48 = vld [vmem:[#allocation169_spill] sm:$0xff] }
 0x6f4   : > { %v13066_v36 = vpop.eup %8625  ;;  %8645 = vpow2.f32 %v5381_v54  ;;  %v5391_v33 = vmul.f32 1.442695, %v5167_v22  ;;  %v5393_v24 = vmul.f32 1.442695, %v5168_v25  ;;  %v5171_v28 = vsub.f32 %v15340_v29, %v12987_v41  ;;  %4162 = vmatmul.mubr.f32.gmra.mrb[98].mxu1 %v15341_v1  ;;  %v15344_v18 = vld [vmem:[#allocation49_spill] sm:$0xff]  ;;  %v15346_v22 = vld [vmem:[#allocation55_spill] sm:$0xff] }
 0x6f5   : > { %v13071_v2 = vpop.eup %8627  ;;  %8647 = vpow2.f32 %v5383_v55  ;;  %v5552_v13 = vadd.f32 %v13054_v42, %v5551_v10  ;;  %v5172_v0 = vsub.f32 %v15343_v48, %v12987_v41  ;;  %v5537_v8 = vadd.f32 %v12983_v5, %v5536_v51  ;;  %4166 = vmatprep.mubr.f32.mxu1 %v15344_v18  ;;  %v15348_v29 = vld [vmem:[#allocation53_spill] sm:$0xff]  ;;  %v15354_v42 = vld [vmem:[#allocation143_spill] sm:$0xff] }
 0x6f6   : > { %15342 = vst [vmem:[#allocation128_spill] sm:$0xff] %v13071_v2  ;;  %v13078_v54 = vpop.eup %8629  ;;  %8649 = vpow2.f32 %v5385_v15  ;;  %v5395_v25 = vmul.f32 1.442695, %v5169_v21  ;;  %v5173_v27 = vsub.f32 %v15346_v22, %v12987_v41  ;;  %v5545_v1 = vadd.f32 %v13015_v19, %v13011_v4  ;;  %v15350_v21 = vld [vmem:[#allocation171_spill] sm:$0xff]  ;;  %v15351_v22 = vld [vmem:[#allocation84_spill] sm:$0xff] }
 0x6f7   : > { %15345 = vst [vmem:[#allocation28_spill] sm:$0xff] %v13078_v54  ;;  %v13084_v55 = vpop.eup %8631  ;;  %8651 = vpow2.f32 %v5387_v45  ;;  %v5397_v10 = vmul.f32 1.442695, %v5170_v47  ;;  %5553 = vadd.xlane.f32.xlu1 %v5552_v13  ;;  %v5174_v51 = vsub.f32 %v15348_v29, %v12987_v41  ;;  %5538 = vadd.xlane.f32.xlu0 %v5537_v8  ;;  %v5555_v48 = vadd.f32 %v13066_v36, %v13061_v26  ;;  %v13097_v47 = vpop.xlane.xlu1 %5054  ;;  %v15352_v13 = vld [vmem:[#allocation52_spill] sm:$0xff] }
 0x6f8   : > { %15347 = vst [vmem:[#allocation218_spill] sm:$0xff] %v13084_v55  ;;  %v13090_v15 = vpop.eup %8633  ;;  %8653 = vpow2.f32 %v5389_v12  ;;  %v5175_v18 = vsub.f32 %v15350_v21, %v13019_v14  ;;  %v5176_v11 = vsub.f32 %v15351_v22, %v13019_v14  ;;  %v5546_v45 = vadd.f32 %v13022_v17, %v5545_v1  ;;  %4167 = vmatmul.mubr.f32.gmra.mrb[100].mxu1 %v15352_v13 }
 0x6f9   : > { %15349 = vst [vmem:[#allocation186_spill] sm:$0xff] %v13090_v15  ;;  %v13100_v41 = vpop.eup %8635  ;;  %8655 = vpow2.f32 %v5391_v33  ;;  %v5399_v8 = vmul.f32 1.442695, %v5171_v28  ;;  %v5401_v29 = vmul.f32 1.442695, %v5172_v0  ;;  %v5560_v12 = vadd.f32 %v13090_v15, %v13084_v55  ;;  %4171 = vmatprep.mubr.f32.mxu1 %v15354_v42  ;;  %v15356_v33 = vld [vmem:[#allocation58_spill] sm:$0xff] }
 0x6fa   : > { %15353 = vst [vmem:[#allocation129_spill] sm:$0xff] %v13100_v41  ;;  %v13105_v21 = vpop.eup %8637  ;;  %8657 = vpow2.f32 %v5393_v24  ;;  %v5403_v22 = vmul.f32 1.442695, %v5173_v27  ;;  %v5547_v1 = vadd.f32 %v13030_v34, %v5546_v45  ;;  %v5556_v17 = vadd.f32 %v13071_v2, %v5555_v48  ;;  %v15357_v42 = vld [vmem:[#allocation56_spill] sm:$0xff]  ;;  %v15358_v45 = vld [vmem:[#allocation145_spill] sm:$0xff] }
 0x6fb   : > { %15355 = vst [vmem:[#allocation185_spill] sm:$0xff] %v13105_v21  ;;  %v13109_v5 = vpop.eup %8639  ;;  %8659 = vpow2.f32 %v5395_v25  ;;  %v5405_v13 = vmul.f32 1.442695, %v5174_v51  ;;  %v5177_v28 = vsub.f32 %v15356_v33, %v13019_v14  ;;  %v5561_v0 = vadd.f32 %v13100_v41, %v5560_v12  ;;  %v15360_v51 = vld [vmem:[#allocation88_spill] sm:$0xff]  ;;  %v15361_v12 = vld [vmem:[#allocation174_spill] sm:$0xff] }
 0x6fc   : > { %v13114_v55 = vpop.eup %8641  ;;  %8661 = vpow2.f32 %v5397_v10  ;;  %v5178_v24 = vsub.f32 %v15357_v42, %v13019_v14  ;;  %v5407_v27 = vmul.f32 1.442695, %v5175_v18  ;;  %v5409_v15 = vmul.f32 1.442695, %v5176_v11  ;;  %5548 = vadd.xlane.f32.xlu0 %v5547_v1  ;;  %4172 = vmatmul.mubr.f32.gmra.mrb[102].mxu1 %v15358_v45  ;;  %v15362_v10 = vld [vmem:[#allocation147_spill] sm:$0xff]  ;;  %v15364_v14 = vld [vmem:[#allocation240_spill] sm:$0xff]  ;;  %v13132_v1 = vpop.xlane.xlu1 %5059 }
 0x6fd   : > { %v13119_v48 = vpop.eup %8643  ;;  %8663 = vpow2.f32 %v5399_v8  ;;  %v5562_v25 = vadd.f32 %v13105_v21, %v5561_v0  ;;  %v5179_v33 = vsub.f32 %v15360_v51, %v13059_v6  ;;  %v5180_v41 = vsub.f32 %v15361_v12, %v13059_v6  ;;  %4176 = vmatprep.mubr.f32.mxu1 %v15362_v10  ;;  %v15365_v45 = vld [vmem:[#allocation61_spill] sm:$0xff]  ;;  %v15366_v12 = vld [vmem:[#allocation114_spill] sm:$0xff] }
 0x6fe   : > { %15359 = vst [vmem:[#allocation130_spill] sm:$0xff] %v13119_v48  ;;  %v13127_v2 = vpop.eup %8645  ;;  %8665 = vpow2.f32 %v5401_v29  ;;  %v5181_v11 = vsub.f32 %v15364_v14, %v13059_v6  ;;  %v5557_v18 = vadd.f32 %v13078_v54, %v5556_v17  ;;  %v5565_v8 = vadd.f32 %v13114_v55, %v13109_v5  ;;  %v15367_v14 = vld [vmem:[#allocation89_spill] sm:$0xff] }
 0x6ff   : > { %15363 = vst [vmem:[#allocation99_spill] sm:$0xff] %v13127_v2  ;;  %v13136_v0 = vpop.eup %8647  ;;  %8667 = vpow2.f32 %v5403_v22  ;;  %v5411_v42 = vmul.f32 1.442695, %v5177_v28  ;;  %5563 = vadd.xlane.f32.xlu1 %v5562_v25  ;;  %v5182_v51 = vsub.f32 %v15365_v45, %v13059_v6  ;;  %v13142_v29 = vmul.f32 %v15238_v20, %v15366_v12  ;;  %v4343_v25 = vld [vmem:[#allocation2 + $0x158] sm:$0xff] }
 0x700   : > { %v13144_v10 = vpop.eup %8649  ;;  %8669 = vpow2.f32 %v5405_v13  ;;  %v5413_v17 = vmul.f32 1.442695, %v5178_v24  ;;  %v5183_v21 = vsub.f32 %v15367_v14, %v13097_v47  ;;  %5558 = vadd.xlane.f32.xlu0 %v5557_v18  ;;  %v5566_v54 = vadd.f32 %v13119_v48, %v5565_v8  ;;  %4177 = vmatmul.mubr.f32.gmra.mrb[104].mxu1 %v12648_v58  ;;  %v4344_v45 = vld [vmem:[#allocation2 + $0x178] sm:$0xff]  ;;  %v15369_v18 = vld [vmem:[#allocation178_spill] sm:$0xff] }
 0x701   : > { %v13150_v22 = vpop.eup %8651  ;;  %8671 = vpow2.f32 %v5407_v27  ;;  %v5415_v6 = vmul.f32 1.442695, %v5179_v33  ;;  %v5417_v28 = vmul.f32 1.442695, %v5180_v41  ;;  %v5570_v20 = vadd.f32 %v13144_v10, %v13136_v0  ;;  %4181 = vmatprep.mubr.f32.mxu1 %v12661_v52  ;;  %v15370_v27 = vld [vmem:[#allocation94_spill] sm:$0xff]  ;;  %v4345_v48 = vld [vmem:[#allocation2 + $0x198] sm:$0xff] }
 0x702   : > { %15368 = vst [vmem:[#allocation219_spill] sm:$0xff] %v13150_v22  ;;  %v13155_v13 = vpop.eup %8653  ;;  %8673 = vpow2.f32 %v5409_v15  ;;  %v5419_v24 = vmul.f32 1.442695, %v5181_v11  ;;  %v5184_v8 = vsub.f32 %v15369_v18, %v13097_v47  ;;  %v5567_v58 = vadd.f32 %v13127_v2, %v5566_v54  ;;  %v4346_v52 = vld [vmem:[#allocation2 + $0x1b8] sm:$0xff]  ;;  %v15371_v15 = vld [vmem:[#allocation149_spill] sm:$0xff]  ;;  %v13169_v54 = vpop.xlane.xlu1 %5064 }
 0x703   : > { %v13160_v12 = vpop.eup %8655  ;;  %8675 = vpow2.f32 %v5411_v42  ;;  %v5421_v41 = vmul.f32 1.442695, %v5182_v51  ;;  %v5185_v33 = vsub.f32 %v15370_v27, %v13097_v47  ;;  %v5571_v14 = vadd.f32 %v13150_v22, %v5570_v20  ;;  %v15373_v20 = vld [vmem:[#allocation59_spill] sm:$0xff] }
 0x704   : > { %v13165_v34 = vpop.eup %8657  ;;  %8677 = vpow2.f32 %v5413_v17  ;;  %v5186_v11 = vsub.f32 %v15371_v15, %v13097_v47  ;;  %v5423_v18 = vmul.f32 1.442695, %v5183_v21  ;;  %5568 = vadd.xlane.f32.xlu0 %v5567_v58  ;;  %v7726_v2 = vpack.c.bf16 %v4344_v45, %v4343_v25  ;;  %4182 = vmatmul.mubr.f32.gmra.mrb[106].mxu1 %v12672_v46  ;;  %v15375_v25 = vld [vmem:[#allocation90_spill] sm:$0xff]  ;;  %v15415_v22 = vld [vmem:[#allocation211_spill] sm:$0xff] }
 0x705   : > { %v13172_v42 = vpop.eup %8659  ;;  %8679 = vpow2.f32 %v5415_v6  ;;  %v5572_v51 = vadd.f32 %v13155_v13, %v5571_v14  ;;  %v5187_v27 = vsub.f32 %v15373_v20, %v13132_v1  ;;  %v5575_v17 = vadd.f32 %v13165_v34, %v13160_v12  ;;  %4186 = vmatprep.mubr.f32.mxu1 %v12685_v7  ;;  %v15376_v14 = vld [vmem:[#allocation97_spill] sm:$0xff]  ;;  %v4347_v7 = vld [vmem:[#allocation2 + $0x1d8] sm:$0xff] }
 0x706   : > { %15372 = vst [vmem:[#allocation188_spill] sm:$0xff] %v13172_v42  ;;  %v13180_v47 = vpop.eup %8661  ;;  %8681 = vpow2.f32 %v5417_v28  ;;  %v5425_v21 = vmul.f32 1.442695, %v5184_v8  ;;  %v5188_v46 = vsub.f32 %v15375_v25, %v13132_v1  ;;  %7727 = vmatpush1.bf16.msra.mxu1 %v7726_v2  ;;  %v7729_v45 = vpack.c.bf16 %v4346_v52, %v4345_v48  ;;  %v4348_v28 = vld [vmem:[#allocation2 + $0x1f8] sm:$0xff]  ;;  %v15377_v2 = vld [vmem:[#allocation241_spill] sm:$0xff] }
 0x707   : > { %15374 = vst [vmem:[#allocation102_spill] sm:$0xff] %v13180_v47  ;;  %v13184_v6 = vpop.eup %8663  ;;  %8683 = vpow2.f32 %v5419_v24  ;;  %v5427_v58 = vmul.f32 1.442695, %v5185_v33  ;;  %5573 = vadd.xlane.f32.xlu1 %v5572_v51  ;;  %v5189_v15 = vsub.f32 %v15376_v14, %v13132_v1  ;;  %v5576_v20 = vadd.f32 %v13172_v42, %v5575_v17  ;;  %7728 = vmatprep.subr.bf16.mxu1 %v14845_v57  ;;  %v15378_v24 = vld [vmem:[#allocation64_spill] sm:$0xff] }
 0x708   : > { %v13190_v8 = vpop.eup %8665  ;;  %8685 = vpow2.f32 %v5421_v41  ;;  %v5429_v25 = vmul.f32 1.442695, %v5186_v11  ;;  %v5190_v48 = vsub.f32 %v15377_v2, %v13132_v1  ;;  %v5191_v33 = vsub.f32 %v15378_v24, %v13169_v54  ;;  %4187 = vmatmul.mubr.f32.gmra.mrb[108].mxu1 %v12703_v35  ;;  %v15381_v11 = vld [vmem:[#allocation93_spill] sm:$0xff]  ;;  %v13207_v24 = vpop.xlane.xlu1 %5069 }
 0x709   : > { %v13197_v52 = vpop.eup %8667  ;;  %8687 = vpow2.f32 %v5423_v18  ;;  %v5431_v51 = vmul.f32 1.442695, %v5187_v27  ;;  %v5577_v17 = vadd.f32 %v13180_v47, %v5576_v20  ;;  %v5580_v14 = vadd.f32 %v13190_v8, %v13184_v6  ;;  %4191 = vmatprep.mubr.f32.mxu1 %v12730_v62  ;;  %v15382_v20 = vld [vmem:[#allocation96_spill] sm:$0xff] }
 0x70a   : > { %15379 = vst [vmem:[#allocation131_spill] sm:$0xff] %v13197_v52  ;;  %v13203_v41 = vpop.eup %8669  ;;  %8689 = vpow2.f32 %v5425_v21  ;;  %v5433_v1 = vmul.f32 1.442695, %v5188_v46  ;;  %v5192_v2 = vsub.f32 %v15381_v11, %v13169_v54  ;;  %7730 = vmatpush1.bf16.msra.mxu1 %v7729_v45  ;;  %v7732_v35 = vpack.c.bf16 %v4348_v28, %v4347_v7  ;;  %v4349_v21 = vld [vmem:[#allocation2 + $0x218] sm:$0xff]  ;;  %v15383_v45 = vld [vmem:[#allocation98_spill] sm:$0xff] }
 0x70b   : > { %15380 = vst [vmem:[#allocation189_spill] sm:$0xff] %v13203_v41  ;;  %v13209_v18 = vpop.eup %8671  ;;  %8691 = vpow2.f32 %v5427_v58  ;;  %v5435_v27 = vmul.f32 1.442695, %v5189_v15  ;;  %v5193_v42 = vsub.f32 %v15382_v20, %v13169_v54  ;;  %5578 = vadd.xlane.f32.xlu0 %v5577_v17  ;;  %v5581_v62 = vadd.f32 %v13197_v52, %v5580_v14  ;;  %7731 = vmatprep.subr.bf16.mxu1 %v14845_v57  ;;  %v4350_v46 = vld [vmem:[#allocation2 + $0x238] sm:$0xff] }
 0x70c   : > { %v13215_v47 = vpop.eup %8673  ;;  %8693 = vpow2.f32 %v5429_v25  ;;  %v5437_v11 = vmul.f32 1.442695, %v5190_v48  ;;  %v5194_v7 = vsub.f32 %v15383_v45, %v13169_v54  ;;  %v5439_v28 = vmul.f32 1.442695, %v5191_v33  ;;  %4192 = vmatmul.mubr.f32.gmra.mrb[110].mxu1 %v12761_v43  ;;  %v15385_v17 = vld [vmem:[#allocation151_spill] sm:$0xff] }
 0x70d   : > { %v13220_v58 = vpop.eup %8675  ;;  %8695 = vpow2.f32 %v5431_v51  ;;  %v5582_v15 = vadd.f32 %v13203_v41, %v5581_v62  ;;  %v5195_v14 = vsub.f32 %v15385_v17, %v13207_v24  ;;  %v5585_v20 = vadd.f32 %v13215_v47, %v13209_v18  ;;  %4196 = vmatprep.mubr.f32.mxu1 %v12795_v3  ;;  %v15387_v48 = vld [vmem:[#allocation67_spill] sm:$0xff]  ;;  %v15388_v17 = vld [vmem:[#allocation116_spill] sm:$0xff]  ;;  %v15389_v3 = vld [vmem:[#allocation157_spill] sm:$0xff] }
 0x70e   : > { %15384 = vst [vmem:[#allocation105_spill] sm:$0xff] %v13220_v58  ;;  %v13228_v25 = vpop.eup %8677  ;;  %8697 = vpow2.f32 %v5433_v1  ;;  %v5441_v54 = vmul.f32 1.442695, %v5192_v2  ;;  %v5196_v43 = vsub.f32 %v15387_v48, %v13207_v24  ;;  %7733 = vmatpush1.bf16.msra.mxu1 %v7732_v35  ;;  %v7735_v33 = vpack.c.bf16 %v4350_v46, %v4349_v21  ;;  %v4351_v41 = vld [vmem:[#allocation2 + $0x258] sm:$0xff] }
 0x70f   : > { %15386 = vst [vmem:[#allocation32_spill] sm:$0xff] %v13228_v25  ;;  %v13232_v51 = vpop.eup %8679  ;;  %8699 = vpow2.f32 %v5435_v27  ;;  %v5443_v62 = vmul.f32 1.442695, %v5193_v42  ;;  %5583 = vadd.xlane.f32.xlu1 %v5582_v15  ;;  %v5586_v45 = vadd.f32 %v13220_v58, %v5585_v20  ;;  %7734 = vmatprep.subr.bf16.mxu1 %v14845_v57  ;;  %v3762_v52 = vmul.f32 %v15389_v3, %v15388_v17  ;;  %v4352_v1 = vld [vmem:[#allocation2 + $0x278] sm:$0xff]  ;;  %v15391_v42 = vld [vmem:[#allocation192_spill] sm:$0xff] }
 0x710   : > { %v13238_v2 = vpop.eup %8681  ;;  %8701 = vpow2.f32 %v5437_v11  ;;  %v5445_v48 = vmul.f32 1.442695, %v5194_v7  ;;  %v15390_v35 = vld [vmem:[#allocation155_spill] sm:$0xff]  ;;  %4197 = vmatmul.mubr.f32.gmra.mrb[112].mxu1 %v13142_v29  ;;  %v3761_v27 = vmul.f32 %v15389_v3, %v15391_v42  ;;  %v5447_v15 = vmul.f32 1.442695, %v5195_v14  ;;  %v15394_v7 = vld [vmem:[#allocation154_spill] sm:$0xff] }
 0x711   : > { %v5197_v21 = vsub.f32 %v15390_v35, %v13207_v24  ;;  %v13245_v46 = vpop.eup %8683  ;;  %8703 = vpow2.f32 %v5439_v28  ;;  %v5587_v20 = vadd.f32 %v13228_v25, %v5586_v45  ;;  %v5590_v17 = vadd.f32 %v13238_v2, %v13232_v51  ;;  %4201 = vmatprep.mubr.f32.mxu1 %v3762_v52  ;;  %v15395_v14 = vld [vmem:[#allocation118_spill] sm:$0xff]  ;;  %v15396_v45 = vld [vmem:[#allocation173_spill] sm:$0xff]  ;;  %v4353_v52 = vld [vmem:[#allocation2 + $0x298] sm:$0xff] }
 0x712   : > { %15392 = vst [vmem:[#allocation31_spill] sm:$0xff] %v13245_v46  ;;  %v13250_v11 = vpop.eup %8685  ;;  %8705 = vpow2.f32 %v5441_v54  ;;  %v5198_v35 = vsub.f32 %v15394_v7, %v13207_v24  ;;  %v5449_v29 = vmul.f32 1.442695, %v5196_v43  ;;  %7736 = vmatpush1.bf16.msra.mxu1 %v7735_v33  ;;  %v7738_v58 = vpack.c.bf16 %v4352_v1, %v4351_v41  ;;  %v4354_v25 = vld [vmem:[#allocation2 + $0x2b8] sm:$0xff]  ;;  %v15401_v7 = vld [vmem:[#allocation184_spill] sm:$0xff] }
 0x713   : > { %15393 = vst [vmem:[#allocation190_spill] sm:$0xff] %v13250_v11  ;;  %v13254_v3 = vpop.eup %8687  ;;  %8707 = vpow2.f32 %v5443_v62  ;;  %5588 = vadd.xlane.f32.xlu0 %v5587_v20  ;;  %v5591_v28 = vadd.f32 %v13245_v46, %v5590_v17  ;;  %v3766_v42 = vmul.f32 %v15396_v45, %v15395_v14  ;;  %7737 = vmatprep.subr.bf16.mxu1 %v14845_v57  ;;  %v5451_v24 = vmul.f32 1.442695, %v5197_v21  ;;  %v15399_v20 = vld [vmem:[#allocation193_spill] sm:$0xff]  ;;  %v4355_v14 = vld [vmem:[#allocation2 + $0x2d8] sm:$0xff] }
 0x714   : > { %v13260_v54 = vpop.eup %8689  ;;  %8709 = vpow2.f32 %v5445_v48  ;;  %4202 = vmatmul.mubr.f32.gmra.mrb[114].mxu1 %v3761_v27  ;;  %v5453_v1 = vmul.f32 1.442695, %v5198_v35  ;;  %v3765_v17 = vmul.f32 %v15396_v45, %v15399_v20  ;;  %v7741_v48 = vpack.c.bf16 %v4354_v25, %v4353_v52  ;;  %v15404_v45 = vld [vmem:[#allocation197_spill] sm:$0xff] }
 0x715   : > { %v13262_v43 = vpop.eup %8691  ;;  %8711 = vpow2.f32 %v5447_v15  ;;  %v5592_v41 = vadd.f32 %v13250_v11, %v5591_v28  ;;  %v5595_v33 = vadd.f32 %v13260_v54, %v13254_v3  ;;  %4206 = vmatprep.mubr.f32.mxu1 %v3766_v42  ;;  %v15400_v15 = vld [vmem:[#allocation198_spill] sm:$0xff]  ;;  %v4356_v42 = vld [vmem:[#allocation2 + $0x2f8] sm:$0xff]  ;;  %v3769_v52 = vmul.f32 %v15401_v7, %v15404_v45  ;;  %v15405_v20 = vld [vmem:[#allocation205_spill] sm:$0xff] }
 0x716   : > { %15397 = vst [vmem:[#allocation225_spill] sm:$0xff] %v13262_v43  ;;  %v13267_v62 = vpop.eup %8693  ;;  %8713 = vpow2.f32 %v5449_v29  ;;  %7739 = vmatpush1.bf16.msra.mxu1 %v7738_v58  ;;  %v3770_v28 = vmul.f32 %v15401_v7, %v15400_v15  ;;  %v4357_v15 = vld [vmem:[#allocation2 + $0x318] sm:$0xff] }
 0x717   : > { %15398 = vst [vmem:[#allocation36_spill] sm:$0xff] %v13267_v62  ;;  %v13271_v21 = vpop.eup %8695  ;;  %5593 = vadd.xlane.f32.xlu1 %v5592_v41  ;;  %v5596_v27 = vadd.f32 %v13262_v43, %v5595_v33  ;;  %7740 = vmatprep.subr.bf16.mxu1 %v14845_v57  ;;  %8715 = vpow2.f32 %v5451_v24  ;;  %v7744_v41 = vpack.c.bf16 %v4356_v42, %v4355_v14  ;;  %v15409_v42 = vld [vmem:[#allocation202_spill] sm:$0xff] }
 0x718   : > { %v13277_v46 = vpop.eup %8697  ;;  %4207 = vmatmul.mubr.f32.gmra.mrb[116].mxu1 %v3765_v17  ;;  %8717 = vpow2.f32 %v5453_v1  ;;  %v15406_v17 = vld [vmem:[#allocation101_spill] sm:$0xff] }
 0x719   : > { %v13279_v58 = vpop.eup %8699  ;;  %v5597_v25 = vadd.f32 %v13267_v62, %v5596_v27  ;;  %v5600_v35 = vadd.f32 %v13277_v46, %v13271_v21  ;;  %4211 = vmatprep.mubr.f32.mxu1 %v3770_v28  ;;  %v3774_v27 = vmul.f32 %v15406_v17, %v15405_v20  ;;  %v4358_v28 = vld [vmem:[#allocation2 + $0x338] sm:$0xff] }
 0x71a   : > { %15402 = vst [vmem:[#allocation37_spill] sm:$0xff] %v13279_v58  ;;  %v13284_v29 = vpop.eup %8701  ;;  %7742 = vmatpush1.bf16.msra.mxu1 %v7741_v48  ;;  %v15410_v20 = vld [vmem:[#allocation207_spill] sm:$0xff] }
 0x71b   : > { %15403 = vst [vmem:[#allocation109_spill] sm:$0xff] %v13284_v29  ;;  %v13288_v33 = vpop.eup %8703  ;;  %5598 = vadd.xlane.f32.xlu0 %v5597_v25  ;;  %v5601_v24 = vadd.f32 %v13279_v58, %v5600_v35  ;;  %7743 = vmatprep.subr.bf16.mxu1 %v14845_v57  ;;  %v3773_v25 = vmul.f32 %v15406_v17, %v15409_v42  ;;  %v15411_v58 = vld [vmem:[#allocation106_spill] sm:$0xff]  ;;  %v15413_v42 = vld [vmem:[#allocation127_spill] sm:$0xff] }
 0x71c   : > { %v13294_v43 = vpop.eup %8705  ;;  %4212 = vmatmul.mubr.f32.gmra.mrb[118].mxu1 %v3769_v52  ;;  %v7747_v35 = vpack.c.bf16 %v4358_v28, %v4357_v15  ;;  %v3778_v62 = vmul.f32 %v15411_v58, %v15410_v20  ;;  %v15412_v15 = vld [vmem:[#allocation206_spill] sm:$0xff]  ;;  %v15414_v20 = vld [vmem:[#allocation108_spill] sm:$0xff] }
 0x71d   : > { %v13296_v1 = vpop.eup %8707  ;;  %v5602_v48 = vadd.f32 %v13284_v29, %v5601_v24  ;;  %v5605_v7 = vadd.f32 %v13294_v43, %v13288_v33  ;;  %4216 = vmatprep.mubr.f32.mxu1 %v3774_v27  ;;  %v4359_v24 = vld [vmem:[#allocation2 + $0x358] sm:$0xff]  ;;  %v3777_v28 = vmul.f32 %v15411_v58, %v15412_v15  ;;  %v3781_v58 = vmul.f32 %v15414_v20, %v15415_v22 }
 0x71e   : > { %15407 = vst [vmem:[#allocation221_spill] sm:$0xff] %v13296_v1  ;;  %v13301_v14 = vpop.eup %8709  ;;  %7745 = vmatpush1.bf16.msra.mxu1 %v7744_v41  ;;  %v4360_v29 = vld [vmem:[#allocation2 + $0x378] sm:$0xff] }
 0x71f   : > { %15408 = vst [vmem:[#allocation39_spill] sm:$0xff] %v13301_v14  ;;  %v13305_v45 = vpop.eup %8711  ;;  %5603 = vadd.xlane.f32.xlu1 %v5602_v48  ;;  %v5606_v52 = vadd.f32 %v13296_v1, %v5605_v7  ;;  %7746 = vmatprep.subr.bf16.mxu1 %v14845_v57  ;;  %v7750_v48 = vpack.c.bf16 %v4360_v29, %v4359_v24  ;;  %v15416_v29 = vld [vmem:[#allocation215_spill] sm:$0xff] }
 0x720   : > { %v13311_v27 = vpop.eup %8713  ;;  %4217 = vmatmul.mubr.f32.gmra.mrb[120].mxu1 %v3773_v25  ;;  %v3782_v1 = vmul.f32 %v15414_v20, %v15413_v42  ;;  %v4361_v25 = vld [vmem:[#allocation2 + $0x398] sm:$0xff]  ;;  %v15418_v42 = vld [vmem:[#allocation213_spill] sm:$0xff] }
 0x721   : > { %v5607_v11 = vadd.f32 %v13301_v14, %v5606_v52  ;;  %v5610_v41 = vadd.f32 %v13311_v27, %v13305_v45  ;;  %4221 = vmatprep.mubr.f32.mxu1 %v3778_v62  ;;  %v13316_v17 = vpop.eup %8715  ;;  %v4362_v52 = vld [vmem:[#allocation2 + $0x3b8] sm:$0xff] }
 0x722   : > { %7748 = vmatpush1.bf16.msra.mxu1 %v7747_v35  ;;  %v13324_v14 = vpop.eup %8717  ;;  %v15417_v35 = vld [vmem:[#allocation112_spill] sm:$0xff]  ;;  %v4364_v15 = vld [vmem:[#allocation2 + $0x3f8] sm:$0xff] }
 0x723   : > { %5608 = vadd.xlane.f32.xlu0 %v5607_v11  ;;  %v5611_v7 = vadd.f32 %v13316_v17, %v5610_v41  ;;  %7749 = vmatprep.subr.bf16.mxu1 %v14845_v57  ;;  %v7753_v11 = vpack.c.bf16 %v4362_v52, %v4361_v25  ;;  %v3786_v24 = vmul.f32 %v15417_v35, %v15416_v29  ;;  %v4363_v41 = vld [vmem:[#allocation2 + $0x3d8] sm:$0xff] }
 0x724   : > { %4222 = vmatmul.mubr.f32.gmra.mrb[122].mxu1 %v3777_v28  ;;  %v3785_v28 = vmul.f32 %v15417_v35, %v15418_v42  ;;  %v4366_v20 = vld [vmem:[#allocation2 + $0x438] sm:$0xff] }
 0x725   : > { %v5612_v62 = vadd.f32 %v13324_v14, %v5611_v7  ;;  %4226 = vmatprep.mubr.f32.mxu1 %v3782_v1  ;;  %v7756_v1 = vpack.c.bf16 %v4364_v15, %v4363_v41  ;;  %v4365_v7 = vld [vmem:[#allocation2 + $0x418] sm:$0xff] }
 0x726   : > { %7751 = vmatpush1.bf16.msra.mxu1 %v7750_v48  ;;  %v7759_v29 = vpack.c.bf16 %v4366_v20, %v4365_v7  ;;  %v4367_v35 = vld [vmem:[#allocation2 + $0x458] sm:$0xff] }
 0x727   : > { %5613 = vadd.xlane.f32.xlu1 %v5612_v62  ;;  %7752 = vmatprep.subr.bf16.mxu1 %v14845_v57  ;;  %v4369_v42 = vld [vmem:[#allocation2 + $0x498] sm:$0xff] }
 0x728   : > { %4227 = vmatmul.mubr.f32.gmra.mrb[124].mxu1 %v3781_v58  ;;  %v15419_v58 = vld [vmem:[#allocation35_spill] sm:$0xff] }
 0x729   : > { %4231 = vmatprep.mubr.f32.mxu1 %v3786_v24  ;;  %v4368_v24 = vld [vmem:[#allocation2 + $0x478] sm:$0xff] }
 0x72a   : > { %7754 = vmatpush1.bf16.msra.mxu1 %v7753_v11  ;;  %v7762_v41 = vpack.c.bf16 %v4368_v24, %v4367_v35  ;;  %v4371_v20 = vld [vmem:[#allocation2 + $0x4d8] sm:$0xff] }
 0x72b   : > { %7755 = vmatprep.subr.bf16.mxu1 %v14845_v57 }
 0x72c   : > { %4232 = vmatmul.mubr.f32.gmra.mrb[126].mxu1 %v3785_v28  ;;  %v4370_v28 = vld [vmem:[#allocation2 + $0x4b8] sm:$0xff] }
 0x72d   : > { %v7765_v7 = vpack.c.bf16 %v4370_v28, %v4369_v42  ;;  %v4374_v42 = vld [vmem:[#allocation2 + $0x538] sm:$0xff] }
 0x72e   : > { %7757 = vmatpush1.bf16.msra.mxu1 %v7756_v1 }
 0x72f   : > { %7758 = vmatprep.subr.bf16.mxu1 %v14845_v57 }
 0x748   : > { %v5459_v22 = vpop.xlane.xlu0 %5458 }
 0x749   : > { %8719 = vrcp.f32 %v5459_v22  ;;  %v15420_v22 = vld [vmem:[#allocation138_spill] sm:$0xff] }
 0x74e   : > { %v5464_v48 = vpop.xlane.xlu0 %5463 }
 0x74f   : > { %8721 = vrcp.f32 %v5464_v48 }
 0x753   : > { %v13336_v25 = vpop.eup %8719 }
 0x754   : > { %v5469_v52 = vpop.xlane.xlu0 %5468  ;;  %v5648_v62 = vmul.f32 %v13336_v25, %v12573_v31  ;;  %v5647_v11 = vmul.f32 %v13336_v25, %v15419_v58 }
 0x755   : > { %8723 = vrcp.f32 %v5469_v52  ;;  %v4372_v52 = vld [vmem:[#allocation2 + $0x4f8] sm:$0xff] }
 0x756   : > { %5839 = vmatprep.mubr.f32.mxu1 %v5648_v62  ;;  %v7768_v24 = vpack.c.bf16 %v4372_v52, %v4371_v20  ;;  %v15424_v20 = vld [vmem:[#allocation63_spill] sm:$0xff] }
 0x757   : > { %5840 = vmatmul.mubr.f32.vlgmr.msra.gmra.mrb[128].mxu1 %v5647_v11  ;;  %v15421_v11 = vld [vmem:[#allocation54_spill] sm:$0xff] }
 0x758   : > { %7760 = vmatpush1.bf16.msra.mxu1 %v7759_v29 }
 0x759   : > { %v13342_v15 = vpop.eup %8721  ;;  %7761 = vmatprep.subr.bf16.mxu1 %v14845_v57 }
 0x75a   : > { %v5474_v1 = vpop.xlane.xlu0 %5473  ;;  %v5652_v31 = vmul.f32 %v13342_v15, %v12599_v40  ;;  %v5651_v48 = vmul.f32 %v13342_v15, %v15420_v22  ;;  %v15422_v40 = vld [vmem:[#allocation141_spill] sm:$0xff]  ;;  %v4375_v22 = vld [vmem:[#allocation2 + $0x558] sm:$0xff] }
 0x75b   : > { %8725 = vrcp.f32 %v5474_v1 }
 0x75c   : > { %5844 = vmatprep.mubr.f32.mxu1 %v5652_v31  ;;  %7763 = vmatpush1.bf16.msra.mxu1 %v7762_v41  ;;  %v4373_v41 = vld [vmem:[#allocation2 + $0x518] sm:$0xff] }
 0x75d   : > { %5845 = vmatmul.mubr.f32.gmra.mrb[130].mxu1 %v5651_v48  ;;  %7764 = vmatprep.subr.bf16.mxu1 %v14845_v57  ;;  %v7771_v28 = vpack.c.bf16 %v4374_v42, %v4373_v41  ;;  %v4376_v48 = vld [vmem:[#allocation2 + $0x578] sm:$0xff] }
 0x75e   : > { %v5479_v62 = vpop.xlane.xlu0 %5478  ;;  %v15425_v42 = vld [vmem:[#allocation71_spill] sm:$0xff] }
 0x75f   : > { %v13350_v58 = vpop.eup %8723  ;;  %8727 = vrcp.f32 %v5479_v62  ;;  %v15423_v62 = vld [vmem:[#allocation150_spill] sm:$0xff] }
 0x760   : > { %v5656_v29 = vmul.f32 %v13350_v58, %v15421_v11  ;;  %v5655_v35 = vmul.f32 %v13350_v58, %v15422_v40  ;;  %7766 = vmatpush1.bf16.msra.mxu1 %v7765_v7  ;;  %v7774_v11 = vpack.c.bf16 %v4376_v48, %v4375_v22  ;;  %v4379_v22 = vld [vmem:[#allocation2 + $0x5d8] sm:$0xff] }
 0x761   : > { %7767 = vmatprep.subr.bf16.mxu1 %v14845_v57  ;;  %v4380_v48 = vld [vmem:[#allocation2 + $0x5f8] sm:$0xff] }
 0x762   : > { %5849 = vmatprep.mubr.f32.mxu1 %v5656_v29 }
 0x763   : > { %5850 = vmatmul.mubr.f32.gmra.mrb[132].mxu1 %v5655_v35  ;;  %v4377_v35 = vld [vmem:[#allocation2 + $0x598] sm:$0xff] }
 0x764   : > { %7769 = vmatpush1.bf16.msra.mxu1 %v7768_v24  ;;  %v4378_v24 = vld [vmem:[#allocation2 + $0x5b8] sm:$0xff] }
 0x765   : > { %v13357_v1 = vpop.eup %8725  ;;  %v5484_v31 = vpop.xlane.xlu0 %5483  ;;  %7770 = vmatprep.subr.bf16.mxu1 %v14845_v57 }
 0x766   : > { %8729 = vrcp.f32 %v5484_v31  ;;  %v5660_v7 = vmul.f32 %v13357_v1, %v15423_v62  ;;  %v5659_v52 = vmul.f32 %v13357_v1, %v15424_v20  ;;  %v7777_v62 = vpack.c.bf16 %v4378_v24, %v4377_v35  ;;  %v4381_v24 = vld [vmem:[#allocation2 + $0x618] sm:$0xff] }
 0x768   : > { %5854 = vmatprep.mubr.f32.mxu1 %v5660_v7  ;;  %7772 = vmatpush1.bf16.msra.mxu1 %v7771_v28  ;;  %v5504_v7 = vpop.xlane.xlu1 %5503 }
 0x769   : > { %v13364_v29 = vpop.eup %8727  ;;  %v5489_v40 = vpop.xlane.xlu0 %5488  ;;  %5855 = vmatmul.mubr.f32.gmra.mrb[134].mxu1 %v5659_v52  ;;  %7773 = vmatprep.subr.bf16.mxu1 %v14845_v57  ;;  %v15426_v52 = vld [vmem:[#allocation159_spill] sm:$0xff] }
 0x76a   : > { %8731 = vrcp.f32 %v5489_v40  ;;  %v5664_v41 = vmul.f32 %v13364_v29, %v12678_v63  ;;  %v5663_v31 = vmul.f32 %v13364_v29, %v15425_v42 }
 0x76c   : > { %5859 = vmatprep.mubr.f32.mxu1 %v5664_v41  ;;  %7775 = vmatpush1.bf16.msra.mxu1 %v7774_v11  ;;  %v7780_v11 = vpack.c.bf16 %v4380_v48, %v4379_v22  ;;  %v4382_v41 = vld [vmem:[#allocation2 + $0x638] sm:$0xff] }
 0x76d   : > { %5860 = vmatmul.mubr.f32.gmra.mrb[136].mxu1 %v5663_v31  ;;  %7776 = vmatprep.subr.bf16.mxu1 %v14845_v57  ;;  %v4383_v22 = vld [vmem:[#allocation2 + $0x658] sm:$0xff] }
 0x76e   : > { %v5494_v28 = vpop.xlane.xlu0 %5493  ;;  %v4384_v48 = vld [vmem:[#allocation2 + $0x678] sm:$0xff] }
 0x76f   : > { %8733 = vrcp.f32 %v5494_v28 }
 0x770   : > { %v13372_v20 = vpop.eup %8729  ;;  %7778 = vmatpush1.bf16.msra.mxu1 %v7777_v62  ;;  %8735 = vrcp.f32 %v5504_v7  ;;  %v7783_v62 = vpack.c.bf16 %v4382_v41, %v4381_v24  ;;  %v5514_v7 = vpop.xlane.xlu1 %5513 }
 0x771   : > { %v5668_v63 = vmul.f32 %v13372_v20, %v12710_v16  ;;  %v5667_v40 = vmul.f32 %v13372_v20, %v15426_v52  ;;  %7779 = vmatprep.subr.bf16.mxu1 %v14845_v57  ;;  %v7786_v52 = vpack.c.bf16 %v4384_v48, %v4383_v22  ;;  %v15427_v22 = vld [vmem:[#allocation170_spill] sm:$0xff] }
 0x772   : > { %v5499_v35 = vpop.xlane.xlu0 %5498 }
 0x773   : > { %8737 = vrcp.f32 %v5499_v35  ;;  %5864 = vmatprep.mubr.f32.mxu1 %v5668_v63 }
 0x774   : > { %v13379_v42 = vpop.eup %8731  ;;  %5865 = vmatmul.mubr.f32.gmra.mrb[138].mxu1 %v5667_v40  ;;  %v4385_v40 = vld [vmem:[#allocation2 + $0x698] sm:$0xff] }
 0x775   : > { %v5672_v31 = vmul.f32 %v13379_v42, %v12738_v39  ;;  %v5671_v16 = vmul.f32 %v13379_v42, %v12732_v59  ;;  %7781 = vmatpush1.bf16.msra.mxu1 %v7780_v11  ;;  %v4386_v11 = vld [vmem:[#allocation2 + $0x6b8] sm:$0xff] }
 0x776   : > { %v5509_v28 = vpop.xlane.xlu0 %5508  ;;  %7782 = vmatprep.subr.bf16.mxu1 %v14845_v57 }
 0x777   : > { %8739 = vrcp.f32 %v5509_v28  ;;  %5869 = vmatprep.mubr.f32.mxu1 %v5672_v31  ;;  %v5524_v28 = vpop.xlane.xlu1 %5523 }
 0x778   : > { %5870 = vmatmul.mubr.f32.gmra.mrb[140].mxu1 %v5671_v16  ;;  %8741 = vrcp.f32 %v5514_v7  ;;  %v4387_v16 = vld [vmem:[#allocation2 + $0x6d8] sm:$0xff] }
 0x779   : > { %v13386_v63 = vpop.eup %8733  ;;  %7784 = vmatpush1.bf16.msra.mxu1 %v7783_v62  ;;  %v4388_v62 = vld [vmem:[#allocation2 + $0x6f8] sm:$0xff] }
 0x77a   : > { %v5676_v39 = vmul.f32 %v13386_v63, %v12763_v37  ;;  %v5675_v59 = vmul.f32 %v13386_v63, %v12756_v32  ;;  %7785 = vmatprep.subr.bf16.mxu1 %v14845_v57  ;;  %v13393_v35 = vpop.eup %8735  ;;  %v5519_v24 = vpop.xlane.xlu0 %5518  ;;  %v7789_v32 = vpack.c.bf16 %v4386_v11, %v4385_v40  ;;  %v4390_v40 = vld [vmem:[#allocation2 + $0x738] sm:$0xff] }
 0x77b   : > { %8743 = vrcp.f32 %v5519_v24  ;;  %v5684_v48 = vmul.f32 %v13393_v35, %v15427_v22  ;;  %v4392_v22 = vld [vmem:[#allocation2 + $0x778] sm:$0xff] }
 0x77c   : > { %5874 = vmatprep.mubr.f32.mxu1 %v5676_v39  ;;  %8745 = vrcp.f32 %v5524_v28  ;;  %v4391_v28 = vld [vmem:[#allocation2 + $0x758] sm:$0xff] }
 0x77d   : > { %v13395_v41 = vpop.eup %8737  ;;  %5875 = vmatmul.mubr.f32.gmra.mrb[142].mxu1 %v5675_v59 }
 0x77e   : > { %v5680_v31 = vmul.f32 %v13395_v41, %v12784_v56  ;;  %v5679_v37 = vmul.f32 %v13395_v41, %v12778_v50  ;;  %7787 = vmatpush1.bf16.msra.mxu1 %v7786_v52  ;;  %v7792_v56 = vpack.c.bf16 %v4388_v62, %v4387_v16  ;;  %v15428_v50 = vld [vmem:[#allocation29_spill] sm:$0xff]  ;;  %v4389_v52 = vld [vmem:[#allocation2 + $0x718] sm:$0xff] }
 0x77f   : > { %7788 = vmatprep.subr.bf16.mxu1 %v14845_v57  ;;  %v5683_v39 = vmul.f32 %v13393_v35, %v15428_v50  ;;  %v15431_v50 = vld [vmem:[#allocation212_spill] sm:$0xff] }
 0x780   : > { %5879 = vmatprep.mubr.f32.mxu1 %v5680_v31  ;;  %v5529_v11 = vpop.xlane.xlu0 %5528 }
 0x781   : > { %v13404_v7 = vpop.eup %8739  ;;  %5880 = vmatmul.mubr.f32.gmra.mrb[144].mxu1 %v5679_v37  ;;  %8747 = vrcp.f32 %v5529_v11  ;;  %v4393_v11 = vld [vmem:[#allocation2 + $0x798] sm:$0xff] }
 0x782   : > { %5884 = vmatprep.mubr.f32.mxu1 %v5684_v48  ;;  %7790 = vmatpush1.bf16.msra.mxu1 %v7789_v32  ;;  %v5688_v24 = vmul.f32 %v13404_v7, %v12826_v53  ;;  %v13413_v31 = vpop.eup %8741  ;;  %v7795_v32 = vpack.c.bf16 %v4390_v40, %v4389_v52  ;;  %v5687_v16 = vmul.f32 %v13404_v7, %v12818_v61  ;;  %v5534_v48 = vpop.xlane.xlu1 %5533  ;;  %v15432_v52 = vld [vmem:[#allocation196_spill] sm:$0xff] }
 0x783   : > { %v13408_v59 = vpop.f32.mrb[64].mxu1  ;;  %7791 = vmatprep.subr.bf16.mxu1 %v14845_v57  ;;  %v5692_v53 = vmul.f32 %v13413_v31, %v15431_v50  ;;  %8749 = vrcp.f32 %v5534_v48  ;;  %v5691_v61 = vmul.f32 %v13413_v31, %v15432_v52  ;;  %v4396_v48 = vld [vmem:[#allocation2 + $0x7f8] sm:$0xff] }
 0x784   : > { %15429 = vst [vmem:[#allocation42_spill] sm:$0xff] %v13408_v59  ;;  %v4080_v37 = vpop.f32.mrb[65].mxu1  ;;  %v15434_v52 = vld [vmem:[#allocation203_spill] sm:$0xff] }
 0x785   : > { %5885 = vmatmul.mubr.f32.gmra.mrb[146].mxu1 %v5683_v39  ;;  %v13422_v39 = vpop.eup %8743  ;;  %v5539_v37 = vpop.xlane.xlu0 %5538 }
 0x786   : > { %5889 = vmatprep.mubr.f32.mxu1 %v5688_v24  ;;  %7793 = vmatpush1.bf16.msra.mxu1 %v7792_v56  ;;  %v7798_v56 = vpack.c.bf16 %v4392_v22, %v4391_v28  ;;  %v4394_v24 = vld [vmem:[#allocation2 + $0x7b8] sm:$0xff]  ;;  %8751 = vrcp.f32 %v5539_v37 }
 0x787   : > { %v13417_v62 = vpop.f32.mrb[66].mxu1  ;;  %7794 = vmatprep.subr.bf16.mxu1 %v14845_v57  ;;  %v4395_v22 = vld [vmem:[#allocation2 + $0x7d8] sm:$0xff] }
 0x788   : > { %15430 = vst [vmem:[#allocation223_spill] sm:$0xff] %v13417_v62  ;;  %v4085_v59 = vpop.f32.mrb[67].mxu1  ;;  %v13431_v62 = vpop.eup %8745 }
 0x789   : > { %5890 = vmatmul.mubr.f32.gmra.mrb[148].mxu1 %v5687_v16  ;;  %v5696_v59 = vmul.f32 %v13422_v39, %v12874_v49  ;;  %v5695_v16 = vmul.f32 %v13422_v39, %v12866_v9  ;;  %v5700_v49 = vmul.f32 %v13431_v62, %v15434_v52 }
 0x78a   : > { %5894 = vmatprep.mubr.f32.mxu1 %v5692_v53  ;;  %7796 = vmatpush1.bf16.msra.mxu1 %v7795_v32  ;;  %v7801_v32 = vpack.c.bf16 %v4394_v24, %v4393_v11  ;;  %v5544_v53 = vpop.xlane.xlu1 %5543  ;;  %v5549_v24 = vpop.xlane.xlu0 %5548 }
 0x78b   : > { %v13426_v40 = vpop.f32.mrb[68].mxu1  ;;  %7797 = vmatprep.subr.bf16.mxu1 %v14845_v57  ;;  %8753 = vrcp.f32 %v5544_v53 }
 0x78c   : > { %15433 = vst [vmem:[#allocation110_spill] sm:$0xff] %v13426_v40  ;;  %v4090_v50 = vpop.f32.mrb[69].mxu1  ;;  %v13440_v40 = vpop.eup %8747  ;;  %8755 = vrcp.f32 %v5549_v24 }
 0x78d   : > { %5895 = vmatmul.mubr.f32.gmra.mrb[150].mxu1 %v5691_v61  ;;  %v15435_v61 = vld [vmem:[#allocation86_spill] sm:$0xff]  ;;  %v5704_v37 = vmul.f32 %v13440_v40, %v12925_v44  ;;  %v13449_v52 = vpop.eup %8749  ;;  %v15437_v44 = vld [vmem:[#allocation123_spill] sm:$0xff] }
 0x78e   : > { %5899 = vmatprep.mubr.f32.mxu1 %v5696_v59  ;;  %7799 = vmatpush1.bf16.msra.mxu1 %v7798_v56  ;;  %v7804_v56 = vpack.c.bf16 %v4396_v48, %v4395_v22  ;;  %v5699_v9 = vmul.f32 %v13431_v62, %v15435_v61  ;;  %v5554_v22 = vpop.xlane.xlu1 %5553  ;;  %v15436_v48 = vld [vmem:[#allocation87_spill] sm:$0xff]  ;;  %v5559_v61 = vpop.xlane.xlu0 %5558 }
 0x78f   : > { %v13435_v28 = vpop.f32.mrb[70].mxu1  ;;  %7800 = vmatprep.subr.bf16.mxu1 %v14845_v57  ;;  %8757 = vrcp.f32 %v5554_v22 }
 0x790   : > { %v4095_v50 = vpop.f32.mrb[71].mxu1  ;;  %8759 = vrcp.f32 %v5559_v61 }
 0x791   : > { %5900 = vmatmul.mubr.f32.gmra.mrb[152].mxu1 %v5695_v16  ;;  %v5707_v50 = vmul.f32 %v13449_v52, %v15437_v44 }
 0x792   : > { %5904 = vmatprep.mubr.f32.mxu1 %v5700_v49  ;;  %7802 = vmatpush1.bf16.msra.mxu1 %v7801_v32  ;;  %v5703_v32 = vmul.f32 %v13440_v40, %v12920_v38  ;;  %v13457_v49 = vpop.eup %8751 }
 0x793   : > { %v13444_v11 = vpop.f32.mrb[72].mxu1  ;;  %7803 = vmatprep.subr.bf16.mxu1 %v14845_v57  ;;  %v5708_v57 = vmul.f32 %v13449_v52, %v15436_v48  ;;  %v5712_v38 = vmul.f32 %v13457_v49, %v12971_v23  ;;  %v15439_v23 = vld [vmem:[#allocation209_spill] sm:$0xff] }
 0x794   : > { %v4100_v59 = vpop.f32.mrb[73].mxu1 }
 0x795   : > { %5905 = vmatmul.mubr.f32.gmra.mrb[154].mxu1 %v5699_v9  ;;  %v13465_v24 = vpop.eup %8753 }
 0x796   : > { %5909 = vmatprep.mubr.f32.mxu1 %v5704_v37  ;;  %7805 = vmatpush1.bf16.msra.mxu1 %v7804_v56  ;;  %v5711_v37 = vmul.f32 %v13457_v49, %v12965_v30  ;;  %v5716_v22 = vmul.f32 %v13465_v24, %v12996_v60 }
 0x797   : > { %v13453_v16 = vpop.f32.mrb[74].mxu1 }
 0x798   : > { %v4105_v53 = vpop.f32.mrb[75].mxu1 }
 0x799   : > { %5910 = vmatmul.mubr.f32.gmra.mrb[156].mxu1 %v5703_v32  ;;  %v5564_v32 = vpop.xlane.xlu1 %5563  ;;  %v5715_v53 = vmul.f32 %v13465_v24, %v15439_v23 }
 0x79a   : > { %5914 = vmatprep.mubr.f32.mxu1 %v5708_v57  ;;  %v13473_v57 = vpop.eup %8755  ;;  %8761 = vrcp.f32 %v5564_v32  ;;  %v15442_v32 = vld [vmem:[#allocation95_spill] sm:$0xff] }
 0x79b   : > { %v13461_v56 = vpop.f32.mrb[76].mxu1  ;;  %v5720_v30 = vmul.f32 %v13473_v57, %v13015_v19  ;;  %v5719_v60 = vmul.f32 %v13473_v57, %v13011_v4  ;;  %v15443_v19 = vld [vmem:[#allocation46_spill] sm:$0xff] }
 0x79c   : > { %v4110_v9 = vpop.f32.mrb[77].mxu1 }
 0x79d   : > { %5915 = vmatmul.mubr.f32.gmra.mrb[158].mxu1 %v5707_v50  ;;  %v5569_v50 = vpop.xlane.xlu0 %5568 }
 0x79e   : > { %5919 = vmatprep.mubr.f32.mxu1 %v5712_v38  ;;  %v13481_v38 = vpop.eup %8757  ;;  %8763 = vrcp.f32 %v5569_v50 }
 0x79f   : > { %v13469_v59 = vpop.f32.mrb[78].mxu1  ;;  %v13489_v23 = vpop.eup %8759 }
 0x7a0   : > { %15438 = vst [vmem:[#allocation43_spill] sm:$0xff] %v13469_v59  ;;  %v4115_v48 = vpop.f32.mrb[79].mxu1  ;;  %v5728_v4 = vmul.f32 %v13489_v23, %v13066_v36  ;;  %v15447_v36 = vld [vmem:[#allocation218_spill] sm:$0xff] }
 0x7a1   : > { %5920 = vmatmul.mubr.f32.gmra.mrb[160].mxu1 %v5711_v37  ;;  %v5574_v37 = vpop.xlane.xlu1 %5573  ;;  %v5579_v50 = vpop.xlane.xlu0 %5578 }
 0x7a2   : > { %5924 = vmatprep.mubr.f32.mxu1 %v5716_v22  ;;  %v5724_v22 = vmul.f32 %v13481_v38, %v15442_v32  ;;  %8765 = vrcp.f32 %v5574_v37 }
 0x7a3   : > { %v13477_v44 = vpop.f32.mrb[80].mxu1  ;;  %8767 = vrcp.f32 %v5579_v50 }
 0x7a4   : > { %15440 = vst [vmem:[#allocation208_spill] sm:$0xff] %v13477_v44  ;;  %v4120_v61 = vpop.f32.mrb[81].mxu1 }
 0x7a5   : > { %5925 = vmatmul.mubr.f32.gmra.mrb[162].mxu1 %v5715_v53  ;;  %v5723_v53 = vmul.f32 %v13481_v38, %v15443_v19  ;;  %v5584_v37 = vpop.xlane.xlu1 %5583  ;;  %v5589_v50 = vpop.xlane.xlu0 %5588 }
 0x7a6   : > { %5929 = vmatprep.mubr.f32.mxu1 %v5720_v30  ;;  %8769 = vrcp.f32 %v5584_v37 }
 0x7a7   : > { %v13485_v9 = vpop.f32.mrb[82].mxu1  ;;  %8771 = vrcp.f32 %v5589_v50 }
 0x7a8   : > { %15441 = vst [vmem:[#allocation47_spill] sm:$0xff] %v13485_v9  ;;  %v4125_v48 = vpop.f32.mrb[83].mxu1  ;;  %v13497_v9 = vpop.eup %8761 }
 0x7a9   : > { %5930 = vmatmul.mubr.f32.gmra.mrb[164].mxu1 %v5719_v60  ;;  %v5727_v60 = vmul.f32 %v13489_v23, %v13061_v26  ;;  %v5594_v59 = vpop.xlane.xlu1 %5593 }
 0x7aa   : > { %5934 = vmatprep.mubr.f32.mxu1 %v5724_v22  ;;  %v15446_v22 = vld [vmem:[#allocation186_spill] sm:$0xff]  ;;  %8773 = vrcp.f32 %v5594_v59 }
 0x7ab   : > { %v13493_v30 = vpop.f32.mrb[84].mxu1  ;;  %v5732_v48 = vmul.f32 %v13497_v9, %v15446_v22  ;;  %v6322_v22 = vld [vmem:[#allocation12 + $0x8] sm:$0xff] }
 0x7ac   : > { %15444 = vst [vmem:[#allocation137_spill] sm:$0xff] %v13493_v30  ;;  %v4130_v61 = vpop.f32.mrb[85].mxu1  ;;  %v13505_v30 = vpop.eup %8763 }
 0x7ad   : > { %5935 = vmatmul.mubr.f32.gmra.mrb[166].mxu1 %v5723_v53  ;;  %v5731_v53 = vmul.f32 %v13497_v9, %v15447_v36  ;;  %v5736_v26 = vmul.f32 %v13505_v30, %v13114_v55  ;;  %v5735_v37 = vmul.f32 %v13505_v30, %v13109_v5  ;;  %v5599_v5 = vpop.xlane.xlu0 %5598 }
 0x7ae   : > { %5939 = vmatprep.mubr.f32.mxu1 %v5728_v4  ;;  %8775 = vrcp.f32 %v5599_v5 }
 0x7af   : > { %v13501_v32 = vpop.f32.mrb[86].mxu1 }
 0x7b0   : > { %15445 = vst [vmem:[#allocation226_spill] sm:$0xff] %v13501_v32  ;;  %v4135_v19 = vpop.f32.mrb[87].mxu1  ;;  %v13513_v32 = vpop.eup %8765 }
 0x7b1   : > { %5940 = vmatmul.mubr.f32.gmra.mrb[168].mxu1 %v5727_v60  ;;  %v6324_v19 = vld [vmem:[#allocation12 + $0x18] sm:$0xff]  ;;  %v6321_v60 = vld [vmem:[#allocation12] sm:$0xff]  ;;  %v5740_v55 = vmul.f32 %v13513_v32, %v13144_v10  ;;  %v5739_v50 = vmul.f32 %v13513_v32, %v13136_v0  ;;  %v6326_v10 = vld [vmem:[#allocation12 + $0x28] sm:$0xff] }
 0x7b2   : > { %5944 = vmatprep.mubr.f32.mxu1 %v5732_v48  ;;  %v7806_v44 = vpack.c.bf16 %v6324_v19, %v6322_v22  ;;  %v6323_v48 = vld [vmem:[#allocation12 + $0x10] sm:$0xff] }
 0x7b3   : > { %v13509_v4 = vpop.f32.mrb[88].mxu1 }
 0x7b4   : > { %15448 = vst [vmem:[#allocation113_spill] sm:$0xff] %v13509_v4  ;;  %v4140_v61 = vpop.f32.mrb[89].mxu1  ;;  %v7808_v4 = vpack.c.bf16 %v6323_v48, %v6321_v60  ;;  %7807 = vmatprep.subr.bf16.mxu0 %v7806_v44  ;;  %v6328_v44 = vld [vmem:[#allocation12 + $0x38] sm:$0xff] }
 0x7b5   : > { %5945 = vmatmul.mubr.f32.gmra.mrb[170].mxu1 %v5731_v53  ;;  %v13521_v53 = vpop.eup %8767  ;;  %v7810_v48 = vpack.c.bf16 %v6328_v44, %v6326_v10 }
 0x7b6   : > { %5949 = vmatprep.mubr.f32.mxu1 %v5736_v26  ;;  %7809 = vmatpush1.bf16.msra.mxu0 %v7808_v4  ;;  %v5744_v22 = vmul.f32 %v13521_v53, %v13165_v34  ;;  %v13529_v60 = vpop.eup %8769  ;;  %v6325_v4 = vld [vmem:[#allocation12 + $0x20] sm:$0xff]  ;;  %v5743_v0 = vmul.f32 %v13521_v53, %v13160_v12  ;;  %v5609_v12 = vpop.xlane.xlu0 %5608 }
 0x7b7   : > { %v13517_v36 = vpop.f32.mrb[90].mxu1  ;;  %v5748_v34 = vmul.f32 %v13529_v60, %v13190_v8  ;;  %7811 = vmatprep.subr.bf16.mxu0 %v7810_v48  ;;  %v5747_v5 = vmul.f32 %v13529_v60, %v13184_v6  ;;  %v6330_v8 = vld [vmem:[#allocation12 + $0x48] sm:$0xff]  ;;  %v6332_v48 = vld [vmem:[#allocation12 + $0x58] sm:$0xff] }
 0x7b8   : > { %v4145_v61 = vpop.f32.mrb[91].mxu1 }
 0x7b9   : > { %5950 = vmatmul.mubr.f32.gmra.mrb[172].mxu1 %v5735_v37  ;;  %v6327_v37 = vld [vmem:[#allocation12 + $0x30] sm:$0xff]  ;;  %v5604_v61 = vpop.xlane.xlu1 %5603 }
 0x7ba   : > { %5954 = vmatprep.mubr.f32.mxu1 %v5740_v55  ;;  %v7812_v55 = vpack.c.bf16 %v6327_v37, %v6325_v4  ;;  %8777 = vrcp.f32 %v5604_v61  ;;  %v7814_v37 = vpack.c.bf16 %v6332_v48, %v6330_v8 }
 0x7bb   : > { %v13525_v26 = vpop.f32.mrb[92].mxu1  ;;  %8779 = vrcp.f32 %v5609_v12 }
 0x7bc   : > { %v4150_v19 = vpop.f32.mrb[93].mxu1  ;;  %7813 = vmatpush1.bf16.msra.mxu0 %v7812_v55  ;;  %v6331_v55 = vld [vmem:[#allocation12 + $0x50] sm:$0xff] }
 0x7bd   : > { %5955 = vmatmul.mubr.f32.gmra.mrb[174].mxu1 %v5739_v50  ;;  %v13537_v50 = vpop.eup %8771  ;;  %7815 = vmatprep.subr.bf16.mxu0 %v7814_v37  ;;  %v6336_v37 = vld [vmem:[#allocation12 + $0x78] sm:$0xff] }
 0x7be   : > { %5959 = vmatprep.mubr.f32.mxu1 %v5744_v22  ;;  %v5752_v10 = vmul.f32 %v13537_v50, %v13215_v47  ;;  %v13545_v4 = vpop.eup %8773  ;;  %v5751_v6 = vmul.f32 %v13537_v50, %v13209_v18 }
 0x7bf   : > { %v13533_v59 = vpop.f32.mrb[94].mxu1  ;;  %v5756_v47 = vmul.f32 %v13545_v4, %v13238_v2  ;;  %v5755_v12 = vmul.f32 %v13545_v4, %v13232_v51  ;;  %v6334_v2 = vld [vmem:[#allocation12 + $0x68] sm:$0xff] }
 0x7c0   : > { %v4155_v19 = vpop.f32.mrb[95].mxu1 }
 0x7c1   : > { %5960 = vmatmul.mubr.f32.gmra.mrb[176].mxu1 %v5743_v0  ;;  %v6329_v0 = vld [vmem:[#allocation12 + $0x40] sm:$0xff]  ;;  %v5614_v19 = vpop.xlane.xlu1 %5613 }
 0x7c2   : > { %5964 = vmatprep.mubr.f32.mxu1 %v5748_v34  ;;  %v7816_v34 = vpack.c.bf16 %v6331_v55, %v6329_v0  ;;  %8781 = vrcp.f32 %v5614_v19  ;;  %v7818_v0 = vpack.c.bf16 %v6336_v37, %v6334_v2  ;;  %v6333_v55 = vld [vmem:[#allocation12 + $0x60] sm:$0xff]  ;;  %v6340_v37 = vld [vmem:[#allocation12 + $0x98] sm:$0xff] }
 0x7c3   : > { %v13541_v22 = vpop.f32.mrb[96].mxu1 }
 0x7c4   : > { %v4160_v44 = vpop.f32.mrb[97].mxu1  ;;  %7817 = vmatpush1.bf16.msra.mxu0 %v7816_v34 }
 0x7c5   : > { %5965 = vmatmul.mubr.f32.gmra.mrb[178].mxu1 %v5747_v5  ;;  %v13553_v5 = vpop.eup %8775  ;;  %7819 = vmatprep.subr.bf16.mxu0 %v7818_v0 }
 0x7c6   : > { %5969 = vmatprep.mubr.f32.mxu1 %v5752_v10  ;;  %v5760_v18 = vmul.f32 %v13553_v5, %v13260_v54  ;;  %v13561_v48 = vpop.eup %8777  ;;  %v5759_v34 = vmul.f32 %v13553_v5, %v13254_v3 }
 0x7c7   : > { %v13549_v61 = vpop.f32.mrb[98].mxu1 }
 0x7c8   : > { %v4165_v44 = vpop.f32.mrb[99].mxu1 }
 0x7c9   : > { %5970 = vmatmul.mubr.f32.gmra.mrb[180].mxu1 %v5751_v6  ;;  %v6335_v6 = vld [vmem:[#allocation12 + $0x70] sm:$0xff]  ;;  %v13569_v44 = vpop.eup %8779 }
 0x7ca   : > { %5974 = vmatprep.mubr.f32.mxu1 %v5756_v47  ;;  %v7820_v51 = vpack.c.bf16 %v6335_v6, %v6333_v55  ;;  %v5764_v47 = vmul.f32 %v13561_v48, %v13277_v46  ;;  %v5768_v3 = vmul.f32 %v13569_v44, %v13294_v43  ;;  %v6338_v46 = vld [vmem:[#allocation12 + $0x88] sm:$0xff]  ;;  %v6337_v55 = vld [vmem:[#allocation12 + $0x80] sm:$0xff]  ;;  %v6339_v6 = vld [vmem:[#allocation12 + $0x90] sm:$0xff] }
 0x7cb   : > { %v13557_v10 = vpop.f32.mrb[100].mxu1  ;;  %v7822_v0 = vpack.c.bf16 %v6340_v37, %v6338_v46  ;;  %v6342_v46 = vld [vmem:[#allocation12 + $0xa8] sm:$0xff]  ;;  %v6344_v37 = vld [vmem:[#allocation12 + $0xb8] sm:$0xff] }
 0x7cc   : > { %15449 = vst [vmem:[#allocation158_spill] sm:$0xff] %v13557_v10  ;;  %v4170_v8 = vpop.f32.mrb[101].mxu1  ;;  %7821 = vmatpush1.bf16.msra.mxu0 %v7820_v51  ;;  %v13577_v2 = vpop.eup %8781  ;;  %v15459_v10 = vld [vmem:[#allocation60_spill] sm:$0xff] }
 0x7cd   : > { %5975 = vmatmul.mubr.f32.gmra.mrb[182].mxu1 %v5755_v12  ;;  %v5763_v12 = vmul.f32 %v13561_v48, %v13271_v21  ;;  %v7824_v21 = vpack.c.bf16 %v6339_v6, %v6337_v55  ;;  %7823 = vmatprep.subr.bf16.mxu0 %v7822_v0  ;;  %v6341_v55 = vld [vmem:[#allocation12 + $0xa0] sm:$0xff]  ;;  %v6343_v6 = vld [vmem:[#allocation12 + $0xb0] sm:$0xff]  ;;  %v6346_v0 = vld [vmem:[#allocation12 + $0xc8] sm:$0xff] }
 0x7ce   : > { %5979 = vmatprep.mubr.f32.mxu1 %v5760_v18 }
 0x7cf   : > { %v13565_v19 = vpop.f32.mrb[102].mxu1 }
 0x7d0   : > { %15450 = vst [vmem:[#allocation228_spill] sm:$0xff] %v13565_v19  ;;  %v4175_v54 = vpop.f32.mrb[103].mxu1  ;;  %7825 = vmatpush1.bf16.msra.mxu0 %v7824_v21  ;;  %v15455_v21 = vld [vmem:[#allocation44_spill] sm:$0xff] }
 0x7d1   : > { %5980 = vmatmul.mubr.f32.gmra.mrb[184].mxu1 %v5759_v34  ;;  %v5767_v34 = vmul.f32 %v13569_v44, %v13288_v33  ;;  %v5771_v54 = vmul.f32 %v13577_v2, %v13305_v45  ;;  %v7828_v45 = vpack.c.bf16 %v6343_v6, %v6341_v55 }
 0x7d2   : > { %5984 = vmatprep.mubr.f32.mxu1 %v5764_v47  ;;  %v5772_v47 = vmul.f32 %v13577_v2, %v13311_v27  ;;  %v7826_v27 = vpack.c.bf16 %v6344_v37, %v6342_v46 }
 0x7d3   : > { %v13573_v18 = vpop.f32.mrb[104].mxu1 }
 0x7d4   : > { %15451 = vst [vmem:[#allocation140_spill] sm:$0xff] %v13573_v18  ;;  %v4180_v8 = vpop.f32.mrb[105].mxu1  ;;  %v6347_v18 = vld [vmem:[#allocation12 + $0xd0] sm:$0xff]  ;;  %7827 = vmatprep.subr.bf16.mxu0 %v7826_v27 }
 0x7d5   : > { %5985 = vmatmul.mubr.f32.gmra.mrb[186].mxu1 %v5763_v12  ;;  %7829 = vmatpush1.bf16.msra.mxu0 %v7828_v45  ;;  %v15460_v45 = vld [vmem:[#allocation57_spill] sm:$0xff] }
 0x7d6   : > { %5989 = vmatprep.mubr.f32.mxu1 %v5768_v3  ;;  %v15454_v3 = vld [vmem:[#allocation48_spill] sm:$0xff] }
 0x7d7   : > { %v13581_v51 = vpop.f32.mrb[106].mxu1  ;;  %v5650_v8 = vmul.f32 %v13336_v25, %v15454_v3  ;;  %v6350_v3 = vld [vmem:[#allocation12 + $0xe8] sm:$0xff] }
 0x7d8   : > { %15452 = vst [vmem:[#allocation161_spill] sm:$0xff] %v13581_v51  ;;  %v4185_v43 = vpop.f32.mrb[107].mxu1  ;;  %v6345_v51 = vld [vmem:[#allocation12 + $0xc0] sm:$0xff] }
 0x7d9   : > { %5990 = vmatmul.mubr.f32.gmra.mrb[188].mxu1 %v5767_v34  ;;  %v6348_v34 = vld [vmem:[#allocation12 + $0xd8] sm:$0xff]  ;;  %v7832_v46 = vpack.c.bf16 %v6347_v18, %v6345_v51  ;;  %v6353_v51 = vld [vmem:[#allocation12 + $0x100] sm:$0xff] }
 0x7da   : > { %5994 = vmatprep.mubr.f32.mxu1 %v5772_v47  ;;  %v5649_v47 = vmul.f32 %v13336_v25, %v15455_v21  ;;  %v6349_v25 = vld [vmem:[#allocation12 + $0xe0] sm:$0xff]  ;;  %v6351_v21 = vld [vmem:[#allocation12 + $0xf0] sm:$0xff] }
 0x7db   : > { %v13587_v12 = vpop.f32.mrb[108].mxu1 }
 0x7dc   : > { %15453 = vst [vmem:[#allocation50_spill] sm:$0xff] %v13587_v12  ;;  %v4190_v33 = vpop.f32.mrb[109].mxu1  ;;  %v7830_v12 = vpack.c.bf16 %v6348_v34, %v6346_v0  ;;  %v6354_v0 = vld [vmem:[#allocation12 + $0x108] sm:$0xff]  ;;  %v6356_v34 = vld [vmem:[#allocation12 + $0x118] sm:$0xff] }
 0x7dd   : > { %5995 = vmatmul.mubr.f32.gmra.mrb[190].mxu1 %v5771_v54  ;;  %v15457_v33 = vld [vmem:[#allocation115_spill] sm:$0xff]  ;;  %v7838_v18 = vpack.c.bf16 %v6356_v34, %v6354_v0  ;;  %v6362_v34 = vld [vmem:[#allocation12 + $0x148] sm:$0xff] }
 0x7de   : > { %6064 = vmatprep.mubr.f32.mxu1 %v5650_v8  ;;  %v5654_v54 = vmul.f32 %v13342_v15, %v15457_v33  ;;  %v6352_v8 = vld [vmem:[#allocation12 + $0xf8] sm:$0xff]  ;;  %7831 = vmatprep.subr.bf16.mxu0 %v7830_v12  ;;  %v6355_v12 = vld [vmem:[#allocation12 + $0x110] sm:$0xff] }
 0x7df   : > { %v13593_v43 = vpop.f32.mrb[110].mxu1  ;;  %v7834_v37 = vpack.c.bf16 %v6352_v8, %v6350_v3  ;;  %7833 = vmatpush1.bf16.msra.mxu0 %v7832_v46  ;;  %v5657_v3 = vmul.f32 %v13350_v58, %v15460_v45  ;;  %v6360_v33 = vld [vmem:[#allocation12 + $0x138] sm:$0xff]  ;;  %v7840_v46 = vpack.c.bf16 %v6355_v12, %v6353_v51  ;;  %v6361_v51 = vld [vmem:[#allocation12 + $0x140] sm:$0xff]  ;;  %v6363_v12 = vld [vmem:[#allocation12 + $0x150] sm:$0xff] }
 0x7e0   : > { %15456 = vst [vmem:[#allocation227_spill] sm:$0xff] %v13593_v43  ;;  %v4195_v19 = vpop.f32.mrb[111].mxu1  ;;  %v15458_v43 = vld [vmem:[#allocation191_spill] sm:$0xff] }
 0x7e1   : > { %6065 = vmatmul.mubr.f32.vlgmr.msra.gmra.mrb[128].mxu1 %v5649_v47  ;;  %v5653_v55 = vmul.f32 %v13342_v15, %v15458_v43  ;;  %v5658_v19 = vmul.f32 %v13350_v58, %v15459_v10  ;;  %v7836_v47 = vpack.c.bf16 %v6351_v21, %v6349_v25  ;;  %7835 = vmatprep.subr.bf16.mxu0 %v7834_v37  ;;  %v6358_v43 = vld [vmem:[#allocation12 + $0x128] sm:$0xff]  ;;  %v6357_v25 = vld [vmem:[#allocation12 + $0x120] sm:$0xff]  ;;  %v6359_v21 = vld [vmem:[#allocation12 + $0x130] sm:$0xff] }
 0x7e2   : > { %6069 = vmatprep.mubr.f32.mxu1 %v5654_v54  ;;  %v15461_v54 = vld [vmem:[#allocation153_spill] sm:$0xff]  ;;  %v7842_v37 = vpack.c.bf16 %v6360_v33, %v6358_v43  ;;  %v6366_v33 = vld [vmem:[#allocation12 + $0x168] sm:$0xff] }
 0x7e3   : > { %v13599_v6 = vpop.f32.mrb[112].mxu1  ;;  %v5662_v8 = vmul.f32 %v13357_v1, %v15461_v54  ;;  %7837 = vmatpush1.bf16.msra.mxu0 %v7836_v47  ;;  %v7844_v47 = vpack.c.bf16 %v6359_v21, %v6357_v25  ;;  %v6365_v25 = vld [vmem:[#allocation12 + $0x160] sm:$0xff]  ;;  %v6367_v21 = vld [vmem:[#allocation12 + $0x170] sm:$0xff] }
 0x7e4   : > { %v4200_v27 = vpop.f32.mrb[113].mxu1  ;;  %7839 = vmatprep.subr.bf16.mxu0 %v7838_v18 }
 0x7e5   : > { %6070 = vmatmul.mubr.f32.gmra.mrb[130].mxu1 %v5653_v55  ;;  %v15462_v55 = vld [vmem:[#allocation68_spill] sm:$0xff] }
 0x7e6   : > { %6074 = vmatprep.mubr.f32.mxu1 %v5658_v19  ;;  %v5661_v0 = vmul.f32 %v13357_v1, %v15462_v55  ;;  %v6364_v19 = vld [vmem:[#allocation12 + $0x158] sm:$0xff] }
 0x7e7   : > { %v13605_v15 = vpop.f32.mrb[114].mxu1  ;;  %v15463_v27 = vld [vmem:[#allocation160_spill] sm:$0xff]  ;;  %7841 = vmatpush1.bf16.msra.mxu0 %v7840_v46  ;;  %v7846_v18 = vpack.c.bf16 %v6364_v19, %v6362_v34  ;;  %v7848_v46 = vpack.c.bf16 %v6363_v12, %v6361_v51  ;;  %v6370_v19 = vld [vmem:[#allocation12 + $0x188] sm:$0xff]  ;;  %v6369_v51 = vld [vmem:[#allocation12 + $0x180] sm:$0xff] }
 0x7e8   : > { %v4205_v10 = vpop.f32.mrb[115].mxu1  ;;  %v5666_v45 = vmul.f32 %v13364_v29, %v15463_v27  ;;  %7843 = vmatprep.subr.bf16.mxu0 %v7842_v37  ;;  %v6371_v12 = vld [vmem:[#allocation12 + $0x190] sm:$0xff] }
 0x7e9   : > { %6075 = vmatmul.mubr.f32.gmra.mrb[132].mxu1 %v5657_v3  ;;  %v15464_v3 = vld [vmem:[#allocation156_spill] sm:$0xff]  ;;  %v15465_v10 = vld [vmem:[#allocation163_spill] sm:$0xff] }
 0x7ea   : > { %6079 = vmatprep.mubr.f32.mxu1 %v5662_v8  ;;  %v5665_v43 = vmul.f32 %v13364_v29, %v15464_v3  ;;  %v6368_v8 = vld [vmem:[#allocation12 + $0x178] sm:$0xff]  ;;  %v5670_v55 = vmul.f32 %v13372_v20, %v15465_v10 }
 0x7eb   : > { %v13611_v58 = vpop.f32.mrb[116].mxu1  ;;  %7845 = vmatpush1.bf16.msra.mxu0 %v7844_v47  ;;  %v7850_v37 = vpack.c.bf16 %v6368_v8, %v6366_v33  ;;  %v7852_v47 = vpack.c.bf16 %v6367_v21, %v6365_v25  ;;  %v6374_v8 = vld [vmem:[#allocation12 + $0x1a8] sm:$0xff]  ;;  %v6373_v25 = vld [vmem:[#allocation12 + $0x1a0] sm:$0xff]  ;;  %v6375_v21 = vld [vmem:[#allocation12 + $0x1b0] sm:$0xff] }
 0x7ec   : > { %v4210_v54 = vpop.f32.mrb[117].mxu1  ;;  %7847 = vmatprep.subr.bf16.mxu0 %v7846_v18 }
 0x7ed   : > { %6080 = vmatmul.mubr.f32.gmra.mrb[134].mxu1 %v5661_v0  ;;  %v15466_v0 = vld [vmem:[#allocation77_spill] sm:$0xff] }
 0x7ee   : > { %6084 = vmatprep.mubr.f32.mxu1 %v5666_v45  ;;  %v5669_v34 = vmul.f32 %v13372_v20, %v15466_v0  ;;  %v6372_v45 = vld [vmem:[#allocation12 + $0x198] sm:$0xff]  ;;  %v15467_v54 = vld [vmem:[#allocation117_spill] sm:$0xff] }
 0x7ef   : > { %v13617_v1 = vpop.f32.mrb[118].mxu1  ;;  %v5674_v3 = vmul.f32 %v13379_v42, %v15467_v54  ;;  %7849 = vmatpush1.bf16.msra.mxu0 %v7848_v46  ;;  %v7854_v18 = vpack.c.bf16 %v6372_v45, %v6370_v19  ;;  %v7856_v46 = vpack.c.bf16 %v6371_v12, %v6369_v51  ;;  %v6378_v45 = vld [vmem:[#allocation12 + $0x1c8] sm:$0xff]  ;;  %v6377_v51 = vld [vmem:[#allocation12 + $0x1c0] sm:$0xff]  ;;  %v6379_v12 = vld [vmem:[#allocation12 + $0x1d0] sm:$0xff] }
 0x7f0   : > { %v4215_v27 = vpop.f32.mrb[119].mxu1  ;;  %7851 = vmatprep.subr.bf16.mxu0 %v7850_v37 }
 0x7f1   : > { %6085 = vmatmul.mubr.f32.gmra.mrb[136].mxu1 %v5665_v43  ;;  %v15468_v43 = vld [vmem:[#allocation27_spill] sm:$0xff]  ;;  %v15469_v27 = vld [vmem:[#allocation166_spill] sm:$0xff] }
 0x7f2   : > { %6089 = vmatprep.mubr.f32.mxu1 %v5670_v55  ;;  %v5673_v33 = vmul.f32 %v13379_v42, %v15468_v43  ;;  %v6376_v55 = vld [vmem:[#allocation12 + $0x1b8] sm:$0xff]  ;;  %v5678_v0 = vmul.f32 %v13386_v63, %v15469_v27 }
 0x7f3   : > { %v13623_v29 = vpop.f32.mrb[120].mxu1  ;;  %7853 = vmatpush1.bf16.msra.mxu0 %v7852_v47  ;;  %v7858_v37 = vpack.c.bf16 %v6376_v55, %v6374_v8  ;;  %v7860_v47 = vpack.c.bf16 %v6375_v21, %v6373_v25  ;;  %v6382_v55 = vld [vmem:[#allocation12 + $0x1e8] sm:$0xff]  ;;  %v6381_v25 = vld [vmem:[#allocation12 + $0x1e0] sm:$0xff]  ;;  %v6383_v21 = vld [vmem:[#allocation12 + $0x1f0] sm:$0xff] }
 0x7f4   : > { %v4220_v10 = vpop.f32.mrb[121].mxu1  ;;  %7855 = vmatprep.subr.bf16.mxu0 %v7854_v18 }
 0x7f5   : > { %6090 = vmatmul.mubr.f32.gmra.mrb[138].mxu1 %v5669_v34  ;;  %v15470_v34 = vld [vmem:[#allocation80_spill] sm:$0xff]  ;;  %v15471_v10 = vld [vmem:[#allocation81_spill] sm:$0xff] }
 0x7f6   : > { %6094 = vmatprep.mubr.f32.mxu1 %v5674_v3  ;;  %v5677_v19 = vmul.f32 %v13386_v63, %v15470_v34  ;;  %v6380_v3 = vld [vmem:[#allocation12 + $0x1d8] sm:$0xff]  ;;  %v5682_v43 = vmul.f32 %v13395_v41, %v15471_v10 }
 0x7f7   : > { %v13629_v20 = vpop.f32.mrb[122].mxu1  ;;  %7857 = vmatpush1.bf16.msra.mxu0 %v7856_v46  ;;  %v7862_v18 = vpack.c.bf16 %v6380_v3, %v6378_v45  ;;  %v7864_v46 = vpack.c.bf16 %v6379_v12, %v6377_v51  ;;  %v15477_v51 = vld [vmem:[#allocation120_spill] sm:$0xff] }
 0x7f8   : > { %v4225_v54 = vpop.f32.mrb[123].mxu1  ;;  %7859 = vmatprep.subr.bf16.mxu0 %v7858_v37  ;;  %v15478_v12 = vld [vmem:[#allocation200_spill] sm:$0xff] }
 0x7f9   : > { %6095 = vmatmul.mubr.f32.gmra.mrb[140].mxu1 %v5673_v33  ;;  %v15472_v33 = vld [vmem:[#allocation195_spill] sm:$0xff]  ;;  %v15473_v54 = vld [vmem:[#allocation201_spill] sm:$0xff] }
 0x7fa   : > { %6099 = vmatprep.mubr.f32.mxu1 %v5678_v0  ;;  %v5681_v8 = vmul.f32 %v13395_v41, %v15472_v33  ;;  %v6384_v0 = vld [vmem:[#allocation12 + $0x1f8] sm:$0xff]  ;;  %v5686_v34 = vmul.f32 %v13393_v35, %v15473_v54  ;;  %v15475_v41 = vld [vmem:[#allocation119_spill] sm:$0xff]  ;;  %v15481_v54 = vld [vmem:[#allocation122_spill] sm:$0xff] }
 0x7fb   : > { %v13635_v42 = vpop.f32.mrb[124].mxu1  ;;  %7861 = vmatpush1.bf16.msra.mxu0 %v7860_v47  ;;  %v7866_v37 = vpack.c.bf16 %v6384_v0, %v6382_v55  ;;  %v5690_v3 = vmul.f32 %v13404_v7, %v15475_v41  ;;  %v15479_v33 = vld [vmem:[#allocation204_spill] sm:$0xff]  ;;  %v15480_v55 = vld [vmem:[#allocation214_spill] sm:$0xff] }
 0x7fc   : > { %v4230_v27 = vpop.f32.mrb[125].mxu1  ;;  %7863 = vmatprep.subr.bf16.mxu0 %v7862_v18  ;;  %v5694_v18 = vmul.f32 %v13413_v31, %v15477_v51  ;;  %v5697_v0 = vmul.f32 %v13422_v39, %v15480_v55  ;;  %v15487_v41 = vld [vmem:[#allocation210_spill] sm:$0xff] }
 0x7fd   : > { %6100 = vmatmul.mubr.f32.gmra.mrb[142].mxu1 %v5677_v19  ;;  %v15474_v19 = vld [vmem:[#allocation194_spill] sm:$0xff]  ;;  %v15476_v27 = vld [vmem:[#allocation199_spill] sm:$0xff] }
 0x7fe   : > { %6104 = vmatprep.mubr.f32.mxu1 %v5682_v43  ;;  %v5685_v45 = vmul.f32 %v13393_v35, %v15474_v19  ;;  %v7868_v43 = vpack.c.bf16 %v6383_v21, %v6381_v25  ;;  %v5689_v47 = vmul.f32 %v13404_v7, %v15476_v27  ;;  %v5693_v35 = vmul.f32 %v13413_v31, %v15478_v12  ;;  %v15484_v31 = vld [vmem:[#allocation216_spill] sm:$0xff] }
 0x7ff   : > { %v13641_v63 = vpop.f32.mrb[126].mxu1  ;;  %7865 = vmatpush1.bf16.msra.mxu0 %v7864_v46  ;;  %v5702_v7 = vmul.f32 %v13431_v62, %v15481_v54  ;;  %v15483_v46 = vld [vmem:[#allocation172_spill] sm:$0xff]  ;;  %v5705_v25 = vmul.f32 %v13440_v40, %v15484_v31 }
 0x800   : > { %v4235_v10 = vpop.f32.mrb[127].mxu1  ;;  %7867 = vmatprep.subr.bf16.mxu0 %v7866_v37  ;;  %v5706_v37 = vmul.f32 %v13440_v40, %v15483_v46  ;;  %v15485_v21 = vld [vmem:[#allocation176_spill] sm:$0xff]  ;;  %v15490_v40 = vld [vmem:[#allocation125_spill] sm:$0xff] }
 0x801   : > { %6105 = vmatmul.mubr.f32.gmra.mrb[144].mxu1 %v5681_v8  ;;  %v5698_v8 = vmul.f32 %v13422_v39, %v15479_v33  ;;  %v5710_v19 = vmul.f32 %v13449_v52, %v15485_v21  ;;  %v15486_v39 = vld [vmem:[#allocation124_spill] sm:$0xff]  ;;  %v5717_v51 = vmul.f32 %v13465_v24, %v15490_v40  ;;  %v15493_v33 = vld [vmem:[#allocation30_spill] sm:$0xff]  ;;  %v5742_v21 = vmul.f32 %v13513_v32, %v13155_v13 }
 0x802   : > { %6109 = vmatprep.mubr.f32.mxu1 %v5686_v34  ;;  %v15482_v34 = vld [vmem:[#allocation121_spill] sm:$0xff]  ;;  %v15489_v27 = vld [vmem:[#allocation92_spill] sm:$0xff]  ;;  %v15508_v40 = vld [vmem:[#allocation190_spill] sm:$0xff] }
 0x803   : > { %7869 = vmatpush1.bf16.msra.mxu0 %v7868_v43  ;;  %v5701_v10 = vmul.f32 %v13431_v62, %v15482_v34  ;;  %v15488_v62 = vld [vmem:[#allocation217_spill] sm:$0xff] }
 0x804   : > { %v5713_v43 = vmul.f32 %v13457_v49, %v15488_v62  ;;  %v15497_v34 = vld [vmem:[#allocation185_spill] sm:$0xff] }
 0x805   : > { %6110 = vmatmul.mubr.f32.gmra.mrb[146].mxu1 %v5685_v45  ;;  %v5709_v45 = vmul.f32 %v13449_v52, %v15486_v39  ;;  %v15492_v52 = vld [vmem:[#allocation126_spill] sm:$0xff] }
 0x806   : > { %6114 = vmatprep.mubr.f32.mxu1 %v5690_v3  ;;  %v5714_v3 = vmul.f32 %v13457_v49, %v15487_v41  ;;  %v15494_v49 = vld [vmem:[#allocation182_spill] sm:$0xff] }
 0x807   : > { %v5725_v55 = vmul.f32 %v13481_v38, %v15494_v49  ;;  %v15502_v39 = vld [vmem:[#allocation102_spill] sm:$0xff] }
 0x809   : > { %6115 = vmatmul.mubr.f32.gmra.mrb[148].mxu1 %v5689_v47  ;;  %v5718_v47 = vmul.f32 %v13465_v24, %v15489_v27  ;;  %v15496_v24 = vld [vmem:[#allocation128_spill] sm:$0xff] }
 0x80a   : > { %6119 = vmatprep.mubr.f32.mxu1 %v5694_v18  ;;  %v15491_v18 = vld [vmem:[#allocation179_spill] sm:$0xff] }
 0x80b   : > { %v5722_v12 = vmul.f32 %v13473_v57, %v15491_v18 }
 0x80d   : > { %6120 = vmatmul.mubr.f32.gmra.mrb[150].mxu1 %v5693_v35  ;;  %v5721_v35 = vmul.f32 %v13473_v57, %v15492_v52  ;;  %v15498_v57 = vld [vmem:[#allocation129_spill] sm:$0xff] }
 0x80e   : > { %6124 = vmatprep.mubr.f32.mxu1 %v5698_v8  ;;  %v5726_v8 = vmul.f32 %v13481_v38, %v15493_v33  ;;  %v5733_v46 = vmul.f32 %v13497_v9, %v15498_v57  ;;  %v15500_v38 = vld [vmem:[#allocation130_spill] sm:$0xff]  ;;  %v15512_v33 = vld [vmem:[#allocation109_spill] sm:$0xff] }
 0x811   : > { %6125 = vmatmul.mubr.f32.gmra.mrb[152].mxu1 %v5697_v0  ;;  %v15495_v0 = vld [vmem:[#allocation28_spill] sm:$0xff] }
 0x812   : > { %6129 = vmatprep.mubr.f32.mxu1 %v5702_v7  ;;  %v5730_v54 = vmul.f32 %v13489_v23, %v15495_v0  ;;  %v5729_v7 = vmul.f32 %v13489_v23, %v15496_v24  ;;  %v15501_v23 = vld [vmem:[#allocation219_spill] sm:$0xff]  ;;  %v5774_v24 = vmul.f32 %v13577_v2, %v13324_v14  ;;  %v15518_v14 = vld [vmem:[#allocation110_spill] sm:$0xff] }
 0x815   : > { %6130 = vmatmul.mubr.f32.gmra.mrb[154].mxu1 %v5701_v10  ;;  %v5734_v10 = vmul.f32 %v13497_v9, %v15497_v34  ;;  %v15503_v9 = vld [vmem:[#allocation188_spill] sm:$0xff] }
 0x816   : > { %6134 = vmatprep.mubr.f32.mxu1 %v5706_v37  ;;  %v15499_v37 = vld [vmem:[#allocation99_spill] sm:$0xff]  ;;  %v5745_v41 = vmul.f32 %v13521_v53, %v15503_v9 }
 0x817   : > { %v5738_v31 = vmul.f32 %v13505_v30, %v15499_v37  ;;  %v15519_v9 = vld [vmem:[#allocation43_spill] sm:$0xff] }
 0x819   : > { %6135 = vmatmul.mubr.f32.gmra.mrb[156].mxu1 %v5705_v25  ;;  %v5737_v25 = vmul.f32 %v13505_v30, %v15500_v38  ;;  %v15505_v30 = vld [vmem:[#allocation131_spill] sm:$0xff] }
 0x81a   : > { %6139 = vmatprep.mubr.f32.mxu1 %v5710_v19  ;;  %v5741_v19 = vmul.f32 %v13513_v32, %v15501_v23  ;;  %v5749_v13 = vmul.f32 %v13529_v60, %v15505_v30  ;;  %v15507_v32 = vld [vmem:[#allocation105_spill] sm:$0xff]  ;;  %v15521_v30 = vld [vmem:[#allocation47_spill] sm:$0xff] }
 0x81d   : > { %6140 = vmatmul.mubr.f32.gmra.mrb[158].mxu1 %v5709_v45  ;;  %v5746_v45 = vmul.f32 %v13521_v53, %v15502_v39  ;;  %v15509_v53 = vld [vmem:[#allocation31_spill] sm:$0xff] }
 0x81e   : > { %6144 = vmatprep.mubr.f32.mxu1 %v5714_v3  ;;  %v15504_v3 = vld [vmem:[#allocation189_spill] sm:$0xff]  ;;  %v5757_v18 = vmul.f32 %v13545_v4, %v15509_v53 }
 0x81f   : > { %v5750_v62 = vmul.f32 %v13529_v60, %v15504_v3  ;;  %v15511_v60 = vld [vmem:[#allocation225_spill] sm:$0xff]  ;;  %v15520_v3 = vld [vmem:[#allocation208_spill] sm:$0xff] }
 0x821   : > { %6145 = vmatmul.mubr.f32.gmra.mrb[160].mxu1 %v5713_v43  ;;  %v15506_v43 = vld [vmem:[#allocation32_spill] sm:$0xff] }
 0x822   : > { %6149 = vmatprep.mubr.f32.mxu1 %v5718_v47  ;;  %v5754_v27 = vmul.f32 %v13537_v50, %v15506_v43  ;;  %v5753_v47 = vmul.f32 %v13537_v50, %v15507_v32  ;;  %v15513_v50 = vld [vmem:[#allocation37_spill] sm:$0xff]  ;;  %v15523_v32 = vld [vmem:[#allocation226_spill] sm:$0xff] }
 0x823   : > { %v5765_v49 = vmul.f32 %v13561_v48, %v15513_v50  ;;  %v15522_v43 = vld [vmem:[#allocation137_spill] sm:$0xff] }
 0x825   : > { %6150 = vmatmul.mubr.f32.gmra.mrb[162].mxu1 %v5717_v51  ;;  %v5758_v51 = vmul.f32 %v13545_v4, %v15508_v40  ;;  %v15515_v4 = vld [vmem:[#allocation221_spill] sm:$0xff] }
 0x826   : > { %6154 = vmatprep.mubr.f32.mxu1 %v5722_v12  ;;  %v15510_v12 = vld [vmem:[#allocation36_spill] sm:$0xff] }
 0x827   : > { %v5762_v52 = vmul.f32 %v13553_v5, %v15510_v12 }
 0x829   : > { %6155 = vmatmul.mubr.f32.gmra.mrb[164].mxu1 %v5721_v35  ;;  %v5761_v35 = vmul.f32 %v13553_v5, %v15511_v60  ;;  %v5773_v5 = vmul.f32 %v13577_v2, %v13316_v17 }
 0x82a   : > { %6159 = vmatprep.mubr.f32.mxu1 %v5726_v8  ;;  %v5766_v8 = vmul.f32 %v13561_v48, %v15512_v33  ;;  %v15516_v48 = vld [vmem:[#allocation42_spill] sm:$0xff] }
 0x82d   : > { %6160 = vmatmul.mubr.f32.gmra.mrb[166].mxu1 %v5725_v55  ;;  %v15514_v55 = vld [vmem:[#allocation39_spill] sm:$0xff] }
 0x82e   : > { %6164 = vmatprep.mubr.f32.mxu1 %v5730_v54  ;;  %v5770_v0 = vmul.f32 %v13569_v44, %v15514_v55  ;;  %v5769_v54 = vmul.f32 %v13569_v44, %v15515_v4 }
 0x831   : > { %6165 = vmatmul.mubr.f32.gmra.mrb[168].mxu1 %v5729_v7 }
 0x832   : > { %6169 = vmatprep.mubr.f32.mxu1 %v5734_v10 }
 0x835   : > { %6170 = vmatmul.mubr.f32.gmra.mrb[170].mxu1 %v5733_v46  ;;  %v15517_v46 = vld [vmem:[#allocation223_spill] sm:$0xff] }
 0x836   : > { %6174 = vmatprep.mubr.f32.mxu1 %v5738_v31 }
 0x839   : > { %6175 = vmatmul.mubr.f32.gmra.mrb[172].mxu1 %v5737_v25 }
 0x83a   : > { %6179 = vmatprep.mubr.f32.mxu1 %v5742_v21 }
 0x83d   : > { %6180 = vmatmul.mubr.f32.gmra.mrb[174].mxu1 %v5741_v19 }
 0x83e   : > { %6184 = vmatprep.mubr.f32.mxu1 %v5746_v45 }
 0x841   : > { %6185 = vmatmul.mubr.f32.gmra.mrb[176].mxu1 %v5745_v41 }
 0x842   : > { %6189 = vmatprep.mubr.f32.mxu1 %v5750_v62 }
 0x845   : > { %6190 = vmatmul.mubr.f32.gmra.mrb[178].mxu1 %v5749_v13 }
 0x846   : > { %6194 = vmatprep.mubr.f32.mxu1 %v5754_v27 }
 0x849   : > { %6195 = vmatmul.mubr.f32.gmra.mrb[180].mxu1 %v5753_v47 }
 0x84a   : > { %6199 = vmatprep.mubr.f32.mxu1 %v5758_v51  ;;  %v15524_v51 = vld [vmem:[#allocation113_spill] sm:$0xff] }
 0x84d   : > { %6200 = vmatmul.mubr.f32.gmra.mrb[182].mxu1 %v5757_v18 }
 0x84e   : > { %6204 = vmatprep.mubr.f32.mxu1 %v5762_v52 }
 0x851   : > { %6205 = vmatmul.mubr.f32.gmra.mrb[184].mxu1 %v5761_v35 }
 0x852   : > { %6209 = vmatprep.mubr.f32.mxu1 %v5766_v8 }
 0x855   : > { %6210 = vmatmul.mubr.f32.gmra.mrb[186].mxu1 %v5765_v49 }
 0x856   : > { %6214 = vmatprep.mubr.f32.mxu1 %v5770_v0  ;;  %v15525_v0 = vld [vmem:[#allocation158_spill] sm:$0xff] }
 0x859   : > { %6215 = vmatmul.mubr.f32.gmra.mrb[188].mxu1 %v5769_v54  ;;  %v15526_v54 = vld [vmem:[#allocation228_spill] sm:$0xff] }
 0x85a   : > { %6219 = vmatprep.mubr.f32.mxu1 %v5774_v24 }
 0x85d   : > { %6220 = vmatmul.mubr.f32.gmra.mrb[190].mxu1 %v5773_v5  ;;  %v15527_v5 = vld [vmem:[#allocation140_spill] sm:$0xff] }
 0x8b4   : > { %v6066_v7 = vpop.f32.mrb[128].mxu1 }
 0x8b5   : > { %v6068_v34 = vpop.f32.mrb[129].mxu1  ;;  %6461 = vmatprep.mubr.f32.mxu0 %v6066_v7 }
 0x8b6   : > { %6462 = vmatmul.mubr.f32.vlgmr.msra.gmra.mrb[0].mxu0 %v15516_v48  ;;  %v15528_v34 = vld [vmem:[#allocation161_spill] sm:$0xff] }
 0x8b8   : > { %v6071_v10 = vpop.f32.mrb[130].mxu1 }
 0x8b9   : > { %v6073_v57 = vpop.f32.mrb[131].mxu1  ;;  %6467 = vmatprep.mubr.f32.mxu0 %v6071_v10  ;;  %v15529_v10 = vld [vmem:[#allocation50_spill] sm:$0xff] }
 0x8ba   : > { %6468 = vmatmul.mubr.f32.gmra.mrb[2].mxu0 %v15517_v46 }
 0x8bc   : > { %v6076_v44 = vpop.f32.mrb[132].mxu1 }
 0x8bd   : > { %v6078_v37 = vpop.f32.mrb[133].mxu1  ;;  %6473 = vmatprep.mubr.f32.mxu0 %v6076_v44  ;;  %v15530_v44 = vld [vmem:[#allocation227_spill] sm:$0xff] }
 0x8be   : > { %6474 = vmatmul.mubr.f32.gmra.mrb[4].mxu0 %v15518_v14 }
 0x8c0   : > { %v6081_v31 = vpop.f32.mrb[134].mxu1 }
 0x8c1   : > { %v6083_v38 = vpop.f32.mrb[135].mxu1  ;;  %6479 = vmatprep.mubr.f32.mxu0 %v6081_v31 }
 0x8c2   : > { %6480 = vmatmul.mubr.f32.gmra.mrb[6].mxu0 %v13435_v28 }
 0x8c4   : > { %v6086_v17 = vpop.f32.mrb[136].mxu1 }
 0x8c5   : > { %v6088_v2 = vpop.f32.mrb[137].mxu1  ;;  %6485 = vmatprep.mubr.f32.mxu0 %v6086_v17 }
 0x8c6   : > { %6486 = vmatmul.mubr.f32.gmra.mrb[8].mxu0 %v13444_v11 }
 0x8c8   : > { %v6091_v25 = vpop.f32.mrb[138].mxu1 }
 0x8c9   : > { %v6093_v21 = vpop.f32.mrb[139].mxu1  ;;  %6491 = vmatprep.mubr.f32.mxu0 %v6091_v25 }
 0x8ca   : > { %6492 = vmatmul.mubr.f32.gmra.mrb[10].mxu0 %v13453_v16 }
 0x8cc   : > { %v6096_v23 = vpop.f32.mrb[140].mxu1 }
 0x8cd   : > { %v6098_v19 = vpop.f32.mrb[141].mxu1  ;;  %6497 = vmatprep.mubr.f32.mxu0 %v6096_v23 }
 0x8ce   : > { %6498 = vmatmul.mubr.f32.gmra.mrb[12].mxu0 %v13461_v56 }
 0x8d0   : > { %v6101_v39 = vpop.f32.mrb[142].mxu1 }
 0x8d1   : > { %v6103_v45 = vpop.f32.mrb[143].mxu1  ;;  %6503 = vmatprep.mubr.f32.mxu0 %v6101_v39 }
 0x8d2   : > { %6504 = vmatmul.mubr.f32.gmra.mrb[14].mxu0 %v15519_v9 }
 0x8d4   : > { %v6106_v28 = vpop.f32.mrb[144].mxu1 }
 0x8d5   : > { %v6108_v41 = vpop.f32.mrb[145].mxu1  ;;  %6509 = vmatprep.mubr.f32.mxu0 %v6106_v28  ;;  %v15533_v28 = vld [vmem:[#allocation26_spill] sm:$0xff] }
 0x8d6   : > { %6510 = vmatmul.mubr.f32.gmra.mrb[16].mxu0 %v15520_v3 }
 0x8d8   : > { %v6111_v11 = vpop.f32.mrb[146].mxu1 }
 0x8d9   : > { %v6113_v62 = vpop.f32.mrb[147].mxu1  ;;  %6515 = vmatprep.mubr.f32.mxu0 %v6111_v11 }
 0x8da   : > { %6516 = vmatmul.mubr.f32.gmra.mrb[18].mxu0 %v15521_v30 }
 0x8dc   : > { %v6116_v16 = vpop.f32.mrb[148].mxu1 }
 0x8dd   : > { %v6118_v13 = vpop.f32.mrb[149].mxu1  ;;  %6521 = vmatprep.mubr.f32.mxu0 %v6116_v16 }
 0x8de   : > { %6522 = vmatmul.mubr.f32.gmra.mrb[20].mxu0 %v15522_v43 }
 0x8e0   : > { %v6121_v56 = vpop.f32.mrb[150].mxu1 }
 0x8e1   : > { %v6123_v27 = vpop.f32.mrb[151].mxu1  ;;  %6527 = vmatprep.mubr.f32.mxu0 %v6121_v56 }
 0x8e2   : > { %6528 = vmatmul.mubr.f32.gmra.mrb[22].mxu0 %v15523_v32 }
 0x8e4   : > { %v6126_v47 = vpop.f32.mrb[152].mxu1 }
 0x8e5   : > { %v6128_v40 = vpop.f32.mrb[153].mxu1  ;;  %6533 = vmatprep.mubr.f32.mxu0 %v6126_v47 }
 0x8e6   : > { %6534 = vmatmul.mubr.f32.gmra.mrb[24].mxu0 %v15524_v51 }
 0x8e8   : > { %v6131_v53 = vpop.f32.mrb[154].mxu1 }
 0x8e9   : > { %v6133_v18 = vpop.f32.mrb[155].mxu1  ;;  %6539 = vmatprep.mubr.f32.mxu0 %v6131_v53 }
 0x8ea   : > { %6540 = vmatmul.mubr.f32.gmra.mrb[26].mxu0 %v13517_v36 }
 0x8ec   : > { %v6136_v12 = vpop.f32.mrb[156].mxu1 }
 0x8ed   : > { %v6138_v52 = vpop.f32.mrb[157].mxu1  ;;  %6545 = vmatprep.mubr.f32.mxu0 %v6136_v12 }
 0x8ee   : > { %6546 = vmatmul.mubr.f32.gmra.mrb[28].mxu0 %v13525_v26 }
 0x8f0   : > { %v6141_v60 = vpop.f32.mrb[158].mxu1 }
 0x8f1   : > { %v6143_v35 = vpop.f32.mrb[159].mxu1  ;;  %6551 = vmatprep.mubr.f32.mxu0 %v6141_v60 }
 0x8f2   : > { %6552 = vmatmul.mubr.f32.gmra.mrb[30].mxu0 %v13533_v59 }
 0x8f4   : > { %v6146_v33 = vpop.f32.mrb[160].mxu1 }
 0x8f5   : > { %v6148_v8 = vpop.f32.mrb[161].mxu1  ;;  %6557 = vmatprep.mubr.f32.mxu0 %v6146_v33 }
 0x8f6   : > { %6558 = vmatmul.mubr.f32.gmra.mrb[32].mxu0 %v13541_v22 }
 0x8f8   : > { %v6151_v50 = vpop.f32.mrb[162].mxu1 }
 0x8f9   : > { %v6153_v49 = vpop.f32.mrb[163].mxu1  ;;  %6563 = vmatprep.mubr.f32.mxu0 %v6151_v50 }
 0x8fa   : > { %6564 = vmatmul.mubr.f32.gmra.mrb[34].mxu0 %v13549_v61 }
 0x8fc   : > { %v6156_v36 = vpop.f32.mrb[164].mxu1 }
 0x8fd   : > { %v6158_v55 = vpop.f32.mrb[165].mxu1  ;;  %6569 = vmatprep.mubr.f32.mxu0 %v6156_v36 }
 0x8fe   : > { %6570 = vmatmul.mubr.f32.gmra.mrb[36].mxu0 %v15525_v0 }
 0x900   : > { %v6161_v26 = vpop.f32.mrb[166].mxu1 }
 0x901   : > { %v6163_v4 = vpop.f32.mrb[167].mxu1  ;;  %6575 = vmatprep.mubr.f32.mxu0 %v6161_v26 }
 0x902   : > { %6576 = vmatmul.mubr.f32.gmra.mrb[38].mxu0 %v15526_v54 }
 0x904   : > { %v6166_v59 = vpop.f32.mrb[168].mxu1 }
 0x905   : > { %v6168_v24 = vpop.f32.mrb[169].mxu1  ;;  %6581 = vmatprep.mubr.f32.mxu0 %v6166_v59 }
 0x906   : > { %6582 = vmatmul.mubr.f32.gmra.mrb[40].mxu0 %v15527_v5 }
 0x908   : > { %v6171_v22 = vpop.f32.mrb[170].mxu1 }
 0x909   : > { %v6173_v7 = vpop.f32.mrb[171].mxu1  ;;  %6587 = vmatprep.mubr.f32.mxu0 %v6171_v22 }
 0x90a   : > { %6588 = vmatmul.mubr.f32.gmra.mrb[42].mxu0 %v15528_v34 }
 0x90c   : > { %v6176_v61 = vpop.f32.mrb[172].mxu1 }
 0x90d   : > { %v6178_v48 = vpop.f32.mrb[173].mxu1  ;;  %6593 = vmatprep.mubr.f32.mxu0 %v6176_v61 }
 0x90e   : > { %6594 = vmatmul.mubr.f32.gmra.mrb[44].mxu0 %v15529_v10 }
 0x910   : > { %v6181_v57 = vpop.f32.mrb[174].mxu1 }
 0x911   : > { %v6183_v46 = vpop.f32.mrb[175].mxu1  ;;  %6599 = vmatprep.mubr.f32.mxu0 %v6181_v57 }
 0x912   : > { %6600 = vmatmul.mubr.f32.gmra.mrb[46].mxu0 %v15530_v44 }
 0x914   : > { %v6186_v37 = vpop.f32.mrb[176].mxu1 }
 0x915   : > { %v6188_v14 = vpop.f32.mrb[177].mxu1  ;;  %6605 = vmatprep.mubr.f32.mxu0 %v6186_v37 }
 0x916   : > { %6606 = vmatmul.mubr.f32.gmra.mrb[48].mxu0 %v13599_v6 }
 0x918   : > { %v6191_v31 = vpop.f32.mrb[178].mxu1 }
 0x919   : > { %v6193_v38 = vpop.f32.mrb[179].mxu1  ;;  %6611 = vmatprep.mubr.f32.mxu0 %v6191_v31 }
 0x91a   : > { %6612 = vmatmul.mubr.f32.gmra.mrb[50].mxu0 %v13605_v15 }
 0x91c   : > { %v6196_v17 = vpop.f32.mrb[180].mxu1 }
 0x91d   : > { %v6198_v2 = vpop.f32.mrb[181].mxu1  ;;  %6617 = vmatprep.mubr.f32.mxu0 %v6196_v17 }
 0x91e   : > { %6618 = vmatmul.mubr.f32.gmra.mrb[52].mxu0 %v13611_v58 }
 0x920   : > { %v6201_v25 = vpop.f32.mrb[182].mxu1 }
 0x921   : > { %v6203_v21 = vpop.f32.mrb[183].mxu1  ;;  %6623 = vmatprep.mubr.f32.mxu0 %v6201_v25 }
 0x922   : > { %6624 = vmatmul.mubr.f32.gmra.mrb[54].mxu0 %v13617_v1  ;;  %v6385_v1 = vld [vmem:[%s15531_s25] sm:$0x3] }
 0x923   : > { %v13774_v41 = vrot.slane %v6385_v1, %v15533_v28 }
 0x924   : > { %v6206_v23 = vpop.f32.mrb[184].mxu1 }
 0x925   : > { %v6208_v19 = vpop.f32.mrb[185].mxu1  ;;  %6629 = vmatprep.mubr.f32.mxu0 %v6206_v23 }
 0x926   : > { %6630 = vmatmul.mubr.f32.gmra.mrb[56].mxu0 %v13623_v29  ;;  %v15532_v29 = vld [vmem:[#allocation25_spill] sm:$0xff] }
 0x928   : > { %v6211_v6 = vpop.f32.mrb[186].mxu1 }
 0x929   : > { %v6213_v39 = vpop.f32.mrb[187].mxu1  ;;  %6635 = vmatprep.mubr.f32.mxu0 %v6211_v6 }
 0x92a   : > { %6636 = vmatmul.mubr.f32.gmra.mrb[58].mxu0 %v13629_v20  ;;  %v13771_v20 = vrot.slane %v6385_v1, %v15532_v29 }
 0x92c   : > { %v6216_v15 = vpop.f32.mrb[188].mxu1 }
 0x92d   : > { %v6218_v45 = vpop.f32.mrb[189].mxu1  ;;  %6641 = vmatprep.mubr.f32.mxu0 %v6216_v15 }
 0x92e   : > { %6642 = vmatmul.mubr.f32.gmra.mrb[60].mxu0 %v13635_v42 }
 0x930   : > { %v6221_v58 = vpop.f32.mrb[190].mxu1 }
 0x931   : > { %v6223_v9 = vpop.f32.mrb[191].mxu1  ;;  %6647 = vmatprep.mubr.f32.mxu0 %v6221_v58 }
 0x932   : > { %6648 = vmatmul.mubr.f32.gmra.mrb[62].mxu0 %v13641_v63 }
 0x989   : > { %v6463_v3 = vpop.f32.mrb[0].mxu0 }
 0x98a   : > { %v6464_v42 = vadd.f32 %v6463_v3, %v13771_v20  ;;  %v6465_v11 = vpop.f32.mrb[1].mxu0 }
 0x98b   : > { %v6466_v62 = vadd.f32 %v6465_v11, %v13774_v41 }
 0x98c   : > { %6654 = vst [vmem:[%s9431_s12] sm:$0xff] %v6464_v42 }
 0x98d   : > { %6655 = vst [vmem:[%s9431_s12 + $0x8] sm:$0xff] %v6466_v62  ;;  %v6469_v63 = vpop.f32.mrb[2].mxu0 }
 0x98e   : > { %v6470_v30 = vadd.f32 %v6469_v63, %v13771_v20  ;;  %v6471_v16 = vpop.f32.mrb[3].mxu0 }
 0x98f   : > { %v6472_v13 = vadd.f32 %v6471_v16, %v13774_v41 }
 0x990   : > { %6656 = vst [vmem:[%s9431_s12 + $0x10] sm:$0xff] %v6470_v30 }
 0x991   : > { %6657 = vst [vmem:[%s9431_s12 + $0x18] sm:$0xff] %v6472_v13  ;;  %v6475_v43 = vpop.f32.mrb[4].mxu0 }
 0x992   : > { %v6476_v56 = vadd.f32 %v6475_v43, %v13771_v20  ;;  %v6477_v27 = vpop.f32.mrb[5].mxu0 }
 0x993   : > { %v6478_v32 = vadd.f32 %v6477_v27, %v13774_v41 }
 0x994   : > { %6658 = vst [vmem:[%s9431_s12 + $0x20] sm:$0xff] %v6476_v56 }
 0x995   : > { %6659 = vst [vmem:[%s9431_s12 + $0x28] sm:$0xff] %v6478_v32  ;;  %v6481_v47 = vpop.f32.mrb[6].mxu0 }
 0x996   : > { %v6482_v40 = vadd.f32 %v6481_v47, %v13771_v20  ;;  %v6483_v51 = vpop.f32.mrb[7].mxu0 }
 0x997   : > { %v6484_v53 = vadd.f32 %v6483_v51, %v13774_v41 }
 0x998   : > { %6660 = vst [vmem:[%s9431_s12 + $0x30] sm:$0xff] %v6482_v40 }
 0x999   : > { %6661 = vst [vmem:[%s9431_s12 + $0x38] sm:$0xff] %v6484_v53  ;;  %v6487_v18 = vpop.f32.mrb[8].mxu0 }
 0x99a   : > { %v6488_v12 = vadd.f32 %v6487_v18, %v13771_v20  ;;  %v6489_v52 = vpop.f32.mrb[9].mxu0 }
 0x99b   : > { %v6490_v60 = vadd.f32 %v6489_v52, %v13774_v41 }
 0x99c   : > { %6662 = vst [vmem:[%s9431_s12 + $0x40] sm:$0xff] %v6488_v12 }
 0x99d   : > { %6663 = vst [vmem:[%s9431_s12 + $0x48] sm:$0xff] %v6490_v60  ;;  %v6493_v35 = vpop.f32.mrb[10].mxu0 }
 0x99e   : > { %v6494_v33 = vadd.f32 %v6493_v35, %v13771_v20  ;;  %v6495_v8 = vpop.f32.mrb[11].mxu0 }
 0x99f   : > { %v6496_v50 = vadd.f32 %v6495_v8, %v13774_v41 }
 0x9a0   : > { %6664 = vst [vmem:[%s9431_s12 + $0x50] sm:$0xff] %v6494_v33 }
 0x9a1   : > { %6665 = vst [vmem:[%s9431_s12 + $0x58] sm:$0xff] %v6496_v50  ;;  %v6499_v49 = vpop.f32.mrb[12].mxu0 }
 0x9a2   : > { %v6500_v36 = vadd.f32 %v6499_v49, %v13771_v20  ;;  %v6501_v55 = vpop.f32.mrb[13].mxu0 }
 0x9a3   : > { %v6502_v0 = vadd.f32 %v6501_v55, %v13774_v41 }
 0x9a4   : > { %6666 = vst [vmem:[%s9431_s12 + $0x60] sm:$0xff] %v6500_v36 }
 0x9a5   : > { %6667 = vst [vmem:[%s9431_s12 + $0x68] sm:$0xff] %v6502_v0  ;;  %v6505_v26 = vpop.f32.mrb[14].mxu0 }
 0x9a6   : > { %v6506_v4 = vadd.f32 %v6505_v26, %v13771_v20  ;;  %v6507_v54 = vpop.f32.mrb[15].mxu0 }
 0x9a7   : > { %v6508_v59 = vadd.f32 %v6507_v54, %v13774_v41 }
 0x9a8   : > { %6668 = vst [vmem:[%s9431_s12 + $0x70] sm:$0xff] %v6506_v4 }
 0x9a9   : > { %6669 = vst [vmem:[%s9431_s12 + $0x78] sm:$0xff] %v6508_v59  ;;  %v6511_v24 = vpop.f32.mrb[16].mxu0 }
 0x9aa   : > { %v6512_v5 = vadd.f32 %v6511_v24, %v13771_v20  ;;  %v6513_v22 = vpop.f32.mrb[17].mxu0 }
 0x9ab   : > { %v6514_v7 = vadd.f32 %v6513_v22, %v13774_v41 }
 0x9ac   : > { %6670 = vst [vmem:[%s9431_s12 + $0x80] sm:$0xff] %v6512_v5 }
 0x9ad   : > { %6671 = vst [vmem:[%s9431_s12 + $0x88] sm:$0xff] %v6514_v7  ;;  %v6517_v34 = vpop.f32.mrb[18].mxu0 }
 0x9ae   : > { %v6518_v61 = vadd.f32 %v6517_v34, %v13771_v20  ;;  %v6519_v48 = vpop.f32.mrb[19].mxu0 }
 0x9af   : > { %v6520_v10 = vadd.f32 %v6519_v48, %v13774_v41 }
 0x9b0   : > { %6672 = vst [vmem:[%s9431_s12 + $0x90] sm:$0xff] %v6518_v61 }
 0x9b1   : > { %6673 = vst [vmem:[%s9431_s12 + $0x98] sm:$0xff] %v6520_v10  ;;  %v6523_v57 = vpop.f32.mrb[20].mxu0 }
 0x9b2   : > { %v6524_v46 = vadd.f32 %v6523_v57, %v13771_v20  ;;  %v6525_v44 = vpop.f32.mrb[21].mxu0 }
 0x9b3   : > { %v6526_v37 = vadd.f32 %v6525_v44, %v13774_v41 }
 0x9b4   : > { %6674 = vst [vmem:[%s9431_s12 + $0xa0] sm:$0xff] %v6524_v46 }
 0x9b5   : > { %6675 = vst [vmem:[%s9431_s12 + $0xa8] sm:$0xff] %v6526_v37  ;;  %v6529_v14 = vpop.f32.mrb[22].mxu0 }
 0x9b6   : > { %v6530_v31 = vadd.f32 %v6529_v14, %v13771_v20  ;;  %v6531_v38 = vpop.f32.mrb[23].mxu0 }
 0x9b7   : > { %v6532_v17 = vadd.f32 %v6531_v38, %v13774_v41 }
 0x9b8   : > { %6676 = vst [vmem:[%s9431_s12 + $0xb0] sm:$0xff] %v6530_v31 }
 0x9b9   : > { %6677 = vst [vmem:[%s9431_s12 + $0xb8] sm:$0xff] %v6532_v17  ;;  %v6535_v2 = vpop.f32.mrb[24].mxu0 }
 0x9ba   : > { %v6536_v25 = vadd.f32 %v6535_v2, %v13771_v20  ;;  %v6537_v21 = vpop.f32.mrb[25].mxu0 }
 0x9bb   : > { %v6538_v23 = vadd.f32 %v6537_v21, %v13774_v41 }
 0x9bc   : > { %6678 = vst [vmem:[%s9431_s12 + $0xc0] sm:$0xff] %v6536_v25 }
 0x9bd   : > { %6679 = vst [vmem:[%s9431_s12 + $0xc8] sm:$0xff] %v6538_v23  ;;  %v6541_v19 = vpop.f32.mrb[26].mxu0 }
 0x9be   : > { %v6542_v6 = vadd.f32 %v6541_v19, %v13771_v20  ;;  %v6543_v39 = vpop.f32.mrb[27].mxu0 }
 0x9bf   : > { %v6544_v15 = vadd.f32 %v6543_v39, %v13774_v41 }
 0x9c0   : > { %6680 = vst [vmem:[%s9431_s12 + $0xd0] sm:$0xff] %v6542_v6 }
 0x9c1   : > { %6681 = vst [vmem:[%s9431_s12 + $0xd8] sm:$0xff] %v6544_v15  ;;  %v6547_v45 = vpop.f32.mrb[28].mxu0 }
 0x9c2   : > { %v6548_v58 = vadd.f32 %v6547_v45, %v13771_v20  ;;  %v6549_v9 = vpop.f32.mrb[29].mxu0 }
 0x9c3   : > { %v6550_v1 = vadd.f32 %v6549_v9, %v13774_v41 }
 0x9c4   : > { %6682 = vst [vmem:[%s9431_s12 + $0xe0] sm:$0xff] %v6548_v58 }
 0x9c5   : > { %6683 = vst [vmem:[%s9431_s12 + $0xe8] sm:$0xff] %v6550_v1  ;;  %v6553_v29 = vpop.f32.mrb[30].mxu0 }
 0x9c6   : > { %v6554_v28 = vadd.f32 %v6553_v29, %v13771_v20  ;;  %v6555_v3 = vpop.f32.mrb[31].mxu0 }
 0x9c7   : > { %v6556_v42 = vadd.f32 %v6555_v3, %v13774_v41 }
 0x9c8   : > { %6684 = vst [vmem:[%s9431_s12 + $0xf0] sm:$0xff] %v6554_v28 }
 0x9c9   : > { %6685 = vst [vmem:[%s9431_s12 + $0xf8] sm:$0xff] %v6556_v42  ;;  %v6559_v11 = vpop.f32.mrb[32].mxu0 }
 0x9ca   : > { %v6560_v62 = vadd.f32 %v6559_v11, %v13771_v20  ;;  %v6561_v63 = vpop.f32.mrb[33].mxu0 }
 0x9cb   : > { %v6562_v30 = vadd.f32 %v6561_v63, %v13774_v41 }
 0x9cc   : > { %6686 = vst [vmem:[%s9431_s12 + $0x100] sm:$0xff] %v6560_v62 }
 0x9cd   : > { %6687 = vst [vmem:[%s9431_s12 + $0x108] sm:$0xff] %v6562_v30  ;;  %v6565_v16 = vpop.f32.mrb[34].mxu0 }
 0x9ce   : > { %v6566_v13 = vadd.f32 %v6565_v16, %v13771_v20  ;;  %v6567_v43 = vpop.f32.mrb[35].mxu0 }
 0x9cf   : > { %v6568_v56 = vadd.f32 %v6567_v43, %v13774_v41 }
 0x9d0   : > { %6688 = vst [vmem:[%s9431_s12 + $0x110] sm:$0xff] %v6566_v13 }
 0x9d1   : > { %6689 = vst [vmem:[%s9431_s12 + $0x118] sm:$0xff] %v6568_v56  ;;  %v6571_v27 = vpop.f32.mrb[36].mxu0 }
 0x9d2   : > { %v6572_v32 = vadd.f32 %v6571_v27, %v13771_v20  ;;  %v6573_v47 = vpop.f32.mrb[37].mxu0 }
 0x9d3   : > { %v6574_v40 = vadd.f32 %v6573_v47, %v13774_v41 }
 0x9d4   : > { %6690 = vst [vmem:[%s9431_s12 + $0x120] sm:$0xff] %v6572_v32 }
 0x9d5   : > { %6691 = vst [vmem:[%s9431_s12 + $0x128] sm:$0xff] %v6574_v40  ;;  %v6577_v51 = vpop.f32.mrb[38].mxu0 }
 0x9d6   : > { %v6578_v53 = vadd.f32 %v6577_v51, %v13771_v20  ;;  %v6579_v18 = vpop.f32.mrb[39].mxu0 }
 0x9d7   : > { %v6580_v12 = vadd.f32 %v6579_v18, %v13774_v41 }
 0x9d8   : > { %6692 = vst [vmem:[%s9431_s12 + $0x130] sm:$0xff] %v6578_v53 }
 0x9d9   : > { %6693 = vst [vmem:[%s9431_s12 + $0x138] sm:$0xff] %v6580_v12  ;;  %v6583_v52 = vpop.f32.mrb[40].mxu0 }
 0x9da   : > { %v6584_v60 = vadd.f32 %v6583_v52, %v13771_v20  ;;  %v6585_v35 = vpop.f32.mrb[41].mxu0 }
 0x9db   : > { %v6586_v33 = vadd.f32 %v6585_v35, %v13774_v41 }
 0x9dc   : > { %6694 = vst [vmem:[%s9431_s12 + $0x140] sm:$0xff] %v6584_v60 }
 0x9dd   : > { %6695 = vst [vmem:[%s9431_s12 + $0x148] sm:$0xff] %v6586_v33  ;;  %v6589_v8 = vpop.f32.mrb[42].mxu0 }
 0x9de   : > { %v6590_v50 = vadd.f32 %v6589_v8, %v13771_v20  ;;  %v6591_v49 = vpop.f32.mrb[43].mxu0 }
 0x9df   : > { %v6592_v36 = vadd.f32 %v6591_v49, %v13774_v41 }
 0x9e0   : > { %6696 = vst [vmem:[%s9431_s12 + $0x150] sm:$0xff] %v6590_v50 }
 0x9e1   : > { %6697 = vst [vmem:[%s9431_s12 + $0x158] sm:$0xff] %v6592_v36  ;;  %v6595_v55 = vpop.f32.mrb[44].mxu0 }
 0x9e2   : > { %v6596_v0 = vadd.f32 %v6595_v55, %v13771_v20  ;;  %v6597_v26 = vpop.f32.mrb[45].mxu0 }
 0x9e3   : > { %v6598_v4 = vadd.f32 %v6597_v26, %v13774_v41 }
 0x9e4   : > { %6698 = vst [vmem:[%s9431_s12 + $0x160] sm:$0xff] %v6596_v0 }
 0x9e5   : > { %6699 = vst [vmem:[%s9431_s12 + $0x168] sm:$0xff] %v6598_v4  ;;  %v6601_v54 = vpop.f32.mrb[46].mxu0 }
 0x9e6   : > { %v6602_v59 = vadd.f32 %v6601_v54, %v13771_v20  ;;  %v6603_v24 = vpop.f32.mrb[47].mxu0 }
 0x9e7   : > { %v6604_v5 = vadd.f32 %v6603_v24, %v13774_v41 }
 0x9e8   : > { %6700 = vst [vmem:[%s9431_s12 + $0x170] sm:$0xff] %v6602_v59 }
 0x9e9   : > { %6701 = vst [vmem:[%s9431_s12 + $0x178] sm:$0xff] %v6604_v5  ;;  %v6607_v22 = vpop.f32.mrb[48].mxu0 }
 0x9ea   : > { %v6608_v7 = vadd.f32 %v6607_v22, %v13771_v20  ;;  %v6609_v34 = vpop.f32.mrb[49].mxu0 }
 0x9eb   : > { %v6610_v61 = vadd.f32 %v6609_v34, %v13774_v41 }
 0x9ec   : > { %6702 = vst [vmem:[%s9431_s12 + $0x180] sm:$0xff] %v6608_v7 }
 0x9ed   : > { %6703 = vst [vmem:[%s9431_s12 + $0x188] sm:$0xff] %v6610_v61  ;;  %v6613_v48 = vpop.f32.mrb[50].mxu0 }
 0x9ee   : > { %v6614_v10 = vadd.f32 %v6613_v48, %v13771_v20  ;;  %v6615_v57 = vpop.f32.mrb[51].mxu0 }
 0x9ef   : > { %v6616_v46 = vadd.f32 %v6615_v57, %v13774_v41 }
 0x9f0   : > { %6704 = vst [vmem:[%s9431_s12 + $0x190] sm:$0xff] %v6614_v10 }
 0x9f1   : > { %6705 = vst [vmem:[%s9431_s12 + $0x198] sm:$0xff] %v6616_v46  ;;  %v6619_v44 = vpop.f32.mrb[52].mxu0 }
 0x9f2   : > { %v6620_v37 = vadd.f32 %v6619_v44, %v13771_v20  ;;  %v6621_v14 = vpop.f32.mrb[53].mxu0 }
 0x9f3   : > { %v6622_v31 = vadd.f32 %v6621_v14, %v13774_v41 }
 0x9f4   : > { %6706 = vst [vmem:[%s9431_s12 + $0x1a0] sm:$0xff] %v6620_v37 }
 0x9f5   : > { %6707 = vst [vmem:[%s9431_s12 + $0x1a8] sm:$0xff] %v6622_v31  ;;  %v6625_v38 = vpop.f32.mrb[54].mxu0 }
 0x9f6   : > { %v6626_v17 = vadd.f32 %v6625_v38, %v13771_v20  ;;  %v6627_v2 = vpop.f32.mrb[55].mxu0 }
 0x9f7   : > { %v6628_v25 = vadd.f32 %v6627_v2, %v13774_v41 }
 0x9f8   : > { %6708 = vst [vmem:[%s9431_s12 + $0x1b0] sm:$0xff] %v6626_v17 }
 0x9f9   : > { %6709 = vst [vmem:[%s9431_s12 + $0x1b8] sm:$0xff] %v6628_v25  ;;  %v6631_v21 = vpop.f32.mrb[56].mxu0 }
 0x9fa   : > { %v6632_v23 = vadd.f32 %v6631_v21, %v13771_v20  ;;  %v6633_v19 = vpop.f32.mrb[57].mxu0 }
 0x9fb   : > { %v6634_v6 = vadd.f32 %v6633_v19, %v13774_v41 }
 0x9fc   : > { %6710 = vst [vmem:[%s9431_s12 + $0x1c0] sm:$0xff] %v6632_v23 }
 0x9fd   : > { %6711 = vst [vmem:[%s9431_s12 + $0x1c8] sm:$0xff] %v6634_v6  ;;  %v6637_v39 = vpop.f32.mrb[58].mxu0 }
 0x9fe   : > { %v6638_v15 = vadd.f32 %v6637_v39, %v13771_v20  ;;  %v6639_v45 = vpop.f32.mrb[59].mxu0 }
 0x9ff   : > { %v6640_v58 = vadd.f32 %v6639_v45, %v13774_v41 }
 0xa00   : > { %6712 = vst [vmem:[%s9431_s12 + $0x1d0] sm:$0xff] %v6638_v15 }
 0xa01   : > { %6713 = vst [vmem:[%s9431_s12 + $0x1d8] sm:$0xff] %v6640_v58  ;;  %v6643_v9 = vpop.f32.mrb[60].mxu0 }
 0xa02   : > { %v6644_v1 = vadd.f32 %v6643_v9, %v13771_v20  ;;  %v6645_v29 = vpop.f32.mrb[61].mxu0 }
 0xa03   : > { %v6646_v28 = vadd.f32 %v6645_v29, %v13774_v41 }
 0xa04   : > { %6714 = vst [vmem:[%s9431_s12 + $0x1e0] sm:$0xff] %v6644_v1 }
 0xa05   : > { %6715 = vst [vmem:[%s9431_s12 + $0x1e8] sm:$0xff] %v6646_v28  ;;  %v6649_v3 = vpop.f32.mrb[62].mxu0 }
 0xa06   : > { %v6650_v42 = vadd.f32 %v6649_v3, %v13771_v20  ;;  %v6651_v11 = vpop.f32.mrb[63].mxu0 }
 0xa07   : > { %v6652_v62 = vadd.f32 %v6651_v11, %v13774_v41 }
 0xa08   : > { %6716 = vst [vmem:[%s9431_s12 + $0x1f0] sm:$0xff] %v6650_v42 }
 0xa09   : > { %6717 = vst [vmem:[%s9431_s12 + $0x1f8] sm:$0xff] %v6652_v62 }
 0xa0a   : > { %8940 = shalt.err (!%p8937_p6)
}
 0xa0b   : > { %s8941_s22 = scalar_lea.hbm %s13910_s17, 8192  ;;  %s8945_s6 = scalar_lea.hbm %s15536_s5, 32768 }
 0xa0c   : > { %p8942_p3 = scmp.ne.s32.totalorder %s13910_s17, %s8941_s22  ;;  %p8946_p11 = scmp.lt.u32.totalorder %s13910_s17, %s15536_s5 }
 0xa0d   : > { %p8947_p0 = scmp.lt.u32.totalorder %s8945_s6, %s8941_s22  ;;  %p8949_p8 = scmp.lt.u32.totalorder %s8941_s22, %s13910_s17 }
 0xa0e   : > { %p8943_p4 = pnand %p8942_p3, %p15537_p12 }
 0xa0f   : > { %p8948_p5 = por %p8947_p0, %p8946_p11 }
 0xa10   : > { %p8944_p13 = pneg %p8943_p4 }
 0xa11   : > { %p8950_p2 = por %p8949_p8, %p8948_p5 }
 0xa13   : > { %p8951_p10 = pnand %p8950_p2, %p8944_p13 }
 0xa15   : > { %8954 = shalt.err (!%p8951_p10)
}
 0xa16   : > { %s9074_s20 = smov 256   ;;  %s9075_s8 = smov 16  }
 0xa17   : > { %8014 = dma.vmem_to_hbm [thread:$0]  (%p15537_p12), %s13904_s16, 8192, %s13910_s17, %s13916_s4, %s9074_s20, %s9074_s20, %s9075_s8  }
 0xa18 PF: > { %s15538_s7 = sld [smem:[#allocation19_spill]]  ;;  %s15539_s19 = sld [smem:[#allocation22_spill]] }
 0xa19   : > { %p8044_p1 = scmp.ge.s32.totalorder %s9061_s15, 2 }
 0xa1e   : > { %s6750_s11 = sand.u32 1, %s15538_s7   ;;  %p15540_p7 = scmp.ne.s32.totalorder %s15539_s19, 0 }
 0xa1f   : > { %s6751_s18 = scalar_lea.sflag [#allocation6], %s6750_s11 }
 0xa20   : > { %p8034_p9 = pnand %p8044_p1, %p15540_p7 }
 0xa22   : > { %9016 = dma.done.wait (!%p8034_p9), %s6751_s18, 8192  }
 0xa23   : > { %9018 = vsyncadd (!%p8034_p9), %s6751_s18, 4294959104  ;;  %s28_s15 = sadd.s32 1, %s9061_s15   ;;  %s15541_s21 = sld [smem:[#allocation23_spill]] }
 0xa24   : > { %p25_p6 = scmp.ge.s32.totalorder %s28_s15, 6   ;;  %s15542_s16 = sld [smem:[#allocation24_spill]] }
 0xa25   : > { %s15543_s27 = smov %s9025_s28  ;;  %s15544_s28 = smov %s9029_s29 }
 0xa26   : > { %s15545_s29 = smov %s9318_s2  ;;  %s15546_s30 = smov %s9037_s9 }
 0xa27   : > { %s15547_s9 = smov %s9041_s10  ;;  %s15548_s10 = smov %s9313_s24 }
 0xa28   : > { %s15549_s11 = smov %s9053_s13  ;;  %s15550_s12 = smov %s9057_s14 }
 0xa29   : > { %s15551_s13 = smov %s15541_s21  ;;  %27 = sbr.rel (!%p25_p6) target bundleno = 21 (0x15), region = 127 }
 0xa2a   : > { %s15552_s14 = smov %s15542_s16 }
 0xa30   :  { %6756 = vsyncpa [#allocation5], 1 }
 0xa31   :  { %6758 = vsyncpa [#allocation5 + $0x1], 1 }
 0xa32   :  { %6759 = vsyncpa [#allocation8], 1 }
 0xa33   :  { %6761 = vsyncpa [#allocation8 + $0x1], 1 }
 0xa34   :  { %6762 = vsyncpa [#allocation11], 1 }
 0xa35   :  { %6763 = vsyncpa [#allocation6], 1 }
 0xa36   :  { %6765 = vsyncpa [#allocation6 + $0x1], 1 }

</bundles_post_ra>
